<compile_context>
chip_gen: v6e
topology: v6e:2x2x1
jax: 0.10.0
libtpu: 0.0.40
codegen_flags: <defaults>
</compile_context>

<pallas_src>
import functools
import numpy as np
import jax
import jax.numpy as jnp
from jax import lax
from jax.experimental import pallas as pl
from jax.experimental.pallas import tpu as pltpu

HIDDEN = 896
NUM_HEADS = 14
HEAD_DIM = HIDDEN // NUM_HEADS             # 64
NUM_KV_HEADS = 2
NUM_KV_GROUPS = NUM_HEADS // NUM_KV_HEADS  # 7
ROPE_THETA = 1000000.0
MASK_VALUE = -0.7 * float(np.finfo(np.float32).max)


def _pick_tile(m, candidates=(256, 128, 64, 32, 16, 8)):
    # On v5e one would prefer capping at 128; 256 is fine on v6e/v7x and for the M dim.
    for t in candidates:
        if m % t == 0:
            return t
    return m


# ---------------------------------------------------------------------------
# Pallas kernel 1: linear layer  y = x @ W_t + b  (bf16 MXU inputs, f32 accum,
# single full-K tile so the grid is 1-D over rows and fully parallel).
# ---------------------------------------------------------------------------
def _linear_kernel(x_ref, w_ref, b_ref, o_ref):
    acc = jnp.dot(x_ref[...], w_ref[...], preferred_element_type=jnp.float32)
    o_ref[...] = (acc + b_ref[...]).astype(o_ref.dtype)


def linear_pallas(x2d, w_t, b, *, out_dtype=jnp.float32):
    M, K = x2d.shape
    K2, N = w_t.shape
    assert K == K2
    tm = _pick_tile(M)
    b2d = jnp.asarray(b, jnp.float32).reshape(1, N)
    return pl.pallas_call(
        _linear_kernel,
        out_shape=jax.ShapeDtypeStruct((M, N), out_dtype),
        grid_spec=pltpu.PrefetchScalarGridSpec(
            num_scalar_prefetch=0,
            grid=(M // tm,),
            in_specs=[
                pl.BlockSpec((tm, K), lambda i: (i, 0)),
                pl.BlockSpec((K, N), lambda i: (0, 0)),   # weight stays resident
                pl.BlockSpec((1, N), lambda i: (0, 0)),
            ],
            out_specs=pl.BlockSpec((tm, N), lambda i: (i, 0)),
        ),
        compiler_params=pltpu.CompilerParams(
            dimension_semantics=("parallel",)),
    )(x2d.astype(jnp.bfloat16), w_t.astype(jnp.bfloat16), b2d)


# ---------------------------------------------------------------------------
# Pallas kernel 2: causal GQA flash attention (online softmax, GQA group folded
# into the matmul M dimension).
#   q: (B, KVH, G, S, D) bf16, pre-scaled by 1/sqrt(D) and RoPE'd
#   k, v: (B, KVH, S, D) bf16
#   out: (B, KVH, G, S, D) bf16
# ---------------------------------------------------------------------------
def _flash_kernel(q_ref, k_ref, v_ref, o_ref, m_sc, l_sc, acc_sc, *, tq, tk, gqa):
    i = pl.program_id(2)   # query block
    j = pl.program_id(3)   # kv block (innermost / "arbitrary")
    d = q_ref.shape[-1]

    @pl.when(j == 0)
    def _init():
        # MASK_VALUE (not -inf) is safe: causal attention guarantees >=1 valid key/row.
        m_sc[...] = jnp.full_like(m_sc, MASK_VALUE)
        l_sc[...] = jnp.zeros_like(l_sc)
        acc_sc[...] = jnp.zeros_like(acc_sc)

    def process(masked):
        # Fold the G query heads into the matmul M dim: (G, tq, D) -> (G*tq, D).
        q = q_ref[...].reshape(gqa * tq, d)                      # bf16
        k = k_ref[...]                                           # (tk, D) bf16
        s = lax.dot_general(q, k, (((1,), (1,)), ((), ())),
                            preferred_element_type=jnp.float32)  # (G*tq, tk)
        if masked:  # only the diagonal block needs the causal mask
            rq = lax.broadcasted_iota(jnp.int32, (gqa, tq, tk), 1).reshape(gqa * tq, tk)
            ck = lax.broadcasted_iota(jnp.int32, (gqa * tq, tk), 1)
            s = jnp.where(rq >= ck, s, MASK_VALUE)
        m_prev = m_sc[...]
        m_new = jnp.maximum(m_prev, s.max(axis=-1, keepdims=True))
        alpha = jnp.exp(m_prev - m_new)
        p = jnp.exp(s - m_new)
        l_sc[...] = alpha * l_sc[...] + p.sum(axis=-1, keepdims=True)
        acc_sc[...] = alpha * acc_sc[...] + jnp.dot(
            p.astype(jnp.bfloat16), v_ref[...], preferred_element_type=jnp.float32)
        m_sc[...] = m_new

    @pl.when(j < i)      # strictly below the diagonal: no mask work at all
    def _full():
        process(masked=False)

    @pl.when(j == i)     # diagonal block: mask, then finalize this query block
    def _diag():
        process(masked=True)
        inv_l = pl.reciprocal(l_sc[...], approx=True)
        o_ref[...] = (acc_sc[...] * inv_l).astype(o_ref.dtype).reshape(gqa, tq, d)
    # j > i blocks are fully masked: no compute; the clamped K/V index_map below also
    # keeps the previous block resident so no new DMA is issued for them.


def flash_attention_pallas(q, k, v, *, tq=128, tk=128):
    B, KVH, G, S, D = q.shape
    tq = min(tq, S)
    tk = min(tk, S)
    assert tq == tk and S % tq == 0, "tq must equal tk and divide S"
    nb = S // tq
    kernel = functools.partial(_flash_kernel, tq=tq, tk=tk, gqa=G)
    kv_map = lambda b, h, i, j: (b, h, jnp.minimum(i, j), 0)   # clamp above-diag blocks
    return pl.pallas_call(
        kernel,
        out_shape=jax.ShapeDtypeStruct((B, KVH, G, S, D), jnp.bfloat16),
        grid_spec=pltpu.PrefetchScalarGridSpec(
            num_scalar_prefetch=0,
            grid=(B, KVH, nb, nb),
            in_specs=[
                pl.BlockSpec((None, None, G, tq, D),
                             lambda b, h, i, j: (b, h, 0, i, 0)),
                pl.BlockSpec((None, None, tk, D), kv_map),
                pl.BlockSpec((None, None, tk, D), kv_map),
            ],
            out_specs=pl.BlockSpec((None, None, G, tq, D),
                                   lambda b, h, i, j: (b, h, 0, i, 0)),
            scratch_shapes=[
                pltpu.VMEM((G * tq, 1), jnp.float32),   # m (running max)
                pltpu.VMEM((G * tq, 1), jnp.float32),   # l (running denom)
                pltpu.VMEM((G * tq, D), jnp.float32),   # acc
            ],
        ),
        compiler_params=pltpu.CompilerParams(
            dimension_semantics=("parallel", "parallel", "parallel", "arbitrary")),
    )(q, k, v)


# ---------------------------------------------------------------------------
# RoPE (plain JAX glue, matches the PyTorch RotaryEmbedding / apply_rotary_pos_emb)
# ---------------------------------------------------------------------------
def rope_cos_sin(position_ids):
    inv_freq = 1.0 / (ROPE_THETA ** (
        jnp.arange(0, HEAD_DIM, 2, dtype=jnp.float32) / HEAD_DIM))
    freqs = position_ids.astype(jnp.float32)[:, :, None] * inv_freq[None, None, :]
    emb = jnp.concatenate([freqs, freqs], axis=-1)
    return jnp.cos(emb), jnp.sin(emb)   # attention_scaling = 1.0


def rotate_half(x):
    half = x.shape[-1] // 2
    return jnp.concatenate([-x[..., half:], x[..., :half]], axis=-1)


def apply_rotary_pos_emb(q, k, cos, sin):
    # q: (B, S, H, D), k: (B, S, KVH, D); cos/sin: (P, S, D) broadcast over heads.
    cos = cos[:, :, None, :]
    sin = sin[:, :, None, :]
    q_embed = q * cos + rotate_half(q) * sin
    k_embed = k * cos + rotate_half(k) * sin
    return q_embed, k_embed


# ---------------------------------------------------------------------------
# Full Attention.forward
# ---------------------------------------------------------------------------
def attention_forward(params, hidden_states, position_ids):
    B, S, _ = hidden_states.shape
    M = B * S
    x2d = hidden_states.reshape(M, HIDDEN)

    # Fused QKV projection: single Pallas matmul over the concatenated weight (N=1152).
    wqkv_t = jnp.concatenate([params["wq"], params["wk"], params["wv"]], axis=0).T
    bqkv = jnp.concatenate([params["bq"], params["bk"], params["bv"]], axis=0)
    qkv = linear_pallas(x2d, wqkv_t, bqkv, out_dtype=jnp.bfloat16)    # (M, 1152)

    kv_dim = NUM_KV_HEADS * HEAD_DIM
    q = qkv[:, :HIDDEN].reshape(B, S, NUM_HEADS, HEAD_DIM)
    k = qkv[:, HIDDEN:HIDDEN + kv_dim].reshape(B, S, NUM_KV_HEADS, HEAD_DIM)
    v = qkv[:, HIDDEN + kv_dim:].reshape(B, S, NUM_KV_HEADS, HEAD_DIM)

    # RoPE in f32 (fuses with the layout change below in XLA).
    cos, sin = rope_cos_sin(position_ids)
    q, k = apply_rotary_pos_emb(q.astype(jnp.float32), k.astype(jnp.float32), cos, sin)

    # Fold the softmax scale into q; cast MXU inputs to bf16.
    scale = 1.0 / float(np.sqrt(HEAD_DIM))
    q = (q * scale).astype(jnp.bfloat16)
    k = k.astype(jnp.bfloat16)

    # (B, S, H, D) -> (B, KVH, G, S, D): query heads of a KV group share K/V tiles.
    q = q.transpose(0, 2, 1, 3).reshape(B, NUM_KV_HEADS, NUM_KV_GROUPS, S, HEAD_DIM)
    k = k.transpose(0, 2, 1, 3)                     # (B, KVH, S, D)
    v = v.transpose(0, 2, 1, 3)                     # (B, KVH, S, D), already bf16

    attn = flash_attention_pallas(q, k, v)          # (B, KVH, G, S, D) bf16
    attn = attn.transpose(0, 3, 1, 2, 4).reshape(M, HIDDEN)

    out = linear_pallas(attn, params["wo"].T,
                        jnp.zeros((HIDDEN,), jnp.float32))   # o_proj has no bias
    return out.reshape(B, S, HIDDEN)


# ---------------------------------------------------------------------------
# Pure-JAX f32 reference (mirrors the PyTorch code path) for a correctness check
# ---------------------------------------------------------------------------
def attention_reference(params, hidden_states, position_ids):
    B, S, _ = hidden_states.shape
    x = hidden_states.astype(jnp.float32)
    q = x @ params["wq"].T + params["bq"]
    k = x @ params["wk"].T + params["bk"]
    v = x @ params["wv"].T + params["bv"]
    q = q.reshape(B, S, NUM_HEADS, HEAD_DIM)
    k = k.reshape(B, S, NUM_KV_HEADS, HEAD_DIM)
    v = v.reshape(B, S, NUM_KV_HEADS, HEAD_DIM)
    cos, sin = rope_cos_sin(position_ids)
    q, k = apply_rotary_pos_emb(q, k, cos, sin)
    q = q.transpose(0, 2, 1, 3)
    k = k.transpose(0, 2, 1, 3)
    v = v.transpose(0, 2, 1, 3)
    k = jnp.repeat(k, NUM_KV_GROUPS, axis=1)   # repeat_kv
    v = jnp.repeat(v, NUM_KV_GROUPS, axis=1)
    scores = jnp.einsum("bhqd,bhkd->bhqk", q, k) / np.sqrt(HEAD_DIM)
    causal = jnp.tril(jnp.ones((S, S), dtype=bool))
    scores = jnp.where(causal[None, None], scores, -jnp.inf)
    probs = jax.nn.softmax(scores, axis=-1)
    attn = jnp.einsum("bhqk,bhkd->bhqd", probs, v)
    attn = attn.transpose(0, 2, 1, 3).reshape(B, S, HIDDEN)
    return attn @ params["wo"].T


# ---------------------------------------------------------------------------
if __name__ == "__main__":
    B, S = 2, 256   # small batch/seq; hidden/heads are fixed by the module (896 / 14 / 2 kv)

    key = jax.random.PRNGKey(0)
    kx, kq, kbq, kk, kbk, kv_, kbv, ko = jax.random.split(key, 8)

    params = {
        "wq": 0.02 * jax.random.normal(kq, (NUM_HEADS * HEAD_DIM, HIDDEN), jnp.float32),
        "bq": 0.02 * jax.random.normal(kbq, (NUM_HEADS * HEAD_DIM,), jnp.float32),
        "wk": 0.02 * jax.random.normal(kk, (NUM_KV_HEADS * HEAD_DIM, HIDDEN), jnp.float32),
        "bk": 0.02 * jax.random.normal(kbk, (NUM_KV_HEADS * HEAD_DIM,), jnp.float32),
        "wv": 0.02 * jax.random.normal(kv_, (NUM_KV_HEADS * HEAD_DIM, HIDDEN), jnp.float32),
        "bv": 0.02 * jax.random.normal(kbv, (NUM_KV_HEADS * HEAD_DIM,), jnp.float32),
        "wo": 0.02 * jax.random.normal(ko, (HIDDEN, NUM_HEADS * HEAD_DIM), jnp.float32),
    }

    hidden_states = jax.random.normal(kx, (B, S, HIDDEN), jnp.float32)
    position_ids = jnp.arange(S, dtype=jnp.int32)[None, :]   # (1, S)

    out = attention_forward(params, hidden_states, position_ids)
    out = jax.block_until_ready(out)

    ref = attention_reference(params, hidden_states, position_ids)
    np.testing.assert_allclose(np.asarray(out), np.asarray(ref),
                               rtol=2e-2, atol=2e-2)

    print("KERNEL_OK")
</pallas_src>

<mosaic_0001>
module attributes {stable_mosaic.version = 11 : i64} {
  func.func @_linear_kernel(%arg0: i32, %arg1: memref<256x896xbf16, #tpu.memory_space<vmem>>, %arg2: memref<896x1152xbf16, #tpu.memory_space<vmem>>, %arg3: memref<1x1152xf32, #tpu.memory_space<vmem>>, %arg4: memref<256x1152xbf16, #tpu.memory_space<vmem>>) attributes {dimension_semantics = [#tpu.dimension_semantics<parallel>], iteration_bounds = array<i64: 2>, scalar_prefetch = 0 : i64, scratch_operands = 0 : i64, tpu.core_type = #tpu.core_type<tc>, window_params = [{transform_indices = @transform_0, window_bounds = array<i64: 256, 896>}, {pipeline_mode = #tpu.pipeline_mode<synchronous>, transform_indices = @transform_1, window_bounds = array<i64: 896, 1152>}, {pipeline_mode = #tpu.pipeline_mode<synchronous>, transform_indices = @transform_2, window_bounds = array<i64: 1, 1152>}, {transform_indices = @transform_3, window_bounds = array<i64: 256, 1152>}]} {
    %c0 = arith.constant 0 : index
    %c0_0 = arith.constant 0 : index
    %0 = vector.load %arg1[%c0, %c0_0] : memref<256x896xbf16, #tpu.memory_space<vmem>>, vector<256x896xbf16>
    %c0_1 = arith.constant 0 : index
    %c0_2 = arith.constant 0 : index
    %1 = vector.load %arg2[%c0_1, %c0_2] : memref<896x1152xbf16, #tpu.memory_space<vmem>>, vector<896x1152xbf16>
    %cst = arith.constant dense<0.000000e+00> : vector<256x1152xf32>
    %2 = tpu.matmul %0, %1, %cst {dimension_numbers = #tpu.dot_dimension_numbers<[1], [0], [0], [1], [0, 0, 1, 1], [], []>} : vector<256x896xbf16>, vector<896x1152xbf16>, vector<256x1152xf32> -> vector<256x1152xf32>
    %c0_3 = arith.constant 0 : index
    %c0_4 = arith.constant 0 : index
    %3 = vector.load %arg3[%c0_3, %c0_4] : memref<1x1152xf32, #tpu.memory_space<vmem>>, vector<1x1152xf32>
    %4 = vector.broadcast %3 : vector<1x1152xf32> to vector<256x1152xf32>
    %5 = arith.addf %2, %4 : vector<256x1152xf32>
    %6 = arith.truncf %5 : vector<256x1152xf32> to vector<256x1152xbf16>
    %c0_5 = arith.constant 0 : index
    %c0_6 = arith.constant 0 : index
    %7 = vector.load %arg4[%c0_5, %c0_6] : memref<256x1152xbf16, #tpu.memory_space<vmem>>, vector<256x1152xbf16>
    tpu.vector_store %arg4[%c0_5, %c0_6], %6 {strides = array<i32>} : memref<256x1152xbf16, #tpu.memory_space<vmem>>, vector<256x1152xbf16>,
    return
  }
  func.func @transform_0(%arg0: i32) -> (i32, i32) {
    %c0_i32 = arith.constant 0 : i32
    %c0_i32_0 = arith.constant 0 : i32
    return %arg0, %c0_i32 : i32, i32
  }
  func.func @transform_1(%arg0: i32) -> (i32, i32) {
    %c0_i32 = arith.constant 0 : i32
    %c0_i32_0 = arith.constant 0 : i32
    %c0_i32_1 = arith.constant 0 : i32
    return %c0_i32, %c0_i32_0 : i32, i32
  }
  func.func @transform_2(%arg0: i32) -> (i32, i32) {
    %c0_i32 = arith.constant 0 : i32
    %c0_i32_0 = arith.constant 0 : i32
    %c0_i32_1 = arith.constant 0 : i32
    return %c0_i32, %c0_i32_0 : i32, i32
  }
  func.func @transform_3(%arg0: i32) -> (i32, i32) {
    %c0_i32 = arith.constant 0 : i32
    %c0_i32_0 = arith.constant 0 : i32
    return %arg0, %c0_i32 : i32, i32
  }
}

</mosaic_0001>

<bundles_post_ra>
// kernel: tpu_custom_call.1
= control target key start
LH: loop header
LB: loop body
LE: loop exit
PB: predicated region body
PF: predicated region fallthrough
CT: control target
= control target key end

     0   :  { %8 = vsyncpa [#allocation3], 0  ;;  %s15724_s0 = inlined_call_operand.hbm [shape: bf16[512,896], index: 0, kind: input, shape index: {}]   ;;  %s15725_s1 = inlined_call_operand.hbm [shape: bf16[896,1152], index: 1, kind: input, shape index: {}]   ;;  %s15726_s2 = inlined_call_operand.hbm [shape: f32[1,1152], index: 2, kind: input, shape index: {}]   ;;  %s15727_s3 = inlined_call_operand.hbm [shape: bf16[512,1152], index: 3, kind: output, shape index: {}]  }
   0x1   :  { %10 = vsyncpa [#allocation3 + $0x1], 0 }
   0x2   :  { %11 = vsyncpa [#allocation6], 0 }
   0x3   :  { %12 = vsyncpa [#allocation4], 0 }
   0x4   :  { %14 = vsyncpa [#allocation4 + $0x1], 0  ;;  %s11996_s12 = smov 0   ;;  %s11998_s13 = smov 0  }
   0x5   :  { %s12000_s14 = smov 0   ;;  %s12002_s15 = smov 0  }
   0x6 LB: > { %s12017_s16 = sadd.s32 4294967295, %s11963_s15   ;;  %s9004_s17 = sadd.s32 4294967294, %s11963_s15   ;;  %s11963_s15 = sphi %s12002_s15, %s16042_s15   ;;  %s11959_s14 = sphi %s12000_s14, %s16041_s14   ;;  %s11955_s13 = sphi %s11998_s13, %s16040_s13   ;;  %s11951_s12 = sphi %s11996_s12, %s16039_s12  }
   0x7   : > { %p40_p0 = scmp.ne.s32.totalorder %s11955_s13, %s11951_s12  ;;  %p15728_p1 = scmp.eq.s32.totalorder %s12017_s16, 0 }
   0x8   : > { %p112_p3 = scmp.eq.s32.totalorder %s9004_s17, 1  ;;  %p9005_p5 = scmp.ge.s32.totalorder %s11963_s15, 1 }
   0x9   : > { %p12026_p4 = por %p15728_p1, %p40_p0  ;;  %p119_p7 = scmp.lt.s32.totalorder %s11963_s15, 3 }
   0xa   : > { %p12031_p6 = por %p112_p3, %p40_p0  ;;  %s11965_s21 = smov [#allocation5]  }
   0xb   : > { %s15740_s18 = scalar_select %p12026_p4, 1, 0 }
   0xc   : > { %s15741_s19 = scalar_select %p12031_p6, 1, 0 }
   0xd   : > { %p12036_p8 = pnand %p9005_p5, %p119_p7  ;;  %s131_s22 = sshll.u32 %s11965_s21, 4  ;;  %s132_s22 = int_to_ptr.vmem [resolvable:$true] %s131_s22 }
   0xe   : > { %s11966_s24 = smov [#allocation7]   ;;  %s11826_s26 = scalar_lea.vmem %s132_s22, 64512 }
   0xf   : > { %s15742_s20 = scalar_select %p12036_p8, 1, 0 }
  0x10   : > { %p10414_p9 = pneg %p12036_p8  ;;  %s145_s25 = sshll.u32 %s11966_s24, 4  ;;  %s146_s25 = int_to_ptr.vmem [resolvable:$true] %s145_s25 }
  0x11   : > { %p11827_p13 = scmp.ne.s32.totalorder %s132_s22, %s11826_s26  ;;  %p11834_p5 = scmp.lt.s32.totalorder %s132_s22, %s132_s22 }
  0x12   : > { %p12045_p11 = pnand %p10414_p9, %p15728_p1  ;;  %p11835_p7 = scmp.lt.s32.totalorder %s11826_s26, %s11826_s26 }
  0x14   : > { %p11817_p12 = pneg %p12045_p11  ;;  %p11836_p10 = por %p11835_p7, %p11834_p5 }
  0x16   : > { %p11829_p0 = pnand %p11827_p13, %p11817_p12 }
  0x18   : > { %p11830_p3 = pneg %p11829_p0 }
  0x1a   : > { %p11837_p9 = pnand %p11836_p10, %p11830_p3 }
  0x1c   : > { %11840 = shalt.err (!%p11837_p9)
}
  0x1d   : > { %s11967_s27 = smov 576   ;;  %s11968_s28 = smov 36  }
  0x1e   : > { %10417 = dma.hbm_to_vmem [thread:$0]  (!%p12045_p11), %s15725_s1, 64512, %s132_s22, [#allocation6], %s11967_s27, %s11967_s27, %s11968_s28  }
  0x1f   : > { %s11852_s4 = scalar_lea.vmem %s146_s25, 144  ;;  %s11859_s5 = scalar_lea.vmem %s146_s25, 160 }
  0x20   : > { %p11853_p1 = scmp.ne.s32.totalorder %s146_s25, %s11852_s4  ;;  %p11860_p2 = scmp.lt.s32.totalorder %s146_s25, %s146_s25 }
  0x21   : > { %p11861_p5 = scmp.lt.s32.totalorder %s11859_s5, %s11852_s4 }
  0x22   : > { %p11855_p13 = pnand %p11853_p1, %p11817_p12 }
  0x23   : > { %p11862_p10 = por %p11861_p5, %p11860_p2 }
  0x24   : > { %p11856_p0 = pneg %p11855_p13 }
  0x26   : > { %p11863_p3 = pnand %p11862_p10, %p11856_p0 }
  0x28   : > { %11866 = shalt.err (!%p11863_p3)
}
  0x29   : > { %10420 = dma.hbm_to_vmem [thread:$0]  (!%p12045_p11), %s15726_s2, 144, %s146_s25, [#allocation6]  }
  0x2a   : > { %s12068_s8 = sadd.s32 1, %s11963_s15   ;;  %s27_s9 = sadd.s32 1, %s11959_s14 }
  0x2b   : > { %s24_s10 = ssub.s32 %s11963_s15, %s12068_s8  ;;  %p34_p1 = scmp.ne.s32.totalorder %s11959_s14, %s11955_s13 }
  0x2c   : > { %p25_p2 = scmp.eq.s32.totalorder %s24_s10, 0  ;;  %p35_p12 = scmp.eq.s32.totalorder %s11963_s15, 0 }
  0x2d   : > { %p15744_p7 = scmp.eq.s32.totalorder %s12017_s16, 1  ;;  %p10431_p13 = scmp.lt.s32.totalorder %s11963_s15, 2 }
  0x2e   : > { %s12084_s17 = scalar_select %p25_p2, %s11959_s14, %s27_s9  }
  0x2f   : > { %p12078_p9 = por %p15744_p7, %p34_p1  ;;  %p36_p0 = por %p35_p12, %p34_p1 }
  0x30   : > { %s156_s21 = sand.u32 1, %s11959_s14   ;;  %s10398_s23 = smul.u32 14336, %s11963_s15 }
  0x31   : > { %s15745_s11 = scalar_select %p12078_p9, 1, 0 }
  0x32   : > { %s10397_s22 = smul.u32 896, %s156_s21  ;;  %p12088_p11 = pnand %p10431_p13, %p36_p0 }
  0x33   : > { %s12095_s27 = scalar_lea.hbm %s15724_s0, %s10398_s23  ;;  %s12099_s30 = scalar_lea.sflag [#allocation3], %s156_s21 }
  0x34   : > { %s160_s28 = scalar_lea.vmem [#allocation2], %s10397_s22  ;;  %s11867_s4 = scalar_lea.hbm %s12095_s27, 14336 }
  0x35   : > { %s168_s29 = sshll.u32 %s160_s28, 4  ;;  %p11868_p5 = scmp.ne.s32.totalorder %s12095_s27, %s11867_s4  ;;  %s12097_s29 = int_to_ptr.vmem [resolvable:$true] %s168_s29 }
  0x36   : > { %p11869_p10 = pneg %p12088_p11  ;;  %s11872_s7 = scalar_lea.hbm %s15724_s0, 28672 }
  0x37   : > { %p11873_p2 = scmp.lt.s32.totalorder %s12095_s27, %s15724_s0  ;;  %p11874_p12 = scmp.lt.s32.totalorder %s11872_s7, %s11867_s4 }
  0x38   : > { %p11870_p3 = pnand %p11869_p10, %p11868_p5 }
  0x39   : > { %p11875_p7 = por %p11874_p12, %p11873_p2 }
  0x3a   : > { %p11871_p1 = pneg %p11870_p3 }
  0x3c   : > { %p11876_p13 = pnand %p11875_p7, %p11871_p1 }
  0x3e   : > { %11879 = shalt.err (!%p11876_p13)
}
  0x3f   : > { %s11880_s21 = scalar_lea.vmem %s12097_s29, 14336  ;;  %s11969_s22 = smov [#allocation2]  }
  0x40   : > { %p11881_p0 = scmp.ne.s32.totalorder %s12097_s29, %s11880_s21  ;;  %s11885_s23 = sshll.u32 %s11969_s22, 4  ;;  %s11886_s23 = int_to_ptr.vmem [resolvable:$false] %s11885_s23 }
  0x41   : > { %s11887_s25 = scalar_lea.vmem %s11886_s23, 28672  ;;  %p11888_p3 = scmp.lt.s32.totalorder %s12097_s29, %s11886_s23 }
  0x42   : > { %p11883_p6 = pnand %p11881_p0, %p11869_p10  ;;  %p11889_p9 = scmp.lt.s32.totalorder %s11887_s25, %s11880_s21 }
  0x44   : > { %p11884_p5 = pneg %p11883_p6  ;;  %p11890_p4 = por %p11889_p9, %p11888_p3 }
  0x46   : > { %p11891_p8 = pnand %p11890_p4, %p11884_p5 }
  0x48   : > { %11894 = shalt.err (!%p11891_p8)
}
  0x49   : > { %s11970_s26 = smov 448   ;;  %s11971_s28 = smov 28  }
  0x4a   : > { %10424 = dma.hbm_to_vmem [thread:$0]  (!%p12088_p11), %s12095_s27, 14336, %s12097_s29, %s12099_s30, %s11970_s26, %s11970_s26, %s11971_s28  }
  0x4b   : > { %p15747_p10 = scmp.ne.s32.totalorder %s15742_s20, 0 }
  0x4d   : > { %180 = sbr.rel (%p15747_p10) target bundleno = 1617 (0x651), region = 32 }
  0x52   : > { %s12123_s4 = sand.u32 1, %s11955_s13   ;;  %p15748_p4 = scmp.ne.s32.totalorder %s15740_s18, 0 }
  0x53   : > { %s10399_s5 = smul.u32 896, %s12123_s4  ;;  %s183_s6 = scalar_lea.sflag [#allocation3], %s12123_s4 }
  0x55   : > { %s12127_s7 = scalar_lea.vmem [#allocation2], %s10399_s5 }
  0x56   : > { %11938 = dma.done.wait (%p15748_p4), %s183_s6, 14336  }
  0x57   : > { %11940 = vsyncadd (%p15748_p4), %s183_s6, 4294952960  ;;  %p15749_p6 = scmp.eq.s32.totalorder %s12017_s16, 0 }
  0x59   : > { %11942 = dma.done.wait (%p15749_p6), [#allocation6], 64656   ;;  %p15750_p8 = pmov %p15749_p6 }
  0x5a   : > { %v10476_v0 = vld [vmem:[#allocation5 + $0x1fc] ss:$36 sps:$4 sm:$0xff]   ;;  %v10482_v4 = vld [vmem:[#allocation5 + $0x1b4] ss:$36 sps:$4 sm:$0xff]   ;;  %v10488_v8 = vld [vmem:[#allocation5 + $0x16c] ss:$36 sps:$4 sm:$0xff]  }
  0x5b   : > { %11944 = vsyncadd (%p15750_p8), [#allocation6], 4294902640  ;;  %v10478_v1 = vld [vmem:[#allocation5 + $0x67c] ss:$36 sps:$4 sm:$0xff]   ;;  %4109 = vmatprep.subr.bf16.mxu0 %v10476_v0  ;;  %v10484_v5 = vld [vmem:[#allocation5 + $0x634] ss:$36 sps:$4 sm:$0xff]  }
  0x5c   : > { %v10480_v2 = vld [vmem:[#allocation5 + $0x1f8] ss:$36 sps:$4 sm:$0xff]   ;;  %4302 = vmatprep.subr.bf16.mxu1 %v10478_v1  ;;  %v10486_v6 = vld [vmem:[#allocation5 + $0x1b0] ss:$36 sps:$4 sm:$0xff]   ;;  %v10492_v10 = vld [vmem:[#allocation5 + $0x168] ss:$36 sps:$4 sm:$0xff]  }
  0x5d   : > { %v10481_v3 = vld [vmem:[#allocation5 + $0x678] ss:$36 sps:$4 sm:$0xff]   ;;  %4110 = vmatpush1.bf16.msra.mxu0 %v10480_v2  ;;  %v10487_v7 = vld [vmem:[#allocation5 + $0x630] ss:$36 sps:$4 sm:$0xff]   ;;  %v10493_v11 = vld [vmem:[#allocation5 + $0x5e8] ss:$36 sps:$4 sm:$0xff]  }
  0x5e   : > { %4303 = vmatpush1.bf16.msra.mxu1 %v10481_v3  ;;  %4111 = vmatprep.subr.bf16.mxu0 %v10482_v4  ;;  %v10490_v9 = vld [vmem:[#allocation5 + $0x5ec] ss:$36 sps:$4 sm:$0xff]   ;;  %v10494_v12 = vld [vmem:[#allocation5 + $0x124] ss:$36 sps:$4 sm:$0xff]   ;;  %v10500_v16 = vld [vmem:[#allocation5 + $0xdc] ss:$36 sps:$4 sm:$0xff]  }
  0x5f   : > { %4304 = vmatprep.subr.bf16.mxu1 %v10484_v5  ;;  %v10496_v13 = vld [vmem:[#allocation5 + $0x5a4] ss:$36 sps:$4 sm:$0xff]   ;;  %v10502_v17 = vld [vmem:[#allocation5 + $0x55c] ss:$36 sps:$4 sm:$0xff]   ;;  %v10506_v20 = vld [vmem:[#allocation5 + $0x94] ss:$36 sps:$4 sm:$0xff]  }
  0x60   : > { %v10498_v14 = vld [vmem:[#allocation5 + $0x120] ss:$36 sps:$4 sm:$0xff]   ;;  %v10504_v18 = vld [vmem:[#allocation5 + $0xd8] ss:$36 sps:$4 sm:$0xff]   ;;  %v10510_v22 = vld [vmem:[#allocation5 + $0x90] ss:$36 sps:$4 sm:$0xff]  }
  0x61   : > { %4112 = vmatpush1.bf16.msra.mxu0 %v10486_v6  ;;  %v10499_v15 = vld [vmem:[#allocation5 + $0x5a0] ss:$36 sps:$4 sm:$0xff]   ;;  %v10505_v19 = vld [vmem:[#allocation5 + $0x558] ss:$36 sps:$4 sm:$0xff]   ;;  %v10511_v23 = vld [vmem:[#allocation5 + $0x510] ss:$36 sps:$4 sm:$0xff]  }
  0x62   : > { %4305 = vmatpush1.bf16.msra.mxu1 %v10487_v7  ;;  %4113 = vmatprep.subr.bf16.mxu0 %v10488_v8  ;;  %v10508_v21 = vld [vmem:[#allocation5 + $0x514] ss:$36 sps:$4 sm:$0xff]   ;;  %v10512_v24 = vld [vmem:[#allocation5 + $0x4c] ss:$36 sps:$4 sm:$0xff]   ;;  %v10518_v28 = vld [vmem:[#allocation5 + $0x4] ss:$36 sps:$4 sm:$0xff]  }
  0x63   : > { %4306 = vmatprep.subr.bf16.mxu1 %v10490_v9  ;;  %v10514_v25 = vld [vmem:[#allocation5 + $0x4cc] ss:$36 sps:$4 sm:$0xff]   ;;  %v10520_v29 = vld [vmem:[#allocation5 + $0x484] ss:$36 sps:$4 sm:$0xff]   ;;  %v10524_v32 = vld [vmem:[#allocation5 + $0x43c] ss:$36 sps:$4 sm:$0xff]  }
  0x64   : > { %v10516_v26 = vld [vmem:[#allocation5 + $0x48] ss:$36 sps:$4 sm:$0xff]   ;;  %v10522_v30 = vld [vmem:[#allocation5] ss:$36 sps:$4 sm:$0xff]   ;;  %v10528_v34 = vld [vmem:[#allocation5 + $0x438] ss:$36 sps:$4 sm:$0xff]  }
  0x65   : > { %4114 = vmatpush1.bf16.msra.mxu0 %v10492_v10  ;;  %v10517_v27 = vld [vmem:[#allocation5 + $0x4c8] ss:$36 sps:$4 sm:$0xff]   ;;  %v10523_v31 = vld [vmem:[#allocation5 + $0x480] ss:$36 sps:$4 sm:$0xff]   ;;  %v10529_v35 = vld [vmem:[#allocation5 + $0x8b8] ss:$36 sps:$4 sm:$0xff]  }
  0x66   : > { %4307 = vmatpush1.bf16.msra.mxu1 %v10493_v11  ;;  %4115 = vmatprep.subr.bf16.mxu0 %v10494_v12  ;;  %v10526_v33 = vld [vmem:[#allocation5 + $0x8bc] ss:$36 sps:$4 sm:$0xff]   ;;  %v10530_v36 = vld [vmem:[#allocation5 + $0x3f4] ss:$36 sps:$4 sm:$0xff]   ;;  %v10536_v40 = vld [vmem:[#allocation5 + $0x3ac] ss:$36 sps:$4 sm:$0xff]  }
  0x67   : > { %4308 = vmatprep.subr.bf16.mxu1 %v10496_v13  ;;  %v10532_v37 = vld [vmem:[#allocation5 + $0x874] ss:$36 sps:$4 sm:$0xff]   ;;  %v10538_v41 = vld [vmem:[#allocation5 + $0x82c] ss:$36 sps:$4 sm:$0xff]   ;;  %v10542_v44 = vld [vmem:[#allocation5 + $0x364] ss:$36 sps:$4 sm:$0xff]  }
  0x68   : > { %v10534_v38 = vld [vmem:[#allocation5 + $0x3f0] ss:$36 sps:$4 sm:$0xff]   ;;  %v10540_v42 = vld [vmem:[#allocation5 + $0x3a8] ss:$36 sps:$4 sm:$0xff]   ;;  %v10546_v46 = vld [vmem:[#allocation5 + $0x360] ss:$36 sps:$4 sm:$0xff]  }
  0x69   : > { %4116 = vmatpush1.bf16.msra.mxu0 %v10498_v14  ;;  %v10535_v39 = vld [vmem:[#allocation5 + $0x870] ss:$36 sps:$4 sm:$0xff]   ;;  %v10541_v43 = vld [vmem:[#allocation5 + $0x828] ss:$36 sps:$4 sm:$0xff]   ;;  %v10547_v47 = vld [vmem:[#allocation5 + $0x7e0] ss:$36 sps:$4 sm:$0xff]  }
  0x6a   : > { %4309 = vmatpush1.bf16.msra.mxu1 %v10499_v15  ;;  %4117 = vmatprep.subr.bf16.mxu0 %v10500_v16  ;;  %v10544_v45 = vld [vmem:[#allocation5 + $0x7e4] ss:$36 sps:$4 sm:$0xff]   ;;  %v10548_v49 = vld [vmem:[#allocation5 + $0x31c] ss:$36 sps:$4 sm:$0xff]   ;;  %v10554_v54 = vld [vmem:[#allocation5 + $0x2d4] ss:$36 sps:$4 sm:$0xff]  }
  0x6b   : > { %4310 = vmatprep.subr.bf16.mxu1 %v10502_v17  ;;  %v10572_v48 = vld [vmem:[%s12127_s7 + $0x4] ss:$28 sps:$4 sm:$0xff]   ;;  %v10574_v50 = vld [vmem:[%s12127_s7 + $0xc] ss:$28 sps:$4 sm:$0xff]   ;;  %v10552_v52 = vld [vmem:[#allocation5 + $0x318] ss:$36 sps:$4 sm:$0xff]  }
  0x6c   : > { %v10550_v51 = vld [vmem:[#allocation5 + $0x79c] ss:$36 sps:$4 sm:$0xff]   ;;  %4141 = vmatprep.mubr.bf16.mxu0 %v10572_v48  ;;  %4334 = vmatprep.mubr.bf16.mxu1 %v10574_v50  ;;  %v10556_v55 = vld [vmem:[#allocation5 + $0x754] ss:$36 sps:$4 sm:$0xff]   ;;  %v10560_v58 = vld [vmem:[#allocation5 + $0x28c] ss:$36 sps:$4 sm:$0xff]  }
  0x6d   : > { %4118 = vmatpush1.bf16.msra.mxu0 %v10504_v18  ;;  %v10553_v53 = vld [vmem:[#allocation5 + $0x798] ss:$36 sps:$4 sm:$0xff]   ;;  %v10558_v56 = vld [vmem:[#allocation5 + $0x2d0] ss:$36 sps:$4 sm:$0xff]   ;;  %v10564_v60 = vld [vmem:[#allocation5 + $0x288] ss:$36 sps:$4 sm:$0xff]  }
  0x6e   : > { %4311 = vmatpush1.bf16.msra.mxu1 %v10505_v19  ;;  %4119 = vmatprep.subr.bf16.mxu0 %v10506_v20  ;;  %v10559_v57 = vld [vmem:[#allocation5 + $0x750] ss:$36 sps:$4 sm:$0xff]   ;;  %v10565_v61 = vld [vmem:[#allocation5 + $0x708] ss:$36 sps:$4 sm:$0xff]   ;;  %v10570_v0 = vld [vmem:[#allocation5 + $0x240] ss:$36 sps:$4 sm:$0xff]  }
  0x6f   : > { %4312 = vmatprep.subr.bf16.mxu1 %v10508_v21  ;;  %v10562_v59 = vld [vmem:[#allocation5 + $0x70c] ss:$36 sps:$4 sm:$0xff]   ;;  %v10566_v62 = vld [vmem:[#allocation5 + $0x244] ss:$36 sps:$4 sm:$0xff]   ;;  %v10580_v2 = vld [vmem:[#allocation5 + $0xafc] ss:$36 sps:$4 sm:$0xff]  }
  0x70   : > { %v10568_v63 = vld [vmem:[#allocation5 + $0x6c4] ss:$36 sps:$4 sm:$0xff]   ;;  %v10576_v3 = vld [vmem:[%s12127_s7] ss:$28 sps:$4 sm:$0xff]   ;;  %v10589_v8 = vld [vmem:[#allocation5 + $0xab4] ss:$36 sps:$4 sm:$0xff]  }
  0x71   : > { %4120 = vmatpush1.bf16.msra.mxu0 %v10510_v22  ;;  %v10571_v1 = vld [vmem:[#allocation5 + $0x6c0] ss:$36 sps:$4 sm:$0xff]   ;;  %v10578_v5 = vld [vmem:[#allocation5 + $0xaf8] ss:$36 sps:$4 sm:$0xff]   ;;  %v10587_v9 = vld [vmem:[#allocation5 + $0xab0] ss:$36 sps:$4 sm:$0xff]  }
  0x72   : > { %4313 = vmatpush1.bf16.msra.mxu1 %v10511_v23  ;;  %4121 = vmatprep.subr.bf16.mxu0 %v10512_v24  ;;  %v10577_v4 = vld [vmem:[%s12127_s7 + $0x8] ss:$28 sps:$4 sm:$0xff]   ;;  %v10581_v6 = vld [vmem:[%s12127_s7 + $0x3c] ss:$28 sps:$4 sm:$0xff]   ;;  %v10598_v10 = vld [vmem:[#allocation5 + $0xa6c] ss:$36 sps:$4 sm:$0xff]  }
  0x73   : > { %4314 = vmatprep.subr.bf16.mxu1 %v10514_v25  ;;  %v10583_v7 = vld [vmem:[%s12127_s7 + $0x44] ss:$28 sps:$4 sm:$0xff]   ;;  %v10585_v11 = vld [vmem:[%s12127_s7 + $0x38] ss:$28 sps:$4 sm:$0xff]   ;;  %v10596_v15 = vld [vmem:[#allocation5 + $0xa68] ss:$36 sps:$4 sm:$0xff]  }
  0x74   : > { %v10586_v12 = vld [vmem:[%s12127_s7 + $0x40] ss:$28 sps:$4 sm:$0xff]   ;;  %v10590_v13 = vld [vmem:[%s12127_s7 + $0x74] ss:$28 sps:$4 sm:$0xff]   ;;  %v10607_v16 = vld [vmem:[#allocation5 + $0xa24] ss:$36 sps:$4 sm:$0xff]  }
  0x75   : > { %4122 = vmatpush1.bf16.msra.mxu0 %v10516_v26  ;;  %v10592_v14 = vld [vmem:[%s12127_s7 + $0x7c] ss:$28 sps:$4 sm:$0xff]   ;;  %v10605_v17 = vld [vmem:[#allocation5 + $0xa20] ss:$36 sps:$4 sm:$0xff]   ;;  %v10594_v18 = vld [vmem:[%s12127_s7 + $0x70] ss:$28 sps:$4 sm:$0xff]  }
  0x76   : > { %4315 = vmatpush1.bf16.msra.mxu1 %v10517_v27  ;;  %4123 = vmatprep.subr.bf16.mxu0 %v10518_v28  ;;  %v10616_v19 = vld [vmem:[#allocation5 + $0x9dc] ss:$36 sps:$4 sm:$0xff]   ;;  %v10595_v20 = vld [vmem:[%s12127_s7 + $0x78] ss:$28 sps:$4 sm:$0xff]   ;;  %v10599_v21 = vld [vmem:[%s12127_s7 + $0xac] ss:$28 sps:$4 sm:$0xff]  }
  0x77   : > { %4316 = vmatprep.subr.bf16.mxu1 %v10520_v29  ;;  %v10601_v22 = vld [vmem:[%s12127_s7 + $0xb4] ss:$28 sps:$4 sm:$0xff]   ;;  %v10614_v23 = vld [vmem:[#allocation5 + $0x9d8] ss:$36 sps:$4 sm:$0xff]   ;;  %v10603_v26 = vld [vmem:[%s12127_s7 + $0xa8] ss:$28 sps:$4 sm:$0xff]  }
  0x78   : > { %v10625_v24 = vld [vmem:[#allocation5 + $0x994] ss:$36 sps:$4 sm:$0xff]   ;;  %v10634_v27 = vld [vmem:[#allocation5 + $0x94c] ss:$36 sps:$4 sm:$0xff]   ;;  %v10608_v29 = vld [vmem:[%s12127_s7 + $0xe4] ss:$28 sps:$4 sm:$0xff]  }
  0x79   : > { %4124 = vmatpush1.bf16.msra.mxu0 %v10522_v30  ;;  %v10623_v25 = vld [vmem:[#allocation5 + $0x990] ss:$36 sps:$4 sm:$0xff]   ;;  %v10610_v30 = vld [vmem:[%s12127_s7 + $0xec] ss:$28 sps:$4 sm:$0xff]   ;;  %s10400_s18 = smul.u32 1152, %s12123_s4  ;;  %p16036_p11 = scmp.ne.s32.totalorder %s15745_s11, 0 }
  0x7a   : > { %4317 = vmatpush1.bf16.msra.mxu1 %v10523_v31  ;;  %4125 = vmatprep.subr.bf16.mxu0 %v10524_v32  ;;  %v10604_v28 = vld [vmem:[%s12127_s7 + $0xb0] ss:$28 sps:$4 sm:$0xff]   ;;  %v10643_v32 = vld [vmem:[#allocation5 + $0x904] ss:$36 sps:$4 sm:$0xff]   ;;  %s10401_s24 = smul.u32 18432, %s12017_s16  ;;  %s8898_s16 = scalar_lea.sflag [#allocation4], %s12123_s4 }
  0x7b   : > { %4318 = vmatprep.subr.bf16.mxu1 %v10526_v33  ;;  %v10632_v31 = vld [vmem:[#allocation5 + $0x948] ss:$36 sps:$4 sm:$0xff]   ;;  %v10641_v33 = vld [vmem:[#allocation5 + $0x900] ss:$36 sps:$4 sm:$0xff]   ;;  %s12616_s20 = scalar_lea.vmem [#allocation8], %s10400_s18  ;;  %s11973_s21 = smov [#allocation8]  }
  0x7c   : > { %v10679_v48 = vld [vmem:[#allocation5 + $0xc64] ss:$36 sps:$4 sm:$0xff]   ;;  %v10630_v50 = vld [vmem:[%s12127_s7 + $0x150] ss:$28 sps:$4 sm:$0xff]   ;;  %s8912_s27 = sshll.u32 %s12616_s20, 4  ;;  %s15678_s9 = scalar_lea.hbm %s15727_s3, %s10401_s24  ;;  %s15680_s27 = int_to_ptr.vmem [resolvable:$true] %s8912_s27 }
  0x7d   : > { %4126 = vmatpush2.bf16.msra.mxu0 %v10528_v34  ;;  %v10612_v34 = vld [vmem:[%s12127_s7 + $0xe0] ss:$28 sps:$4 sm:$0xff]   ;;  %s11895_s10 = scalar_lea.vmem %s15680_s27, 18432  ;;  %s11899_s22 = sshll.u32 %s11973_s21, 4  ;;  %s11900_s22 = int_to_ptr.vmem [resolvable:$false] %s11899_s22 }
  0x7e   : > { %4319 = vmatpush2.bf16.msra.mxu1 %v10529_v35  ;;  %4127 = vmatprep.subr.bf16.mxu0 %v10530_v36  ;;  %v10652_v35 = vld [vmem:[#allocation5 + $0xd3c] ss:$36 sps:$4 sm:$0xff]   ;;  %v10613_v36 = vld [vmem:[%s12127_s7 + $0xe8] ss:$28 sps:$4 sm:$0xff]   ;;  %p11896_p9 = scmp.ne.s32.totalorder %s15680_s27, %s11895_s10  ;;  %s11901_s23 = scalar_lea.vmem %s11900_s22, 36864 }
  0x7f   : > { %4320 = vmatprep.subr.bf16.mxu1 %v10532_v37  ;;  %v10617_v37 = vld [vmem:[%s12127_s7 + $0x11c] ss:$28 sps:$4 sm:$0xff]   ;;  %p11902_p12 = scmp.lt.s32.totalorder %s15680_s27, %s11900_s22  ;;  %p11903_p7 = scmp.lt.s32.totalorder %s11901_s23, %s11895_s10 }
  0x80   : > { %p11897_p1 = pnand %p11896_p9, %p16036_p11 }
  0x81   : > { %4128 = vmatpush2.bf16.msra.mxu0 %v10534_v38  ;;  %v10619_v38 = vld [vmem:[%s12127_s7 + $0x124] ss:$28 sps:$4 sm:$0xff]   ;;  %p11904_p13 = por %p11903_p7, %p11902_p12 }
  0x82   : > { %4321 = vmatpush2.bf16.msra.mxu1 %v10535_v39  ;;  %4129 = vmatprep.subr.bf16.mxu0 %v10536_v40  ;;  %v10650_v39 = vld [vmem:[#allocation5 + $0xd38] ss:$36 sps:$4 sm:$0xff]   ;;  %p11898_p2 = pneg %p11897_p1 }
  0x83   : > { %4322 = vmatprep.subr.bf16.mxu1 %v10538_v41  ;;  %v10661_v40 = vld [vmem:[#allocation5 + $0xcf4] ss:$36 sps:$4 sm:$0xff]  }
  0x84   : > { %v10659_v41 = vld [vmem:[#allocation5 + $0xcf0] ss:$36 sps:$4 sm:$0xff]   ;;  %p11905_p0 = pnand %p11904_p13, %p11898_p2 }
  0x85   : > { %4130 = vmatpush2.bf16.msra.mxu0 %v10540_v42  ;;  %v10621_v42 = vld [vmem:[%s12127_s7 + $0x118] ss:$28 sps:$4 sm:$0xff]  }
  0x86   : > { %4323 = vmatpush2.bf16.msra.mxu1 %v10541_v43  ;;  %4131 = vmatprep.subr.bf16.mxu0 %v10542_v44  ;;  %v10670_v43 = vld [vmem:[#allocation5 + $0xcac] ss:$36 sps:$4 sm:$0xff]   ;;  %v10622_v44 = vld [vmem:[%s12127_s7 + $0x120] ss:$28 sps:$4 sm:$0xff]  }
  0x87   : > { %4324 = vmatprep.subr.bf16.mxu1 %v10544_v45  ;;  %v10626_v45 = vld [vmem:[%s12127_s7 + $0x154] ss:$28 sps:$4 sm:$0xff]  }
  0x89   : > { %4132 = vmatpush2.bf16.msra.mxu0 %v10546_v46  ;;  %v10628_v46 = vld [vmem:[%s12127_s7 + $0x15c] ss:$28 sps:$4 sm:$0xff]  }
  0x8a   : > { %4325 = vmatpush2.bf16.msra.mxu1 %v10547_v47  ;;  %4133 = vmatprep.subr.bf16.mxu0 %v10548_v49  ;;  %v10668_v47 = vld [vmem:[#allocation5 + $0xca8] ss:$36 sps:$4 sm:$0xff]   ;;  %v10677_v49 = vld [vmem:[#allocation5 + $0xc60] ss:$36 sps:$4 sm:$0xff]  }
  0x8b   : > { %4326 = vmatprep.subr.bf16.mxu1 %v10550_v51  ;;  %v10688_v51 = vld [vmem:[#allocation5 + $0xc1c] ss:$36 sps:$4 sm:$0xff]  }
  0x8d   : > { %4134 = vmatpush2.bf16.msra.mxu0 %v10552_v52  ;;  %v10631_v52 = vld [vmem:[%s12127_s7 + $0x158] ss:$28 sps:$4 sm:$0xff]  }
  0x8e   : > { %4327 = vmatpush2.bf16.msra.mxu1 %v10553_v53  ;;  %4135 = vmatprep.subr.bf16.mxu0 %v10554_v54  ;;  %v10635_v53 = vld [vmem:[%s12127_s7 + $0x18c] ss:$28 sps:$4 sm:$0xff]   ;;  %v10637_v54 = vld [vmem:[%s12127_s7 + $0x194] ss:$28 sps:$4 sm:$0xff]  }
  0x8f   : > { %4328 = vmatprep.subr.bf16.mxu1 %v10556_v55  ;;  %v10686_v55 = vld [vmem:[#allocation5 + $0xc18] ss:$36 sps:$4 sm:$0xff]  }
  0x91   : > { %4136 = vmatpush2.bf16.msra.mxu0 %v10558_v56  ;;  %v10697_v56 = vld [vmem:[#allocation5 + $0xbd4] ss:$36 sps:$4 sm:$0xff]  }
  0x92   : > { %4329 = vmatpush2.bf16.msra.mxu1 %v10559_v57  ;;  %4137 = vmatprep.subr.bf16.mxu0 %v10560_v58  ;;  %v10695_v57 = vld [vmem:[#allocation5 + $0xbd0] ss:$36 sps:$4 sm:$0xff]   ;;  %v10639_v58 = vld [vmem:[%s12127_s7 + $0x188] ss:$28 sps:$4 sm:$0xff]  }
  0x93   : > { %4330 = vmatprep.subr.bf16.mxu1 %v10562_v59  ;;  %v10706_v59 = vld [vmem:[#allocation5 + $0xb8c] ss:$36 sps:$4 sm:$0xff]  }
  0x95   : > { %4138 = vmatpush2.bf16.msra.mxu0 %v10564_v60  ;;  %v10640_v60 = vld [vmem:[%s12127_s7 + $0x190] ss:$28 sps:$4 sm:$0xff]  }
  0x96   : > { %4331 = vmatpush2.bf16.msra.mxu1 %v10565_v61  ;;  %4139 = vmatprep.subr.bf16.mxu0 %v10566_v62  ;;  %v10644_v61 = vld [vmem:[%s12127_s7 + $0x1c4] ss:$28 sps:$4 sm:$0xff]   ;;  %v10646_v62 = vld [vmem:[%s12127_s7 + $0x1cc] ss:$28 sps:$4 sm:$0xff]  }
  0x97   : > { %4332 = vmatprep.subr.bf16.mxu1 %v10568_v63  ;;  %v10704_v63 = vld [vmem:[#allocation5 + $0xb88] ss:$36 sps:$4 sm:$0xff]  }
  0x99   : > { %4140 = vmatpush2.bf16.msra.mxu0 %v10570_v0  ;;  %v10715_v0 = vld [vmem:[#allocation5 + $0xb44] ss:$36 sps:$4 sm:$0xff]  }
  0x9a   : > { %4333 = vmatpush2.bf16.msra.mxu1 %v10571_v1  ;;  %4495 = vmatprep.subr.bf16.mxu0 %v10580_v2  ;;  %v10648_v1 = vld [vmem:[%s12127_s7 + $0x1c0] ss:$28 sps:$4 sm:$0xff]  }
  0x9b   : > { %10365 = vmatprep.subr.bf16.mxu1 %v10580_v2  ;;  %v10713_v2 = vld [vmem:[#allocation5 + $0xb40] ss:$36 sps:$4 sm:$0xff]  }
  0x9c   : > { %4142 = vmatmul.mubr.bf16.vlgmr.msra.gmra.mxu0 %v10576_v3  ;;  %v10724_v3 = vld [vmem:[#allocation5 + $0xf7c] ss:$36 sps:$4 sm:$0xff]  }
  0x9d   : > { %4335 = vmatmul.mubr.bf16.vlgmr.msra.gmra.mxu1 %v10577_v4  ;;  %4496 = vmatpush1.bf16.msra.mxu0 %v10578_v5  ;;  %v10727_v4 = vld [vmem:[#allocation5 + $0x204] ss:$36 sps:$4 sm:$0xff]  }
  0x9e   : > { %10381 = vmatpush1.bf16.msra.mxu1 %v10578_v5  ;;  %4151 = vmatprep.mubr.bf16.mxu0 %v10581_v6  ;;  %v10649_v5 = vld [vmem:[%s12127_s7 + $0x1c8] ss:$28 sps:$4 sm:$0xff]   ;;  %v10653_v6 = vld [vmem:[%s12127_s7 + $0x1fc] ss:$28 sps:$4 sm:$0xff]  }
  0x9f   : > { %4344 = vmatprep.mubr.bf16.mxu1 %v10583_v7  ;;  %4497 = vmatprep.subr.bf16.mxu0 %v10589_v8  ;;  %v10655_v7 = vld [vmem:[%s12127_s7 + $0x204] ss:$28 sps:$4 sm:$0xff]  }
  0xa0   : > { %10366 = vmatprep.subr.bf16.mxu1 %v10589_v8  ;;  %v10657_v8 = vld [vmem:[%s12127_s7 + $0x1f8] ss:$28 sps:$4 sm:$0xff]  }
  0xa1   : > { %4498 = vmatpush1.bf16.msra.mxu0 %v10587_v9 }
  0xa2   : > { %10382 = vmatpush1.bf16.msra.mxu1 %v10587_v9  ;;  %4499 = vmatprep.subr.bf16.mxu0 %v10598_v10  ;;  %v10658_v9 = vld [vmem:[%s12127_s7 + $0x200] ss:$28 sps:$4 sm:$0xff]  }
  0xa3   : > { %10367 = vmatprep.subr.bf16.mxu1 %v10598_v10  ;;  %v10662_v10 = vld [vmem:[%s12127_s7 + $0x234] ss:$28 sps:$4 sm:$0xff]  }
  0xa4   : > { %4152 = vmatmul.mubr.bf16.gmra.mxu0 %v10585_v11  ;;  %v10664_v11 = vld [vmem:[%s12127_s7 + $0x23c] ss:$28 sps:$4 sm:$0xff]  }
  0xa5   : > { %4345 = vmatmul.mubr.bf16.gmra.mxu1 %v10586_v12  ;;  %4161 = vmatprep.mubr.bf16.mxu0 %v10590_v13  ;;  %v10666_v12 = vld [vmem:[%s12127_s7 + $0x230] ss:$28 sps:$4 sm:$0xff]   ;;  %v10667_v13 = vld [vmem:[%s12127_s7 + $0x238] ss:$28 sps:$4 sm:$0xff]  }
  0xa6   : > { %4354 = vmatprep.mubr.bf16.mxu1 %v10592_v14  ;;  %4500 = vmatpush1.bf16.msra.mxu0 %v10596_v15  ;;  %v10671_v14 = vld [vmem:[%s12127_s7 + $0x26c] ss:$28 sps:$4 sm:$0xff]  }
  0xa7   : > { %10383 = vmatpush1.bf16.msra.mxu1 %v10596_v15  ;;  %4501 = vmatprep.subr.bf16.mxu0 %v10607_v16  ;;  %v10673_v15 = vld [vmem:[%s12127_s7 + $0x274] ss:$28 sps:$4 sm:$0xff]  }
  0xa8   : > { %10368 = vmatprep.subr.bf16.mxu1 %v10607_v16  ;;  %v10675_v16 = vld [vmem:[%s12127_s7 + $0x268] ss:$28 sps:$4 sm:$0xff]  }
  0xaa   : > { %4502 = vmatpush1.bf16.msra.mxu0 %v10605_v17 }
  0xab   : > { %10384 = vmatpush1.bf16.msra.mxu1 %v10605_v17  ;;  %4503 = vmatprep.subr.bf16.mxu0 %v10616_v19  ;;  %v10676_v17 = vld [vmem:[%s12127_s7 + $0x270] ss:$28 sps:$4 sm:$0xff]  }
  0xac   : > { %10369 = vmatprep.subr.bf16.mxu1 %v10616_v19  ;;  %4162 = vmatmul.mubr.bf16.gmra.mxu0 %v10594_v18  ;;  %v10680_v18 = vld [vmem:[%s12127_s7 + $0x2a4] ss:$28 sps:$4 sm:$0xff]   ;;  %v10682_v19 = vld [vmem:[%s12127_s7 + $0x2ac] ss:$28 sps:$4 sm:$0xff]  }
  0xad   : > { %4355 = vmatmul.mubr.bf16.gmra.mxu1 %v10595_v20  ;;  %4171 = vmatprep.mubr.bf16.mxu0 %v10599_v21  ;;  %v10684_v20 = vld [vmem:[%s12127_s7 + $0x2a0] ss:$28 sps:$4 sm:$0xff]   ;;  %v10685_v21 = vld [vmem:[%s12127_s7 + $0x2a8] ss:$28 sps:$4 sm:$0xff]  }
  0xae   : > { %4364 = vmatprep.mubr.bf16.mxu1 %v10601_v22  ;;  %4504 = vmatpush1.bf16.msra.mxu0 %v10614_v23  ;;  %v10689_v22 = vld [vmem:[%s12127_s7 + $0x2dc] ss:$28 sps:$4 sm:$0xff]  }
  0xaf   : > { %10385 = vmatpush1.bf16.msra.mxu1 %v10614_v23  ;;  %4505 = vmatprep.subr.bf16.mxu0 %v10625_v24  ;;  %v10691_v23 = vld [vmem:[%s12127_s7 + $0x2e4] ss:$28 sps:$4 sm:$0xff]  }
  0xb0   : > { %10370 = vmatprep.subr.bf16.mxu1 %v10625_v24  ;;  %v10693_v24 = vld [vmem:[%s12127_s7 + $0x2d8] ss:$28 sps:$4 sm:$0xff]  }
  0xb2   : > { %4506 = vmatpush1.bf16.msra.mxu0 %v10623_v25 }
  0xb3   : > { %10386 = vmatpush1.bf16.msra.mxu1 %v10623_v25  ;;  %4507 = vmatprep.subr.bf16.mxu0 %v10634_v27  ;;  %v10694_v25 = vld [vmem:[%s12127_s7 + $0x2e0] ss:$28 sps:$4 sm:$0xff]  }
  0xb4   : > { %10371 = vmatprep.subr.bf16.mxu1 %v10634_v27  ;;  %4172 = vmatmul.mubr.bf16.gmra.mxu0 %v10603_v26  ;;  %v10698_v26 = vld [vmem:[%s12127_s7 + $0x314] ss:$28 sps:$4 sm:$0xff]   ;;  %v10700_v27 = vld [vmem:[%s12127_s7 + $0x31c] ss:$28 sps:$4 sm:$0xff]  }
  0xb5   : > { %4365 = vmatmul.mubr.bf16.gmra.mxu1 %v10604_v28  ;;  %4181 = vmatprep.mubr.bf16.mxu0 %v10608_v29  ;;  %v10702_v28 = vld [vmem:[%s12127_s7 + $0x310] ss:$28 sps:$4 sm:$0xff]   ;;  %v10703_v29 = vld [vmem:[%s12127_s7 + $0x318] ss:$28 sps:$4 sm:$0xff]  }
  0xb6   : > { %4374 = vmatprep.mubr.bf16.mxu1 %v10610_v30  ;;  %4508 = vmatpush1.bf16.msra.mxu0 %v10632_v31  ;;  %v10707_v30 = vld [vmem:[%s12127_s7 + $0x34c] ss:$28 sps:$4 sm:$0xff]  }
  0xb7   : > { %10387 = vmatpush1.bf16.msra.mxu1 %v10632_v31  ;;  %4509 = vmatprep.subr.bf16.mxu0 %v10643_v32  ;;  %v10709_v31 = vld [vmem:[%s12127_s7 + $0x354] ss:$28 sps:$4 sm:$0xff]  }
  0xb8   : > { %10372 = vmatprep.subr.bf16.mxu1 %v10643_v32  ;;  %v10711_v32 = vld [vmem:[%s12127_s7 + $0x348] ss:$28 sps:$4 sm:$0xff]  }
  0xba   : > { %4510 = vmatpush1.bf16.msra.mxu0 %v10641_v33 }
  0xbb   : > { %10388 = vmatpush1.bf16.msra.mxu1 %v10641_v33  ;;  %4511 = vmatprep.subr.bf16.mxu0 %v10652_v35  ;;  %v10712_v33 = vld [vmem:[%s12127_s7 + $0x350] ss:$28 sps:$4 sm:$0xff]  }
  0xbc   : > { %10373 = vmatprep.subr.bf16.mxu1 %v10652_v35  ;;  %4182 = vmatmul.mubr.bf16.gmra.mxu0 %v10612_v34  ;;  %v10716_v34 = vld [vmem:[%s12127_s7 + $0x14] ss:$28 sps:$4 sm:$0xff]  }
  0xbd   : > { %4375 = vmatmul.mubr.bf16.gmra.mxu1 %v10613_v36  ;;  %4191 = vmatprep.mubr.bf16.mxu0 %v10617_v37  ;;  %v10718_v35 = vld [vmem:[%s12127_s7 + $0x2b4] ss:$28 sps:$4 sm:$0xff]  }
  0xbe   : > { %4384 = vmatprep.mubr.bf16.mxu1 %v10619_v38  ;;  %4512 = vmatpush2.bf16.msra.mxu0 %v10650_v39  ;;  %v10720_v36 = vld [vmem:[%s12127_s7 + $0x10] ss:$28 sps:$4 sm:$0xff]   ;;  %v10722_v38 = vld [vmem:[#allocation5 + $0xf78] ss:$36 sps:$4 sm:$0xff]  }
  0xbf   : > { %10389 = vmatpush2.bf16.msra.mxu1 %v10650_v39  ;;  %4513 = vmatprep.subr.bf16.mxu0 %v10661_v40  ;;  %v10721_v37 = vld [vmem:[%s12127_s7 + $0x2b0] ss:$28 sps:$4 sm:$0xff]   ;;  %v10725_v39 = vld [vmem:[#allocation5 + $0x200] ss:$36 sps:$4 sm:$0xff]  }
  0xc0   : > { %10374 = vmatprep.subr.bf16.mxu1 %v10661_v40  ;;  %v10730_v40 = vld [vmem:[#allocation5 + $0xf34] ss:$36 sps:$4 sm:$0xff]  }
  0xc2   : > { %4514 = vmatpush2.bf16.msra.mxu0 %v10659_v41 }
  0xc3   : > { %10390 = vmatpush2.bf16.msra.mxu1 %v10659_v41  ;;  %4515 = vmatprep.subr.bf16.mxu0 %v10670_v43  ;;  %v10733_v41 = vld [vmem:[#allocation5 + $0x1bc] ss:$36 sps:$4 sm:$0xff]  }
  0xc4   : > { %10375 = vmatprep.subr.bf16.mxu1 %v10670_v43  ;;  %4192 = vmatmul.mubr.bf16.gmra.mxu0 %v10621_v42  ;;  %v10728_v42 = vld [vmem:[#allocation5 + $0xf30] ss:$36 sps:$4 sm:$0xff]   ;;  %v10731_v43 = vld [vmem:[#allocation5 + $0x1b8] ss:$36 sps:$4 sm:$0xff]  }
  0xc5   : > { %4385 = vmatmul.mubr.bf16.gmra.mxu1 %v10622_v44  ;;  %4201 = vmatprep.mubr.bf16.mxu0 %v10626_v45  ;;  %v10734_v44 = vld [vmem:[%s12127_s7 + $0x4c] ss:$28 sps:$4 sm:$0xff]  }
  0xc6   : > { %4394 = vmatprep.mubr.bf16.mxu1 %v10628_v46  ;;  %4516 = vmatpush2.bf16.msra.mxu0 %v10668_v47  ;;  %v10736_v45 = vld [vmem:[%s12127_s7 + $0x2ec] ss:$28 sps:$4 sm:$0xff]  }
  0xc7   : > { %10391 = vmatpush2.bf16.msra.mxu1 %v10668_v47  ;;  %4517 = vmatprep.subr.bf16.mxu0 %v10679_v48  ;;  %v10742_v46 = vld [vmem:[#allocation5 + $0xeec] ss:$36 sps:$4 sm:$0xff]   ;;  %v10748_v47 = vld [vmem:[#allocation5 + $0x174] ss:$36 sps:$4 sm:$0xff]  }
  0xc8   : > { %10376 = vmatprep.subr.bf16.mxu1 %v10679_v48  ;;  %v10738_v48 = vld [vmem:[%s12127_s7 + $0x48] ss:$28 sps:$4 sm:$0xff]  }
  0xca   : > { %4518 = vmatpush2.bf16.msra.mxu0 %v10677_v49 }
  0xcb   : > { %10392 = vmatpush2.bf16.msra.mxu1 %v10677_v49  ;;  %4519 = vmatprep.subr.bf16.mxu0 %v10688_v51  ;;  %v10739_v49 = vld [vmem:[%s12127_s7 + $0x2e8] ss:$28 sps:$4 sm:$0xff]  }
  0xcc   : > { %10377 = vmatprep.subr.bf16.mxu1 %v10688_v51  ;;  %4202 = vmatmul.mubr.bf16.gmra.mxu0 %v10630_v50  ;;  %v10740_v50 = vld [vmem:[#allocation5 + $0xee8] ss:$36 sps:$4 sm:$0xff]   ;;  %v10746_v51 = vld [vmem:[#allocation5 + $0x170] ss:$36 sps:$4 sm:$0xff]  }
  0xcd   : > { %4395 = vmatmul.mubr.bf16.gmra.mxu1 %v10631_v52  ;;  %4211 = vmatprep.mubr.bf16.mxu0 %v10635_v53  ;;  %v10745_v52 = vld [vmem:[#allocation5 + $0xea4] ss:$36 sps:$4 sm:$0xff]  }
  0xce   : > { %4404 = vmatprep.mubr.bf16.mxu1 %v10637_v54  ;;  %4520 = vmatpush2.bf16.msra.mxu0 %v10686_v55  ;;  %v10749_v53 = vld [vmem:[%s12127_s7 + $0x84] ss:$28 sps:$4 sm:$0xff]  }
  0xcf   : > { %10393 = vmatpush2.bf16.msra.mxu1 %v10686_v55  ;;  %4521 = vmatprep.subr.bf16.mxu0 %v10697_v56  ;;  %v10751_v54 = vld [vmem:[%s12127_s7 + $0x324] ss:$28 sps:$4 sm:$0xff]  }
  0xd0   : > { %10378 = vmatprep.subr.bf16.mxu1 %v10697_v56  ;;  %v10743_v55 = vld [vmem:[#allocation5 + $0xea0] ss:$36 sps:$4 sm:$0xff]   ;;  %v10758_v56 = vld [vmem:[#allocation5 + $0x128] ss:$36 sps:$4 sm:$0xff]  }
  0xd2   : > { %4522 = vmatpush2.bf16.msra.mxu0 %v10695_v57 }
  0xd3   : > { %10394 = vmatpush2.bf16.msra.mxu1 %v10695_v57  ;;  %4523 = vmatprep.subr.bf16.mxu0 %v10706_v59  ;;  %v10760_v57 = vld [vmem:[#allocation5 + $0x12c] ss:$36 sps:$4 sm:$0xff]  }
  0xd4   : > { %10379 = vmatprep.subr.bf16.mxu1 %v10706_v59  ;;  %4212 = vmatmul.mubr.bf16.gmra.mxu0 %v10639_v58  ;;  %v10757_v58 = vld [vmem:[#allocation5 + $0xe5c] ss:$36 sps:$4 sm:$0xff]   ;;  %v10775_v59 = vld [vmem:[#allocation5 + $0xe4] ss:$36 sps:$4 sm:$0xff]  }
  0xd5   : > { %4405 = vmatmul.mubr.bf16.gmra.mxu1 %v10640_v60  ;;  %4221 = vmatprep.mubr.bf16.mxu0 %v10644_v61  ;;  %v10753_v60 = vld [vmem:[%s12127_s7 + $0x80] ss:$28 sps:$4 sm:$0xff]  }
  0xd6   : > { %4414 = vmatprep.mubr.bf16.mxu1 %v10646_v62  ;;  %4524 = vmatpush2.bf16.msra.mxu0 %v10704_v63  ;;  %v10754_v61 = vld [vmem:[%s12127_s7 + $0x320] ss:$28 sps:$4 sm:$0xff]  }
  0xd7   : > { %10395 = vmatpush2.bf16.msra.mxu1 %v10704_v63  ;;  %4525 = vmatprep.subr.bf16.mxu0 %v10715_v0  ;;  %v10755_v62 = vld [vmem:[#allocation5 + $0xe58] ss:$36 sps:$4 sm:$0xff]  }
  0xd8   : > { %10380 = vmatprep.subr.bf16.mxu1 %v10715_v0  ;;  %v10764_v63 = vld [vmem:[%s12127_s7 + $0xbc] ss:$28 sps:$4 sm:$0xff]  }
  0xd9   : > { %v10763_v0 = vld [vmem:[#allocation5 + $0xe14] ss:$36 sps:$4 sm:$0xff]  }
  0xda   : > { %4526 = vmatpush2.bf16.msra.mxu0 %v10713_v2 }
  0xdb   : > { %10396 = vmatpush2.bf16.msra.mxu1 %v10713_v2  ;;  %4881 = vmatprep.subr.bf16.mxu0 %v10727_v4  ;;  %v10761_v2 = vld [vmem:[#allocation5 + $0xe10] ss:$36 sps:$4 sm:$0xff]   ;;  %v10781_v4 = vld [vmem:[#allocation5 + $0x9c] ss:$36 sps:$4 sm:$0xff]  }
  0xdc   : > { %4688 = vmatprep.subr.bf16.mxu1 %v10724_v3  ;;  %4222 = vmatmul.mubr.bf16.gmra.mxu0 %v10648_v1  ;;  %v10766_v1 = vld [vmem:[%s12127_s7 + $0x35c] ss:$28 sps:$4 sm:$0xff]   ;;  %v10773_v3 = vld [vmem:[#allocation5 + $0xe0] ss:$36 sps:$4 sm:$0xff]  }
  0xdd   : > { %4415 = vmatmul.mubr.bf16.gmra.mxu1 %v10649_v5  ;;  %4231 = vmatprep.mubr.bf16.mxu0 %v10653_v6  ;;  %v10772_v5 = vld [vmem:[#allocation5 + $0xdcc] ss:$36 sps:$4 sm:$0xff]   ;;  %v10768_v6 = vld [vmem:[%s12127_s7 + $0xb8] ss:$28 sps:$4 sm:$0xff]  }
  0xde   : > { %4424 = vmatprep.mubr.bf16.mxu1 %v10655_v7  ;;  %v10769_v7 = vld [vmem:[%s12127_s7 + $0x358] ss:$28 sps:$4 sm:$0xff]  }
  0xe4   : > { %4232 = vmatmul.mubr.bf16.gmra.mxu0 %v10657_v8  ;;  %v10770_v8 = vld [vmem:[#allocation5 + $0xdc8] ss:$36 sps:$4 sm:$0xff]  }
  0xe5   : > { %4425 = vmatmul.mubr.bf16.gmra.mxu1 %v10658_v9  ;;  %4241 = vmatprep.mubr.bf16.mxu0 %v10662_v10  ;;  %v10779_v9 = vld [vmem:[#allocation5 + $0x98] ss:$36 sps:$4 sm:$0xff]   ;;  %v10782_v10 = vld [vmem:[%s12127_s7 + $0xf4] ss:$28 sps:$4 sm:$0xff]  }
  0xe6   : > { %4434 = vmatprep.mubr.bf16.mxu1 %v10664_v11  ;;  %v10778_v11 = vld [vmem:[#allocation5 + $0xd84] ss:$36 sps:$4 sm:$0xff]  }
  0xec   : > { %4242 = vmatmul.mubr.bf16.gmra.mxu0 %v10666_v12  ;;  %v10786_v12 = vld [vmem:[#allocation5 + $0x50] ss:$36 sps:$4 sm:$0xff]  }
  0xed   : > { %4435 = vmatmul.mubr.bf16.gmra.mxu1 %v10667_v13  ;;  %4251 = vmatprep.mubr.bf16.mxu0 %v10671_v14  ;;  %v10788_v13 = vld [vmem:[#allocation5 + $0x54] ss:$36 sps:$4 sm:$0xff]   ;;  %v10776_v14 = vld [vmem:[#allocation5 + $0xd80] ss:$36 sps:$4 sm:$0xff]  }
  0xee   : > { %4444 = vmatprep.mubr.bf16.mxu1 %v10673_v15  ;;  %v10798_v15 = vld [vmem:[#allocation5 + $0xc] ss:$36 sps:$4 sm:$0xff]  }
  0xf4   : > { %4252 = vmatmul.mubr.bf16.gmra.mxu0 %v10675_v16  ;;  %v15732_v16 = vmov 0  }
  0xf5   : > { %4445 = vmatmul.mubr.bf16.gmra.mxu1 %v10676_v17  ;;  %4261 = vmatprep.mubr.bf16.mxu0 %v10680_v18  ;;  %v10784_v17 = vld [vmem:[%s12127_s7 + $0xf0] ss:$28 sps:$4 sm:$0xff]   ;;  %v10791_v18 = vld [vmem:[#allocation5 + $0x684] ss:$36 sps:$4 sm:$0xff]  }
  0xf6   : > { %4454 = vmatprep.mubr.bf16.mxu1 %v10682_v19  ;;  %v10785_v19 = vld [vmem:[%s12127_s7 + $0x18] ss:$28 sps:$4 sm:$0xff]  }
  0xfc   : > { %4262 = vmatmul.mubr.bf16.gmra.mxu0 %v10684_v20  ;;  %v10789_v20 = vld [vmem:[#allocation5 + $0x680] ss:$36 sps:$4 sm:$0xff]  }
  0xfd   : > { %4455 = vmatmul.mubr.bf16.gmra.mxu1 %v10685_v21  ;;  %4271 = vmatprep.mubr.bf16.mxu0 %v10689_v22  ;;  %v10792_v21 = vld [vmem:[%s12127_s7 + $0x12c] ss:$28 sps:$4 sm:$0xff]  }
  0xfe   : > { %4464 = vmatprep.mubr.bf16.mxu1 %v10691_v23  ;;  %v10796_v22 = vld [vmem:[#allocation5 + $0x8] ss:$36 sps:$4 sm:$0xff]   ;;  %v10801_v23 = vld [vmem:[#allocation5 + $0x63c] ss:$36 sps:$4 sm:$0xff]  }
 0x104   : > { %4272 = vmatmul.mubr.bf16.gmra.mxu0 %v10693_v24  ;;  %v10808_v24 = vld [vmem:[#allocation5 + $0x444] ss:$36 sps:$4 sm:$0xff]  }
 0x105   : > { %4465 = vmatmul.mubr.bf16.gmra.mxu1 %v10694_v25  ;;  %4281 = vmatprep.mubr.bf16.mxu0 %v10698_v26  ;;  %v10799_v25 = vld [vmem:[#allocation5 + $0x638] ss:$36 sps:$4 sm:$0xff]   ;;  %v10806_v26 = vld [vmem:[#allocation5 + $0x440] ss:$36 sps:$4 sm:$0xff]  }
 0x106   : > { %4474 = vmatprep.mubr.bf16.mxu1 %v10700_v27  ;;  %v10811_v27 = vld [vmem:[#allocation5 + $0x5f4] ss:$36 sps:$4 sm:$0xff]  }
 0x10c   : > { %4282 = vmatmul.mubr.bf16.gmra.mxu0 %v10702_v28  ;;  %v10794_v28 = vld [vmem:[%s12127_s7 + $0x128] ss:$28 sps:$4 sm:$0xff]  }
 0x10d   : > { %4475 = vmatmul.mubr.bf16.gmra.mxu1 %v10703_v29  ;;  %4291 = vmatprep.mubr.bf16.mxu0 %v10707_v30  ;;  %v10795_v29 = vld [vmem:[%s12127_s7 + $0x50] ss:$28 sps:$4 sm:$0xff]   ;;  %v10802_v30 = vld [vmem:[%s12127_s7 + $0x164] ss:$28 sps:$4 sm:$0xff]  }
 0x10e   : > { %4484 = vmatprep.mubr.bf16.mxu1 %v10709_v31  ;;  %v10814_v31 = vld [vmem:[#allocation5 + $0x3fc] ss:$36 sps:$4 sm:$0xff]  }
 0x114   : > { %4292 = vmatmul.mubr.bf16.gmra.mxu0 %v10711_v32  ;;  %v10809_v32 = vld [vmem:[#allocation5 + $0x5f0] ss:$36 sps:$4 sm:$0xff]  }
 0x115   : > { %4485 = vmatmul.mubr.bf16.gmra.mxu1 %v10712_v33  ;;  %4527 = vmatprep.mubr.bf16.mxu0 %v10716_v34  ;;  %v10812_v33 = vld [vmem:[#allocation5 + $0x3f8] ss:$36 sps:$4 sm:$0xff]  }
 0x116   : > { %4647 = vmatprep.mubr.bf16.mxu1 %v10718_v35  ;;  %v10821_v34 = vld [vmem:[#allocation5 + $0x3b4] ss:$36 sps:$4 sm:$0xff]   ;;  %v10824_v35 = vld [vmem:[#allocation5 + $0x5ac] ss:$36 sps:$4 sm:$0xff]  }
 0x11c   : > { %4528 = vmatmul.mubr.bf16.vlgmr.msra.gmra.mxu0 %v10720_v36  ;;  %v10819_v36 = vld [vmem:[#allocation5 + $0x3b0] ss:$36 sps:$4 sm:$0xff]  }
 0x11d   : > { %4648 = vmatmul.mubr.bf16.vlgmr.msra.gmra.mxu1 %v10721_v37  ;;  %4882 = vmatpush1.bf16.msra.mxu0 %v10725_v39  ;;  %v10822_v37 = vld [vmem:[#allocation5 + $0x5a8] ss:$36 sps:$4 sm:$0xff]  }
 0x11e   : > { %4689 = vmatpush1.bf16.msra.mxu1 %v10722_v38  ;;  %4883 = vmatprep.subr.bf16.mxu0 %v10733_v41  ;;  %v10804_v38 = vld [vmem:[%s12127_s7 + $0x160] ss:$28 sps:$4 sm:$0xff]   ;;  %v10805_v39 = vld [vmem:[%s12127_s7 + $0x88] ss:$28 sps:$4 sm:$0xff]   ;;  %v10831_v41 = vld [vmem:[#allocation5 + $0x36c] ss:$36 sps:$4 sm:$0xff]  }
 0x11f   : > { %4690 = vmatprep.subr.bf16.mxu1 %v10730_v40  ;;  %4537 = vmatprep.mubr.bf16.mxu0 %v10734_v44  ;;  %v10815_v40 = vld [vmem:[%s12127_s7 + $0x19c] ss:$28 sps:$4 sm:$0xff]   ;;  %v10832_v44 = vld [vmem:[#allocation5 + $0x560] ss:$36 sps:$4 sm:$0xff]  }
 0x120   : > { %4657 = vmatprep.mubr.bf16.mxu1 %v10736_v45  ;;  %v10841_v45 = vld [vmem:[#allocation5 + $0x324] ss:$36 sps:$4 sm:$0xff]  }
 0x121   : > { %4884 = vmatpush1.bf16.msra.mxu0 %v10731_v43  ;;  %v10829_v43 = vld [vmem:[#allocation5 + $0x368] ss:$36 sps:$4 sm:$0xff]  }
 0x122   : > { %4691 = vmatpush1.bf16.msra.mxu1 %v10728_v42  ;;  %4885 = vmatprep.subr.bf16.mxu0 %v10748_v47  ;;  %v10834_v42 = vld [vmem:[#allocation5 + $0x564] ss:$36 sps:$4 sm:$0xff]  }
 0x123   : > { %4692 = vmatprep.subr.bf16.mxu1 %v10742_v46  ;;  %v10844_v46 = vld [vmem:[#allocation5 + $0x51c] ss:$36 sps:$4 sm:$0xff]  }
 0x124   : > { %4538 = vmatmul.mubr.bf16.gmra.mxu0 %v10738_v48  ;;  %v10839_v47 = vld [vmem:[#allocation5 + $0x320] ss:$36 sps:$4 sm:$0xff]   ;;  %v10842_v48 = vld [vmem:[#allocation5 + $0x518] ss:$36 sps:$4 sm:$0xff]  }
 0x125   : > { %4658 = vmatmul.mubr.bf16.gmra.mxu1 %v10739_v49  ;;  %4886 = vmatpush1.bf16.msra.mxu0 %v10746_v51  ;;  %v912_v49 = vlaneseq  ;;  %v10818_v51 = vld [vmem:[%s12127_s7 + $0xc0] ss:$28 sps:$4 sm:$0xff]  }
 0x126   : > { %4693 = vmatpush1.bf16.msra.mxu1 %v10740_v50  ;;  %4547 = vmatprep.mubr.bf16.mxu0 %v10749_v53  ;;  %v10817_v50 = vld [vmem:[%s12127_s7 + $0x198] ss:$28 sps:$4 sm:$0xff]   ;;  %v10847_v53 = vld [vmem:[#allocation5 + $0x2dc] ss:$36 sps:$4 sm:$0xff]  }
 0x127   : > { %4694 = vmatprep.subr.bf16.mxu1 %v10745_v52  ;;  %4667 = vmatprep.mubr.bf16.mxu1 %v10751_v54  ;;  %v10825_v52 = vld [vmem:[%s12127_s7 + $0x1d4] ss:$28 sps:$4 sm:$0xff]  }
 0x128   : > { %4887 = vmatprep.subr.bf16.mxu0 %v10760_v57  ;;  %v10857_v54 = vld [vmem:[#allocation5 + $0x4d4] ss:$36 sps:$4 sm:$0xff]   ;;  %v12234_v57 = vshrl.u32 %v912_v49, 7 }
 0x129   : > { %4888 = vmatpush1.bf16.msra.mxu0 %v10758_v56  ;;  %v10855_v56 = vld [vmem:[#allocation5 + $0x4d0] ss:$36 sps:$4 sm:$0xff]  }
 0x12a   : > { %4695 = vmatpush1.bf16.msra.mxu1 %v10743_v55  ;;  %4889 = vmatprep.subr.bf16.mxu0 %v10775_v59  ;;  %v10845_v55 = vld [vmem:[#allocation5 + $0x2d8] ss:$36 sps:$4 sm:$0xff]   ;;  %15751 = vst [vmem:[#allocation12_spill] sm:$0xff] %v12234_v57  ;;  %v10867_v59 = vld [vmem:[#allocation5 + $0x48c] ss:$36 sps:$4 sm:$0xff]  }
 0x12b   : > { %4696 = vmatprep.subr.bf16.mxu1 %v10757_v58  ;;  %v10854_v58 = vld [vmem:[#allocation5 + $0x294] ss:$36 sps:$4 sm:$0xff]  }
 0x12c   : > { %4548 = vmatmul.mubr.bf16.gmra.mxu0 %v10753_v60  ;;  %v908_v60 = vld [vmem:[#allocation7] sm:$0xff] }
 0x12d   : > { %4668 = vmatmul.mubr.bf16.gmra.mxu1 %v10754_v61  ;;  %4557 = vmatprep.mubr.bf16.mxu0 %v10764_v63  ;;  %v10852_v61 = vld [vmem:[#allocation5 + $0x290] ss:$36 sps:$4 sm:$0xff]   ;;  %v914_v63 = vsub.s32 0, %v12234_v57 }
 0x12e   : > { %4697 = vmatpush1.bf16.msra.mxu1 %v10755_v62  ;;  %4677 = vmatprep.mubr.bf16.mxu1 %v10766_v1  ;;  %v10865_v62 = vld [vmem:[#allocation5 + $0x488] ss:$36 sps:$4 sm:$0xff]   ;;  %v10828_v1 = vld [vmem:[%s12127_s7 + $0xf8] ss:$28 sps:$4 sm:$0xff]  }
 0x12f   : > { %4698 = vmatprep.subr.bf16.mxu1 %v10763_v0  ;;  %4890 = vmatpush1.bf16.msra.mxu0 %v10773_v3  ;;  %v10827_v0 = vld [vmem:[%s12127_s7 + $0x1d0] ss:$28 sps:$4 sm:$0xff]  }
 0x130   : > { %4891 = vmatprep.subr.bf16.mxu0 %v10781_v4  ;;  %v10835_v3 = vld [vmem:[%s12127_s7 + $0x20c] ss:$28 sps:$4 sm:$0xff]  }
 0x131   : > { %v10864_v4 = vld [vmem:[#allocation5 + $0x24c] ss:$36 sps:$4 sm:$0xff]  }
 0x132   : > { %4699 = vmatpush1.bf16.msra.mxu1 %v10761_v2  ;;  %v918_v2 = vsub.s32 1, %v12234_v57  ;;  %v11382_v57 = vld [vmem:[%s12127_s7 + $0x1c0] ss:$28 sps:$4 sm:$0xff]  }
 0x133   : > { %4700 = vmatprep.subr.bf16.mxu1 %v10772_v5  ;;  %4892 = vmatpush1.bf16.msra.mxu0 %v10779_v9  ;;  %v10874_v5 = vld [vmem:[#allocation5 + $0x8c4] ss:$36 sps:$4 sm:$0xff]  }
 0x134   : > { %4558 = vmatmul.mubr.bf16.gmra.mxu0 %v10768_v6  ;;  %4893 = vmatprep.subr.bf16.mxu0 %v10788_v13  ;;  %v10862_v6 = vld [vmem:[#allocation5 + $0x248] ss:$36 sps:$4 sm:$0xff]  }
 0x135   : > { %4678 = vmatmul.mubr.bf16.gmra.mxu1 %v10769_v7  ;;  %4567 = vmatprep.mubr.bf16.mxu0 %v10782_v10  ;;  %v10872_v7 = vld [vmem:[#allocation5 + $0x8c0] ss:$36 sps:$4 sm:$0xff]  }
 0x136   : > { %4701 = vmatpush1.bf16.msra.mxu1 %v10770_v8  ;;  %4720 = vmatprep.mubr.bf16.mxu1 %v15732_v16  ;;  %v12242_v8 = vrot.slane %v908_v60, %v914_v63  ;;  %v10871_v9 = vld [vmem:[#allocation5 + $0xb04] ss:$36 sps:$4 sm:$0xff]   ;;  %v10881_v10 = vld [vmem:[#allocation5 + $0x87c] ss:$36 sps:$4 sm:$0xff]  }
 0x137   : > { %4702 = vmatprep.subr.bf16.mxu1 %v10778_v11  ;;  %4894 = vmatpush1.bf16.msra.mxu0 %v10786_v12  ;;  %v12244_v11 = vrot.slane %v908_v60, %v918_v2  ;;  %v10907_v63 = vld [vmem:[#allocation5 + $0x758] ss:$36 sps:$4 sm:$0xff]  }
 0x138   : > { %4895 = vmatprep.subr.bf16.mxu0 %v10798_v15  ;;  %v10879_v15 = vld [vmem:[#allocation5 + $0x878] ss:$36 sps:$4 sm:$0xff]  }
 0x13a   : > { %4703 = vmatpush1.bf16.msra.mxu1 %v10776_v14 }
 0x13b   : > { %5074 = vmatprep.subr.bf16.mxu1 %v10791_v18  ;;  %4896 = vmatpush1.bf16.msra.mxu0 %v10796_v22 }
 0x13c   : > { %4568 = vmatmul.mubr.bf16.gmra.mxu0 %v10784_v17  ;;  %4897 = vmatprep.subr.bf16.mxu0 %v10808_v24  ;;  %v10888_v17 = vld [vmem:[#allocation5 + $0x834] ss:$36 sps:$4 sm:$0xff]   ;;  %v10848_v24 = vld [vmem:[%s12127_s7 + $0x244] ss:$28 sps:$4 sm:$0xff]  }
 0x13d   : > { %4721 = vmatmul.mubr.bf16.vlgmr.msra.gmra.mxu1 %v10785_v19  ;;  %4577 = vmatprep.mubr.bf16.mxu0 %v10792_v21  ;;  %v10838_v21 = vld [vmem:[%s12127_s7 + $0x130] ss:$28 sps:$4 sm:$0xff]  }
 0x13e   : > { %5075 = vmatpush1.bf16.msra.mxu1 %v10789_v20  ;;  %4730 = vmatprep.mubr.bf16.mxu1 %v15732_v16  ;;  %v10837_v20 = vld [vmem:[%s12127_s7 + $0x208] ss:$28 sps:$4 sm:$0xff]  }
 0x13f   : > { %5076 = vmatprep.subr.bf16.mxu1 %v10801_v23  ;;  %4898 = vmatpush2.bf16.msra.mxu0 %v10806_v26 }
 0x140   : > { %4899 = vmatprep.subr.bf16.mxu0 %v10814_v31 }
 0x142   : > { %5077 = vmatpush1.bf16.msra.mxu1 %v10799_v25 }
 0x143   : > { %5078 = vmatprep.subr.bf16.mxu1 %v10811_v27  ;;  %4900 = vmatpush2.bf16.msra.mxu0 %v10812_v33 }
 0x144   : > { %4578 = vmatmul.mubr.bf16.gmra.mxu0 %v10794_v28  ;;  %4901 = vmatprep.subr.bf16.mxu0 %v10821_v34 }
 0x145   : > { %4731 = vmatmul.mubr.bf16.gmra.mxu1 %v10795_v29  ;;  %4587 = vmatprep.mubr.bf16.mxu0 %v10802_v30  ;;  %v10886_v29 = vld [vmem:[#allocation5 + $0x830] ss:$36 sps:$4 sm:$0xff]  }
 0x146   : > { %4740 = vmatprep.mubr.bf16.mxu1 %v15732_v16  ;;  %5079 = vmatpush1.bf16.msra.mxu1 %v10809_v32  ;;  %v10895_v30 = vld [vmem:[#allocation5 + $0x7ec] ss:$36 sps:$4 sm:$0xff]  }
 0x147   : > { %5080 = vmatprep.subr.bf16.mxu1 %v10824_v35  ;;  %4902 = vmatpush2.bf16.msra.mxu0 %v10819_v36 }
 0x148   : > { %4903 = vmatprep.subr.bf16.mxu0 %v10831_v41 }
 0x14a   : > { %5081 = vmatpush1.bf16.msra.mxu1 %v10822_v37 }
 0x14b   : > { %5082 = vmatprep.subr.bf16.mxu1 %v10834_v42  ;;  %4904 = vmatpush2.bf16.msra.mxu0 %v10829_v43  ;;  %v10850_v43 = vld [vmem:[%s12127_s7 + $0x240] ss:$28 sps:$4 sm:$0xff]  }
 0x14c   : > { %4588 = vmatmul.mubr.bf16.gmra.mxu0 %v10804_v38  ;;  %4905 = vmatprep.subr.bf16.mxu0 %v10841_v45 }
 0x14d   : > { %4741 = vmatmul.mubr.bf16.gmra.mxu1 %v10805_v39  ;;  %4597 = vmatprep.mubr.bf16.mxu0 %v10815_v40  ;;  %v10893_v39 = vld [vmem:[#allocation5 + $0x7e8] ss:$36 sps:$4 sm:$0xff]  }
 0x14e   : > { %4750 = vmatprep.mubr.bf16.mxu1 %v15732_v16  ;;  %5083 = vmatpush1.bf16.msra.mxu1 %v10832_v44  ;;  %v10902_v40 = vld [vmem:[#allocation5 + $0x7a4] ss:$36 sps:$4 sm:$0xff]  }
 0x14f   : > { %5084 = vmatprep.subr.bf16.mxu1 %v10844_v46  ;;  %4906 = vmatpush2.bf16.msra.mxu0 %v10839_v47  ;;  %v10851_v44 = vld [vmem:[%s12127_s7 + $0x168] ss:$28 sps:$4 sm:$0xff]   ;;  %v10858_v47 = vld [vmem:[%s12127_s7 + $0x27c] ss:$28 sps:$4 sm:$0xff]  }
 0x150   : > { %4907 = vmatprep.subr.bf16.mxu0 %v10847_v53  ;;  %v10909_v53 = vld [vmem:[#allocation5 + $0x75c] ss:$36 sps:$4 sm:$0xff]  }
 0x152   : > { %5085 = vmatpush1.bf16.msra.mxu1 %v10842_v48 }
 0x153   : > { %5086 = vmatprep.subr.bf16.mxu1 %v10857_v54  ;;  %4908 = vmatpush2.bf16.msra.mxu0 %v10845_v55 }
 0x154   : > { %4598 = vmatmul.mubr.bf16.gmra.mxu0 %v10817_v50  ;;  %4909 = vmatprep.subr.bf16.mxu0 %v10854_v58  ;;  %v10900_v50 = vld [vmem:[#allocation5 + $0x7a0] ss:$36 sps:$4 sm:$0xff]  }
 0x155   : > { %4751 = vmatmul.mubr.bf16.gmra.mxu1 %v10818_v51  ;;  %4607 = vmatprep.mubr.bf16.mxu0 %v10825_v52 }
 0x156   : > { %4760 = vmatprep.mubr.bf16.mxu1 %v15732_v16  ;;  %5087 = vmatpush1.bf16.msra.mxu1 %v10855_v56 }
 0x157   : > { %5088 = vmatprep.subr.bf16.mxu1 %v10867_v59  ;;  %4910 = vmatpush2.bf16.msra.mxu0 %v10852_v61 }
 0x158   : > { %4911 = vmatprep.subr.bf16.mxu0 %v10864_v4  ;;  %v10861_v4 = vld [vmem:[%s12127_s7 + $0x1a0] ss:$28 sps:$4 sm:$0xff]  }
 0x15a   : > { %5089 = vmatpush1.bf16.msra.mxu1 %v10865_v62 }
 0x15b   : > { %5090 = vmatprep.subr.bf16.mxu1 %v10874_v5  ;;  %4912 = vmatpush2.bf16.msra.mxu0 %v10862_v6 }
 0x15c   : > { %v4143_v12 = vpop.f32.mrf.mxu0  ;;  %4608 = vmatmul.mubr.bf16.gmra.mxu0 %v10827_v0  ;;  %5267 = vmatprep.subr.bf16.mxu0 %v10871_v9  ;;  %v10916_v0 = vld [vmem:[#allocation5 + $0x714] ss:$36 sps:$4 sm:$0xff]  }
 0x15d   : > { %v4336_v13 = vpop.f32.mrf.mxu1  ;;  %4761 = vmatmul.mubr.bf16.gmra.mxu1 %v10828_v1  ;;  %v4144_v14 = vadd.f32 %v4143_v12, %v12242_v8  ;;  %4617 = vmatprep.mubr.bf16.mxu0 %v10835_v3  ;;  %v10860_v3 = vld [vmem:[%s12127_s7 + $0x278] ss:$28 sps:$4 sm:$0xff]  }
 0x15e   : > { %4770 = vmatprep.mubr.bf16.mxu1 %v15732_v16  ;;  %v4145_v18 = vpop.f32.mrf.mxu0  ;;  %5091 = vmatpush2.bf16.msra.mxu1 %v10872_v7 }
 0x15f   : > { %v4338_v19 = vpop.f32.mrf.mxu1  ;;  %v12250_v22 = vadd.f32 %v4336_v13, %v4144_v14  ;;  %v4146_v23 = vadd.f32 %v4145_v18, %v12244_v11  ;;  %5092 = vmatprep.subr.bf16.mxu1 %v10881_v10  ;;  %v10914_v13 = vld [vmem:[#allocation5 + $0x710] ss:$36 sps:$4 sm:$0xff]  }
 0x160   : > { %v4147_v25 = vpop.f32.mrf.mxu0  ;;  %v10923_v14 = vld [vmem:[#allocation5 + $0x6cc] ss:$36 sps:$4 sm:$0xff]  }
 0x161   : > { %v4340_v26 = vpop.f32.mrf.mxu1  ;;  %v12254_v27 = vadd.f32 %v4338_v19, %v4146_v23  ;;  %v4148_v28 = vadd.f32 %v4147_v25, %v12242_v8  ;;  %v11364_v25 = vld [vmem:[%s12127_s7 + $0x4] ss:$28 sps:$4 sm:$0xff]  }
 0x162   : > { %v4149_v31 = vpop.f32.mrf.mxu0  ;;  %5093 = vmatpush2.bf16.msra.mxu1 %v10879_v15 }
 0x163   : > { %v4342_v32 = vpop.f32.mrf.mxu1  ;;  %v12257_v33 = vadd.f32 %v4340_v26, %v4148_v28  ;;  %v4150_v34 = vadd.f32 %v4149_v31, %v12244_v11  ;;  %5094 = vmatprep.subr.bf16.mxu1 %v10888_v17  ;;  %v10921_v26 = vld [vmem:[#allocation5 + $0x6c8] ss:$36 sps:$4 sm:$0xff]   ;;  %v10868_v31 = vld [vmem:[%s12127_s7 + $0x1d8] ss:$28 sps:$4 sm:$0xff]  }
 0x164   : > { %v4153_v35 = vpop.f32.mrf.mxu0  ;;  %4618 = vmatmul.mubr.bf16.gmra.mxu0 %v10837_v20  ;;  %v10929_v28 = vld [vmem:[#allocation5 + $0xf84] ss:$36 sps:$4 sm:$0xff]  }
 0x165   : > { %v4346_v36 = vpop.f32.mrf.mxu1  ;;  %4771 = vmatmul.mubr.bf16.gmra.mxu1 %v10838_v21  ;;  %v12260_v37 = vadd.f32 %v4342_v32, %v4150_v34  ;;  %v4154_v38 = vadd.f32 %v4153_v35, %v12242_v8  ;;  %4627 = vmatprep.mubr.bf16.mxu0 %v10848_v24  ;;  %v10869_v35 = vld [vmem:[#allocation5 + $0xb00] ss:$36 sps:$4 sm:$0xff]  }
 0x166   : > { %4780 = vmatprep.mubr.bf16.mxu1 %v15732_v16  ;;  %v4155_v41 = vpop.f32.mrf.mxu0  ;;  %5095 = vmatpush2.bf16.msra.mxu1 %v10886_v29 }
 0x167   : > { %v4348_v42 = vpop.f32.mrf.mxu1  ;;  %v12266_v45 = vadd.f32 %v4346_v36, %v4154_v38  ;;  %v4156_v46 = vadd.f32 %v4155_v41, %v12244_v11  ;;  %5096 = vmatprep.subr.bf16.mxu1 %v10895_v30 }
 0x168   : > { %v4157_v48 = vpop.f32.mrf.mxu0 }
 0x169   : > { %v4350_v49 = vpop.f32.mrf.mxu1  ;;  %v12270_v51 = vadd.f32 %v4348_v42, %v4156_v46  ;;  %v4158_v52 = vadd.f32 %v4157_v48, %v12242_v8 }
 0x16a   : > { %v4159_v54 = vpop.f32.mrf.mxu0  ;;  %5097 = vmatpush2.bf16.msra.mxu1 %v10893_v39  ;;  %v10878_v39 = vld [vmem:[#allocation5 + $0xabc] ss:$36 sps:$4 sm:$0xff]  }
 0x16b   : > { %v4352_v55 = vpop.f32.mrf.mxu1  ;;  %v12273_v56 = vadd.f32 %v4350_v49, %v4158_v52  ;;  %v4160_v58 = vadd.f32 %v4159_v54, %v12244_v11  ;;  %5098 = vmatprep.subr.bf16.mxu1 %v10902_v40  ;;  %v11365_v49 = vld [vmem:[%s12127_s7] ss:$28 sps:$4 sm:$0xff]   ;;  %v10885_v54 = vld [vmem:[#allocation5 + $0xa74] ss:$36 sps:$4 sm:$0xff]  }
 0x16c   : > { %v4163_v59 = vpop.f32.mrf.mxu0  ;;  %4628 = vmatmul.mubr.bf16.gmra.mxu0 %v10850_v43 }
 0x16d   : > { %v4356_v60 = vpop.f32.mrf.mxu1  ;;  %4781 = vmatmul.mubr.bf16.gmra.mxu1 %v10851_v44  ;;  %v12276_v61 = vadd.f32 %v4352_v55, %v4160_v58  ;;  %v4164_v62 = vadd.f32 %v4163_v59, %v12242_v8  ;;  %4637 = vmatprep.mubr.bf16.mxu0 %v10858_v47  ;;  %v11366_v59 = vld [vmem:[%s12127_s7 + $0x3c] ss:$28 sps:$4 sm:$0xff]  }
 0x16e   : > { %4790 = vmatprep.mubr.bf16.mxu1 %v15732_v16  ;;  %v4165_v1 = vpop.f32.mrf.mxu0  ;;  %5099 = vmatpush2.bf16.msra.mxu1 %v10900_v50 }
 0x16f   : > { %v4358_v2 = vpop.f32.mrf.mxu1  ;;  %v12282_v5 = vadd.f32 %v4356_v60, %v4164_v62  ;;  %v4166_v6 = vadd.f32 %v4165_v1, %v12244_v11  ;;  %5100 = vmatprep.subr.bf16.mxu1 %v10909_v53  ;;  %v10876_v53 = vld [vmem:[#allocation5 + $0xab8] ss:$36 sps:$4 sm:$0xff]   ;;  %v10875_v60 = vld [vmem:[%s12127_s7 + $0x210] ss:$28 sps:$4 sm:$0xff]  }
 0x170   : > { %v4167_v7 = vpop.f32.mrf.mxu0 }
 0x171   : > { %v4360_v9 = vpop.f32.mrf.mxu1  ;;  %v12285_v10 = vadd.f32 %v4358_v2, %v4166_v6  ;;  %v4168_v12 = vadd.f32 %v4167_v7, %v12242_v8  ;;  %v10883_v2 = vld [vmem:[#allocation5 + $0xa70] ss:$36 sps:$4 sm:$0xff]  }
 0x172   : > { %v4169_v15 = vpop.f32.mrf.mxu0  ;;  %5101 = vmatpush2.bf16.msra.mxu1 %v10907_v63 }
 0x173   : > { %v4362_v17 = vpop.f32.mrf.mxu1  ;;  %v12288_v18 = vadd.f32 %v4360_v9, %v4168_v12  ;;  %v4170_v19 = vadd.f32 %v4169_v15, %v12244_v11  ;;  %5102 = vmatprep.subr.bf16.mxu1 %v10916_v0 }
 0x174   : > { %v4173_v20 = vpop.f32.mrf.mxu0  ;;  %4638 = vmatmul.mubr.bf16.gmra.mxu0 %v10860_v3 }
 0x175   : > { %v4366_v21 = vpop.f32.mrf.mxu1  ;;  %4791 = vmatmul.mubr.bf16.gmra.mxu1 %v10861_v4  ;;  %v12291_v23 = vadd.f32 %v4362_v17, %v4170_v19  ;;  %v4174_v24 = vadd.f32 %v4173_v20, %v12242_v8  ;;  %4913 = vmatprep.mubr.bf16.mxu0 %v11364_v25  ;;  %v11367_v17 = vld [vmem:[%s12127_s7 + $0x38] ss:$28 sps:$4 sm:$0xff]   ;;  %v10890_v19 = vld [vmem:[#allocation5 + $0xa28] ss:$36 sps:$4 sm:$0xff]  }
 0x176   : > { %4800 = vmatprep.mubr.bf16.mxu1 %v15732_v16  ;;  %v4175_v29 = vpop.f32.mrf.mxu0  ;;  %5103 = vmatpush2.bf16.msra.mxu1 %v10914_v13  ;;  %v10892_v13 = vld [vmem:[#allocation5 + $0xa2c] ss:$36 sps:$4 sm:$0xff]  }
 0x177   : > { %v4368_v30 = vpop.f32.mrf.mxu1  ;;  %v12297_v32 = vadd.f32 %v4366_v21, %v4174_v24  ;;  %v4176_v34 = vadd.f32 %v4175_v29, %v12244_v11  ;;  %5104 = vmatprep.subr.bf16.mxu1 %v10923_v14  ;;  %v11368_v24 = vld [vmem:[%s12127_s7 + $0x74] ss:$28 sps:$4 sm:$0xff]  }
 0x178   : > { %v4177_v36 = vpop.f32.mrf.mxu0 }
 0x179   : > { %v4370_v38 = vpop.f32.mrf.mxu1  ;;  %v12300_v40 = vadd.f32 %v4368_v30, %v4176_v34  ;;  %v4178_v41 = vadd.f32 %v4177_v36, %v12242_v8  ;;  %v10882_v30 = vld [vmem:[%s12127_s7 + $0x248] ss:$28 sps:$4 sm:$0xff]  }
 0x17a   : > { %v4179_v42 = vpop.f32.mrf.mxu0  ;;  %5105 = vmatpush2.bf16.msra.mxu1 %v10921_v26  ;;  %v10897_v36 = vld [vmem:[#allocation5 + $0x9e0] ss:$36 sps:$4 sm:$0xff]  }
 0x17b   : > { %v4372_v43 = vpop.f32.mrf.mxu1  ;;  %v12303_v44 = vadd.f32 %v4370_v38, %v4178_v41  ;;  %v4180_v46 = vadd.f32 %v4179_v42, %v12244_v11  ;;  %5460 = vmatprep.subr.bf16.mxu1 %v10929_v28  ;;  %v10906_v41 = vld [vmem:[#allocation5 + $0x99c] ss:$36 sps:$4 sm:$0xff]  }
 0x17c   : > { %v4183_v47 = vpop.f32.mrf.mxu0  ;;  %4914 = vmatmul.mubr.bf16.vlgmr.msra.gmra.mxu0 %v11365_v49 }
 0x17d   : > { %v4376_v48 = vpop.f32.mrf.mxu1  ;;  %4801 = vmatmul.mubr.bf16.gmra.mxu1 %v10868_v31  ;;  %v12307_v50 = vadd.f32 %v4372_v43, %v4180_v46  ;;  %v4184_v52 = vadd.f32 %v4183_v47, %v12242_v8  ;;  %5268 = vmatpush1.bf16.msra.mxu0 %v10869_v35  ;;  %v10899_v31 = vld [vmem:[#allocation5 + $0x9e4] ss:$36 sps:$4 sm:$0xff]  }
 0x17e   : > { %4810 = vmatprep.mubr.bf16.mxu1 %v15732_v16  ;;  %v4185_v55 = vpop.f32.mrf.mxu0  ;;  %4923 = vmatprep.mubr.bf16.mxu0 %v11366_v59 }
 0x17f   : > { %v4378_v58 = vpop.f32.mrf.mxu1  ;;  %5269 = vmatprep.subr.bf16.mxu0 %v10878_v39  ;;  %v12313_v62 = vadd.f32 %v4376_v48, %v4184_v52  ;;  %v4186_v63 = vadd.f32 %v4185_v55, %v12244_v11  ;;  %v11369_v52 = vld [vmem:[%s12127_s7 + $0x70] ss:$28 sps:$4 sm:$0xff]  }
 0x180   : > { %v4187_v0 = vpop.f32.mrf.mxu0 }
 0x181   : > { %v4380_v1 = vpop.f32.mrf.mxu1  ;;  %v12316_v3 = vadd.f32 %v4378_v58, %v4186_v63  ;;  %v4188_v4 = vadd.f32 %v4187_v0, %v12242_v8  ;;  %5270 = vmatpush1.bf16.msra.mxu0 %v10876_v53  ;;  %v10904_v53 = vld [vmem:[#allocation5 + $0x998] ss:$36 sps:$4 sm:$0xff]   ;;  %v11370_v58 = vld [vmem:[%s12127_s7 + $0xac] ss:$28 sps:$4 sm:$0xff]  }
 0x182   : > { %v4189_v6 = vpop.f32.mrf.mxu0  ;;  %5271 = vmatprep.subr.bf16.mxu0 %v10885_v54 }
 0x183   : > { %v4382_v7 = vpop.f32.mrf.mxu1  ;;  %v12319_v9 = vadd.f32 %v4380_v1, %v4188_v4  ;;  %v4190_v12 = vadd.f32 %v4189_v6, %v12244_v11  ;;  %v10889_v1 = vld [vmem:[%s12127_s7 + $0x280] ss:$28 sps:$4 sm:$0xff]  }
 0x184   : > { %v4193_v14 = vpop.f32.mrf.mxu0  ;;  %4924 = vmatmul.mubr.bf16.gmra.mxu0 %v11367_v17 }
 0x185   : > { %v4386_v15 = vpop.f32.mrf.mxu1  ;;  %4811 = vmatmul.mubr.bf16.gmra.mxu1 %v10875_v60  ;;  %v12323_v20 = vadd.f32 %v4382_v7, %v4190_v12  ;;  %v4194_v21 = vadd.f32 %v4193_v14, %v12242_v8  ;;  %4933 = vmatprep.mubr.bf16.mxu0 %v11368_v24  ;;  %v10911_v7 = vld [vmem:[#allocation5 + $0x950] ss:$36 sps:$4 sm:$0xff]  }
 0x186   : > { %4820 = vmatprep.mubr.bf16.mxu1 %v15732_v16  ;;  %v4195_v25 = vpop.f32.mrf.mxu0  ;;  %5272 = vmatpush1.bf16.msra.mxu0 %v10883_v2  ;;  %v10913_v2 = vld [vmem:[#allocation5 + $0x954] ss:$36 sps:$4 sm:$0xff]  }
 0x187   : > { %v4388_v26 = vpop.f32.mrf.mxu1  ;;  %v12328_v28 = vadd.f32 %v4386_v15, %v4194_v21  ;;  %v4196_v29 = vadd.f32 %v4195_v25, %v12244_v11  ;;  %5273 = vmatprep.subr.bf16.mxu0 %v10892_v13  ;;  %v10920_v21 = vld [vmem:[#allocation5 + $0x90c] ss:$36 sps:$4 sm:$0xff]  }
 0x188   : > { %v4197_v34 = vpop.f32.mrf.mxu0 }
 0x189   : > { %v4390_v35 = vpop.f32.mrf.mxu1  ;;  %v12332_v38 = vadd.f32 %v4388_v26, %v4196_v29  ;;  %v4198_v39 = vadd.f32 %v4197_v34, %v12242_v8  ;;  %v11371_v26 = vld [vmem:[%s12127_s7 + $0xa8] ss:$28 sps:$4 sm:$0xff]  }
 0x18a   : > { %v4199_v42 = vpop.f32.mrf.mxu0  ;;  %5274 = vmatpush1.bf16.msra.mxu0 %v10890_v19  ;;  %v10918_v29 = vld [vmem:[#allocation5 + $0x908] ss:$36 sps:$4 sm:$0xff]   ;;  %v11372_v34 = vld [vmem:[%s12127_s7 + $0xe4] ss:$28 sps:$4 sm:$0xff]  }
 0x18b   : > { %v4392_v43 = vpop.f32.mrf.mxu1  ;;  %v12335_v46 = vadd.f32 %v4390_v35, %v4198_v39  ;;  %v4200_v47 = vadd.f32 %v4199_v42, %v12244_v11  ;;  %5275 = vmatprep.subr.bf16.mxu0 %v10899_v31  ;;  %v10896_v42 = vld [vmem:[%s12127_s7 + $0x2b8] ss:$28 sps:$4 sm:$0xff]  }
 0x18c   : > { %v4203_v48 = vpop.f32.mrf.mxu0  ;;  %4934 = vmatmul.mubr.bf16.gmra.mxu0 %v11369_v52 }
 0x18d   : > { %v4396_v49 = vpop.f32.mrf.mxu1  ;;  %4821 = vmatmul.mubr.bf16.gmra.mxu1 %v10882_v30  ;;  %v12339_v54 = vadd.f32 %v4392_v43, %v4200_v47  ;;  %v4204_v55 = vadd.f32 %v4203_v48, %v12242_v8  ;;  %4943 = vmatprep.mubr.bf16.mxu0 %v11370_v58  ;;  %v10926_v43 = vld [vmem:[#allocation5 + $0xd44] ss:$36 sps:$4 sm:$0xff]  }
 0x18e   : > { %4830 = vmatprep.mubr.bf16.mxu1 %v15732_v16  ;;  %v4205_v59 = vpop.f32.mrf.mxu0  ;;  %5276 = vmatpush1.bf16.msra.mxu0 %v10897_v36 }
 0x18f   : > { %v4398_v60 = vpop.f32.mrf.mxu1  ;;  %v12344_v63 = vadd.f32 %v4396_v49, %v4204_v55  ;;  %v4206_v0 = vadd.f32 %v4205_v59, %v12244_v11  ;;  %5277 = vmatprep.subr.bf16.mxu0 %v10906_v41  ;;  %v10924_v49 = vld [vmem:[#allocation5 + $0xd40] ss:$36 sps:$4 sm:$0xff]  }
 0x190   : > { %v4207_v4 = vpop.f32.mrf.mxu0  ;;  %v10932_v55 = vld [vmem:[#allocation5 + $0xcfc] ss:$36 sps:$4 sm:$0xff]  }
 0x191   : > { %v4400_v6 = vpop.f32.mrf.mxu1  ;;  %v12348_v12 = vadd.f32 %v4398_v60, %v4206_v0  ;;  %v4208_v13 = vadd.f32 %v4207_v4, %v12242_v8  ;;  %v11373_v4 = vld [vmem:[%s12127_s7 + $0xe0] ss:$28 sps:$4 sm:$0xff]  }
 0x192   : > { %v4209_v14 = vpop.f32.mrf.mxu0  ;;  %5278 = vmatpush1.bf16.msra.mxu0 %v10904_v53 }
 0x193   : > { %v4402_v15 = vpop.f32.mrf.mxu1  ;;  %v12351_v17 = vadd.f32 %v4400_v6, %v4208_v13  ;;  %v4210_v19 = vadd.f32 %v4209_v14, %v12244_v11  ;;  %5279 = vmatprep.subr.bf16.mxu0 %v10913_v2  ;;  %v10930_v6 = vld [vmem:[#allocation5 + $0xcf8] ss:$36 sps:$4 sm:$0xff]  }
 0x194   : > { %v4213_v24 = vpop.f32.mrf.mxu0  ;;  %4944 = vmatmul.mubr.bf16.gmra.mxu0 %v11371_v26  ;;  %v11374_v14 = vld [vmem:[%s12127_s7 + $0x11c] ss:$28 sps:$4 sm:$0xff]  }
 0x195   : > { %v4406_v25 = vpop.f32.mrf.mxu1  ;;  %4831 = vmatmul.mubr.bf16.gmra.mxu1 %v10889_v1  ;;  %v12355_v30 = vadd.f32 %v4402_v15, %v4210_v19  ;;  %v4214_v31 = vadd.f32 %v4213_v24, %v12242_v8  ;;  %4953 = vmatprep.mubr.bf16.mxu0 %v11372_v34  ;;  %v10935_v26 = vld [vmem:[#allocation5 + $0xcb4] ss:$36 sps:$4 sm:$0xff]  }
 0x196   : > { %4840 = vmatprep.mubr.bf16.mxu1 %v15732_v16  ;;  %v4215_v35 = vpop.f32.mrf.mxu0  ;;  %5280 = vmatpush1.bf16.msra.mxu0 %v10911_v7  ;;  %v10933_v34 = vld [vmem:[#allocation5 + $0xcb0] ss:$36 sps:$4 sm:$0xff]  }
 0x197   : > { %v4408_v36 = vpop.f32.mrf.mxu1  ;;  %v12360_v39 = vadd.f32 %v4406_v25, %v4214_v31  ;;  %v4216_v41 = vadd.f32 %v4215_v35, %v12244_v11  ;;  %5281 = vmatprep.subr.bf16.mxu0 %v10920_v21  ;;  %v10903_v25 = vld [vmem:[%s12127_s7 + $0x2f0] ss:$28 sps:$4 sm:$0xff]  }
 0x198   : > { %v4217_v47 = vpop.f32.mrf.mxu0 }
 0x199   : > { %v4410_v48 = vpop.f32.mrf.mxu1  ;;  %v12364_v52 = vadd.f32 %v4408_v36, %v4216_v41  ;;  %v4218_v53 = vadd.f32 %v4217_v47, %v12242_v8 }
 0x19a   : > { %v4219_v58 = vpop.f32.mrf.mxu0  ;;  %5282 = vmatpush1.bf16.msra.mxu0 %v10918_v29 }
 0x19b   : > { %v4412_v59 = vpop.f32.mrf.mxu1  ;;  %v12367_v60 = vadd.f32 %v4410_v48, %v4218_v53  ;;  %v4220_v0 = vadd.f32 %v4219_v58, %v12244_v11  ;;  %5283 = vmatprep.subr.bf16.mxu0 %v10926_v43  ;;  %v10941_v48 = vld [vmem:[#allocation5 + $0xc6c] ss:$36 sps:$4 sm:$0xff]  }
 0x19c   : > { %v4223_v1 = vpop.f32.mrf.mxu0  ;;  %4954 = vmatmul.mubr.bf16.gmra.mxu0 %v11373_v4  ;;  %v10939_v58 = vld [vmem:[#allocation5 + $0xc68] ss:$36 sps:$4 sm:$0xff]  }
 0x19d   : > { %v4416_v2 = vpop.f32.mrf.mxu1  ;;  %4841 = vmatmul.mubr.bf16.gmra.mxu1 %v10896_v42  ;;  %v12371_v7 = vadd.f32 %v4412_v59, %v4220_v0  ;;  %v4224_v13 = vadd.f32 %v4223_v1, %v12242_v8  ;;  %4963 = vmatprep.mubr.bf16.mxu0 %v11374_v14  ;;  %v11376_v1 = vld [vmem:[%s12127_s7 + $0x154] ss:$28 sps:$4 sm:$0xff]   ;;  %v10910_v14 = vld [vmem:[%s12127_s7 + $0x328] ss:$28 sps:$4 sm:$0xff]  }
 0x19e   : > { %4850 = vmatprep.mubr.bf16.mxu1 %v15732_v16  ;;  %v4225_v15 = vpop.f32.mrf.mxu0  ;;  %5284 = vmatpush2.bf16.msra.mxu0 %v10924_v49 }
 0x19f   : > { %v4418_v19 = vpop.f32.mrf.mxu1  ;;  %v12376_v21 = vadd.f32 %v4416_v2, %v4224_v13  ;;  %v4226_v24 = vadd.f32 %v4225_v15, %v12244_v11  ;;  %5285 = vmatprep.subr.bf16.mxu0 %v10932_v55  ;;  %v11375_v55 = vld [vmem:[%s12127_s7 + $0x118] ss:$28 sps:$4 sm:$0xff]   ;;  %v10944_v15 = vld [vmem:[#allocation5 + $0xc24] ss:$36 sps:$4 sm:$0xff]  }
 0x1a0   : > { %v4227_v29 = vpop.f32.mrf.mxu0 }
 0x1a1   : > { %15752 = vst [vmem:[#allocation13_spill] sm:$0xff] %v12376_v21  ;;  %v4420_v31 = vpop.f32.mrf.mxu1  ;;  %v12380_v35 = vadd.f32 %v4418_v19, %v4226_v24  ;;  %v4228_v36 = vadd.f32 %v4227_v29, %v12242_v8 }
 0x1a2   : > { %v4229_v41 = vpop.f32.mrf.mxu0  ;;  %5286 = vmatpush2.bf16.msra.mxu0 %v10930_v6 }
 0x1a3   : > { %15753 = vst [vmem:[#allocation14_spill] sm:$0xff] %v12380_v35  ;;  %v4422_v42 = vpop.f32.mrf.mxu1  ;;  %v12383_v43 = vadd.f32 %v4420_v31, %v4228_v36  ;;  %v4230_v47 = vadd.f32 %v4229_v41, %v12244_v11  ;;  %5287 = vmatprep.subr.bf16.mxu0 %v10935_v26  ;;  %v10950_v31 = vld [vmem:[#allocation5 + $0xbdc] ss:$36 sps:$4 sm:$0xff]   ;;  %v11399_v35 = vld [vmem:[%s12127_s7 + $0xe8] ss:$28 sps:$4 sm:$0xff]  }
 0x1a4   : > { %v4233_v49 = vpop.f32.mrf.mxu0  ;;  %4964 = vmatmul.mubr.bf16.gmra.mxu0 %v11375_v55 }
 0x1a5   : > { %15754 = vst [vmem:[#allocation15_spill] sm:$0xff] %v12383_v43  ;;  %v4426_v53 = vpop.f32.mrf.mxu1  ;;  %4851 = vmatmul.mubr.bf16.gmra.mxu1 %v10903_v25  ;;  %v12387_v59 = vadd.f32 %v4422_v42, %v4230_v47  ;;  %v4234_v0 = vadd.f32 %v4233_v49, %v12242_v8  ;;  %4973 = vmatprep.mubr.bf16.mxu0 %v11376_v1  ;;  %v10942_v25 = vld [vmem:[#allocation5 + $0xc20] ss:$36 sps:$4 sm:$0xff]   ;;  %v11377_v49 = vld [vmem:[%s12127_s7 + $0x150] ss:$28 sps:$4 sm:$0xff]  }
 0x1a6   : > { %4860 = vmatprep.mubr.bf16.mxu1 %v15732_v16  ;;  %v4235_v2 = vpop.f32.mrf.mxu0  ;;  %5288 = vmatpush2.bf16.msra.mxu0 %v10933_v34  ;;  %v11378_v1 = vld [vmem:[%s12127_s7 + $0x18c] ss:$28 sps:$4 sm:$0xff]  }
 0x1a7   : > { %15755 = vst [vmem:[#allocation16_spill] sm:$0xff] %v12387_v59  ;;  %v4428_v4 = vpop.f32.mrf.mxu1  ;;  %v12392_v6 = vadd.f32 %v4426_v53, %v4234_v0  ;;  %v4236_v13 = vadd.f32 %v4235_v2, %v12244_v11  ;;  %5289 = vmatprep.subr.bf16.mxu0 %v10941_v48  ;;  %v10948_v53 = vld [vmem:[#allocation5 + $0xbd8] ss:$36 sps:$4 sm:$0xff]   ;;  %v11396_v59 = vld [vmem:[%s12127_s7 + $0x2a4] ss:$28 sps:$4 sm:$0xff]  }
 0x1a8   : > { %v4237_v19 = vpop.f32.mrf.mxu0 }
 0x1a9   : > { %15756 = vst [vmem:[#allocation17_spill] sm:$0xff] %v12392_v6  ;;  %v4430_v24 = vpop.f32.mrf.mxu1  ;;  %v12396_v26 = vadd.f32 %v4428_v4, %v4236_v13  ;;  %v4238_v29 = vadd.f32 %v4237_v19, %v12242_v8  ;;  %v11394_v6 = vld [vmem:[%s12127_s7 + $0x268] ss:$28 sps:$4 sm:$0xff]  }
 0x1aa   : > { %v4239_v36 = vpop.f32.mrf.mxu0  ;;  %5290 = vmatpush2.bf16.msra.mxu0 %v10939_v58 }
 0x1ab   : > { %15757 = vst [vmem:[#allocation18_spill] sm:$0xff] %v12396_v26  ;;  %v4432_v41 = vpop.f32.mrf.mxu1  ;;  %v12399_v34 = vadd.f32 %v4430_v24, %v4238_v29  ;;  %v4240_v42 = vadd.f32 %v4239_v36, %v12244_v11  ;;  %5291 = vmatprep.subr.bf16.mxu0 %v10944_v15  ;;  %v10917_v15 = vld [vmem:[%s12127_s7 + $0x360] ss:$28 sps:$4 sm:$0xff]  }
 0x1ac   : > { %v4243_v47 = vpop.f32.mrf.mxu0  ;;  %4974 = vmatmul.mubr.bf16.gmra.mxu0 %v11377_v49 }
 0x1ad   : > { %15758 = vst [vmem:[#allocation19_spill] sm:$0xff] %v12399_v34  ;;  %v4436_v48 = vpop.f32.mrf.mxu1  ;;  %4861 = vmatmul.mubr.bf16.gmra.mxu1 %v10910_v14  ;;  %v12403_v55 = vadd.f32 %v4432_v41, %v4240_v42  ;;  %v4244_v0 = vadd.f32 %v4243_v47, %v12242_v8  ;;  %4983 = vmatprep.mubr.bf16.mxu0 %v11378_v1  ;;  %v10953_v14 = vld [vmem:[#allocation5 + $0xb94] ss:$36 sps:$4 sm:$0xff]   ;;  %v11379_v1 = vld [vmem:[%s12127_s7 + $0x188] ss:$28 sps:$4 sm:$0xff]  }
 0x1ae   : > { %4870 = vmatprep.mubr.bf16.mxu1 %v15732_v16  ;;  %v4245_v58 = vpop.f32.mrf.mxu0  ;;  %5292 = vmatpush2.bf16.msra.mxu0 %v10942_v25  ;;  %v10951_v25 = vld [vmem:[#allocation5 + $0xb90] ss:$36 sps:$4 sm:$0xff]  }
 0x1af   : > { %15759 = vst [vmem:[#allocation20_spill] sm:$0xff] %v12403_v55  ;;  %v4438_v2 = vpop.f32.mrf.mxu1  ;;  %v12408_v4 = vadd.f32 %v4436_v48, %v4244_v0  ;;  %v4246_v13 = vadd.f32 %v4245_v58, %v12244_v11  ;;  %5293 = vmatprep.subr.bf16.mxu0 %v10950_v31  ;;  %v10959_v31 = vld [vmem:[#allocation5 + $0xb4c] ss:$36 sps:$4 sm:$0xff]  }
 0x1b0   : > { %v4247_v19 = vpop.f32.mrf.mxu0  ;;  %v11392_v55 = vld [vmem:[%s12127_s7 + $0x26c] ss:$28 sps:$4 sm:$0xff]  }
 0x1b1   : > { %15760 = vst [vmem:[#allocation21_spill] sm:$0xff] %v12408_v4  ;;  %v4440_v24 = vpop.f32.mrf.mxu1  ;;  %v12412_v29 = vadd.f32 %v4438_v2, %v4246_v13  ;;  %v4248_v36 = vadd.f32 %v4247_v19, %v12242_v8  ;;  %v11380_v13 = vld [vmem:[%s12127_s7 + $0x1c4] ss:$28 sps:$4 sm:$0xff]   ;;  %v11381_v19 = vld [vmem:[%s12127_s7 + $0xc] ss:$28 sps:$4 sm:$0xff]  }
 0x1b2   : > { %v4249_v41 = vpop.f32.mrf.mxu0  ;;  %5294 = vmatpush2.bf16.msra.mxu0 %v10948_v53  ;;  %v11390_v4 = vld [vmem:[%s12127_s7 + $0x230] ss:$28 sps:$4 sm:$0xff]  }
 0x1b3   : > { %15761 = vst [vmem:[#allocation22_spill] sm:$0xff] %v12412_v29  ;;  %v4442_v42 = vpop.f32.mrf.mxu1  ;;  %v12415_v47 = vadd.f32 %v4440_v24, %v4248_v36  ;;  %v4250_v48 = vadd.f32 %v4249_v41, %v12244_v11  ;;  %5295 = vmatprep.subr.bf16.mxu0 %v10953_v14  ;;  %v10957_v36 = vld [vmem:[#allocation5 + $0xb48] ss:$36 sps:$4 sm:$0xff]  }
 0x1b4   : > { %v4253_v49 = vpop.f32.mrf.mxu0  ;;  %4984 = vmatmul.mubr.bf16.gmra.mxu0 %v11379_v1 }
 0x1b5   : > { %15762 = vst [vmem:[#allocation23_spill] sm:$0xff] %v12415_v47  ;;  %v4446_v0 = vpop.f32.mrf.mxu1  ;;  %4871 = vmatmul.mubr.bf16.gmra.mxu1 %v10917_v15  ;;  %v12419_v58 = vadd.f32 %v4442_v42, %v4250_v48  ;;  %v4254_v2 = vadd.f32 %v4253_v49, %v12242_v8  ;;  %4993 = vmatprep.mubr.bf16.mxu0 %v11380_v13  ;;  %v10962_v15 = vld [vmem:[#allocation5 + $0x20c] ss:$36 sps:$4 sm:$0xff]   ;;  %v10927_v13 = vld [vmem:[#allocation5 + $0xf80] ss:$36 sps:$4 sm:$0xff]  }
 0x1b6   : > { %5106 = vmatprep.mubr.bf16.mxu1 %v11381_v19  ;;  %v4255_v53 = vpop.f32.mrf.mxu0  ;;  %5296 = vmatpush2.bf16.msra.mxu0 %v10951_v25  ;;  %v10938_v25 = vld [vmem:[#allocation5 + $0xf3c] ss:$36 sps:$4 sm:$0xff]  }
 0x1b7   : > { %15763 = vst [vmem:[#allocation24_spill] sm:$0xff] %v12419_v58  ;;  %v4448_v24 = vpop.f32.mrf.mxu1  ;;  %v12424_v41 = vadd.f32 %v4446_v0, %v4254_v2  ;;  %v4256_v14 = vadd.f32 %v4255_v53, %v12244_v11  ;;  %5297 = vmatprep.subr.bf16.mxu0 %v10959_v31  ;;  %v11389_v58 = vld [vmem:[%s12127_s7 + $0x7c] ss:$28 sps:$4 sm:$0xff]  }
 0x1b8   : > { %v4257_v1 = vpop.f32.mrf.mxu0 }
 0x1b9   : > { %15764 = vst [vmem:[#allocation25_spill] sm:$0xff] %v12424_v41  ;;  %v4450_v42 = vpop.f32.mrf.mxu1  ;;  %v12427_v48 = vadd.f32 %v4448_v24, %v4256_v14  ;;  %v4258_v49 = vadd.f32 %v4257_v1, %v12242_v8  ;;  %v11383_v24 = vld [vmem:[%s12127_s7 + $0x8] ss:$28 sps:$4 sm:$0xff]   ;;  %v11386_v41 = vld [vmem:[%s12127_s7 + $0x1f8] ss:$28 sps:$4 sm:$0xff]  }
 0x1ba   : > { %v4259_v19 = vpop.f32.mrf.mxu0  ;;  %5298 = vmatpush2.bf16.msra.mxu0 %v10957_v36  ;;  %v10936_v36 = vld [vmem:[#allocation5 + $0xf38] ss:$36 sps:$4 sm:$0xff]  }
 0x1bb   : > { %15765 = vst [vmem:[#allocation26_spill] sm:$0xff] %v12427_v48  ;;  %v4452_v16 = vpop.f32.mrf.mxu1  ;;  %v12430_v0 = vadd.f32 %v4450_v42, %v4258_v49  ;;  %v4260_v2 = vadd.f32 %v4259_v19, %v12244_v11  ;;  %5653 = vmatprep.subr.bf16.mxu0 %v10962_v15  ;;  %v11384_v48 = vld [vmem:[%s12127_s7 + $0x1fc] ss:$28 sps:$4 sm:$0xff]  }
 0x1bc   : > { %v4263_v31 = vpop.f32.mrf.mxu0  ;;  %4994 = vmatmul.mubr.bf16.gmra.mxu0 %v11382_v57  ;;  %v10947_v15 = vld [vmem:[#allocation5 + $0xef4] ss:$36 sps:$4 sm:$0xff]  }
 0x1bd   : > { %15766 = vst [vmem:[#allocation27_spill] sm:$0xff] %v12430_v0  ;;  %v4456_v53 = vpop.f32.mrf.mxu1  ;;  %5107 = vmatmul.mubr.bf16.vlgmr.msra.gmra.mxu1 %v11383_v24  ;;  %v12435_v14 = vadd.f32 %v4452_v16, %v4260_v2  ;;  %v4264_v1 = vadd.f32 %v4263_v31, %v12242_v8  ;;  %5003 = vmatprep.mubr.bf16.mxu0 %v11384_v48  ;;  %v11385_v0 = vld [vmem:[%s12127_s7 + $0x44] ss:$28 sps:$4 sm:$0xff]  }
 0x1be   : > { %5461 = vmatpush1.bf16.msra.mxu1 %v10927_v13  ;;  %v4265_v42 = vpop.f32.mrf.mxu0  ;;  %5116 = vmatprep.mubr.bf16.mxu1 %v11385_v0  ;;  %v10945_v0 = vld [vmem:[#allocation5 + $0xef0] ss:$36 sps:$4 sm:$0xff]  }
 0x1bf   : > { %15767 = vst [vmem:[#allocation28_spill] sm:$0xff] %v12435_v14  ;;  %v4458_v49 = vpop.f32.mrf.mxu1  ;;  %5462 = vmatprep.subr.bf16.mxu1 %v10938_v25  ;;  %v12440_v19 = vadd.f32 %v4456_v53, %v4264_v1  ;;  %v4266_v57 = vadd.f32 %v4265_v42, %v12244_v11  ;;  %v10956_v1 = vld [vmem:[#allocation5 + $0xeac] ss:$36 sps:$4 sm:$0xff]  }
 0x1c0   : > { %v4267_v24 = vpop.f32.mrf.mxu0 }
 0x1c1   : > { %v4460_v16 = vpop.f32.mrf.mxu1  ;;  %v12443_v2 = vadd.f32 %v4458_v49, %v4266_v57  ;;  %v4268_v13 = vadd.f32 %v4267_v24, %v12242_v8  ;;  %v11387_v49 = vld [vmem:[%s12127_s7 + $0x40] ss:$28 sps:$4 sm:$0xff]   ;;  %v11388_v24 = vld [vmem:[%s12127_s7 + $0x234] ss:$28 sps:$4 sm:$0xff]  }
 0x1c2   : > { %5463 = vmatpush1.bf16.msra.mxu1 %v10936_v36  ;;  %v4269_v48 = vpop.f32.mrf.mxu0 }
 0x1c3   : > { %v4462_v31 = vpop.f32.mrf.mxu1  ;;  %5464 = vmatprep.subr.bf16.mxu1 %v10947_v15  ;;  %v12446_v25 = vadd.f32 %v4460_v16, %v4268_v13  ;;  %v4270_v53 = vadd.f32 %v4269_v48, %v12244_v11  ;;  %v10954_v13 = vld [vmem:[#allocation5 + $0xea8] ss:$36 sps:$4 sm:$0xff]  }
 0x1c4   : > { %v4273_v42 = vpop.f32.mrf.mxu0  ;;  %5004 = vmatmul.mubr.bf16.gmra.mxu0 %v11386_v41  ;;  %v10965_v41 = vld [vmem:[#allocation5 + $0xe64] ss:$36 sps:$4 sm:$0xff]  }
 0x1c5   : > { %v4466_v14 = vpop.f32.mrf.mxu1  ;;  %5117 = vmatmul.mubr.bf16.gmra.mxu1 %v11387_v49  ;;  %v12451_v57 = vadd.f32 %v4462_v31, %v4270_v53  ;;  %v4274_v36 = vadd.f32 %v4273_v42, %v12242_v8  ;;  %5013 = vmatprep.mubr.bf16.mxu0 %v11388_v24 }
 0x1c6   : > { %5126 = vmatprep.mubr.bf16.mxu1 %v11389_v58  ;;  %v4275_v15 = vpop.f32.mrf.mxu0  ;;  %5465 = vmatpush1.bf16.msra.mxu1 %v10945_v0  ;;  %v10963_v0 = vld [vmem:[#allocation5 + $0xe60] ss:$36 sps:$4 sm:$0xff]  }
 0x1c7   : > { %v4468_v16 = vpop.f32.mrf.mxu1  ;;  %v12456_v48 = vadd.f32 %v4466_v14, %v4274_v36  ;;  %v4276_v47 = vadd.f32 %v4275_v15, %v12244_v11  ;;  %5466 = vmatprep.subr.bf16.mxu1 %v10956_v1  ;;  %v10974_v1 = vld [vmem:[#allocation5 + $0xe1c] ss:$36 sps:$4 sm:$0xff]  }
 0x1c8   : > { %v4277_v49 = vpop.f32.mrf.mxu0 }
 0x1c9   : > { %v4470_v31 = vpop.f32.mrf.mxu1  ;;  %v12459_v53 = vadd.f32 %v4468_v16, %v4276_v47  ;;  %v4278_v42 = vadd.f32 %v4277_v49, %v12242_v8  ;;  %v11391_v47 = vld [vmem:[%s12127_s7 + $0x78] ss:$28 sps:$4 sm:$0xff]  }
 0x1ca   : > { %v4279_v24 = vpop.f32.mrf.mxu0  ;;  %5467 = vmatpush1.bf16.msra.mxu1 %v10954_v13  ;;  %v11393_v13 = vld [vmem:[%s12127_s7 + $0xb4] ss:$28 sps:$4 sm:$0xff]  }
 0x1cb   : > { %v4472_v58 = vpop.f32.mrf.mxu1  ;;  %v12462_v14 = vadd.f32 %v4470_v31, %v4278_v42  ;;  %v4280_v36 = vadd.f32 %v4279_v24, %v12244_v11  ;;  %5468 = vmatprep.subr.bf16.mxu1 %v10965_v41  ;;  %v10972_v24 = vld [vmem:[#allocation5 + $0xe18] ss:$36 sps:$4 sm:$0xff]  }
 0x1cc   : > { %v4283_v15 = vpop.f32.mrf.mxu0  ;;  %5014 = vmatmul.mubr.bf16.gmra.mxu0 %v11390_v4  ;;  %v10983_v4 = vld [vmem:[#allocation5 + $0xdd4] ss:$36 sps:$4 sm:$0xff]  }
 0x1cd   : > { %v4476_v29 = vpop.f32.mrf.mxu1  ;;  %5127 = vmatmul.mubr.bf16.gmra.mxu1 %v11391_v47  ;;  %v12467_v16 = vadd.f32 %v4472_v58, %v4280_v36  ;;  %v4284_v49 = vadd.f32 %v4283_v15, %v12242_v8  ;;  %5023 = vmatprep.mubr.bf16.mxu0 %v11392_v55 }
 0x1ce   : > { %5136 = vmatprep.mubr.bf16.mxu1 %v11393_v13  ;;  %v4285_v31 = vpop.f32.mrf.mxu0  ;;  %5469 = vmatpush1.bf16.msra.mxu1 %v10963_v0  ;;  %v10981_v0 = vld [vmem:[#allocation5 + $0xdd0] ss:$36 sps:$4 sm:$0xff]  }
 0x1cf   : > { %v4478_v42 = vpop.f32.mrf.mxu1  ;;  %v12472_v41 = vadd.f32 %v4476_v29, %v4284_v49  ;;  %v4286_v34 = vadd.f32 %v4285_v31, %v12244_v11  ;;  %5470 = vmatprep.subr.bf16.mxu1 %v10974_v1  ;;  %v10992_v1 = vld [vmem:[#allocation5 + $0xd8c] ss:$36 sps:$4 sm:$0xff]  }
 0x1d0   : > { %v4287_v47 = vpop.f32.mrf.mxu0 }
 0x1d1   : > { %v4480_v58 = vpop.f32.mrf.mxu1  ;;  %v12475_v36 = vadd.f32 %v4478_v42, %v4286_v34  ;;  %v4288_v55 = vadd.f32 %v4287_v47, %v12242_v8  ;;  %v11395_v34 = vld [vmem:[%s12127_s7 + $0xb0] ss:$28 sps:$4 sm:$0xff]  }
 0x1d2   : > { %v4289_v15 = vpop.f32.mrf.mxu0  ;;  %5471 = vmatpush1.bf16.msra.mxu1 %v10972_v24  ;;  %v11397_v24 = vld [vmem:[%s12127_s7 + $0xec] ss:$28 sps:$4 sm:$0xff]  }
 0x1d3   : > { %v4482_v13 = vpop.f32.mrf.mxu1  ;;  %v12478_v29 = vadd.f32 %v4480_v58, %v4288_v55  ;;  %v4290_v49 = vadd.f32 %v4289_v15, %v12244_v11  ;;  %5472 = vmatprep.subr.bf16.mxu1 %v10983_v4  ;;  %v10990_v15 = vld [vmem:[#allocation5 + $0xd88] ss:$36 sps:$4 sm:$0xff]  }
 0x1d4   : > { %v4293_v31 = vpop.f32.mrf.mxu0  ;;  %5024 = vmatmul.mubr.bf16.gmra.mxu0 %v11394_v6  ;;  %v11001_v6 = vld [vmem:[#allocation5 + $0x68c] ss:$36 sps:$4 sm:$0xff]  }
 0x1d5   : > { %v4486_v26 = vpop.f32.mrf.mxu1  ;;  %5137 = vmatmul.mubr.bf16.gmra.mxu1 %v11395_v34  ;;  %v12483_v42 = vadd.f32 %v4482_v13, %v4290_v49  ;;  %v4294_v47 = vadd.f32 %v4293_v31, %v12242_v8  ;;  %5033 = vmatprep.mubr.bf16.mxu0 %v11396_v59 }
 0x1d6   : > { %5146 = vmatprep.mubr.bf16.mxu1 %v11397_v24  ;;  %v4295_v58 = vpop.f32.mrf.mxu0  ;;  %5473 = vmatpush1.bf16.msra.mxu1 %v10981_v0 }
 0x1d7   : > { %v4488_v55 = vpop.f32.mrf.mxu1  ;;  %v12488_v4 = vadd.f32 %v4486_v26, %v4294_v47  ;;  %v4296_v43 = vadd.f32 %v4295_v58, %v12244_v11  ;;  %5474 = vmatprep.subr.bf16.mxu1 %v10992_v1  ;;  %v11398_v58 = vld [vmem:[%s12127_s7 + $0x2a0] ss:$28 sps:$4 sm:$0xff]  }
 0x1d8   : > { %v4297_v13 = vpop.f32.mrf.mxu0 }
 0x1d9   : > { %v4490_v49 = vpop.f32.mrf.mxu1  ;;  %v12491_v34 = vadd.f32 %v4488_v55, %v4296_v43  ;;  %v4298_v59 = vadd.f32 %v4297_v13, %v12242_v8  ;;  %v11400_v55 = vld [vmem:[%s12127_s7 + $0x2dc] ss:$28 sps:$4 sm:$0xff]  }
 0x1da   : > { %v4299_v31 = vpop.f32.mrf.mxu0  ;;  %5475 = vmatpush1.bf16.msra.mxu1 %v10990_v15  ;;  %v11401_v15 = vld [vmem:[%s12127_s7 + $0x124] ss:$28 sps:$4 sm:$0xff]  }
 0x1db   : > { %v4492_v24 = vpop.f32.mrf.mxu1  ;;  %v12494_v0 = vadd.f32 %v4490_v49, %v4298_v59  ;;  %v4300_v26 = vadd.f32 %v4299_v31, %v12244_v11  ;;  %5846 = vmatprep.subr.bf16.mxu1 %v11001_v6 }
 0x1dc   : > { %v12497_v47 = vpop.f32.mrf.mxu0  ;;  %5034 = vmatmul.mubr.bf16.gmra.mxu0 %v11398_v58  ;;  %v11402_v58 = vld [vmem:[%s12127_s7 + $0x2d8] ss:$28 sps:$4 sm:$0xff]  }
 0x1dd   : > { %v4649_v1 = vpop.f32.mrf.mxu1  ;;  %5147 = vmatmul.mubr.bf16.gmra.mxu1 %v11399_v35  ;;  %v12501_v43 = vadd.f32 %v4492_v24, %v4300_v26  ;;  %5043 = vmatprep.mubr.bf16.mxu0 %v11400_v55 }
 0x1de   : > { %v12504_v8 = vadd.f32 %v4649_v1, %v12440_v19  ;;  %5156 = vmatprep.mubr.bf16.mxu1 %v11401_v15  ;;  %v12508_v11 = vpop.f32.mrf.mxu0  ;;  %v11404_v15 = vld [vmem:[%s12127_s7 + $0x314] ss:$28 sps:$4 sm:$0xff]  }
 0x1df   : > { %v4651_v6 = vpop.f32.mrf.mxu1 }
 0x1e0   : > { %15768 = vst [vmem:[#allocation29_spill] sm:$0xff] %v12504_v8  ;;  %v12511_v13 = vadd.f32 %v4651_v6, %v12443_v2  ;;  %v12513_v35 = vpop.f32.mrf.mxu0  ;;  %v11403_v2 = vld [vmem:[%s12127_s7 + $0x120] ss:$28 sps:$4 sm:$0xff]  }
 0x1e1   : > { %v4653_v49 = vpop.f32.mrf.mxu1 }
 0x1e2   : > { %15769 = vst [vmem:[#allocation30_spill] sm:$0xff] %v12511_v13  ;;  %v12516_v19 = vadd.f32 %v4653_v49, %v12446_v25  ;;  %v12518_v59 = vpop.f32.mrf.mxu0  ;;  %v11405_v25 = vld [vmem:[%s12127_s7 + $0x15c] ss:$28 sps:$4 sm:$0xff]  }
 0x1e3   : > { %v4655_v31 = vpop.f32.mrf.mxu1 }
 0x1e4   : > { %15770 = vst [vmem:[#allocation31_spill] sm:$0xff] %v12516_v19  ;;  %v12521_v24 = vadd.f32 %v4655_v31, %v12451_v57  ;;  %v12523_v26 = vpop.f32.mrf.mxu0  ;;  %5044 = vmatmul.mubr.bf16.gmra.mxu0 %v11402_v58  ;;  %v11417_v19 = vld [vmem:[%s12127_s7 + $0x4c] ss:$28 sps:$4 sm:$0xff]  }
 0x1e5   : > { %v4659_v1 = vpop.f32.mrf.mxu1  ;;  %5157 = vmatmul.mubr.bf16.gmra.mxu1 %v11403_v2  ;;  %5053 = vmatprep.mubr.bf16.mxu0 %v11404_v15 }
 0x1e6   : > { %15771 = vst [vmem:[#allocation32_spill] sm:$0xff] %v12521_v24  ;;  %v12528_v55 = vadd.f32 %v4659_v1, %v12456_v48  ;;  %5166 = vmatprep.mubr.bf16.mxu1 %v11405_v25  ;;  %v12532_v6 = vpop.f32.mrf.mxu0  ;;  %v11406_v24 = vld [vmem:[%s12127_s7 + $0x310] ss:$28 sps:$4 sm:$0xff]  }
 0x1e7   : > { %v4661_v57 = vpop.f32.mrf.mxu1 }
 0x1e8   : > { %15772 = vst [vmem:[#allocation33_spill] sm:$0xff] %v12528_v55  ;;  %v12535_v49 = vadd.f32 %v4661_v57, %v12459_v53  ;;  %v12537_v31 = vpop.f32.mrf.mxu0  ;;  %v11407_v53 = vld [vmem:[%s12127_s7 + $0x158] ss:$28 sps:$4 sm:$0xff]  }
 0x1e9   : > { %v4663_v58 = vpop.f32.mrf.mxu1 }
 0x1ea   : > { %15773 = vst [vmem:[#allocation34_spill] sm:$0xff] %v12535_v49  ;;  %v12540_v48 = vadd.f32 %v4663_v58, %v12462_v14  ;;  %v12542_v1 = vpop.f32.mrf.mxu0  ;;  %v11408_v49 = vld [vmem:[%s12127_s7 + $0x34c] ss:$28 sps:$4 sm:$0xff]   ;;  %v11409_v14 = vld [vmem:[%s12127_s7 + $0x194] ss:$28 sps:$4 sm:$0xff]  }
 0x1eb   : > { %v4665_v2 = vpop.f32.mrf.mxu1 }
 0x1ec   : > { %15774 = vst [vmem:[#allocation35_spill] sm:$0xff] %v12540_v48  ;;  %v12545_v15 = vadd.f32 %v4665_v2, %v12467_v16  ;;  %v12547_v25 = vpop.f32.mrf.mxu0  ;;  %5054 = vmatmul.mubr.bf16.gmra.mxu0 %v11406_v24  ;;  %v11410_v48 = vld [vmem:[%s12127_s7 + $0x348] ss:$28 sps:$4 sm:$0xff]  }
 0x1ed   : > { %v4669_v55 = vpop.f32.mrf.mxu1  ;;  %5167 = vmatmul.mubr.bf16.gmra.mxu1 %v11407_v53  ;;  %5063 = vmatprep.mubr.bf16.mxu0 %v11408_v49 }
 0x1ee   : > { %15775 = vst [vmem:[#allocation36_spill] sm:$0xff] %v12545_v15  ;;  %v12552_v57 = vadd.f32 %v4669_v55, %v12472_v41  ;;  %5176 = vmatprep.mubr.bf16.mxu1 %v11409_v14  ;;  %v12556_v58 = vpop.f32.mrf.mxu0 }
 0x1ef   : > { %v4671_v16 = vpop.f32.mrf.mxu1 }
 0x1f0   : > { %15776 = vst [vmem:[#allocation37_spill] sm:$0xff] %v12552_v57  ;;  %v12559_v2 = vadd.f32 %v4671_v16, %v12475_v36  ;;  %v12561_v24 = vpop.f32.mrf.mxu0  ;;  %v11411_v36 = vld [vmem:[%s12127_s7 + $0x190] ss:$28 sps:$4 sm:$0xff]  }
 0x1f1   : > { %v4673_v53 = vpop.f32.mrf.mxu1 }
 0x1f2   : > { %15777 = vst [vmem:[#allocation38_spill] sm:$0xff] %v12559_v2  ;;  %v12564_v41 = vadd.f32 %v4673_v53, %v12478_v29  ;;  %v12566_v55 = vpop.f32.mrf.mxu0  ;;  %v11412_v2 = vld [vmem:[%s12127_s7 + $0x1cc] ss:$28 sps:$4 sm:$0xff]   ;;  %v11413_v29 = vld [vmem:[%s12127_s7 + $0x14] ss:$28 sps:$4 sm:$0xff]  }
 0x1f3   : > { %v4675_v49 = vpop.f32.mrf.mxu1 }
 0x1f4   : > { %15778 = vst [vmem:[#allocation39_spill] sm:$0xff] %v12564_v41  ;;  %v12569_v57 = vadd.f32 %v4675_v49, %v12483_v42  ;;  %v12571_v14 = vpop.f32.mrf.mxu0  ;;  %5064 = vmatmul.mubr.bf16.gmra.mxu0 %v11410_v48 }
 0x1f5   : > { %v4679_v15 = vpop.f32.mrf.mxu1  ;;  %5177 = vmatmul.mubr.bf16.gmra.mxu1 %v11411_v36  ;;  %5299 = vmatprep.mubr.bf16.mxu0 %v11413_v29  ;;  %v10968_v29 = vld [vmem:[#allocation5 + $0x1c4] ss:$36 sps:$4 sm:$0xff]  }
 0x1f6   : > { %15779 = vst [vmem:[#allocation40_spill] sm:$0xff] %v12569_v57  ;;  %v12576_v16 = vadd.f32 %v4679_v15, %v12488_v4  ;;  %5186 = vmatprep.mubr.bf16.mxu1 %v11412_v2  ;;  %v12580_v53 = vpop.f32.mrf.mxu0  ;;  %v10960_v4 = vld [vmem:[#allocation5 + $0x208] ss:$36 sps:$4 sm:$0xff]  }
 0x1f7   : > { %v4681_v42 = vpop.f32.mrf.mxu1 }
 0x1f8   : > { %15780 = vst [vmem:[#allocation41_spill] sm:$0xff] %v12576_v16  ;;  %v12583_v49 = vadd.f32 %v4681_v42, %v12491_v34  ;;  %v12585_v57 = vpop.f32.mrf.mxu0  ;;  %v11414_v42 = vld [vmem:[%s12127_s7 + $0x1c8] ss:$28 sps:$4 sm:$0xff]  }
 0x1f9   : > { %v4683_v48 = vpop.f32.mrf.mxu1 }
 0x1fa   : > { %15781 = vst [vmem:[#allocation42_spill] sm:$0xff] %v12583_v49  ;;  %v12588_v36 = vadd.f32 %v4683_v48, %v12494_v0  ;;  %v12590_v15 = vpop.f32.mrf.mxu0  ;;  %v11415_v49 = vld [vmem:[%s12127_s7 + $0x10] ss:$28 sps:$4 sm:$0xff]   ;;  %v4530_v0 = vadd.f32 %v12497_v47, %v12250_v22  ;;  %v4532_v48 = vadd.f32 %v12508_v11, %v12254_v27  ;;  %v4534_v22 = vadd.f32 %v12513_v35, %v12257_v33  ;;  %v10977_v33 = vld [vmem:[#allocation5 + $0x134] ss:$36 sps:$4 sm:$0xff]  }
 0x1fb   : > { %v4685_v2 = vpop.f32.mrf.mxu1  ;;  %v4536_v27 = vadd.f32 %v12518_v59, %v12260_v37  ;;  %v11419_v59 = vld [vmem:[%s12127_s7 + $0x48] ss:$28 sps:$4 sm:$0xff]  }
 0x1fc   : > { %15782 = vst [vmem:[#allocation43_spill] sm:$0xff] %v12588_v36  ;;  %v12593_v16 = vadd.f32 %v4685_v2, %v12501_v43  ;;  %v12595_v41 = vpop.f32.mrf.mxu0  ;;  %5300 = vmatmul.mubr.bf16.vlgmr.msra.gmra.mxu0 %v11415_v49  ;;  %v11416_v36 = vld [vmem:[%s12127_s7 + $0x204] ss:$28 sps:$4 sm:$0xff]  }
 0x1fd   : > { %v4722_v34 = vpop.f32.mrf.mxu1  ;;  %5187 = vmatmul.mubr.bf16.gmra.mxu1 %v11414_v42  ;;  %5654 = vmatpush1.bf16.msra.mxu0 %v10960_v4  ;;  %v10966_v43 = vld [vmem:[#allocation5 + $0x1c0] ss:$36 sps:$4 sm:$0xff]  }
 0x1fe   : > { %15783 = vst [vmem:[#allocation44_spill] sm:$0xff] %v12593_v16  ;;  %5196 = vmatprep.mubr.bf16.mxu1 %v11416_v36  ;;  %v12605_v2 = vpop.f32.mrf.mxu0  ;;  %5309 = vmatprep.mubr.bf16.mxu0 %v11417_v19  ;;  %v10971_v42 = vld [vmem:[#allocation5 + $0x17c] ss:$36 sps:$4 sm:$0xff]   ;;  %v4723_v13 = vadd.f32 %v4722_v34, %v4530_v0  ;;  %v4542_v34 = vadd.f32 %v12532_v6, %v12270_v51 }
 0x1ff   : > { %v4724_v16 = vpop.f32.mrf.mxu1  ;;  %5655 = vmatprep.subr.bf16.mxu0 %v10968_v29  ;;  %v10969_v36 = vld [vmem:[#allocation5 + $0x178] ss:$36 sps:$4 sm:$0xff]   ;;  %v4540_v29 = vadd.f32 %v12523_v26, %v12266_v45  ;;  %v4544_v26 = vadd.f32 %v12537_v31, %v12273_v56  ;;  %v4546_v6 = vadd.f32 %v12542_v1, %v12276_v61  ;;  %v4550_v1 = vadd.f32 %v12547_v25, %v12282_v5 }
 0x200   : > { %v4725_v49 = vadd.f32 %v4724_v16, %v4532_v48  ;;  %v12608_v8 = vpop.f32.mrf.mxu0  ;;  %v11420_v48 = vld [vmem:[%s12127_s7 + $0x23c] ss:$28 sps:$4 sm:$0xff]   ;;  %v4554_v25 = vadd.f32 %v12561_v24, %v12288_v18  ;;  %v11426_v24 = vld [vmem:[%s12127_s7 + $0x270] ss:$28 sps:$4 sm:$0xff]  }
 0x201   : > { %v4726_v21 = vpop.f32.mrf.mxu1  ;;  %5656 = vmatpush1.bf16.msra.mxu0 %v10966_v43  ;;  %v11422_v31 = vld [vmem:[%s12127_s7 + $0x238] ss:$28 sps:$4 sm:$0xff]   ;;  %v11423_v61 = vld [vmem:[%s12127_s7 + $0x80] ss:$28 sps:$4 sm:$0xff]  }
 0x202   : > { %v9797_v47 = vpack.c.bf16 %v4725_v49, %v4723_v13  ;;  %v12614_v11 = vpop.f32.mrf.mxu0  ;;  %5657 = vmatprep.subr.bf16.mxu0 %v10971_v42  ;;  %v4727_v16 = vadd.f32 %v4726_v21, %v4534_v22  ;;  %v11418_v13 = vld [vmem:[%s12127_s7 + $0x200] ss:$28 sps:$4 sm:$0xff]   ;;  %v10975_v49 = vld [vmem:[#allocation5 + $0x130] ss:$36 sps:$4 sm:$0xff]  }
 0x203   : > { %v4728_v19 = vpop.f32.mrf.mxu1  ;;  %v11421_v21 = vld [vmem:[%s12127_s7 + $0x84] ss:$28 sps:$4 sm:$0xff]  }
 0x204   : > { %8737 = vst [vmem:[%s12616_s20] sm:$0xff] %v9797_v47  ;;  %v4729_v4 = vadd.f32 %v4728_v19, %v4536_v27  ;;  %v12619_v35 = vpop.f32.mrf.mxu0  ;;  %5310 = vmatmul.mubr.bf16.gmra.mxu0 %v11419_v59  ;;  %v10980_v47 = vld [vmem:[#allocation5 + $0xec] ss:$36 sps:$4 sm:$0xff]  }
 0x205   : > { %v4732_v37 = vpop.f32.mrf.mxu1  ;;  %5197 = vmatmul.mubr.bf16.gmra.mxu1 %v11418_v13  ;;  %5319 = vmatprep.mubr.bf16.mxu0 %v11421_v21  ;;  %v10986_v13 = vld [vmem:[#allocation5 + $0xa4] ss:$36 sps:$4 sm:$0xff]  }
 0x206   : > { %v9802_v0 = vpack.c.bf16 %v4729_v4, %v4727_v16  ;;  %5206 = vmatprep.mubr.bf16.mxu1 %v11420_v48  ;;  %v12629_v43 = vpop.f32.mrf.mxu0  ;;  %5658 = vmatpush1.bf16.msra.mxu0 %v10969_v36  ;;  %v4733_v22 = vadd.f32 %v4732_v37, %v4540_v29  ;;  %v10978_v4 = vld [vmem:[#allocation5 + $0xe8] ss:$36 sps:$4 sm:$0xff]   ;;  %v4552_v29 = vadd.f32 %v12556_v58, %v12285_v10  ;;  %v11425_v48 = vld [vmem:[%s12127_s7 + $0xbc] ss:$28 sps:$4 sm:$0xff]  }
 0x207   : > { %v4734_v42 = vpop.f32.mrf.mxu1  ;;  %5659 = vmatprep.subr.bf16.mxu0 %v10977_v33  ;;  %v4556_v58 = vadd.f32 %v12566_v55, %v12291_v23  ;;  %v11427_v23 = vld [vmem:[%s12127_s7 + $0xb8] ss:$28 sps:$4 sm:$0xff]   ;;  %v4560_v55 = vadd.f32 %v12571_v14, %v12297_v32  ;;  %v4564_v14 = vadd.f32 %v12585_v57, %v12303_v44  ;;  %v11430_v57 = vld [vmem:[%s12127_s7 + $0x2a8] ss:$28 sps:$4 sm:$0xff]  }
 0x208   : > { %8742 = vst [vmem:[%s12616_s20 + $0x24] sm:$0xff] %v9802_v0  ;;  %v4735_v27 = vadd.f32 %v4734_v42, %v4542_v34  ;;  %v12632_v45 = vpop.f32.mrf.mxu0  ;;  %v11424_v0 = vld [vmem:[%s12127_s7 + $0x274] ss:$28 sps:$4 sm:$0xff]  }
 0x209   : > { %v4736_v51 = vpop.f32.mrf.mxu1 }
 0x20a   : > { %v9807_v19 = vpack.c.bf16 %v4735_v27, %v4733_v22  ;;  %v12638_v36 = vpop.f32.mrf.mxu0  ;;  %5660 = vmatpush1.bf16.msra.mxu0 %v10975_v49  ;;  %v4737_v33 = vadd.f32 %v4736_v51, %v4544_v26  ;;  %v10984_v49 = vld [vmem:[#allocation5 + $0xa0] ss:$36 sps:$4 sm:$0xff]  }
 0x20b   : > { %v4738_v16 = vpop.f32.mrf.mxu1  ;;  %5661 = vmatprep.subr.bf16.mxu0 %v10980_v47  ;;  %v10989_v47 = vld [vmem:[#allocation5 + $0x5c] ss:$36 sps:$4 sm:$0xff]  }
 0x20c   : > { %8747 = vst [vmem:[%s12616_s20 + $0x48] sm:$0xff] %v9807_v19  ;;  %v4739_v37 = vadd.f32 %v4738_v16, %v4546_v6  ;;  %v12641_v59 = vpop.f32.mrf.mxu0  ;;  %5320 = vmatmul.mubr.bf16.gmra.mxu0 %v11423_v61  ;;  %v10987_v19 = vld [vmem:[#allocation5 + $0x58] ss:$36 sps:$4 sm:$0xff]   ;;  %v11429_v61 = vld [vmem:[%s12127_s7 + $0xf4] ss:$28 sps:$4 sm:$0xff]  }
 0x20d   : > { %v4742_v56 = vpop.f32.mrf.mxu1  ;;  %5207 = vmatmul.mubr.bf16.gmra.mxu1 %v11422_v31  ;;  %5329 = vmatprep.mubr.bf16.mxu0 %v11425_v48  ;;  %v11428_v31 = vld [vmem:[%s12127_s7 + $0x2ac] ss:$28 sps:$4 sm:$0xff]  }
 0x20e   : > { %v9812_v34 = vpack.c.bf16 %v4739_v37, %v4737_v33  ;;  %5216 = vmatprep.mubr.bf16.mxu1 %v11424_v0  ;;  %v12651_v21 = vpop.f32.mrf.mxu0  ;;  %5662 = vmatpush1.bf16.msra.mxu0 %v10978_v4  ;;  %v4743_v22 = vadd.f32 %v4742_v56, %v4550_v1  ;;  %v10995_v33 = vld [vmem:[#allocation5 + $0x14] ss:$36 sps:$4 sm:$0xff]  }
 0x20f   : > { %v4744_v42 = vpop.f32.mrf.mxu1  ;;  %5663 = vmatprep.subr.bf16.mxu0 %v10986_v13  ;;  %v4562_v13 = vadd.f32 %v12580_v53, %v12300_v40  ;;  %v4566_v53 = vadd.f32 %v12590_v15, %v12307_v50  ;;  %v11431_v50 = vld [vmem:[%s12127_s7 + $0xf0] ss:$28 sps:$4 sm:$0xff]   ;;  %v4570_v15 = vadd.f32 %v12595_v41, %v12313_v62  ;;  %v4574_v41 = vadd.f32 %v12608_v8, %v12319_v9  ;;  %v11434_v8 = vld [vmem:[%s12127_s7 + $0x2e0] ss:$28 sps:$4 sm:$0xff]  }
 0x210   : > { %8752 = vst [vmem:[%s12616_s20 + $0x6c] sm:$0xff] %v9812_v34  ;;  %v4745_v27 = vadd.f32 %v4744_v42, %v4552_v29  ;;  %v12654_v5 = vpop.f32.mrf.mxu0  ;;  %v10993_v34 = vld [vmem:[#allocation5 + $0x10] ss:$36 sps:$4 sm:$0xff]  }
 0x211   : > { %v4746_v10 = vpop.f32.mrf.mxu1  ;;  %v10998_v42 = vld [vmem:[#allocation5 + $0x44c] ss:$36 sps:$4 sm:$0xff]  }
 0x212   : > { %v9817_v51 = vpack.c.bf16 %v4745_v27, %v4743_v22  ;;  %v12660_v26 = vpop.f32.mrf.mxu0  ;;  %5664 = vmatpush1.bf16.msra.mxu0 %v10984_v49  ;;  %v4747_v16 = vadd.f32 %v4746_v10, %v4554_v25 }
 0x213   : > { %v4748_v6 = vpop.f32.mrf.mxu1  ;;  %5665 = vmatprep.subr.bf16.mxu0 %v10989_v47  ;;  %v10996_v47 = vld [vmem:[#allocation5 + $0x448] ss:$36 sps:$4 sm:$0xff]  }
 0x214   : > { %8757 = vst [vmem:[%s12616_s20 + $0x90] sm:$0xff] %v9817_v51  ;;  %v4749_v4 = vadd.f32 %v4748_v6, %v4556_v58  ;;  %v12663_v37 = vpop.f32.mrf.mxu0  ;;  %5330 = vmatmul.mubr.bf16.gmra.mxu0 %v11427_v23  ;;  %v11004_v58 = vld [vmem:[#allocation5 + $0x404] ss:$36 sps:$4 sm:$0xff]   ;;  %v4572_v6 = vadd.f32 %v12605_v2, %v12316_v3  ;;  %v4576_v2 = vadd.f32 %v12614_v11, %v12323_v20 }
 0x215   : > { %v4752_v18 = vpop.f32.mrf.mxu1  ;;  %5217 = vmatmul.mubr.bf16.gmra.mxu1 %v11426_v24  ;;  %5339 = vmatprep.mubr.bf16.mxu0 %v11429_v61  ;;  %v11002_v24 = vld [vmem:[#allocation5 + $0x400] ss:$36 sps:$4 sm:$0xff]   ;;  %v4580_v11 = vadd.f32 %v12619_v35, %v12328_v28  ;;  %v4584_v35 = vadd.f32 %v12632_v45, %v12335_v46  ;;  %v11438_v45 = vld [vmem:[%s12127_s7 + $0x318] ss:$28 sps:$4 sm:$0xff]  }
 0x216   : > { %v9822_v56 = vpack.c.bf16 %v4749_v4, %v4747_v16  ;;  %5226 = vmatprep.mubr.bf16.mxu1 %v11428_v31  ;;  %v12673_v1 = vpop.f32.mrf.mxu0  ;;  %5666 = vmatpush1.bf16.msra.mxu0 %v10987_v19  ;;  %v4753_v0 = vadd.f32 %v4752_v18, %v4560_v55  ;;  %v11432_v16 = vld [vmem:[%s12127_s7 + $0x2e4] ss:$28 sps:$4 sm:$0xff]   ;;  %v11433_v4 = vld [vmem:[%s12127_s7 + $0x12c] ss:$28 sps:$4 sm:$0xff]  }
 0x217   : > { %v4754_v29 = vpop.f32.mrf.mxu1  ;;  %5667 = vmatprep.subr.bf16.mxu0 %v10995_v33  ;;  %v11435_v20 = vld [vmem:[%s12127_s7 + $0x128] ss:$28 sps:$4 sm:$0xff]  }
 0x218   : > { %8762 = vst [vmem:[%s12616_s20 + $0xb4] sm:$0xff] %v9822_v56  ;;  %v4755_v48 = vadd.f32 %v4754_v29, %v4562_v13  ;;  %v12676_v32 = vpop.f32.mrf.mxu0  ;;  %v11010_v13 = vld [vmem:[#allocation5 + $0x3bc] ss:$36 sps:$4 sm:$0xff]  }
 0x219   : > { %v4756_v40 = vpop.f32.mrf.mxu1  ;;  %v11008_v29 = vld [vmem:[#allocation5 + $0x3b8] ss:$36 sps:$4 sm:$0xff]  }
 0x21a   : > { %v9827_v49 = vpack.c.bf16 %v4755_v48, %v4753_v0  ;;  %v12682_v22 = vpop.f32.mrf.mxu0  ;;  %5668 = vmatpush1.bf16.msra.mxu0 %v10993_v34  ;;  %v4757_v10 = vadd.f32 %v4756_v40, %v4564_v14  ;;  %v11016_v48 = vld [vmem:[#allocation5 + $0x374] ss:$36 sps:$4 sm:$0xff]   ;;  %v4582_v40 = vadd.f32 %v12629_v43, %v12332_v38  ;;  %v4586_v43 = vadd.f32 %v12638_v36, %v12339_v54  ;;  %v11439_v54 = vld [vmem:[%s12127_s7 + $0x160] ss:$28 sps:$4 sm:$0xff]  }
 0x21b   : > { %v4758_v27 = vpop.f32.mrf.mxu1  ;;  %5669 = vmatprep.subr.bf16.mxu0 %v10998_v42  ;;  %v4590_v36 = vadd.f32 %v12641_v59, %v12344_v63  ;;  %v4594_v59 = vadd.f32 %v12654_v5, %v12351_v17  ;;  %v11442_v5 = vld [vmem:[%s12127_s7 + $0x350] ss:$28 sps:$4 sm:$0xff]  }
 0x21c   : > { %8767 = vst [vmem:[%s12616_s20 + $0xd8] sm:$0xff] %v9827_v49  ;;  %v4759_v25 = vadd.f32 %v4758_v27, %v4566_v53  ;;  %v12685_v51 = vpop.f32.mrf.mxu0  ;;  %5340 = vmatmul.mubr.bf16.gmra.mxu0 %v11431_v50  ;;  %v11436_v53 = vld [vmem:[%s12127_s7 + $0x31c] ss:$28 sps:$4 sm:$0xff]   ;;  %v11437_v49 = vld [vmem:[%s12127_s7 + $0x164] ss:$28 sps:$4 sm:$0xff]  }
 0x21d   : > { %v4762_v44 = vpop.f32.mrf.mxu1  ;;  %5227 = vmatmul.mubr.bf16.gmra.mxu1 %v11430_v57  ;;  %5349 = vmatprep.mubr.bf16.mxu0 %v11433_v4  ;;  %v11028_v4 = vld [vmem:[#allocation5 + $0x2e4] ss:$36 sps:$4 sm:$0xff]  }
 0x21e   : > { %v9832_v19 = vpack.c.bf16 %v4759_v25, %v4757_v10  ;;  %5236 = vmatprep.mubr.bf16.mxu1 %v11432_v16  ;;  %v12695_v33 = vpop.f32.mrf.mxu0  ;;  %5670 = vmatpush2.bf16.msra.mxu0 %v10996_v47  ;;  %v4763_v23 = vadd.f32 %v4762_v44, %v4570_v15  ;;  %v11014_v10 = vld [vmem:[#allocation5 + $0x370] ss:$36 sps:$4 sm:$0xff]  }
 0x21f   : > { %v4764_v18 = vpop.f32.mrf.mxu1  ;;  %5671 = vmatprep.subr.bf16.mxu0 %v11004_v58  ;;  %v11022_v44 = vld [vmem:[#allocation5 + $0x32c] ss:$36 sps:$4 sm:$0xff]  }
 0x220   : > { %8772 = vst [vmem:[%s12616_s20 + $0xfc] sm:$0xff] %v9832_v19  ;;  %v4765_v55 = vadd.f32 %v4764_v18, %v4572_v6  ;;  %v12698_v62 = vpop.f32.mrf.mxu0  ;;  %v11020_v6 = vld [vmem:[#allocation5 + $0x328] ss:$36 sps:$4 sm:$0xff]  }
 0x221   : > { %v4766_v3 = vpop.f32.mrf.mxu1 }
 0x222   : > { %v9837_v56 = vpack.c.bf16 %v4765_v55, %v4763_v23  ;;  %v12704_v31 = vpop.f32.mrf.mxu0  ;;  %5672 = vmatpush2.bf16.msra.mxu0 %v11002_v24  ;;  %v4767_v34 = vadd.f32 %v4766_v3, %v4574_v41  ;;  %v4592_v24 = vadd.f32 %v12651_v21, %v12348_v12  ;;  %v11440_v55 = vld [vmem:[%s12127_s7 + $0x354] ss:$28 sps:$4 sm:$0xff]   ;;  %v4596_v21 = vadd.f32 %v12660_v26, %v12355_v30 }
 0x223   : > { %v4768_v61 = vpop.f32.mrf.mxu1  ;;  %5673 = vmatprep.subr.bf16.mxu0 %v11010_v13  ;;  %v11441_v13 = vld [vmem:[%s12127_s7 + $0x19c] ss:$28 sps:$4 sm:$0xff]   ;;  %v4600_v30 = vadd.f32 %v12663_v37, %v12360_v39  ;;  %v4602_v26 = vadd.f32 %v12673_v1, %v12364_v52  ;;  %v4604_v37 = vadd.f32 %v12676_v32, %v12367_v60  ;;  %v4606_v1 = vadd.f32 %v12682_v22, %v12371_v7  ;;  %v11445_v60 = vld [vmem:[%s12127_s7 + $0x1d0] ss:$28 sps:$4 sm:$0xff]  }
 0x224   : > { %8777 = vst [vmem:[%s12616_s20 + $0x120] sm:$0xff] %v9837_v56  ;;  %v4769_v0 = vadd.f32 %v4768_v61, %v4576_v2  ;;  %v12707_v42 = vpop.f32.mrf.mxu0  ;;  %5350 = vmatmul.mubr.bf16.gmra.mxu0 %v11435_v20  ;;  %v11026_v2 = vld [vmem:[#allocation5 + $0x2e0] ss:$36 sps:$4 sm:$0xff]   ;;  %v11446_v32 = vld [vmem:[%s12127_s7 + $0x18] ss:$28 sps:$4 sm:$0xff]  }
 0x225   : > { %v4772_v9 = vpop.f32.mrf.mxu1  ;;  %5237 = vmatmul.mubr.bf16.gmra.mxu1 %v11434_v8  ;;  %5359 = vmatprep.mubr.bf16.mxu0 %v11437_v49  ;;  %v11444_v49 = vld [vmem:[%s12127_s7 + $0x1d4] ss:$28 sps:$4 sm:$0xff]  }
 0x226   : > { %v9842_v14 = vpack.c.bf16 %v4769_v0, %v4767_v34  ;;  %5246 = vmatprep.mubr.bf16.mxu1 %v11436_v53  ;;  %v12717_v27 = vpop.f32.mrf.mxu0  ;;  %5674 = vmatpush2.bf16.msra.mxu0 %v11008_v29  ;;  %v4773_v25 = vadd.f32 %v4772_v9, %v4580_v11  ;;  %v11034_v29 = vld [vmem:[#allocation5 + $0x29c] ss:$36 sps:$4 sm:$0xff]   ;;  %v11040_v11 = vld [vmem:[#allocation5 + $0x254] ss:$36 sps:$4 sm:$0xff]  }
 0x227   : > { %v4774_v47 = vpop.f32.mrf.mxu1  ;;  %5675 = vmatprep.subr.bf16.mxu0 %v11016_v48  ;;  %v11032_v9 = vld [vmem:[#allocation5 + $0x298] ss:$36 sps:$4 sm:$0xff]  }
 0x228   : > { %8782 = vst [vmem:[%s12616_s20 + $0x144] sm:$0xff] %v9842_v14  ;;  %v4775_v58 = vadd.f32 %v4774_v47, %v4582_v40  ;;  %v12720_v28 = vpop.f32.mrf.mxu0  ;;  %v11443_v14 = vld [vmem:[%s12127_s7 + $0x198] ss:$28 sps:$4 sm:$0xff]   ;;  %v15784_v47 = vmov 0  }
 0x229   : > { %v4776_v38 = vpop.f32.mrf.mxu1  ;;  %v15785_v7 = vld [vmem:[#allocation13_spill] sm:$0xff] }
 0x22a   : > { %v9847_v57 = vpack.c.bf16 %v4775_v58, %v4773_v25  ;;  %v12726_v50 = vpop.f32.mrf.mxu0  ;;  %5676 = vmatpush2.bf16.msra.mxu0 %v11014_v10  ;;  %v4777_v19 = vadd.f32 %v4776_v38, %v4584_v35  ;;  %v11038_v58 = vld [vmem:[#allocation5 + $0x250] ss:$36 sps:$4 sm:$0xff]   ;;  %v4610_v22 = vadd.f32 %v12685_v51, %v15785_v7 }
 0x22b   : > { %v4778_v15 = vpop.f32.mrf.mxu1  ;;  %5677 = vmatprep.subr.bf16.mxu0 %v11022_v44  ;;  %v11046_v35 = vld [vmem:[#allocation5 + $0xb0c] ss:$36 sps:$4 sm:$0xff]  }
 0x22c   : > { %8787 = vst [vmem:[%s12616_s20 + $0x168] sm:$0xff] %v9847_v57  ;;  %v4779_v16 = vadd.f32 %v4778_v15, %v4586_v43  ;;  %v12729_v18 = vpop.f32.mrf.mxu0  ;;  %5360 = vmatmul.mubr.bf16.gmra.mxu0 %v11439_v54  ;;  %v10999_v57 = vld [vmem:[#allocation5 + $0x688] ss:$36 sps:$4 sm:$0xff]   ;;  %v15786_v54 = vld [vmem:[#allocation14_spill] sm:$0xff] }
 0x22d   : > { %v4782_v46 = vpop.f32.mrf.mxu1  ;;  %5247 = vmatmul.mubr.bf16.gmra.mxu1 %v11438_v45  ;;  %5369 = vmatprep.mubr.bf16.mxu0 %v11441_v13 }
 0x22e   : > { %v9852_v23 = vpack.c.bf16 %v4779_v16, %v4777_v19  ;;  %5256 = vmatprep.mubr.bf16.mxu1 %v11440_v55  ;;  %v12739_v3 = vpop.f32.mrf.mxu0  ;;  %5678 = vmatpush2.bf16.msra.mxu0 %v11020_v6  ;;  %v4783_v56 = vadd.f32 %v4782_v46, %v4590_v36  ;;  %v11007_v19 = vld [vmem:[#allocation5 + $0x644] ss:$36 sps:$4 sm:$0xff]   ;;  %v4612_v36 = vadd.f32 %v12695_v33, %v15786_v54 }
 0x22f   : > { %v4784_v41 = vpop.f32.mrf.mxu1  ;;  %5679 = vmatprep.subr.bf16.mxu0 %v11028_v4  ;;  %v11005_v55 = vld [vmem:[#allocation5 + $0x640] ss:$36 sps:$4 sm:$0xff]  }
 0x230   : > { %8792 = vst [vmem:[%s12616_s20 + $0x18c] sm:$0xff] %v9852_v23  ;;  %v4785_v61 = vadd.f32 %v4784_v41, %v4592_v24  ;;  %v12742_v63 = vpop.f32.mrf.mxu0  ;;  %v11447_v23 = vld [vmem:[%s12127_s7 + $0x20c] ss:$28 sps:$4 sm:$0xff]  }
 0x231   : > { %v4786_v12 = vpop.f32.mrf.mxu1  ;;  %v15787_v33 = vld [vmem:[#allocation15_spill] sm:$0xff] }
 0x232   : > { %v9857_v34 = vpack.c.bf16 %v4785_v61, %v4783_v56  ;;  %v12748_v0 = vpop.f32.mrf.mxu0  ;;  %5680 = vmatpush2.bf16.msra.mxu0 %v11026_v2  ;;  %v4787_v8 = vadd.f32 %v4786_v12, %v4594_v59  ;;  %v11013_v2 = vld [vmem:[#allocation5 + $0x5fc] ss:$36 sps:$4 sm:$0xff]   ;;  %v4614_v12 = vadd.f32 %v12698_v62, %v15787_v33  ;;  %v15788_v59 = vld [vmem:[#allocation16_spill] sm:$0xff] }
 0x233   : > { %v4788_v48 = vpop.f32.mrf.mxu1  ;;  %5681 = vmatprep.subr.bf16.mxu0 %v11034_v29  ;;  %v11448_v62 = vld [vmem:[%s12127_s7 + $0x208] ss:$28 sps:$4 sm:$0xff]  }
 0x234   : > { %8797 = vst [vmem:[%s12616_s20 + $0x1b0] sm:$0xff] %v9857_v34  ;;  %v4789_v20 = vadd.f32 %v4788_v48, %v4596_v21  ;;  %v12751_v40 = vpop.f32.mrf.mxu0  ;;  %5370 = vmatmul.mubr.bf16.gmra.mxu0 %v11443_v14  ;;  %v4616_v21 = vadd.f32 %v12704_v31, %v15788_v59  ;;  %v15789_v31 = vld [vmem:[#allocation17_spill] sm:$0xff]  ;;  %v11029_v33 = vld [vmem:[#allocation5 + $0x520] ss:$36 sps:$4 sm:$0xff]  }
 0x235   : > { %v4792_v17 = vpop.f32.mrf.mxu1  ;;  %5257 = vmatmul.mubr.bf16.gmra.mxu1 %v11442_v5  ;;  %5379 = vmatprep.mubr.bf16.mxu0 %v11444_v49 }
 0x236   : > { %v9862_v53 = vpack.c.bf16 %v4789_v20, %v4787_v8  ;;  %5492 = vmatprep.mubr.bf16.mxu1 %v15784_v47  ;;  %v12761_v10 = vpop.f32.mrf.mxu0  ;;  %5682 = vmatpush2.bf16.msra.mxu0 %v11032_v9  ;;  %v4793_v44 = vadd.f32 %v4792_v17, %v4600_v30  ;;  %v11011_v8 = vld [vmem:[#allocation5 + $0x5f8] ss:$36 sps:$4 sm:$0xff]   ;;  %v11449_v30 = vld [vmem:[%s12127_s7 + $0x50] ss:$28 sps:$4 sm:$0xff]  }
 0x237   : > { %v4794_v25 = vpop.f32.mrf.mxu1  ;;  %5683 = vmatprep.subr.bf16.mxu0 %v11040_v11  ;;  %v11019_v17 = vld [vmem:[#allocation5 + $0x5b4] ss:$36 sps:$4 sm:$0xff]  }
 0x238   : > { %8802 = vst [vmem:[%s12616_s20 + $0x1d4] sm:$0xff] %v9862_v53  ;;  %v4795_v38 = vadd.f32 %v4794_v25, %v4602_v26  ;;  %v12764_v39 = vpop.f32.mrf.mxu0  ;;  %v4620_v26 = vadd.f32 %v12707_v42, %v15789_v31  ;;  %v15790_v53 = vld [vmem:[#allocation18_spill] sm:$0xff] }
 0x239   : > { %v4796_v52 = vpop.f32.mrf.mxu1  ;;  %v4622_v49 = vadd.f32 %v12717_v27, %v15790_v53  ;;  %v15791_v27 = vld [vmem:[#allocation19_spill] sm:$0xff] }
 0x23a   : > { %v9867_v43 = vpack.c.bf16 %v4795_v38, %v4793_v44  ;;  %v12770_v15 = vpop.f32.mrf.mxu0  ;;  %5684 = vmatpush2.bf16.msra.mxu0 %v11038_v58  ;;  %v4797_v16 = vadd.f32 %v4796_v52, %v4604_v37  ;;  %v11450_v58 = vld [vmem:[%s12127_s7 + $0x244] ss:$28 sps:$4 sm:$0xff]  }
 0x23b   : > { %v4798_v6 = vpop.f32.mrf.mxu1  ;;  %6039 = vmatprep.subr.bf16.mxu0 %v11046_v35  ;;  %v11017_v35 = vld [vmem:[#allocation5 + $0x5b0] ss:$36 sps:$4 sm:$0xff]  }
 0x23c   : > { %8807 = vst [vmem:[%s12616_s20 + $0x1f8] sm:$0xff] %v9867_v43  ;;  %v4799_v4 = vadd.f32 %v4798_v6, %v4606_v1  ;;  %v12773_v45 = vpop.f32.mrf.mxu0  ;;  %5380 = vmatmul.mubr.bf16.gmra.mxu0 %v11445_v60  ;;  %v11025_v1 = vld [vmem:[#allocation5 + $0x56c] ss:$36 sps:$4 sm:$0xff]  }
 0x23d   : > { %v4802_v46 = vpop.f32.mrf.mxu1  ;;  %5493 = vmatmul.mubr.bf16.vlgmr.msra.gmra.mxu1 %v11446_v32  ;;  %5389 = vmatprep.mubr.bf16.mxu0 %v11447_v23  ;;  %v15792_v6 = vld [vmem:[#allocation20_spill] sm:$0xff] }
 0x23e   : > { %v9872_v24 = vpack.c.bf16 %v4799_v4, %v4797_v16  ;;  %5847 = vmatpush1.bf16.msra.mxu1 %v10999_v57  ;;  %v12782_v41 = vpop.f32.mrf.mxu0  ;;  %5502 = vmatprep.mubr.bf16.mxu1 %v15784_v47  ;;  %v4803_v56 = vadd.f32 %v4802_v46, %v4610_v22  ;;  %v4624_v57 = vadd.f32 %v12720_v28, %v15791_v27  ;;  %v11023_v60 = vld [vmem:[#allocation5 + $0x568] ss:$36 sps:$4 sm:$0xff]   ;;  %v11451_v28 = vld [vmem:[%s12127_s7 + $0x240] ss:$28 sps:$4 sm:$0xff]   ;;  %v11041_v27 = vld [vmem:[#allocation5 + $0x490] ss:$36 sps:$4 sm:$0xff]  }
 0x23f   : > { %v4804_v13 = vpop.f32.mrf.mxu1  ;;  %5848 = vmatprep.subr.bf16.mxu1 %v11007_v19  ;;  %v4626_v19 = vadd.f32 %v12726_v50, %v15792_v6  ;;  %v11031_v22 = vld [vmem:[#allocation5 + $0x524] ss:$36 sps:$4 sm:$0xff]   ;;  %v15793_v50 = vld [vmem:[#allocation21_spill] sm:$0xff] }
 0x240   : > { %8812 = vst [vmem:[%s12616_s20 + $0x21c] sm:$0xff] %v9872_v24  ;;  %v4805_v61 = vadd.f32 %v4804_v13, %v4612_v36  ;;  %v12786_v29 = vpop.f32.mrf.mxu0  ;;  %v11452_v24 = vld [vmem:[%s12127_s7 + $0x88] ss:$28 sps:$4 sm:$0xff]   ;;  %v4630_v23 = vadd.f32 %v12729_v18, %v15793_v50 }
 0x241   : > { %v4806_v51 = vpop.f32.mrf.mxu1 }
 0x242   : > { %v9877_v34 = vpack.c.bf16 %v4805_v61, %v4803_v56  ;;  %5849 = vmatpush1.bf16.msra.mxu1 %v11005_v55  ;;  %v12792_v9 = vpop.f32.mrf.mxu0  ;;  %v4807_v20 = vadd.f32 %v4806_v51, %v4614_v12  ;;  %v15794_v55 = vld [vmem:[#allocation22_spill] sm:$0xff] }
 0x243   : > { %v4808_v48 = vpop.f32.mrf.mxu1  ;;  %5850 = vmatprep.subr.bf16.mxu1 %v11013_v2  ;;  %v4632_v13 = vadd.f32 %v12739_v3, %v15794_v55  ;;  %v11453_v56 = vld [vmem:[%s12127_s7 + $0x27c] ss:$28 sps:$4 sm:$0xff]   ;;  %v15795_v3 = vld [vmem:[#allocation23_spill] sm:$0xff] }
 0x244   : > { %8817 = vst [vmem:[%s12616_s20 + $0x240] sm:$0xff] %v9877_v34  ;;  %v4809_v11 = vadd.f32 %v4808_v48, %v4616_v21  ;;  %v12795_v14 = vpop.f32.mrf.mxu0  ;;  %5390 = vmatmul.mubr.bf16.gmra.mxu0 %v11448_v62  ;;  %v11037_v21 = vld [vmem:[#allocation5 + $0x4dc] ss:$36 sps:$4 sm:$0xff]   ;;  %v4634_v48 = vadd.f32 %v12742_v63, %v15795_v3  ;;  %v11454_v63 = vld [vmem:[%s12127_s7 + $0x278] ss:$28 sps:$4 sm:$0xff]  }
 0x245   : > { %v4812_v5 = vpop.f32.mrf.mxu1  ;;  %5503 = vmatmul.mubr.bf16.gmra.mxu1 %v11449_v30  ;;  %5399 = vmatprep.mubr.bf16.mxu0 %v11450_v58  ;;  %v11035_v62 = vld [vmem:[#allocation5 + $0x4d8] ss:$36 sps:$4 sm:$0xff]  }
 0x246   : > { %v9882_v25 = vpack.c.bf16 %v4809_v11, %v4807_v20  ;;  %5512 = vmatprep.mubr.bf16.mxu1 %v15784_v47  ;;  %v12805_v38 = vpop.f32.mrf.mxu0  ;;  %5851 = vmatpush1.bf16.msra.mxu1 %v11011_v8  ;;  %v4813_v52 = vadd.f32 %v4812_v5, %v4620_v26  ;;  %v15796_v8 = vld [vmem:[#allocation24_spill] sm:$0xff]  ;;  %v11043_v26 = vld [vmem:[#allocation5 + $0x494] ss:$36 sps:$4 sm:$0xff]  }
 0x247   : > { %v4814_v44 = vpop.f32.mrf.mxu1  ;;  %5852 = vmatprep.subr.bf16.mxu1 %v11019_v17  ;;  %v4636_v20 = vadd.f32 %v12748_v0, %v15796_v8  ;;  %v15797_v0 = vld [vmem:[#allocation25_spill] sm:$0xff] }
 0x248   : > { %8822 = vst [vmem:[%s12616_s20 + $0x264] sm:$0xff] %v9882_v25  ;;  %v4815_v37 = vadd.f32 %v4814_v44, %v4622_v49  ;;  %v12808_v43 = vpop.f32.mrf.mxu0  ;;  %v11455_v25 = vld [vmem:[%s12127_s7 + $0xc0] ss:$28 sps:$4 sm:$0xff]   ;;  %v4640_v58 = vadd.f32 %v12751_v40, %v15797_v0 }
 0x249   : > { %v4816_v42 = vpop.f32.mrf.mxu1  ;;  %v15798_v44 = vld [vmem:[#allocation26_spill] sm:$0xff] }
 0x24a   : > { %v9887_v16 = vpack.c.bf16 %v4815_v37, %v4813_v52  ;;  %v12814_v46 = vpop.f32.mrf.mxu0  ;;  %5853 = vmatpush1.bf16.msra.mxu1 %v11017_v35  ;;  %v4817_v32 = vadd.f32 %v4816_v42, %v4624_v57  ;;  %v4642_v35 = vadd.f32 %v12761_v10, %v15798_v44  ;;  %v11456_v37 = vld [vmem:[%s12127_s7 + $0x2b4] ss:$28 sps:$4 sm:$0xff]   ;;  %v15799_v10 = vld [vmem:[#allocation27_spill] sm:$0xff] }
 0x24b   : > { %v4818_v4 = vpop.f32.mrf.mxu1  ;;  %5854 = vmatprep.subr.bf16.mxu1 %v11025_v1  ;;  %v11460_v44 = vld [vmem:[%s12127_s7 + $0x2e8] ss:$28 sps:$4 sm:$0xff]  }
 0x24c   : > { %8827 = vst [vmem:[%s12616_s20 + $0x288] sm:$0xff] %v9887_v16  ;;  %v4819_v7 = vadd.f32 %v4818_v4, %v4626_v19  ;;  %v12817_v36 = vpop.f32.mrf.mxu0  ;;  %5400 = vmatmul.mubr.bf16.gmra.mxu0 %v11451_v28  ;;  %v11049_v19 = vld [vmem:[#allocation5 + $0x8cc] ss:$36 sps:$4 sm:$0xff]   ;;  %v4644_v4 = vadd.f32 %v12764_v39, %v15799_v10 }
 0x24d   : > { %v4822_v54 = vpop.f32.mrf.mxu1  ;;  %5513 = vmatmul.mubr.bf16.gmra.mxu1 %v11452_v24  ;;  %5409 = vmatprep.mubr.bf16.mxu0 %v11453_v56  ;;  %v11047_v28 = vld [vmem:[#allocation5 + $0x8c8] ss:$36 sps:$4 sm:$0xff]  }
 0x24e   : > { %v9892_v2 = vpack.c.bf16 %v4819_v7, %v4817_v32  ;;  %5522 = vmatprep.mubr.bf16.mxu1 %v15784_v47  ;;  %v12827_v51 = vpop.f32.mrf.mxu0  ;;  %5855 = vmatpush1.bf16.msra.mxu1 %v11023_v60  ;;  %v4823_v12 = vadd.f32 %v4822_v54, %v4630_v23  ;;  %v15800_v60 = vld [vmem:[#allocation28_spill] sm:$0xff] }
 0x24f   : > { %v4824_v61 = vpop.f32.mrf.mxu1  ;;  %5856 = vmatprep.subr.bf16.mxu1 %v11031_v22  ;;  %v4646_v32 = vadd.f32 %v12770_v15, %v15800_v60  ;;  %v11055_v23 = vld [vmem:[#allocation5 + $0x884] ss:$36 sps:$4 sm:$0xff]   ;;  %v11457_v39 = vld [vmem:[%s12127_s7 + $0x2b0] ss:$28 sps:$4 sm:$0xff]  }
 0x250   : > { %8832 = vst [vmem:[%s12616_s20 + $0x2ac] sm:$0xff] %v9892_v2  ;;  %v4825_v59 = vadd.f32 %v4824_v61, %v4632_v13  ;;  %v12830_v34 = vpop.f32.mrf.mxu0  ;;  %v11458_v2 = vld [vmem:[%s12127_s7 + $0xf8] ss:$28 sps:$4 sm:$0xff]   ;;  %v11459_v56 = vld [vmem:[%s12127_s7 + $0x2ec] ss:$28 sps:$4 sm:$0xff]  }
 0x251   : > { %v4826_v18 = vpop.f32.mrf.mxu1 }
 0x252   : > { %v9897_v11 = vpack.c.bf16 %v4825_v59, %v4823_v12  ;;  %v12836_v5 = vpop.f32.mrf.mxu0  ;;  %5857 = vmatpush1.bf16.msra.mxu1 %v11029_v33  ;;  %v4827_v30 = vadd.f32 %v4826_v18, %v4634_v48  ;;  %v11053_v12 = vld [vmem:[#allocation5 + $0x880] ss:$36 sps:$4 sm:$0xff]   ;;  %v15801_v59 = vld [vmem:[#allocation29_spill] sm:$0xff] }
 0x253   : > { %v4828_v17 = vpop.f32.mrf.mxu1  ;;  %5858 = vmatprep.subr.bf16.mxu1 %v11037_v21  ;;  %v15802_v18 = vld [vmem:[#allocation30_spill] sm:$0xff] }
 0x254   : > { %8837 = vst [vmem:[%s12616_s20 + $0x2d0] sm:$0xff] %v9897_v11  ;;  %v4829_v31 = vadd.f32 %v4828_v17, %v4636_v20  ;;  %v12839_v49 = vpop.f32.mrf.mxu0  ;;  %5410 = vmatmul.mubr.bf16.gmra.mxu0 %v11454_v63  ;;  %v11061_v48 = vld [vmem:[#allocation5 + $0x83c] ss:$36 sps:$4 sm:$0xff]  }
 0x255   : > { %v4832_v53 = vpop.f32.mrf.mxu1  ;;  %5523 = vmatmul.mubr.bf16.gmra.mxu1 %v11455_v25  ;;  %5419 = vmatprep.mubr.bf16.mxu0 %v11456_v37  ;;  %v11067_v25 = vld [vmem:[#allocation5 + $0x7f4] ss:$36 sps:$4 sm:$0xff]   ;;  %v11462_v37 = vld [vmem:[%s12127_s7 + $0x324] ss:$28 sps:$4 sm:$0xff]  }
 0x256   : > { %v9902_v52 = vpack.c.bf16 %v4829_v31, %v4827_v30  ;;  %5532 = vmatprep.mubr.bf16.mxu1 %v15784_v47  ;;  %v12849_v42 = vpop.f32.mrf.mxu0  ;;  %5859 = vmatpush1.bf16.msra.mxu1 %v11035_v62  ;;  %v4833_v57 = vadd.f32 %v4832_v53, %v4640_v58  ;;  %v11059_v30 = vld [vmem:[#allocation5 + $0x838] ss:$36 sps:$4 sm:$0xff]   ;;  %v15803_v31 = vld [vmem:[#allocation31_spill] sm:$0xff]  ;;  %v15804_v53 = vld [vmem:[#allocation32_spill] sm:$0xff] }
 0x257   : > { %v4834_v1 = vpop.f32.mrf.mxu1  ;;  %5860 = vmatprep.subr.bf16.mxu1 %v11043_v26 }
 0x258   : > { %8842 = vst [vmem:[%s12616_s20 + $0x2f4] sm:$0xff] %v9902_v52  ;;  %v4835_v6 = vadd.f32 %v4834_v1, %v4642_v35  ;;  %v12852_v16 = vpop.f32.mrf.mxu0  ;;  %v11461_v35 = vld [vmem:[%s12127_s7 + $0x130] ss:$28 sps:$4 sm:$0xff]  }
 0x259   : > { %v4836_v40 = vpop.f32.mrf.mxu1 }
 0x25a   : > { %v9907_v7 = vpack.c.bf16 %v4835_v6, %v4833_v57  ;;  %v12858_v54 = vpop.f32.mrf.mxu0  ;;  %5861 = vmatpush1.bf16.msra.mxu1 %v11041_v27  ;;  %v4837_v24 = vadd.f32 %v4836_v40, %v4644_v4  ;;  %v11065_v57 = vld [vmem:[#allocation5 + $0x7f0] ss:$36 sps:$4 sm:$0xff]   ;;  %v15806_v40 = vld [vmem:[#allocation34_spill] sm:$0xff] }
 0x25b   : > { %v4838_v22 = vpop.f32.mrf.mxu1  ;;  %5862 = vmatprep.subr.bf16.mxu1 %v11049_v19  ;;  %v15805_v6 = vld [vmem:[#allocation33_spill] sm:$0xff] }
 0x25c   : > { %8847 = vst [vmem:[%s12616_s20 + $0x318] sm:$0xff] %v9907_v7  ;;  %v4839_v50 = vadd.f32 %v4838_v22, %v4646_v32  ;;  %v12861_v13 = vpop.f32.mrf.mxu0  ;;  %5420 = vmatmul.mubr.bf16.gmra.mxu0 %v11457_v39  ;;  %v11073_v4 = vld [vmem:[#allocation5 + $0x7ac] ss:$36 sps:$4 sm:$0xff]  }
 0x25d   : > { %v4842_v55 = vpop.f32.mrf.mxu1  ;;  %5533 = vmatmul.mubr.bf16.gmra.mxu1 %v11458_v2  ;;  %5429 = vmatprep.mubr.bf16.mxu0 %v11459_v56  ;;  %v11079_v2 = vld [vmem:[#allocation5 + $0x764] ss:$36 sps:$4 sm:$0xff]  }
 0x25e   : > { %v9912_v15 = vpack.c.bf16 %v4839_v50, %v4837_v24  ;;  %5542 = vmatprep.mubr.bf16.mxu1 %v15784_v47  ;;  %v12867_v33 = vpop.f32.mrf.mxu0  ;;  %5863 = vmatpush2.bf16.msra.mxu1 %v11047_v28  ;;  %v4843_v21 = vadd.f32 %v4842_v55, %v15801_v59  ;;  %v11071_v24 = vld [vmem:[#allocation5 + $0x7a8] ss:$36 sps:$4 sm:$0xff]  }
 0x25f   : > { %v4844_v61 = vpop.f32.mrf.mxu1  ;;  %5864 = vmatprep.subr.bf16.mxu1 %v11055_v23  ;;  %v15807_v50 = vld [vmem:[#allocation35_spill] sm:$0xff]  ;;  %v15808_v55 = vld [vmem:[#allocation36_spill] sm:$0xff] }
 0x260   : > { %8852 = vst [vmem:[%s12616_s20 + $0x33c] sm:$0xff] %v9912_v15  ;;  %v4845_v3 = vadd.f32 %v4844_v61, %v15802_v18  ;;  %v12872_v20 = vpop.f32.mrf.mxu0  ;;  %v11463_v61 = vld [vmem:[%s12127_s7 + $0x320] ss:$28 sps:$4 sm:$0xff]  }
 0x261   : > { %v4846_v8 = vpop.f32.mrf.mxu1 }
 0x262   : > { %v9917_v11 = vpack.c.bf16 %v4845_v3, %v4843_v21  ;;  %v12874_v62 = vpop.f32.mrf.mxu0  ;;  %5865 = vmatpush2.bf16.msra.mxu1 %v11053_v12  ;;  %v4847_v26 = vadd.f32 %v4846_v8, %v15803_v31  ;;  %v11464_v12 = vld [vmem:[%s12127_s7 + $0x168] ss:$28 sps:$4 sm:$0xff]   ;;  %v11465_v21 = vld [vmem:[%s12127_s7 + $0x35c] ss:$28 sps:$4 sm:$0xff]  }
 0x263   : > { %v4848_v17 = vpop.f32.mrf.mxu1  ;;  %5866 = vmatprep.subr.bf16.mxu1 %v11061_v48  ;;  %v11077_v48 = vld [vmem:[#allocation5 + $0x760] ss:$36 sps:$4 sm:$0xff]   ;;  %v15809_v8 = vld [vmem:[#allocation37_spill] sm:$0xff] }
 0x264   : > { %8857 = vst [vmem:[%s12616_s20 + $0x360] sm:$0xff] %v9917_v11  ;;  %v4849_v63 = vadd.f32 %v4848_v17, %v15804_v53  ;;  %v12879_v58 = vpop.f32.mrf.mxu0  ;;  %5430 = vmatmul.mubr.bf16.gmra.mxu0 %v11460_v44  ;;  %v15810_v17 = vld [vmem:[#allocation38_spill] sm:$0xff] }
 0x265   : > { %v4852_v0 = vpop.f32.mrf.mxu1  ;;  %5543 = vmatmul.mubr.bf16.gmra.mxu1 %v11461_v35  ;;  %5439 = vmatprep.mubr.bf16.mxu0 %v11462_v37  ;;  %v11085_v31 = vld [vmem:[#allocation5 + $0x71c] ss:$36 sps:$4 sm:$0xff]   ;;  %v15811_v35 = vld [vmem:[#allocation12_spill] sm:$0xff] }
 0x266   : > { %v9922_v52 = vpack.c.bf16 %v4849_v63, %v4847_v26  ;;  %5552 = vmatprep.mubr.bf16.mxu1 %v15784_v47  ;;  %v12885_v27 = vpop.f32.mrf.mxu0  ;;  %5867 = vmatpush2.bf16.msra.mxu1 %v11059_v30  ;;  %v4853_v19 = vadd.f32 %v4852_v0, %v15805_v6  ;;  %v11083_v44 = vld [vmem:[#allocation5 + $0x718] ss:$36 sps:$4 sm:$0xff]   ;;  %v15812_v37 = vld [vmem:[#allocation39_spill] sm:$0xff] }
 0x267   : > { %v4854_v1 = vpop.f32.mrf.mxu1  ;;  %5868 = vmatprep.subr.bf16.mxu1 %v11067_v25 }
 0x268   : > { %8862 = vst [vmem:[%s12616_s20 + $0x384] sm:$0xff] %v9922_v52  ;;  %v4855_v10 = vadd.f32 %v4854_v1, %v15806_v40  ;;  %v12890_v32 = vpop.f32.mrf.mxu0  ;;  %v922_v52 = vsub.s32 2, %v15811_v35 }
 0x269   : > { %v4856_v60 = vpop.f32.mrf.mxu1 }
 0x26a   : > { %v9927_v7 = vpack.c.bf16 %v4855_v10, %v4853_v19  ;;  %v12892_v28 = vpop.f32.mrf.mxu0  ;;  %5869 = vmatpush2.bf16.msra.mxu1 %v11065_v57  ;;  %v4857_v23 = vadd.f32 %v4856_v60, %v15807_v50  ;;  %v15813_v57 = vld [vmem:[#allocation40_spill] sm:$0xff]  ;;  %v11091_v19 = vld [vmem:[#allocation5 + $0x6d4] ss:$36 sps:$4 sm:$0xff]   ;;  %v11467_v60 = vld [vmem:[%s12127_s7 + $0x1a0] ss:$28 sps:$4 sm:$0xff]  }
 0x26b   : > { %v4858_v22 = vpop.f32.mrf.mxu1  ;;  %5870 = vmatprep.subr.bf16.mxu1 %v11073_v4  ;;  %v11466_v4 = vld [vmem:[%s12127_s7 + $0x358] ss:$28 sps:$4 sm:$0xff]  }
 0x26c   : > { %8867 = vst [vmem:[%s12616_s20 + $0x3a8] sm:$0xff] %v9927_v7  ;;  %v4859_v39 = vadd.f32 %v4858_v22, %v15808_v55  ;;  %v12897_v56 = vpop.f32.mrf.mxu0  ;;  %5440 = vmatmul.mubr.bf16.gmra.mxu0 %v11463_v61  ;;  %v926_v7 = vsub.s32 3, %v15811_v35  ;;  %v11089_v55 = vld [vmem:[#allocation5 + $0x6d0] ss:$36 sps:$4 sm:$0xff]  }
 0x26d   : > { %v4862_v15 = vpop.f32.mrf.mxu1  ;;  %5553 = vmatmul.mubr.bf16.gmra.mxu1 %v11464_v12  ;;  %5449 = vmatprep.mubr.bf16.mxu0 %v11465_v21  ;;  %v15815_v12 = vld [vmem:[#allocation42_spill] sm:$0xff]  ;;  %v11097_v21 = vld [vmem:[#allocation5 + $0xf8c] ss:$36 sps:$4 sm:$0xff]  }
 0x26e   : > { %v9932_v59 = vpack.c.bf16 %v4859_v39, %v4857_v23  ;;  %5562 = vmatprep.mubr.bf16.mxu1 %v15784_v47  ;;  %v12903_v3 = vpop.f32.mrf.mxu0  ;;  %5871 = vmatpush2.bf16.msra.mxu1 %v11071_v24  ;;  %v4863_v11 = vadd.f32 %v4862_v15, %v15809_v8  ;;  %v11468_v24 = vld [vmem:[%s12127_s7 + $0x4] ss:$28 sps:$4 sm:$0xff]   ;;  %v15814_v15 = vld [vmem:[#allocation41_spill] sm:$0xff] }
 0x26f   : > { %v4864_v18 = vpop.f32.mrf.mxu1  ;;  %5872 = vmatprep.subr.bf16.mxu1 %v11079_v2  ;;  %v11469_v39 = vld [vmem:[#allocation7] sm:$0xff]  ;;  %v11482_v35 = vld [vmem:[%s12127_s7 + $0x2b8] ss:$28 sps:$4 sm:$0xff]  }
 0x270   : > { %8872 = vst [vmem:[%s12616_s20 + $0x3cc] sm:$0xff] %v9932_v59  ;;  %v4865_v30 = vadd.f32 %v4864_v18, %v15810_v17  ;;  %v12908_v53 = vpop.f32.mrf.mxu0  ;;  %v12925_v2 = vrot.slane %v11469_v39, %v922_v52  ;;  %v12932_v8 = vrot.slane %v11469_v39, %v926_v7  ;;  %v11044_v17 = vld [vmem:[#allocation5 + $0xb08] ss:$36 sps:$4 sm:$0xff]  }
 0x271   : > { %v4866_v26 = vpop.f32.mrf.mxu1  ;;  %v15817_v52 = vld [vmem:[#allocation44_spill] sm:$0xff] }
 0x272   : > { %v9937_v63 = vpack.c.bf16 %v4865_v30, %v4863_v11  ;;  %v12910_v0 = vpop.f32.mrf.mxu0  ;;  %5873 = vmatpush2.bf16.msra.mxu1 %v11077_v48  ;;  %v4867_v1 = vadd.f32 %v4866_v26, %v15812_v37  ;;  %v11052_v26 = vld [vmem:[#allocation5 + $0xac4] ss:$36 sps:$4 sm:$0xff]  }
 0x273   : > { %v4868_v25 = vpop.f32.mrf.mxu1  ;;  %5874 = vmatprep.subr.bf16.mxu1 %v11085_v31 }
 0x274   : > { %8877 = vst [vmem:[%s12616_s20 + $0x3f0] sm:$0xff] %v9937_v63  ;;  %v4869_v6 = vadd.f32 %v4868_v25, %v15813_v57  ;;  %v12916_v10 = vpop.f32.mrf.mxu0  ;;  %5450 = vmatmul.mubr.bf16.gmra.mxu0 %v11466_v4  ;;  %v4916_v63 = vadd.f32 %v12773_v45, %v12925_v2  ;;  %v15816_v25 = vld [vmem:[#allocation43_spill] sm:$0xff] }
 0x275   : > { %v4872_v40 = vpop.f32.mrf.mxu1  ;;  %5563 = vmatmul.mubr.bf16.gmra.mxu1 %v11467_v60  ;;  %5685 = vmatprep.mubr.bf16.mxu0 %v11468_v24  ;;  %v11050_v60 = vld [vmem:[#allocation5 + $0xac0] ss:$36 sps:$4 sm:$0xff]   ;;  %v11472_v24 = vld [vmem:[%s12127_s7 + $0x3c] ss:$28 sps:$4 sm:$0xff]  }
 0x276   : > { %v9942_v22 = vpack.c.bf16 %v4869_v6, %v4867_v1  ;;  %5572 = vmatprep.mubr.bf16.mxu1 %v15784_v47  ;;  %v12923_v23 = vpop.f32.mrf.mxu0  ;;  %5875 = vmatpush2.bf16.msra.mxu1 %v11083_v44  ;;  %v4873_v61 = vadd.f32 %v4872_v40, %v15814_v15  ;;  %v11470_v6 = vld [vmem:[%s12127_s7 + $0x1d8] ss:$28 sps:$4 sm:$0xff]   ;;  %v4918_v40 = vadd.f32 %v12782_v41, %v12932_v8 }
 0x277   : > { %v4874_v50 = vpop.f32.mrf.mxu1  ;;  %5876 = vmatprep.subr.bf16.mxu1 %v11091_v19  ;;  %v11471_v19 = vld [vmem:[%s12127_s7] ss:$28 sps:$4 sm:$0xff]  }
 0x278   : > { %8882 = vst [vmem:[%s12616_s20 + $0x414] sm:$0xff] %v9942_v22  ;;  %v4875_v59 = vadd.f32 %v4874_v50, %v15815_v12  ;;  %v12930_v48 = vpop.f32.mrf.mxu0  ;;  %v11058_v50 = vld [vmem:[#allocation5 + $0xa7c] ss:$36 sps:$4 sm:$0xff]  }
 0x279   : > { %v4876_v18 = vpop.f32.mrf.mxu1 }
 0x27a   : > { %v9947_v11 = vpack.c.bf16 %v4875_v59, %v4873_v61  ;;  %v12934_v31 = vpop.f32.mrf.mxu0  ;;  %5877 = vmatpush2.bf16.msra.mxu1 %v11089_v55  ;;  %v4877_v44 = vadd.f32 %v4876_v18, %v15816_v25  ;;  %v4920_v55 = vadd.f32 %v12786_v29, %v12925_v2  ;;  %v4922_v61 = vadd.f32 %v12792_v9, %v12932_v8  ;;  %v11056_v18 = vld [vmem:[#allocation5 + $0xa78] ss:$36 sps:$4 sm:$0xff]  }
 0x27b   : > { %v4878_v30 = vpop.f32.mrf.mxu1  ;;  %6232 = vmatprep.subr.bf16.mxu1 %v11097_v21  ;;  %v4926_v29 = vadd.f32 %v12795_v14, %v12925_v2  ;;  %v11474_v9 = vld [vmem:[%s12127_s7 + $0x38] ss:$28 sps:$4 sm:$0xff]   ;;  %v4928_v25 = vadd.f32 %v12805_v38, %v12932_v8 }
 0x27c   : > { %8887 = vst [vmem:[%s12616_s20 + $0x438] sm:$0xff] %v9947_v11  ;;  %v4879_v37 = vadd.f32 %v4878_v30, %v15817_v52  ;;  %v12941_v1 = vpop.f32.mrf.mxu0  ;;  %5686 = vmatmul.mubr.bf16.vlgmr.msra.gmra.mxu0 %v11471_v19  ;;  %v11475_v52 = vld [vmem:[%s12127_s7 + $0x74] ss:$28 sps:$4 sm:$0xff]  }
 0x27d   : > { %v5108_v57 = vpop.f32.mrf.mxu1  ;;  %5573 = vmatmul.mubr.bf16.gmra.mxu1 %v11470_v6  ;;  %6040 = vmatpush1.bf16.msra.mxu0 %v11044_v17  ;;  %v11064_v17 = vld [vmem:[#allocation5 + $0xa34] ss:$36 sps:$4 sm:$0xff]   ;;  %v4930_v6 = vadd.f32 %v12808_v43, %v12925_v2  ;;  %v11068_v43 = vld [vmem:[#allocation5 + $0x9e8] ss:$36 sps:$4 sm:$0xff]  }
 0x27e   : > { %v9952_v4 = vpack.c.bf16 %v4879_v37, %v4877_v44  ;;  %v12947_v45 = vadd.f32 %v5108_v57, %v4916_v63  ;;  %5582 = vmatprep.mubr.bf16.mxu1 %v15784_v47  ;;  %v12950_v7 = vpop.f32.mrf.mxu0  ;;  %5695 = vmatprep.mubr.bf16.mxu0 %v11472_v24  ;;  %v11473_v63 = vld [vmem:[%s12127_s7 + $0x210] ss:$28 sps:$4 sm:$0xff]  }
 0x27f   : > { %v5110_v22 = vpop.f32.mrf.mxu1  ;;  %6041 = vmatprep.subr.bf16.mxu0 %v11052_v26  ;;  %v11062_v57 = vld [vmem:[#allocation5 + $0xa30] ss:$36 sps:$4 sm:$0xff]  }
 0x280   : > { %8892 = vst [vmem:[%s12616_s20 + $0x45c] sm:$0xff] %v9952_v4  ;;  %v12956_v41 = vadd.f32 %v5110_v22, %v4918_v40  ;;  %v12958_v39 = vpop.f32.mrf.mxu0  ;;  %v11070_v40 = vld [vmem:[#allocation5 + $0x9ec] ss:$36 sps:$4 sm:$0xff]  }
 0x281   : > { %v5112_v15 = vpop.f32.mrf.mxu1  ;;  %6042 = vmatpush1.bf16.msra.mxu0 %v11050_v60  ;;  %v4932_v60 = vadd.f32 %v12814_v46, %v12932_v8  ;;  %v11477_v46 = vld [vmem:[%s12127_s7 + $0x70] ss:$28 sps:$4 sm:$0xff]  }
 0x282   : > { %15818 = vst [vmem:[#allocation13_spill] sm:$0xff] %v12956_v41  ;;  %v12962_v12 = vadd.f32 %v5112_v15, %v4920_v55  ;;  %v12964_v59 = vpop.f32.mrf.mxu0  ;;  %6043 = vmatprep.subr.bf16.mxu0 %v11058_v50  ;;  %v4936_v55 = vadd.f32 %v12817_v36, %v12925_v2  ;;  %v11495_v41 = vld [vmem:[%s12127_s7 + $0x1c0] ss:$28 sps:$4 sm:$0xff]  }
 0x283   : > { %v5114_v21 = vpop.f32.mrf.mxu1 }
 0x284   : > { %v12968_v11 = vadd.f32 %v5114_v21, %v4922_v61  ;;  %v12970_v30 = vpop.f32.mrf.mxu0  ;;  %5696 = vmatmul.mubr.bf16.gmra.mxu0 %v11474_v9  ;;  %v11076_v61 = vld [vmem:[#allocation5 + $0x9a4] ss:$36 sps:$4 sm:$0xff]  }
 0x285   : > { %v5118_v26 = vpop.f32.mrf.mxu1  ;;  %5583 = vmatmul.mubr.bf16.gmra.mxu1 %v11473_v63  ;;  %5705 = vmatprep.mubr.bf16.mxu0 %v11475_v52  ;;  %v11478_v63 = vld [vmem:[%s12127_s7 + $0xac] ss:$28 sps:$4 sm:$0xff]   ;;  %v4940_v52 = vadd.f32 %v12830_v34, %v12925_v2  ;;  %v11080_v34 = vld [vmem:[#allocation5 + $0x958] ss:$36 sps:$4 sm:$0xff]  }
 0x286   : > { %15819 = vst [vmem:[#allocation14_spill] sm:$0xff] %v12968_v11  ;;  %v12976_v44 = vadd.f32 %v5118_v26, %v4926_v29  ;;  %5592 = vmatprep.mubr.bf16.mxu1 %v15784_v47  ;;  %v12980_v14 = vpop.f32.mrf.mxu0  ;;  %6044 = vmatpush1.bf16.msra.mxu0 %v11056_v18  ;;  %v11476_v29 = vld [vmem:[%s12127_s7 + $0x248] ss:$28 sps:$4 sm:$0xff]  }
 0x287   : > { %v5120_v37 = vpop.f32.mrf.mxu1  ;;  %6045 = vmatprep.subr.bf16.mxu0 %v11064_v17  ;;  %v4938_v17 = vadd.f32 %v12827_v51, %v12932_v8  ;;  %v11494_v11 = vld [vmem:[%s12127_s7 + $0xc] ss:$28 sps:$4 sm:$0xff]  }
 0x288   : > { %v12984_v19 = vadd.f32 %v5120_v37, %v4928_v25  ;;  %v12986_v38 = vpop.f32.mrf.mxu0  ;;  %v11074_v25 = vld [vmem:[#allocation5 + $0x9a0] ss:$36 sps:$4 sm:$0xff]  }
 0x289   : > { %v5122_v4 = vpop.f32.mrf.mxu1 }
 0x28a   : > { %15820 = vst [vmem:[#allocation15_spill] sm:$0xff] %v12984_v19  ;;  %v12990_v22 = vadd.f32 %v5122_v4, %v4930_v6  ;;  %v12992_v24 = vpop.f32.mrf.mxu0  ;;  %6046 = vmatpush1.bf16.msra.mxu0 %v11062_v57  ;;  %v11082_v57 = vld [vmem:[#allocation5 + $0x95c] ss:$36 sps:$4 sm:$0xff]  }
 0x28b   : > { %v5124_v50 = vpop.f32.mrf.mxu1  ;;  %6047 = vmatprep.subr.bf16.mxu0 %v11070_v40  ;;  %v4942_v40 = vadd.f32 %v12836_v5, %v12932_v8  ;;  %v11480_v5 = vld [vmem:[%s12127_s7 + $0xa8] ss:$28 sps:$4 sm:$0xff]  }
 0x28c   : > { %v12996_v15 = vadd.f32 %v5124_v50, %v4932_v60  ;;  %v12998_v21 = vpop.f32.mrf.mxu0  ;;  %5706 = vmatmul.mubr.bf16.gmra.mxu0 %v11477_v46  ;;  %v11479_v46 = vld [vmem:[%s12127_s7 + $0x280] ss:$28 sps:$4 sm:$0xff]  }
 0x28d   : > { %v5128_v18 = vpop.f32.mrf.mxu1  ;;  %5593 = vmatmul.mubr.bf16.gmra.mxu1 %v11476_v29  ;;  %5715 = vmatprep.mubr.bf16.mxu0 %v11478_v63  ;;  %v11493_v19 = vld [vmem:[%s12127_s7 + $0x1c4] ss:$28 sps:$4 sm:$0xff]  }
 0x28e   : > { %15821 = vst [vmem:[#allocation16_spill] sm:$0xff] %v12996_v15  ;;  %v13004_v26 = vadd.f32 %v5128_v18, %v4936_v55  ;;  %5602 = vmatprep.mubr.bf16.mxu1 %v15784_v47  ;;  %v13008_v36 = vpop.f32.mrf.mxu0  ;;  %6048 = vmatpush1.bf16.msra.mxu0 %v11068_v43  ;;  %v4946_v43 = vadd.f32 %v12839_v49, %v12925_v2  ;;  %v11488_v15 = vld [vmem:[%s12127_s7 + $0x328] ss:$28 sps:$4 sm:$0xff]  }
 0x28f   : > { %v5130_v9 = vpop.f32.mrf.mxu1  ;;  %6049 = vmatprep.subr.bf16.mxu0 %v11076_v61  ;;  %v11088_v61 = vld [vmem:[#allocation5 + $0x914] ss:$36 sps:$4 sm:$0xff]  }
 0x290   : > { %v13012_v37 = vadd.f32 %v5130_v9, %v4938_v17  ;;  %v13014_v51 = vpop.f32.mrf.mxu0  ;;  %v4948_v17 = vadd.f32 %v12849_v42, %v12932_v8  ;;  %v11481_v9 = vld [vmem:[%s12127_s7 + $0xe4] ss:$28 sps:$4 sm:$0xff]  }
 0x291   : > { %v5132_v6 = vpop.f32.mrf.mxu1 }
 0x292   : > { %15822 = vst [vmem:[#allocation17_spill] sm:$0xff] %v13012_v37  ;;  %v13018_v4 = vadd.f32 %v5132_v6, %v4940_v52  ;;  %v13020_v60 = vpop.f32.mrf.mxu0  ;;  %6050 = vmatpush1.bf16.msra.mxu0 %v11074_v25  ;;  %v11086_v52 = vld [vmem:[#allocation5 + $0x910] ss:$36 sps:$4 sm:$0xff]  }
 0x293   : > { %v5134_v50 = vpop.f32.mrf.mxu1  ;;  %6051 = vmatprep.subr.bf16.mxu0 %v11082_v57  ;;  %v4950_v57 = vadd.f32 %v12852_v16, %v12925_v2  ;;  %v11092_v16 = vld [vmem:[#allocation5 + $0xd48] ss:$36 sps:$4 sm:$0xff]  }
 0x294   : > { %v13024_v55 = vadd.f32 %v5134_v50, %v4942_v40  ;;  %v13026_v18 = vpop.f32.mrf.mxu0  ;;  %5716 = vmatmul.mubr.bf16.gmra.mxu0 %v11480_v5  ;;  %v11094_v40 = vld [vmem:[#allocation5 + $0xd4c] ss:$36 sps:$4 sm:$0xff]  }
 0x295   : > { %v5138_v29 = vpop.f32.mrf.mxu1  ;;  %5603 = vmatmul.mubr.bf16.gmra.mxu1 %v11479_v46  ;;  %5725 = vmatprep.mubr.bf16.mxu0 %v11481_v9 }
 0x296   : > { %15823 = vst [vmem:[#allocation18_spill] sm:$0xff] %v13024_v55  ;;  %v13032_v63 = vadd.f32 %v5138_v29, %v4946_v43  ;;  %5612 = vmatprep.mubr.bf16.mxu1 %v15784_v47  ;;  %v13036_v49 = vpop.f32.mrf.mxu0  ;;  %6052 = vmatpush1.bf16.msra.mxu0 %v11080_v34  ;;  %v4952_v43 = vadd.f32 %v12858_v54, %v12932_v8  ;;  %v11483_v54 = vld [vmem:[%s12127_s7 + $0xe0] ss:$28 sps:$4 sm:$0xff]   ;;  %v11485_v55 = vld [vmem:[%s12127_s7 + $0x2f0] ss:$28 sps:$4 sm:$0xff]  }
 0x297   : > { %v5140_v25 = vpop.f32.mrf.mxu1  ;;  %6053 = vmatprep.subr.bf16.mxu0 %v11088_v61  ;;  %v4956_v61 = vadd.f32 %v12861_v13, %v12925_v2 }
 0x298   : > { %v13040_v6 = vadd.f32 %v5140_v25, %v4948_v17  ;;  %v13042_v42 = vpop.f32.mrf.mxu0  ;;  %v11100_v17 = vld [vmem:[#allocation5 + $0xd04] ss:$36 sps:$4 sm:$0xff]  }
 0x299   : > { %v5142_v50 = vpop.f32.mrf.mxu1 }
 0x29a   : > { %15824 = vst [vmem:[#allocation19_spill] sm:$0xff] %v13040_v6  ;;  %v13046_v29 = vadd.f32 %v5142_v50, %v4950_v57  ;;  %v13048_v46 = vpop.f32.mrf.mxu0  ;;  %6054 = vmatpush1.bf16.msra.mxu0 %v11086_v52  ;;  %v4958_v57 = vadd.f32 %v12867_v33, %v12932_v8  ;;  %v11484_v52 = vld [vmem:[%s12127_s7 + $0x11c] ss:$28 sps:$4 sm:$0xff]  }
 0x29b   : > { %v5144_v34 = vpop.f32.mrf.mxu1  ;;  %6055 = vmatprep.subr.bf16.mxu0 %v11094_v40 }
 0x29c   : > { %v13052_v5 = vadd.f32 %v5144_v34, %v4952_v43  ;;  %v13054_v9 = vpop.f32.mrf.mxu0  ;;  %5726 = vmatmul.mubr.bf16.gmra.mxu0 %v11483_v54  ;;  %v11098_v43 = vld [vmem:[#allocation5 + $0xd00] ss:$36 sps:$4 sm:$0xff]   ;;  %v4960_v34 = vadd.f32 %v12872_v20, %v12925_v2  ;;  %v11101_v20 = vld [vmem:[#allocation5 + $0xcb8] ss:$36 sps:$4 sm:$0xff]  }
 0x29d   : > { %v5148_v25 = vpop.f32.mrf.mxu1  ;;  %5613 = vmatmul.mubr.bf16.gmra.mxu1 %v11482_v35  ;;  %5735 = vmatprep.mubr.bf16.mxu0 %v11484_v52  ;;  %v11103_v54 = vld [vmem:[#allocation5 + $0xcbc] ss:$36 sps:$4 sm:$0xff]  }
 0x29e   : > { %15825 = vst [vmem:[#allocation20_spill] sm:$0xff] %v13052_v5  ;;  %v13060_v50 = vadd.f32 %v5148_v25, %v4956_v61  ;;  %5622 = vmatprep.mubr.bf16.mxu1 %v15784_v47  ;;  %v13064_v13 = vpop.f32.mrf.mxu0  ;;  %6056 = vmatpush2.bf16.msra.mxu0 %v11092_v16  ;;  %v4962_v25 = vadd.f32 %v12874_v62, %v12932_v8  ;;  %v11486_v62 = vld [vmem:[%s12127_s7 + $0x118] ss:$28 sps:$4 sm:$0xff]  }
 0x29f   : > { %v5150_v40 = vpop.f32.mrf.mxu1  ;;  %6057 = vmatprep.subr.bf16.mxu0 %v11100_v17  ;;  %v4966_v17 = vadd.f32 %v12879_v58, %v12925_v2 }
 0x2a0   : > { %v13068_v35 = vadd.f32 %v5150_v40, %v4958_v57  ;;  %v13070_v33 = vpop.f32.mrf.mxu0  ;;  %v11109_v40 = vld [vmem:[#allocation5 + $0xc74] ss:$36 sps:$4 sm:$0xff]  }
 0x2a1   : > { %v5152_v61 = vpop.f32.mrf.mxu1 }
 0x2a2   : > { %15826 = vst [vmem:[#allocation21_spill] sm:$0xff] %v13068_v35  ;;  %v13074_v52 = vadd.f32 %v5152_v61, %v4960_v34  ;;  %v13076_v5 = vpop.f32.mrf.mxu0  ;;  %6058 = vmatpush2.bf16.msra.mxu0 %v11098_v43  ;;  %v4968_v34 = vadd.f32 %v12885_v27, %v12932_v8  ;;  %v11487_v43 = vld [vmem:[%s12127_s7 + $0x154] ss:$28 sps:$4 sm:$0xff]  }
 0x2a3   : > { %v5154_v16 = vpop.f32.mrf.mxu1  ;;  %6059 = vmatprep.subr.bf16.mxu0 %v11103_v54 }
 0x2a4   : > { %v13080_v57 = vadd.f32 %v5154_v16, %v4962_v25  ;;  %v13082_v35 = vpop.f32.mrf.mxu0  ;;  %5736 = vmatmul.mubr.bf16.gmra.mxu0 %v11486_v62  ;;  %v11107_v25 = vld [vmem:[#allocation5 + $0xc70] ss:$36 sps:$4 sm:$0xff]   ;;  %v4970_v16 = vadd.f32 %v12890_v32, %v12925_v2  ;;  %v11110_v32 = vld [vmem:[#allocation5 + $0xc28] ss:$36 sps:$4 sm:$0xff]  }
 0x2a5   : > { %v5158_v6 = vpop.f32.mrf.mxu1  ;;  %5623 = vmatmul.mubr.bf16.gmra.mxu1 %v11485_v55  ;;  %5745 = vmatprep.mubr.bf16.mxu0 %v11487_v43  ;;  %v11112_v62 = vld [vmem:[#allocation5 + $0xc2c] ss:$36 sps:$4 sm:$0xff]  }
 0x2a6   : > { %15827 = vst [vmem:[#allocation22_spill] sm:$0xff] %v13080_v57  ;;  %v13088_v61 = vadd.f32 %v5158_v6, %v4966_v17  ;;  %5632 = vmatprep.mubr.bf16.mxu1 %v15784_v47  ;;  %v13092_v58 = vpop.f32.mrf.mxu0  ;;  %6060 = vmatpush2.bf16.msra.mxu0 %v11101_v20  ;;  %v4972_v17 = vadd.f32 %v12892_v28, %v12932_v8  ;;  %v11489_v28 = vld [vmem:[%s12127_s7 + $0x150] ss:$28 sps:$4 sm:$0xff]  }
 0x2a7   : > { %v5160_v54 = vpop.f32.mrf.mxu1  ;;  %6061 = vmatprep.subr.bf16.mxu0 %v11109_v40  ;;  %v4976_v40 = vadd.f32 %v12897_v56, %v12925_v2 }
 0x2a8   : > { %v13096_v55 = vadd.f32 %v5160_v54, %v4968_v34  ;;  %v13098_v27 = vpop.f32.mrf.mxu0  ;;  %v11118_v54 = vld [vmem:[#allocation5 + $0xbe4] ss:$36 sps:$4 sm:$0xff]  }
 0x2a9   : > { %v5162_v6 = vpop.f32.mrf.mxu1 }
 0x2aa   : > { %15828 = vst [vmem:[#allocation23_spill] sm:$0xff] %v13096_v55  ;;  %v13102_v43 = vadd.f32 %v5162_v6, %v4970_v16  ;;  %v13104_v57 = vpop.f32.mrf.mxu0  ;;  %6062 = vmatpush2.bf16.msra.mxu0 %v11107_v25  ;;  %v4978_v16 = vadd.f32 %v12903_v3, %v12932_v8  ;;  %v11490_v25 = vld [vmem:[%s12127_s7 + $0x18c] ss:$28 sps:$4 sm:$0xff]  }
 0x2ab   : > { %v5164_v20 = vpop.f32.mrf.mxu1  ;;  %6063 = vmatprep.subr.bf16.mxu0 %v11112_v62 }
 0x2ac   : > { %v13108_v34 = vadd.f32 %v5164_v20, %v4972_v17  ;;  %v13110_v55 = vpop.f32.mrf.mxu0  ;;  %5746 = vmatmul.mubr.bf16.gmra.mxu0 %v11489_v28  ;;  %v11116_v17 = vld [vmem:[#allocation5 + $0xbe0] ss:$36 sps:$4 sm:$0xff]   ;;  %v4980_v20 = vadd.f32 %v12908_v53, %v12925_v2  ;;  %v11119_v53 = vld [vmem:[#allocation5 + $0xb98] ss:$36 sps:$4 sm:$0xff]  }
 0x2ad   : > { %v5168_v37 = vpop.f32.mrf.mxu1  ;;  %5633 = vmatmul.mubr.bf16.gmra.mxu1 %v11488_v15  ;;  %5755 = vmatprep.mubr.bf16.mxu0 %v11490_v25  ;;  %v11121_v28 = vld [vmem:[#allocation5 + $0xb9c] ss:$36 sps:$4 sm:$0xff]  }
 0x2ae   : > { %15829 = vst [vmem:[#allocation24_spill] sm:$0xff] %v13108_v34  ;;  %v13116_v6 = vadd.f32 %v5168_v37, %v4976_v40  ;;  %5642 = vmatprep.mubr.bf16.mxu1 %v15784_v47  ;;  %v13120_v56 = vpop.f32.mrf.mxu0  ;;  %6064 = vmatpush2.bf16.msra.mxu0 %v11110_v32  ;;  %v4982_v40 = vadd.f32 %v12910_v0, %v12932_v8  ;;  %v11491_v0 = vld [vmem:[%s12127_s7 + $0x360] ss:$28 sps:$4 sm:$0xff]  }
 0x2af   : > { %v5170_v62 = vpop.f32.mrf.mxu1  ;;  %6065 = vmatprep.subr.bf16.mxu0 %v11118_v54  ;;  %v4986_v54 = vadd.f32 %v12916_v10, %v12925_v2 }
 0x2b0   : > { %v13124_v15 = vadd.f32 %v5170_v62, %v4978_v16  ;;  %v13126_v3 = vpop.f32.mrf.mxu0  ;;  %v11127_v62 = vld [vmem:[#allocation5 + $0xb54] ss:$36 sps:$4 sm:$0xff]  }
 0x2b1   : > { %v5172_v37 = vpop.f32.mrf.mxu1 }
 0x2b2   : > { %15830 = vst [vmem:[#allocation25_spill] sm:$0xff] %v13124_v15  ;;  %v13130_v25 = vadd.f32 %v5172_v37, %v4980_v20  ;;  %v13132_v47 = vpop.f32.mrf.mxu0  ;;  %6066 = vmatpush2.bf16.msra.mxu0 %v11116_v17  ;;  %v11492_v20 = vld [vmem:[%s12127_s7 + $0x188] ss:$28 sps:$4 sm:$0xff]   ;;  %v4988_v37 = vadd.f32 %v12923_v23, %v12932_v8 }
 0x2b3   : > { %v5174_v32 = vpop.f32.mrf.mxu1  ;;  %6067 = vmatprep.subr.bf16.mxu0 %v11121_v28 }
 0x2b4   : > { %v13136_v16 = vadd.f32 %v5174_v32, %v4982_v40  ;;  %v13138_v15 = vpop.f32.mrf.mxu0  ;;  %5756 = vmatmul.mubr.bf16.gmra.mxu0 %v11492_v20  ;;  %v11125_v40 = vld [vmem:[#allocation5 + $0xb50] ss:$36 sps:$4 sm:$0xff]   ;;  %v4990_v32 = vadd.f32 %v12930_v48, %v12925_v2  ;;  %v11106_v48 = vld [vmem:[#allocation5 + $0xf44] ss:$36 sps:$4 sm:$0xff]  }
 0x2b5   : > { %v5178_v34 = vpop.f32.mrf.mxu1  ;;  %5643 = vmatmul.mubr.bf16.gmra.mxu1 %v11491_v0  ;;  %5765 = vmatprep.mubr.bf16.mxu0 %v11493_v19  ;;  %v11130_v20 = vld [vmem:[#allocation5 + $0x214] ss:$36 sps:$4 sm:$0xff]  }
 0x2b6   : > { %15831 = vst [vmem:[#allocation26_spill] sm:$0xff] %v13136_v16  ;;  %v13144_v17 = vadd.f32 %v5178_v34, %v4986_v54  ;;  %5878 = vmatprep.mubr.bf16.mxu1 %v11494_v11  ;;  %v13148_v10 = vpop.f32.mrf.mxu0  ;;  %6068 = vmatpush2.bf16.msra.mxu0 %v11119_v53  ;;  %v4992_v11 = vadd.f32 %v12934_v31, %v12932_v8  ;;  %v11095_v54 = vld [vmem:[#allocation5 + $0xf88] ss:$36 sps:$4 sm:$0xff]  }
 0x2b7   : > { %v5180_v28 = vpop.f32.mrf.mxu1  ;;  %6069 = vmatprep.subr.bf16.mxu0 %v11127_v62  ;;  %v4996_v62 = vadd.f32 %v12941_v1, %v12925_v2  ;;  %v11496_v31 = vld [vmem:[%s12127_s7 + $0x8] ss:$28 sps:$4 sm:$0xff]   ;;  %v11497_v1 = vld [vmem:[%s12127_s7 + $0x1fc] ss:$28 sps:$4 sm:$0xff]  }
 0x2b8   : > { %v13152_v0 = vadd.f32 %v5180_v28, %v4988_v37  ;;  %v13154_v23 = vpop.f32.mrf.mxu0 }
 0x2b9   : > { %v5182_v34 = vpop.f32.mrf.mxu1 }
 0x2ba   : > { %15832 = vst [vmem:[#allocation27_spill] sm:$0xff] %v13152_v0  ;;  %v13158_v19 = vadd.f32 %v5182_v34, %v4990_v32  ;;  %v13160_v53 = vpop.f32.mrf.mxu0  ;;  %6070 = vmatpush2.bf16.msra.mxu0 %v11125_v40  ;;  %v4998_v32 = vadd.f32 %v12950_v7, %v12932_v8 }
 0x2bb   : > { %v5184_v16 = vpop.f32.mrf.mxu1  ;;  %6425 = vmatprep.subr.bf16.mxu0 %v11130_v20 }
 0x2bc   : > { %v13164_v37 = vadd.f32 %v5184_v16, %v4992_v11  ;;  %v5301_v0 = vpop.f32.mrf.mxu0  ;;  %5766 = vmatmul.mubr.bf16.gmra.mxu0 %v11495_v41  ;;  %v11104_v16 = vld [vmem:[#allocation5 + $0xf40] ss:$36 sps:$4 sm:$0xff]  }
 0x2bd   : > { %v5188_v28 = vpop.f32.mrf.mxu1  ;;  %5879 = vmatmul.mubr.bf16.vlgmr.msra.gmra.mxu1 %v11496_v31  ;;  %v13173_v40 = vadd.f32 %v5301_v0, %v12947_v45  ;;  %5775 = vmatprep.mubr.bf16.mxu0 %v11497_v1  ;;  %v11115_v41 = vld [vmem:[#allocation5 + $0xefc] ss:$36 sps:$4 sm:$0xff]   ;;  %v5000_v31 = vadd.f32 %v12958_v39, %v12925_v2  ;;  %v5002_v0 = vadd.f32 %v12964_v59, %v12932_v8 }
 0x2be   : > { %15833 = vst [vmem:[#allocation28_spill] sm:$0xff] %v13164_v37  ;;  %v13170_v34 = vadd.f32 %v5188_v28, %v4996_v62  ;;  %6233 = vmatpush1.bf16.msra.mxu1 %v11095_v54  ;;  %v13176_v11 = vpop.f32.mrf.mxu0  ;;  %v11498_v37 = vld [vmem:[%s12127_s7 + $0x44] ss:$28 sps:$4 sm:$0xff]   ;;  %v11113_v39 = vld [vmem:[#allocation5 + $0xef8] ss:$36 sps:$4 sm:$0xff]  }
 0x2bf   : > { %v5190_v20 = vpop.f32.mrf.mxu1  ;;  %5888 = vmatprep.mubr.bf16.mxu1 %v11498_v37  ;;  %6234 = vmatprep.subr.bf16.mxu1 %v11106_v48 }
 0x2c0   : > { %v13181_v7 = vadd.f32 %v5190_v20, %v4998_v32  ;;  %v5305_v45 = vpop.f32.mrf.mxu0  ;;  %v5006_v32 = vadd.f32 %v12970_v30, %v12925_v2  ;;  %v11124_v20 = vld [vmem:[#allocation5 + $0xeb4] ss:$36 sps:$4 sm:$0xff]  }
 0x2c1   : > { %v5192_v62 = vpop.f32.mrf.mxu1  ;;  %v13188_v28 = vadd.f32 %v5305_v45, %v12962_v12  ;;  %v11500_v12 = vld [vmem:[%s12127_s7 + $0x40] ss:$28 sps:$4 sm:$0xff]  }
 0x2c2   : > { %15834 = vst [vmem:[#allocation29_spill] sm:$0xff] %v13181_v7  ;;  %v13185_v54 = vadd.f32 %v5192_v62, %v5000_v31  ;;  %6235 = vmatpush1.bf16.msra.mxu1 %v11104_v16  ;;  %v13190_v37 = vpop.f32.mrf.mxu0  ;;  %v11499_v62 = vld [vmem:[%s12127_s7 + $0x1f8] ss:$28 sps:$4 sm:$0xff]   ;;  %v5008_v16 = vadd.f32 %v12980_v14, %v12932_v8  ;;  %v11133_v14 = vld [vmem:[#allocation5 + $0xe6c] ss:$36 sps:$4 sm:$0xff]  }
 0x2c3   : > { %v5194_v48 = vpop.f32.mrf.mxu1  ;;  %6236 = vmatprep.subr.bf16.mxu1 %v11115_v41  ;;  %v11501_v41 = vld [vmem:[%s12127_s7 + $0x234] ss:$28 sps:$4 sm:$0xff]   ;;  %v11502_v30 = vld [vmem:[%s12127_s7 + $0x7c] ss:$28 sps:$4 sm:$0xff]  }
 0x2c4   : > { %v13194_v1 = vadd.f32 %v5194_v48, %v5002_v0  ;;  %v5311_v31 = vpop.f32.mrf.mxu0  ;;  %5776 = vmatmul.mubr.bf16.gmra.mxu0 %v11499_v62  ;;  %v5010_v62 = vadd.f32 %v12986_v38, %v12925_v2  ;;  %v11131_v38 = vld [vmem:[#allocation5 + $0xe68] ss:$36 sps:$4 sm:$0xff]  }
 0x2c5   : > { %v5198_v59 = vpop.f32.mrf.mxu1  ;;  %5889 = vmatmul.mubr.bf16.gmra.mxu1 %v11500_v12  ;;  %v13203_v7 = vadd.f32 %v5311_v31, %v12976_v44  ;;  %5785 = vmatprep.mubr.bf16.mxu0 %v11501_v41 }
 0x2c6   : > { %15835 = vst [vmem:[#allocation30_spill] sm:$0xff] %v13194_v1  ;;  %v13200_v45 = vadd.f32 %v5198_v59, %v5006_v32  ;;  %5898 = vmatprep.mubr.bf16.mxu1 %v11502_v30  ;;  %v13207_v48 = vpop.f32.mrf.mxu0  ;;  %6237 = vmatpush1.bf16.msra.mxu1 %v11113_v39  ;;  %v11122_v1 = vld [vmem:[#allocation5 + $0xeb0] ss:$36 sps:$4 sm:$0xff]   ;;  %v5012_v59 = vadd.f32 %v12992_v24, %v12932_v8 }
 0x2c7   : > { %v5200_v0 = vpop.f32.mrf.mxu1  ;;  %6238 = vmatprep.subr.bf16.mxu1 %v11124_v20  ;;  %v5016_v20 = vadd.f32 %v12998_v21, %v12925_v2  ;;  %v11506_v21 = vld [vmem:[%s12127_s7 + $0xb4] ss:$28 sps:$4 sm:$0xff]  }
 0x2c8   : > { %v13211_v12 = vadd.f32 %v5200_v0, %v5008_v16  ;;  %v5315_v44 = vpop.f32.mrf.mxu0  ;;  %v11142_v0 = vld [vmem:[#allocation5 + $0xe24] ss:$36 sps:$4 sm:$0xff]  }
 0x2c9   : > { %v5202_v32 = vpop.f32.mrf.mxu1  ;;  %v13218_v41 = vadd.f32 %v5315_v44, %v12990_v22  ;;  %v11504_v22 = vld [vmem:[%s12127_s7 + $0x78] ss:$28 sps:$4 sm:$0xff]   ;;  %v5018_v44 = vadd.f32 %v13008_v36, %v12932_v8  ;;  %v11151_v36 = vld [vmem:[#allocation5 + $0xddc] ss:$36 sps:$4 sm:$0xff]  }
 0x2ca   : > { %15836 = vst [vmem:[#allocation31_spill] sm:$0xff] %v13211_v12  ;;  %v13215_v31 = vadd.f32 %v5202_v32, %v5010_v62  ;;  %v13220_v30 = vpop.f32.mrf.mxu0  ;;  %6239 = vmatpush1.bf16.msra.mxu1 %v11122_v1  ;;  %v11503_v32 = vld [vmem:[%s12127_s7 + $0x230] ss:$28 sps:$4 sm:$0xff]  }
 0x2cb   : > { %15837 = vst [vmem:[#allocation32_spill] sm:$0xff] %v13218_v41  ;;  %v5204_v39 = vpop.f32.mrf.mxu1  ;;  %6240 = vmatprep.subr.bf16.mxu1 %v11133_v14  ;;  %v11505_v41 = vld [vmem:[%s12127_s7 + $0x26c] ss:$28 sps:$4 sm:$0xff]  }
 0x2cc   : > { %v13224_v16 = vadd.f32 %v5204_v39, %v5012_v59  ;;  %v5321_v62 = vpop.f32.mrf.mxu0  ;;  %5786 = vmatmul.mubr.bf16.gmra.mxu0 %v11503_v32  ;;  %v11140_v39 = vld [vmem:[#allocation5 + $0xe20] ss:$36 sps:$4 sm:$0xff]   ;;  %v5020_v32 = vadd.f32 %v13014_v51, %v12925_v2  ;;  %v11149_v51 = vld [vmem:[#allocation5 + $0xdd8] ss:$36 sps:$4 sm:$0xff]  }
 0x2cd   : > { %v5208_v24 = vpop.f32.mrf.mxu1  ;;  %5899 = vmatmul.mubr.bf16.gmra.mxu1 %v11504_v22  ;;  %v13233_v1 = vadd.f32 %v5321_v62, %v13004_v26  ;;  %5795 = vmatprep.mubr.bf16.mxu0 %v11505_v41  ;;  %v5022_v41 = vadd.f32 %v13020_v60, %v12932_v8 }
 0x2ce   : > { %15838 = vst [vmem:[#allocation33_spill] sm:$0xff] %v13224_v16  ;;  %v13230_v12 = vadd.f32 %v5208_v24, %v5016_v20  ;;  %5908 = vmatprep.mubr.bf16.mxu1 %v11506_v21  ;;  %v13237_v59 = vpop.f32.mrf.mxu0  ;;  %6241 = vmatpush1.bf16.msra.mxu1 %v11131_v38  ;;  %v11509_v16 = vld [vmem:[%s12127_s7 + $0x2a4] ss:$28 sps:$4 sm:$0xff]  }
 0x2cf   : > { %v5210_v14 = vpop.f32.mrf.mxu1  ;;  %6242 = vmatprep.subr.bf16.mxu1 %v11142_v0  ;;  %v5026_v0 = vadd.f32 %v13026_v18, %v12925_v2  ;;  %v11510_v18 = vld [vmem:[%s12127_s7 + $0xec] ss:$28 sps:$4 sm:$0xff]  }
 0x2d0   : > { %v13241_v22 = vadd.f32 %v5210_v14, %v5018_v44  ;;  %v5325_v26 = vpop.f32.mrf.mxu0  ;;  %v11160_v14 = vld [vmem:[#allocation5 + $0xd94] ss:$36 sps:$4 sm:$0xff]  }
 0x2d1   : > { %v5212_v20 = vpop.f32.mrf.mxu1  ;;  %v13248_v62 = vadd.f32 %v5325_v26, %v13018_v4  ;;  %v11508_v4 = vld [vmem:[%s12127_s7 + $0xb0] ss:$28 sps:$4 sm:$0xff]   ;;  %v5028_v26 = vadd.f32 %v13036_v49, %v12932_v8  ;;  %v11169_v49 = vld [vmem:[#allocation5 + $0x694] ss:$36 sps:$4 sm:$0xff]  }
 0x2d2   : > { %15839 = vst [vmem:[#allocation34_spill] sm:$0xff] %v13241_v22  ;;  %v13245_v24 = vadd.f32 %v5212_v20, %v5020_v32  ;;  %v13250_v21 = vpop.f32.mrf.mxu0  ;;  %6243 = vmatpush1.bf16.msra.mxu1 %v11140_v39  ;;  %v11507_v20 = vld [vmem:[%s12127_s7 + $0x268] ss:$28 sps:$4 sm:$0xff]  }
 0x2d3   : > { %v5214_v38 = vpop.f32.mrf.mxu1  ;;  %6244 = vmatprep.subr.bf16.mxu1 %v11151_v36 }
 0x2d4   : > { %v13254_v44 = vadd.f32 %v5214_v38, %v5022_v41  ;;  %v5331_v32 = vpop.f32.mrf.mxu0  ;;  %5796 = vmatmul.mubr.bf16.gmra.mxu0 %v11507_v20  ;;  %v11158_v38 = vld [vmem:[#allocation5 + $0xd90] ss:$36 sps:$4 sm:$0xff]   ;;  %v5030_v20 = vadd.f32 %v13042_v42, %v12925_v2  ;;  %v5036_v42 = vadd.f32 %v13054_v9, %v12925_v2  ;;  %v11514_v9 = vld [vmem:[%s12127_s7 + $0x124] ss:$28 sps:$4 sm:$0xff]  }
 0x2d5   : > { %v5218_v60 = vpop.f32.mrf.mxu1  ;;  %5909 = vmatmul.mubr.bf16.gmra.mxu1 %v11508_v4  ;;  %v13263_v39 = vadd.f32 %v5331_v32, %v13032_v63  ;;  %5805 = vmatprep.mubr.bf16.mxu0 %v11509_v16  ;;  %v5032_v16 = vadd.f32 %v13048_v46, %v12932_v8  ;;  %v11511_v46 = vld [vmem:[%s12127_s7 + $0x2a0] ss:$28 sps:$4 sm:$0xff]  }
 0x2d6   : > { %v13260_v22 = vadd.f32 %v5218_v60, %v5026_v0  ;;  %5918 = vmatprep.mubr.bf16.mxu1 %v11510_v18  ;;  %v13267_v41 = vpop.f32.mrf.mxu0  ;;  %6245 = vmatpush1.bf16.msra.mxu1 %v11149_v51 }
 0x2d7   : > { %v5220_v36 = vpop.f32.mrf.mxu1  ;;  %6246 = vmatprep.subr.bf16.mxu1 %v11160_v14 }
 0x2d8   : > { %v13271_v4 = vadd.f32 %v5220_v36, %v5028_v26  ;;  %v5335_v0 = vpop.f32.mrf.mxu0 }
 0x2d9   : > { %v5222_v63 = vpop.f32.mrf.mxu1  ;;  %v13278_v32 = vadd.f32 %v5335_v0, %v13046_v29  ;;  %v5038_v29 = vadd.f32 %v13064_v13, %v12932_v8 }
 0x2da   : > { %15840 = vst [vmem:[#allocation35_spill] sm:$0xff] %v13271_v4  ;;  %v13275_v60 = vadd.f32 %v5222_v63, %v5030_v20  ;;  %v13280_v18 = vpop.f32.mrf.mxu0  ;;  %6247 = vmatpush1.bf16.msra.mxu1 %v11158_v38  ;;  %v11512_v20 = vld [vmem:[%s12127_s7 + $0xe8] ss:$28 sps:$4 sm:$0xff]   ;;  %v11513_v38 = vld [vmem:[%s12127_s7 + $0x2dc] ss:$28 sps:$4 sm:$0xff]  }
 0x2db   : > { %v5224_v51 = vpop.f32.mrf.mxu1  ;;  %6618 = vmatprep.subr.bf16.mxu1 %v11169_v49 }
 0x2dc   : > { %v13284_v14 = vadd.f32 %v5224_v51, %v5032_v16  ;;  %v5341_v36 = vpop.f32.mrf.mxu0  ;;  %5806 = vmatmul.mubr.bf16.gmra.mxu0 %v11511_v46  ;;  %v5040_v51 = vadd.f32 %v13070_v33, %v12925_v2  ;;  %v5046_v33 = vadd.f32 %v13082_v35, %v12925_v2 }
 0x2dd   : > { %v5228_v26 = vpop.f32.mrf.mxu1  ;;  %5919 = vmatmul.mubr.bf16.gmra.mxu1 %v11512_v20  ;;  %v13293_v0 = vadd.f32 %v5341_v36, %v13060_v50  ;;  %5815 = vmatprep.mubr.bf16.mxu0 %v11513_v38  ;;  %v5042_v50 = vadd.f32 %v13076_v5, %v12932_v8  ;;  %v11516_v5 = vld [vmem:[%s12127_s7 + $0x120] ss:$28 sps:$4 sm:$0xff]  }
 0x2de   : > { %15841 = vst [vmem:[#allocation36_spill] sm:$0xff] %v13284_v14  ;;  %v13290_v63 = vadd.f32 %v5228_v26, %v5036_v42  ;;  %5928 = vmatprep.mubr.bf16.mxu1 %v11514_v9  ;;  %v13297_v16 = vpop.f32.mrf.mxu0  ;;  %v11518_v14 = vld [vmem:[%s12127_s7 + $0x15c] ss:$28 sps:$4 sm:$0xff]  }
 0x2df   : > { %v5230_v49 = vpop.f32.mrf.mxu1 }
 0x2e0   : > { %v13301_v46 = vadd.f32 %v5230_v49, %v5038_v29  ;;  %v5345_v42 = vpop.f32.mrf.mxu0 }
 0x2e1   : > { %v5232_v13 = vpop.f32.mrf.mxu1  ;;  %v13308_v36 = vadd.f32 %v5345_v42, %v13074_v52  ;;  %v11517_v42 = vld [vmem:[%s12127_s7 + $0x314] ss:$28 sps:$4 sm:$0xff]  }
 0x2e2   : > { %15842 = vst [vmem:[#allocation37_spill] sm:$0xff] %v13301_v46  ;;  %v13305_v26 = vadd.f32 %v5232_v13, %v5040_v51  ;;  %v13310_v38 = vpop.f32.mrf.mxu0  ;;  %v11515_v46 = vld [vmem:[%s12127_s7 + $0x2d8] ss:$28 sps:$4 sm:$0xff]   ;;  %v5048_v51 = vadd.f32 %v13092_v58, %v12932_v8 }
 0x2e3   : > { %v5234_v20 = vpop.f32.mrf.mxu1 }
 0x2e4   : > { %v13314_v29 = vadd.f32 %v5234_v20, %v5042_v50  ;;  %v5351_v49 = vpop.f32.mrf.mxu0  ;;  %5816 = vmatmul.mubr.bf16.gmra.mxu0 %v11515_v46  ;;  %v5050_v46 = vadd.f32 %v13098_v27, %v12925_v2  ;;  %v5056_v27 = vadd.f32 %v13110_v55, %v12925_v2 }
 0x2e5   : > { %v5238_v9 = vpop.f32.mrf.mxu1  ;;  %5929 = vmatmul.mubr.bf16.gmra.mxu1 %v11516_v5  ;;  %v13323_v13 = vadd.f32 %v5351_v49, %v13088_v61  ;;  %5825 = vmatprep.mubr.bf16.mxu0 %v11517_v42  ;;  %v5052_v61 = vadd.f32 %v13104_v57, %v12932_v8  ;;  %v11520_v57 = vld [vmem:[%s12127_s7 + $0x158] ss:$28 sps:$4 sm:$0xff]  }
 0x2e6   : > { %15843 = vst [vmem:[#allocation38_spill] sm:$0xff] %v13314_v29  ;;  %v13320_v52 = vadd.f32 %v5238_v9, %v5046_v33  ;;  %5938 = vmatprep.mubr.bf16.mxu1 %v11518_v14  ;;  %v13327_v50 = vpop.f32.mrf.mxu0  ;;  %v11522_v29 = vld [vmem:[%s12127_s7 + $0x194] ss:$28 sps:$4 sm:$0xff]  }
 0x2e7   : > { %v5240_v35 = vpop.f32.mrf.mxu1 }
 0x2e8   : > { %v13331_v20 = vadd.f32 %v5240_v35, %v5048_v51  ;;  %v5355_v33 = vpop.f32.mrf.mxu0 }
 0x2e9   : > { %v5242_v58 = vpop.f32.mrf.mxu1  ;;  %v13338_v14 = vadd.f32 %v5355_v33, %v13102_v43  ;;  %v11521_v33 = vld [vmem:[%s12127_s7 + $0x34c] ss:$28 sps:$4 sm:$0xff]  }
 0x2ea   : > { %15844 = vst [vmem:[#allocation39_spill] sm:$0xff] %v13331_v20  ;;  %v13335_v9 = vadd.f32 %v5242_v58, %v5050_v46  ;;  %v13340_v5 = vpop.f32.mrf.mxu0  ;;  %v11519_v20 = vld [vmem:[%s12127_s7 + $0x310] ss:$28 sps:$4 sm:$0xff]   ;;  %v5058_v46 = vadd.f32 %v13120_v56, %v12932_v8 }
 0x2eb   : > { %v5244_v49 = vpop.f32.mrf.mxu1 }
 0x2ec   : > { %v13344_v51 = vadd.f32 %v5244_v49, %v5052_v61  ;;  %v5361_v35 = vpop.f32.mrf.mxu0  ;;  %5826 = vmatmul.mubr.bf16.gmra.mxu0 %v11519_v20  ;;  %v5060_v20 = vadd.f32 %v13126_v3, %v12925_v2  ;;  %v5066_v3 = vadd.f32 %v13138_v15, %v12925_v2 }
 0x2ed   : > { %v5248_v42 = vpop.f32.mrf.mxu1  ;;  %5939 = vmatmul.mubr.bf16.gmra.mxu1 %v11520_v57  ;;  %v13353_v58 = vadd.f32 %v5361_v35, %v13116_v6  ;;  %5835 = vmatprep.mubr.bf16.mxu0 %v11521_v33  ;;  %v5062_v6 = vadd.f32 %v13132_v47, %v12932_v8  ;;  %v11524_v47 = vld [vmem:[%s12127_s7 + $0x190] ss:$28 sps:$4 sm:$0xff]  }
 0x2ee   : > { %15845 = vst [vmem:[#allocation40_spill] sm:$0xff] %v13344_v51  ;;  %v13350_v43 = vadd.f32 %v5248_v42, %v5056_v27  ;;  %5948 = vmatprep.mubr.bf16.mxu1 %v11522_v29  ;;  %v13357_v61 = vpop.f32.mrf.mxu0  ;;  %v11526_v51 = vld [vmem:[%s12127_s7 + $0x14] ss:$28 sps:$4 sm:$0xff]  }
 0x2ef   : > { %v5250_v55 = vpop.f32.mrf.mxu1 }
 0x2f0   : > { %v13361_v49 = vadd.f32 %v5250_v55, %v5058_v46  ;;  %v5365_v27 = vpop.f32.mrf.mxu0 }
 0x2f1   : > { %v5252_v56 = vpop.f32.mrf.mxu1  ;;  %v13368_v29 = vadd.f32 %v5365_v27, %v13130_v25  ;;  %v11525_v27 = vld [vmem:[%s12127_s7 + $0x1cc] ss:$28 sps:$4 sm:$0xff]  }
 0x2f2   : > { %15846 = vst [vmem:[#allocation41_spill] sm:$0xff] %v13361_v49  ;;  %v13365_v42 = vadd.f32 %v5252_v56, %v5060_v20  ;;  %v13370_v57 = vpop.f32.mrf.mxu0  ;;  %v11523_v49 = vld [vmem:[%s12127_s7 + $0x348] ss:$28 sps:$4 sm:$0xff]   ;;  %v5068_v20 = vadd.f32 %v13148_v10, %v12932_v8 }
 0x2f3   : > { %v5254_v35 = vpop.f32.mrf.mxu1 }
 0x2f4   : > { %v13374_v46 = vadd.f32 %v5254_v35, %v5062_v6  ;;  %v5371_v55 = vpop.f32.mrf.mxu0  ;;  %5836 = vmatmul.mubr.bf16.gmra.mxu0 %v11523_v49  ;;  %v5070_v49 = vadd.f32 %v13154_v23, %v12925_v2 }
 0x2f5   : > { %v5258_v33 = vpop.f32.mrf.mxu1  ;;  %5949 = vmatmul.mubr.bf16.gmra.mxu1 %v11524_v47  ;;  %v13383_v56 = vadd.f32 %v5371_v55, %v13144_v17  ;;  %6071 = vmatprep.mubr.bf16.mxu0 %v11526_v51  ;;  %v5072_v17 = vadd.f32 %v13160_v53, %v12932_v8  ;;  %v11128_v55 = vld [vmem:[#allocation5 + $0x210] ss:$36 sps:$4 sm:$0xff]  }
 0x2f6   : > { %15847 = vst [vmem:[#allocation42_spill] sm:$0xff] %v13374_v46  ;;  %v13380_v25 = vadd.f32 %v5258_v33, %v5066_v3  ;;  %5958 = vmatprep.mubr.bf16.mxu1 %v11525_v27  ;;  %v13387_v6 = vpop.f32.mrf.mxu0  ;;  %v11136_v46 = vld [vmem:[#allocation5 + $0x1cc] ss:$36 sps:$4 sm:$0xff]  }
 0x2f7   : > { %v5260_v15 = vpop.f32.mrf.mxu1  ;;  %v15850_v8 = vld [vmem:[#allocation13_spill] sm:$0xff] }
 0x2f8   : > { %v13391_v35 = vadd.f32 %v5260_v15, %v5068_v20  ;;  %v5375_v3 = vpop.f32.mrf.mxu0  ;;  %v11527_v15 = vld [vmem:[%s12127_s7 + $0x1c8] ss:$28 sps:$4 sm:$0xff]   ;;  %v5304_v53 = vadd.f32 %v13176_v11, %v15850_v8 }
 0x2f9   : > { %v5262_v10 = vpop.f32.mrf.mxu1  ;;  %v13398_v51 = vadd.f32 %v5375_v3, %v13158_v19 }
 0x2fa   : > { %15848 = vst [vmem:[#allocation43_spill] sm:$0xff] %v13391_v35  ;;  %v13395_v33 = vadd.f32 %v5262_v10, %v5070_v49  ;;  %v13400_v27 = vpop.f32.mrf.mxu0  ;;  %v11528_v35 = vld [vmem:[%s12127_s7 + $0x10] ss:$28 sps:$4 sm:$0xff]   ;;  %v11529_v49 = vld [vmem:[%s12127_s7 + $0x204] ss:$28 sps:$4 sm:$0xff]  }
 0x2fb   : > { %v5264_v47 = vpop.f32.mrf.mxu1  ;;  %v11134_v10 = vld [vmem:[#allocation5 + $0x1c8] ss:$36 sps:$4 sm:$0xff]  }
 0x2fc   : > { %v13402_v2 = vadd.f32 %v5264_v47, %v5072_v17  ;;  %v5381_v23 = vpop.f32.mrf.mxu0  ;;  %6072 = vmatmul.mubr.bf16.vlgmr.msra.gmra.mxu0 %v11528_v35  ;;  %v11530_v47 = vld [vmem:[%s12127_s7 + $0x4c] ss:$28 sps:$4 sm:$0xff]  }
 0x2fd   : > { %v5494_v20 = vpop.f32.mrf.mxu1  ;;  %5959 = vmatmul.mubr.bf16.gmra.mxu1 %v11527_v15  ;;  %v13409_v19 = vadd.f32 %v5381_v23, %v13170_v34  ;;  %6426 = vmatpush1.bf16.msra.mxu0 %v11128_v55  ;;  %v11139_v15 = vld [vmem:[#allocation5 + $0x184] ss:$36 sps:$4 sm:$0xff]   ;;  %v15851_v34 = vld [vmem:[#allocation14_spill] sm:$0xff] }
 0x2fe   : > { %15849 = vst [vmem:[#allocation44_spill] sm:$0xff] %v13402_v2  ;;  %5968 = vmatprep.mubr.bf16.mxu1 %v11529_v49  ;;  %v13412_v3 = vpop.f32.mrf.mxu0  ;;  %6081 = vmatprep.mubr.bf16.mxu0 %v11530_v47  ;;  %v5495_v35 = vadd.f32 %v5494_v20, %v13173_v40  ;;  %v5308_v55 = vadd.f32 %v13190_v37, %v15851_v34 }
 0x2ff   : > { %v5496_v17 = vpop.f32.mrf.mxu1  ;;  %6427 = vmatprep.subr.bf16.mxu0 %v11136_v46  ;;  %v11137_v46 = vld [vmem:[#allocation5 + $0x180] ss:$36 sps:$4 sm:$0xff]  }
 0x300   : > { %v5497_v2 = vadd.f32 %v5496_v17, %v5304_v53  ;;  %v5385_v4 = vpop.f32.mrf.mxu0  ;;  %v11145_v53 = vld [vmem:[#allocation5 + $0x13c] ss:$36 sps:$4 sm:$0xff]  }
 0x301   : > { %v5498_v11 = vpop.f32.mrf.mxu1  ;;  %v13419_v8 = vadd.f32 %v5385_v4, %v13185_v54  ;;  %6428 = vmatpush1.bf16.msra.mxu0 %v11134_v10  ;;  %v11532_v54 = vld [vmem:[%s12127_s7 + $0x48] ss:$28 sps:$4 sm:$0xff]  }
 0x302   : > { %v9798_v23 = vpack.c.bf16 %v5497_v2, %v5495_v35  ;;  %v13421_v49 = vpop.f32.mrf.mxu0  ;;  %6429 = vmatprep.subr.bf16.mxu0 %v11139_v15  ;;  %v5499_v40 = vadd.f32 %v5498_v11, %v13188_v28  ;;  %v11531_v2 = vld [vmem:[%s12127_s7 + $0x200] ss:$28 sps:$4 sm:$0xff]  }
 0x303   : > { %v5500_v47 = vpop.f32.mrf.mxu1  ;;  %v15852_v4 = vld [vmem:[#allocation15_spill] sm:$0xff]  ;;  %v11533_v15 = vld [vmem:[%s12127_s7 + $0x23c] ss:$28 sps:$4 sm:$0xff]  }
 0x304   : > { %8738 = vst [vmem:[%s12616_s20 + $0x8] sm:$0xff] %v9798_v23  ;;  %v5501_v20 = vadd.f32 %v5500_v47, %v5308_v55  ;;  %v5391_v17 = vpop.f32.mrf.mxu0  ;;  %6082 = vmatmul.mubr.bf16.gmra.mxu0 %v11532_v54  ;;  %v5314_v10 = vadd.f32 %v13207_v48, %v15852_v4  ;;  %v11534_v23 = vld [vmem:[%s12127_s7 + $0x84] ss:$28 sps:$4 sm:$0xff]   ;;  %v11143_v55 = vld [vmem:[#allocation5 + $0x138] ss:$36 sps:$4 sm:$0xff]  }
 0x305   : > { %v5504_v37 = vpop.f32.mrf.mxu1  ;;  %5969 = vmatmul.mubr.bf16.gmra.mxu1 %v11531_v2  ;;  %v13430_v34 = vadd.f32 %v5391_v17, %v13200_v45  ;;  %6091 = vmatprep.mubr.bf16.mxu0 %v11534_v23  ;;  %v11148_v48 = vld [vmem:[#allocation5 + $0xf4] ss:$36 sps:$4 sm:$0xff]  }
 0x306   : > { %v9803_v35 = vpack.c.bf16 %v5501_v20, %v5499_v40  ;;  %5978 = vmatprep.mubr.bf16.mxu1 %v11533_v15  ;;  %v13434_v28 = vpop.f32.mrf.mxu0  ;;  %6430 = vmatpush1.bf16.msra.mxu0 %v11137_v46  ;;  %v5505_v47 = vadd.f32 %v5504_v37, %v13203_v7  ;;  %v15853_v20 = vld [vmem:[#allocation16_spill] sm:$0xff] }
 0x307   : > { %v5506_v11 = vpop.f32.mrf.mxu1  ;;  %6431 = vmatprep.subr.bf16.mxu0 %v11145_v53  ;;  %v5318_v17 = vadd.f32 %v13220_v30, %v15853_v20  ;;  %v11146_v7 = vld [vmem:[#allocation5 + $0xf0] ss:$36 sps:$4 sm:$0xff]  }
 0x308   : > { %8743 = vst [vmem:[%s12616_s20 + $0x2c] sm:$0xff] %v9803_v35  ;;  %v5507_v2 = vadd.f32 %v5506_v11, %v5314_v10  ;;  %v5395_v40 = vpop.f32.mrf.mxu0  ;;  %v15854_v53 = vld [vmem:[#allocation32_spill] sm:$0xff]  ;;  %v11535_v11 = vld [vmem:[%s12127_s7 + $0x238] ss:$28 sps:$4 sm:$0xff]  }
 0x309   : > { %v5508_v45 = vpop.f32.mrf.mxu1  ;;  %v13441_v4 = vadd.f32 %v5395_v40, %v13215_v31  ;;  %v11154_v35 = vld [vmem:[#allocation5 + $0xac] ss:$36 sps:$4 sm:$0xff]   ;;  %v11536_v31 = vld [vmem:[%s12127_s7 + $0x80] ss:$28 sps:$4 sm:$0xff]  }
 0x30a   : > { %v9808_v54 = vpack.c.bf16 %v5507_v2, %v5505_v47  ;;  %v13443_v46 = vpop.f32.mrf.mxu0  ;;  %6432 = vmatpush1.bf16.msra.mxu0 %v11143_v55  ;;  %v5509_v37 = vadd.f32 %v5508_v45, %v15854_v53  ;;  %v15855_v47 = vld [vmem:[#allocation17_spill] sm:$0xff] }
 0x30b   : > { %v5510_v15 = vpop.f32.mrf.mxu1  ;;  %6433 = vmatprep.subr.bf16.mxu0 %v11148_v48  ;;  %v5324_v2 = vadd.f32 %v13237_v59, %v15855_v47  ;;  %v11537_v20 = vld [vmem:[%s12127_s7 + $0x274] ss:$28 sps:$4 sm:$0xff]   ;;  %v11538_v45 = vld [vmem:[%s12127_s7 + $0xbc] ss:$28 sps:$4 sm:$0xff]   ;;  %v11157_v59 = vld [vmem:[#allocation5 + $0x64] ss:$36 sps:$4 sm:$0xff]  }
 0x30c   : > { %8748 = vst [vmem:[%s12616_s20 + $0x50] sm:$0xff] %v9808_v54  ;;  %v5511_v10 = vadd.f32 %v5510_v15, %v5318_v17  ;;  %v5401_v23 = vpop.f32.mrf.mxu0  ;;  %6092 = vmatmul.mubr.bf16.gmra.mxu0 %v11536_v31  ;;  %v11152_v54 = vld [vmem:[#allocation5 + $0xa8] ss:$36 sps:$4 sm:$0xff]  }
 0x30d   : > { %v5514_v30 = vpop.f32.mrf.mxu1  ;;  %5979 = vmatmul.mubr.bf16.gmra.mxu1 %v11535_v11  ;;  %v13452_v40 = vadd.f32 %v5401_v23, %v13230_v12  ;;  %6101 = vmatprep.mubr.bf16.mxu0 %v11538_v45  ;;  %v15857_v45 = vld [vmem:[#allocation19_spill] sm:$0xff] }
 0x30e   : > { %v9813_v55 = vpack.c.bf16 %v5511_v10, %v5509_v37  ;;  %5988 = vmatprep.mubr.bf16.mxu1 %v11537_v20  ;;  %v13456_v48 = vpop.f32.mrf.mxu0  ;;  %6434 = vmatpush1.bf16.msra.mxu0 %v11146_v7  ;;  %v5515_v15 = vadd.f32 %v5514_v30, %v13233_v1  ;;  %v15856_v10 = vld [vmem:[#allocation18_spill] sm:$0xff]  ;;  %v11539_v20 = vld [vmem:[%s12127_s7 + $0x270] ss:$28 sps:$4 sm:$0xff]  }
 0x30f   : > { %v5516_v17 = vpop.f32.mrf.mxu1  ;;  %6435 = vmatprep.subr.bf16.mxu0 %v11154_v35  ;;  %v5328_v23 = vadd.f32 %v13250_v21, %v15856_v10  ;;  %v11155_v1 = vld [vmem:[#allocation5 + $0x60] ss:$36 sps:$4 sm:$0xff]  }
 0x310   : > { %8753 = vst [vmem:[%s12616_s20 + $0x74] sm:$0xff] %v9813_v55  ;;  %v5517_v53 = vadd.f32 %v5516_v17, %v5324_v2  ;;  %v5405_v37 = vpop.f32.mrf.mxu0  ;;  %v11163_v2 = vld [vmem:[#allocation5 + $0x1c] ss:$36 sps:$4 sm:$0xff]   ;;  %v5334_v17 = vadd.f32 %v13267_v41, %v15857_v45  ;;  %v11166_v41 = vld [vmem:[#allocation5 + $0x454] ss:$36 sps:$4 sm:$0xff]  }
 0x311   : > { %v5518_v12 = vpop.f32.mrf.mxu1  ;;  %v13463_v31 = vadd.f32 %v5405_v37, %v13245_v24  ;;  %v11540_v24 = vld [vmem:[%s12127_s7 + $0xb8] ss:$28 sps:$4 sm:$0xff]  }
 0x312   : > { %v9818_v11 = vpack.c.bf16 %v5517_v53, %v5515_v15  ;;  %v13465_v7 = vpop.f32.mrf.mxu0  ;;  %6436 = vmatpush1.bf16.msra.mxu0 %v11152_v54  ;;  %v5519_v35 = vadd.f32 %v5518_v12, %v13248_v62  ;;  %v11541_v53 = vld [vmem:[%s12127_s7 + $0x2ac] ss:$28 sps:$4 sm:$0xff]   ;;  %v11542_v62 = vld [vmem:[%s12127_s7 + $0xf4] ss:$28 sps:$4 sm:$0xff]   ;;  %v11161_v12 = vld [vmem:[#allocation5 + $0x18] ss:$36 sps:$4 sm:$0xff]  }
 0x313   : > { %v5520_v47 = vpop.f32.mrf.mxu1  ;;  %6437 = vmatprep.subr.bf16.mxu0 %v11157_v59 }
 0x314   : > { %8758 = vst [vmem:[%s12616_s20 + $0x98] sm:$0xff] %v9818_v11  ;;  %v5521_v30 = vadd.f32 %v5520_v47, %v5328_v23  ;;  %v5411_v55 = vpop.f32.mrf.mxu0  ;;  %6102 = vmatmul.mubr.bf16.gmra.mxu0 %v11540_v24  ;;  %v15858_v47 = vld [vmem:[#allocation20_spill] sm:$0xff] }
 0x315   : > { %v5524_v21 = vpop.f32.mrf.mxu1  ;;  %5989 = vmatmul.mubr.bf16.gmra.mxu1 %v11539_v20  ;;  %v13474_v15 = vadd.f32 %v5411_v55, %v13260_v22  ;;  %6111 = vmatprep.mubr.bf16.mxu0 %v11542_v62  ;;  %v11172_v24 = vld [vmem:[#allocation5 + $0x40c] ss:$36 sps:$4 sm:$0xff]  }
 0x316   : > { %v9823_v54 = vpack.c.bf16 %v5521_v30, %v5519_v35  ;;  %5998 = vmatprep.mubr.bf16.mxu1 %v11541_v53  ;;  %v13478_v59 = vpop.f32.mrf.mxu0  ;;  %6438 = vmatpush1.bf16.msra.mxu0 %v11155_v1  ;;  %v5525_v10 = vadd.f32 %v5524_v21, %v13263_v39  ;;  %v5338_v35 = vadd.f32 %v13280_v18, %v15858_v47  ;;  %v11164_v39 = vld [vmem:[#allocation5 + $0x450] ss:$36 sps:$4 sm:$0xff]  }
 0x317   : > { %v5526_v37 = vpop.f32.mrf.mxu1  ;;  %6439 = vmatprep.subr.bf16.mxu0 %v11163_v2 }
 0x318   : > { %8763 = vst [vmem:[%s12616_s20 + $0xbc] sm:$0xff] %v9823_v54  ;;  %v5527_v23 = vadd.f32 %v5526_v37, %v5334_v17  ;;  %v5415_v11 = vpop.f32.mrf.mxu0  ;;  %v11543_v17 = vld [vmem:[%s12127_s7 + $0x2a8] ss:$28 sps:$4 sm:$0xff]   ;;  %v15859_v54 = vld [vmem:[#allocation21_spill] sm:$0xff] }
 0x319   : > { %v5528_v22 = vpop.f32.mrf.mxu1  ;;  %v13485_v55 = vadd.f32 %v5415_v11, %v13275_v60  ;;  %v11544_v60 = vld [vmem:[%s12127_s7 + $0xf0] ss:$28 sps:$4 sm:$0xff]   ;;  %v5344_v53 = vadd.f32 %v13297_v16, %v15859_v54  ;;  %v11178_v16 = vld [vmem:[#allocation5 + $0x3c4] ss:$36 sps:$4 sm:$0xff]  }
 0x31a   : > { %v9828_v30 = vpack.c.bf16 %v5527_v23, %v5525_v10  ;;  %v13487_v1 = vpop.f32.mrf.mxu0  ;;  %6440 = vmatpush1.bf16.msra.mxu0 %v11161_v12  ;;  %v5529_v2 = vadd.f32 %v5528_v22, %v13278_v32  ;;  %v11545_v12 = vld [vmem:[%s12127_s7 + $0x2e4] ss:$28 sps:$4 sm:$0xff]   ;;  %v11546_v32 = vld [vmem:[%s12127_s7 + $0x12c] ss:$28 sps:$4 sm:$0xff]  }
 0x31b   : > { %v5530_v20 = vpop.f32.mrf.mxu1  ;;  %6441 = vmatprep.subr.bf16.mxu0 %v11166_v41  ;;  %v11170_v41 = vld [vmem:[#allocation5 + $0x408] ss:$36 sps:$4 sm:$0xff]  }
 0x31c   : > { %8768 = vst [vmem:[%s12616_s20 + $0xe0] sm:$0xff] %v9828_v30  ;;  %v5531_v21 = vadd.f32 %v5530_v20, %v5338_v35  ;;  %v5421_v45 = vpop.f32.mrf.mxu0  ;;  %6112 = vmatmul.mubr.bf16.gmra.mxu0 %v11544_v60  ;;  %v15860_v35 = vld [vmem:[#allocation22_spill] sm:$0xff]  ;;  %v15861_v54 = vld [vmem:[#allocation23_spill] sm:$0xff] }
 0x31d   : > { %v5534_v18 = vpop.f32.mrf.mxu1  ;;  %5999 = vmatmul.mubr.bf16.gmra.mxu1 %v11543_v17  ;;  %v13496_v37 = vadd.f32 %v5421_v45, %v13290_v63  ;;  %6121 = vmatprep.mubr.bf16.mxu0 %v11546_v32  ;;  %v5348_v30 = vadd.f32 %v13310_v38, %v15860_v35  ;;  %v11547_v60 = vld [vmem:[%s12127_s7 + $0x2e0] ss:$28 sps:$4 sm:$0xff]  }
 0x31e   : > { %v9833_v62 = vpack.c.bf16 %v5531_v21, %v5529_v2  ;;  %6008 = vmatprep.mubr.bf16.mxu1 %v11545_v12  ;;  %v13500_v10 = vpop.f32.mrf.mxu0  ;;  %6442 = vmatpush2.bf16.msra.mxu0 %v11164_v39  ;;  %v5535_v11 = vadd.f32 %v5534_v18, %v13293_v0  ;;  %v11176_v0 = vld [vmem:[#allocation5 + $0x3c0] ss:$36 sps:$4 sm:$0xff]   ;;  %v11549_v32 = vld [vmem:[%s12127_s7 + $0x31c] ss:$28 sps:$4 sm:$0xff]  }
 0x31f   : > { %v5536_v23 = vpop.f32.mrf.mxu1  ;;  %6443 = vmatprep.subr.bf16.mxu0 %v11172_v24  ;;  %v11184_v18 = vld [vmem:[#allocation5 + $0x37c] ss:$36 sps:$4 sm:$0xff]  }
 0x320   : > { %8773 = vst [vmem:[%s12616_s20 + $0x104] sm:$0xff] %v9833_v62  ;;  %v5537_v22 = vadd.f32 %v5536_v23, %v5344_v53  ;;  %v5425_v47 = vpop.f32.mrf.mxu0  ;;  %v5354_v53 = vadd.f32 %v13327_v50, %v15861_v54  ;;  %v11190_v50 = vld [vmem:[#allocation5 + $0x334] ss:$36 sps:$4 sm:$0xff]  }
 0x321   : > { %v5538_v63 = vpop.f32.mrf.mxu1  ;;  %v13507_v2 = vadd.f32 %v5425_v47, %v13305_v26  ;;  %v11548_v26 = vld [vmem:[%s12127_s7 + $0x128] ss:$28 sps:$4 sm:$0xff]  }
 0x322   : > { %v9838_v20 = vpack.c.bf16 %v5537_v22, %v5535_v11  ;;  %v13509_v39 = vpop.f32.mrf.mxu0  ;;  %6444 = vmatpush2.bf16.msra.mxu0 %v11170_v41  ;;  %v5539_v24 = vadd.f32 %v5538_v63, %v13308_v36  ;;  %v11550_v36 = vld [vmem:[%s12127_s7 + $0x164] ss:$28 sps:$4 sm:$0xff]   ;;  %v11182_v11 = vld [vmem:[#allocation5 + $0x378] ss:$36 sps:$4 sm:$0xff]   ;;  %v15862_v63 = vld [vmem:[#allocation24_spill] sm:$0xff] }
 0x323   : > { %v5540_v21 = vpop.f32.mrf.mxu1  ;;  %6445 = vmatprep.subr.bf16.mxu0 %v11178_v16  ;;  %v5358_v35 = vadd.f32 %v13340_v5, %v15862_v63 }
 0x324   : > { %8778 = vst [vmem:[%s12616_s20 + $0x128] sm:$0xff] %v9838_v20  ;;  %v5541_v45 = vadd.f32 %v5540_v21, %v5348_v30  ;;  %v5431_v17 = vpop.f32.mrf.mxu0  ;;  %6122 = vmatmul.mubr.bf16.gmra.mxu0 %v11548_v26 }
 0x325   : > { %v5544_v38 = vpop.f32.mrf.mxu1  ;;  %6009 = vmatmul.mubr.bf16.gmra.mxu1 %v11547_v60  ;;  %v13518_v12 = vadd.f32 %v5431_v17, %v13320_v52  ;;  %6131 = vmatprep.mubr.bf16.mxu0 %v11550_v36  ;;  %v15863_v60 = vld [vmem:[#allocation25_spill] sm:$0xff] }
 0x326   : > { %v9843_v62 = vpack.c.bf16 %v5541_v45, %v5539_v24  ;;  %6018 = vmatprep.mubr.bf16.mxu1 %v11549_v32  ;;  %v13522_v23 = vpop.f32.mrf.mxu0  ;;  %6446 = vmatpush2.bf16.msra.mxu0 %v11176_v0  ;;  %v5545_v22 = vadd.f32 %v5544_v38, %v13323_v13  ;;  %v11188_v13 = vld [vmem:[#allocation5 + $0x330] ss:$36 sps:$4 sm:$0xff]   ;;  %v5364_v26 = vadd.f32 %v13357_v61, %v15863_v60  ;;  %v11202_v61 = vld [vmem:[#allocation5 + $0x2a4] ss:$36 sps:$4 sm:$0xff]  }
 0x327   : > { %v5546_v41 = vpop.f32.mrf.mxu1  ;;  %6447 = vmatprep.subr.bf16.mxu0 %v11184_v18  ;;  %v11196_v18 = vld [vmem:[#allocation5 + $0x2ec] ss:$36 sps:$4 sm:$0xff]   ;;  %v11551_v38 = vld [vmem:[%s12127_s7 + $0x318] ss:$28 sps:$4 sm:$0xff]  }
 0x328   : > { %8783 = vst [vmem:[%s12616_s20 + $0x14c] sm:$0xff] %v9843_v62  ;;  %v5547_v16 = vadd.f32 %v5546_v41, %v5354_v53  ;;  %v5435_v47 = vpop.f32.mrf.mxu0  ;;  %v11553_v62 = vld [vmem:[%s12127_s7 + $0x354] ss:$28 sps:$4 sm:$0xff]   ;;  %v11194_v41 = vld [vmem:[#allocation5 + $0x2e8] ss:$36 sps:$4 sm:$0xff]  }
 0x329   : > { %v5548_v52 = vpop.f32.mrf.mxu1  ;;  %v13529_v20 = vadd.f32 %v5435_v47, %v13335_v9  ;;  %v11552_v9 = vld [vmem:[%s12127_s7 + $0x160] ss:$28 sps:$4 sm:$0xff]   ;;  %v11557_v60 = vld [vmem:[%s12127_s7 + $0x1d4] ss:$28 sps:$4 sm:$0xff]  }
 0x32a   : > { %v9848_v30 = vpack.c.bf16 %v5547_v16, %v5545_v22  ;;  %v13531_v21 = vpop.f32.mrf.mxu0  ;;  %6448 = vmatpush2.bf16.msra.mxu0 %v11182_v11  ;;  %v5549_v24 = vadd.f32 %v5548_v52, %v13338_v14  ;;  %v11554_v14 = vld [vmem:[%s12127_s7 + $0x19c] ss:$28 sps:$4 sm:$0xff]  }
 0x32b   : > { %v5550_v0 = vpop.f32.mrf.mxu1  ;;  %6449 = vmatprep.subr.bf16.mxu0 %v11190_v50  ;;  %v15864_v50 = vld [vmem:[#allocation26_spill] sm:$0xff] }
 0x32c   : > { %8788 = vst [vmem:[%s12616_s20 + $0x170] sm:$0xff] %v9848_v30  ;;  %v5551_v45 = vadd.f32 %v5550_v0, %v5358_v35  ;;  %v5441_v17 = vpop.f32.mrf.mxu0  ;;  %6132 = vmatmul.mubr.bf16.gmra.mxu0 %v11552_v9  ;;  %v5368_v47 = vadd.f32 %v13370_v57, %v15864_v50 }
 0x32d   : > { %v5554_v5 = vpop.f32.mrf.mxu1  ;;  %6019 = vmatmul.mubr.bf16.gmra.mxu1 %v11551_v38  ;;  %v13540_v53 = vadd.f32 %v5441_v17, %v13350_v43  ;;  %6141 = vmatprep.mubr.bf16.mxu0 %v11554_v14  ;;  %v11556_v17 = vld [vmem:[%s12127_s7 + $0x198] ss:$28 sps:$4 sm:$0xff]  }
 0x32e   : > { %v9853_v54 = vpack.c.bf16 %v5551_v45, %v5549_v24  ;;  %6028 = vmatprep.mubr.bf16.mxu1 %v11553_v62  ;;  %v13544_v32 = vpop.f32.mrf.mxu0  ;;  %6450 = vmatpush2.bf16.msra.mxu0 %v11188_v13  ;;  %v5555_v11 = vadd.f32 %v5554_v5, %v13353_v58  ;;  %v11200_v58 = vld [vmem:[#allocation5 + $0x2a0] ss:$36 sps:$4 sm:$0xff]   ;;  %v11206_v62 = vld [vmem:[#allocation5 + $0x258] ss:$36 sps:$4 sm:$0xff]  }
 0x32f   : > { %v5556_v36 = vpop.f32.mrf.mxu1  ;;  %6451 = vmatprep.subr.bf16.mxu0 %v11196_v18  ;;  %v11208_v24 = vld [vmem:[#allocation5 + $0x25c] ss:$36 sps:$4 sm:$0xff]   ;;  %v11555_v18 = vld [vmem:[%s12127_s7 + $0x350] ss:$28 sps:$4 sm:$0xff]  }
 0x330   : > { %8793 = vst [vmem:[%s12616_s20 + $0x194] sm:$0xff] %v9853_v54  ;;  %v5557_v22 = vadd.f32 %v5556_v36, %v5364_v26  ;;  %v5445_v16 = vpop.f32.mrf.mxu0 }
 0x331   : > { %v5558_v43 = vpop.f32.mrf.mxu1  ;;  %v13551_v63 = vadd.f32 %v5445_v16, %v13365_v42  ;;  %v15865_v42 = vld [vmem:[#allocation27_spill] sm:$0xff] }
 0x332   : > { %v9858_v52 = vpack.c.bf16 %v5557_v22, %v5555_v11  ;;  %v13553_v35 = vpop.f32.mrf.mxu0  ;;  %6452 = vmatpush2.bf16.msra.mxu0 %v11194_v41  ;;  %v5559_v0 = vadd.f32 %v5558_v43, %v13368_v29  ;;  %v5374_v5 = vadd.f32 %v13387_v6, %v15865_v42  ;;  %v15866_v29 = vmov 0   ;;  %v11214_v6 = vld [vmem:[#allocation5 + $0xb14] ss:$36 sps:$4 sm:$0xff]   ;;  %v15867_v11 = vld [vmem:[#allocation28_spill] sm:$0xff] }
 0x333   : > { %v5560_v30 = vpop.f32.mrf.mxu1  ;;  %6453 = vmatprep.subr.bf16.mxu0 %v11202_v61  ;;  %v5378_v22 = vadd.f32 %v13400_v27, %v15867_v11  ;;  %v11167_v43 = vld [vmem:[#allocation5 + $0x690] ss:$36 sps:$4 sm:$0xff]   ;;  %v11181_v42 = vld [vmem:[#allocation5 + $0x604] ss:$36 sps:$4 sm:$0xff]   ;;  %v11187_v11 = vld [vmem:[#allocation5 + $0x5bc] ss:$36 sps:$4 sm:$0xff]  }
 0x334   : > { %8798 = vst [vmem:[%s12616_s20 + $0x1b8] sm:$0xff] %v9858_v52  ;;  %v5561_v13 = vadd.f32 %v5560_v30, %v5368_v47  ;;  %v5451_v45 = vpop.f32.mrf.mxu0  ;;  %6142 = vmatmul.mubr.bf16.gmra.mxu0 %v11556_v17  ;;  %v11558_v27 = vld [vmem:[%s12127_s7 + $0x1d0] ss:$28 sps:$4 sm:$0xff]  }
 0x335   : > { %v5564_v57 = vpop.f32.mrf.mxu1  ;;  %6029 = vmatmul.mubr.bf16.gmra.mxu1 %v11555_v18  ;;  %v13562_v9 = vadd.f32 %v5451_v45, %v13380_v25  ;;  %6151 = vmatprep.mubr.bf16.mxu0 %v11557_v60  ;;  %v11173_v18 = vld [vmem:[#allocation5 + $0x648] ss:$36 sps:$4 sm:$0xff]  }
 0x336   : > { %v9863_v38 = vpack.c.bf16 %v5561_v13, %v5559_v0  ;;  %6264 = vmatprep.mubr.bf16.mxu1 %v15866_v29  ;;  %v13566_v26 = vpop.f32.mrf.mxu0  ;;  %6454 = vmatpush2.bf16.msra.mxu0 %v11200_v58  ;;  %v5565_v14 = vadd.f32 %v5564_v57, %v13383_v56  ;;  %v11175_v56 = vld [vmem:[#allocation5 + $0x64c] ss:$36 sps:$4 sm:$0xff]  }
 0x337   : > { %v5566_v54 = vpop.f32.mrf.mxu1  ;;  %6455 = vmatprep.subr.bf16.mxu0 %v11208_v24  ;;  %v15868_v13 = vld [vmem:[#allocation29_spill] sm:$0xff]  ;;  %v11560_v57 = vld [vmem:[%s12127_s7 + $0x20c] ss:$28 sps:$4 sm:$0xff]  }
 0x338   : > { %8803 = vst [vmem:[%s12616_s20 + $0x1dc] sm:$0xff] %v9863_v38  ;;  %v5567_v36 = vadd.f32 %v5566_v54, %v5374_v5  ;;  %v5455_v41 = vpop.f32.mrf.mxu0  ;;  %v5384_v24 = vadd.f32 %v13412_v3, %v15868_v13  ;;  %v15869_v54 = vld [vmem:[#allocation30_spill] sm:$0xff] }
 0x339   : > { %v5568_v25 = vpop.f32.mrf.mxu1  ;;  %v13573_v16 = vadd.f32 %v5455_v41, %v13395_v33  ;;  %v11559_v33 = vld [vmem:[%s12127_s7 + $0x18] ss:$28 sps:$4 sm:$0xff]   ;;  %v11179_v41 = vld [vmem:[#allocation5 + $0x600] ss:$36 sps:$4 sm:$0xff]  }
 0x33a   : > { %v9868_v61 = vpack.c.bf16 %v5567_v36, %v5565_v14  ;;  %v13575_v50 = vpop.f32.mrf.mxu0  ;;  %6456 = vmatpush2.bf16.msra.mxu0 %v11206_v62  ;;  %v5569_v52 = vadd.f32 %v5568_v25, %v13398_v51  ;;  %v5388_v62 = vadd.f32 %v13421_v49, %v15869_v54  ;;  %v11562_v49 = vld [vmem:[%s12127_s7 + $0x50] ss:$28 sps:$4 sm:$0xff]  }
 0x33b   : > { %v5570_v47 = vpop.f32.mrf.mxu1  ;;  %6811 = vmatprep.subr.bf16.mxu0 %v11214_v6  ;;  %v11199_v54 = vld [vmem:[#allocation5 + $0x52c] ss:$36 sps:$4 sm:$0xff]  }
 0x33c   : > { %8808 = vst [vmem:[%s12616_s20 + $0x200] sm:$0xff] %v9868_v61  ;;  %v5571_v30 = vadd.f32 %v5570_v47, %v5378_v22  ;;  %v13579_v0 = vpop.f32.mrf.mxu0  ;;  %6152 = vmatmul.mubr.bf16.gmra.mxu0 %v11558_v27  ;;  %v15870_v47 = vld [vmem:[#allocation31_spill] sm:$0xff]  ;;  %v11185_v27 = vld [vmem:[#allocation5 + $0x5b8] ss:$36 sps:$4 sm:$0xff]  }
 0x33d   : > { %v5574_v58 = vpop.f32.mrf.mxu1  ;;  %6265 = vmatmul.mubr.bf16.vlgmr.msra.gmra.mxu1 %v11559_v33  ;;  %6161 = vmatprep.mubr.bf16.mxu0 %v11560_v57  ;;  %v15871_v57 = vld [vmem:[#allocation33_spill] sm:$0xff] }
 0x33e   : > { %v9873_v45 = vpack.c.bf16 %v5571_v30, %v5569_v52  ;;  %6619 = vmatpush1.bf16.msra.mxu1 %v11167_v43  ;;  %v13586_v51 = vpop.f32.mrf.mxu0  ;;  %6274 = vmatprep.mubr.bf16.mxu1 %v15866_v29  ;;  %v5575_v5 = vadd.f32 %v5574_v58, %v13409_v19  ;;  %v11561_v43 = vld [vmem:[%s12127_s7 + $0x208] ss:$28 sps:$4 sm:$0xff]  }
 0x33f   : > { %v5576_v17 = vpop.f32.mrf.mxu1  ;;  %6620 = vmatprep.subr.bf16.mxu1 %v11175_v56  ;;  %v5394_v56 = vadd.f32 %v13434_v28, %v15870_v47  ;;  %v11563_v30 = vld [vmem:[%s12127_s7 + $0x244] ss:$28 sps:$4 sm:$0xff]  }
 0x340   : > { %8813 = vst [vmem:[%s12616_s20 + $0x224] sm:$0xff] %v9873_v45  ;;  %v5577_v38 = vadd.f32 %v5576_v17, %v5384_v24  ;;  %v13591_v3 = vpop.f32.mrf.mxu0  ;;  %v11193_v24 = vld [vmem:[#allocation5 + $0x574] ss:$36 sps:$4 sm:$0xff]  }
 0x341   : > { %v5578_v60 = vpop.f32.mrf.mxu1 }
 0x342   : > { %v9878_v14 = vpack.c.bf16 %v5577_v38, %v5575_v5  ;;  %6621 = vmatpush1.bf16.msra.mxu1 %v11173_v18  ;;  %v13595_v6 = vpop.f32.mrf.mxu0  ;;  %v5579_v19 = vadd.f32 %v5578_v60, %v13419_v8  ;;  %v5398_v18 = vadd.f32 %v13443_v46, %v15871_v57  ;;  %v11191_v38 = vld [vmem:[#allocation5 + $0x570] ss:$36 sps:$4 sm:$0xff]   ;;  %v11565_v46 = vld [vmem:[%s12127_s7 + $0x88] ss:$28 sps:$4 sm:$0xff]  }
 0x343   : > { %v5580_v36 = vpop.f32.mrf.mxu1  ;;  %6622 = vmatprep.subr.bf16.mxu1 %v11181_v42 }
 0x344   : > { %8818 = vst [vmem:[%s12616_s20 + $0x248] sm:$0xff] %v9878_v14  ;;  %v5581_v25 = vadd.f32 %v5580_v36, %v5388_v62  ;;  %v13599_v61 = vpop.f32.mrf.mxu0  ;;  %6162 = vmatmul.mubr.bf16.gmra.mxu0 %v11561_v43  ;;  %v11564_v36 = vld [vmem:[%s12127_s7 + $0x240] ss:$28 sps:$4 sm:$0xff]   ;;  %v11197_v43 = vld [vmem:[#allocation5 + $0x528] ss:$36 sps:$4 sm:$0xff]  }
 0x345   : > { %v5584_v22 = vpop.f32.mrf.mxu1  ;;  %6275 = vmatmul.mubr.bf16.gmra.mxu1 %v11562_v49  ;;  %6171 = vmatprep.mubr.bf16.mxu0 %v11563_v30  ;;  %v5408_v30 = vadd.f32 %v13465_v7, %v13254_v44  ;;  %v11568_v44 = vld [vmem:[%s12127_s7 + $0xc0] ss:$28 sps:$4 sm:$0xff]  }
 0x346   : > { %v9883_v52 = vpack.c.bf16 %v5581_v25, %v5579_v19  ;;  %6284 = vmatprep.mubr.bf16.mxu1 %v15866_v29  ;;  %v13607_v8 = vpop.f32.mrf.mxu0  ;;  %6623 = vmatpush1.bf16.msra.mxu1 %v11179_v41  ;;  %v5585_v33 = vadd.f32 %v5584_v22, %v13430_v34  ;;  %v15872_v41 = vld [vmem:[#allocation34_spill] sm:$0xff]  ;;  %v15873_v7 = vld [vmem:[#allocation35_spill] sm:$0xff] }
 0x347   : > { %v5586_v58 = vpop.f32.mrf.mxu1  ;;  %6624 = vmatprep.subr.bf16.mxu1 %v11187_v11  ;;  %v5404_v19 = vadd.f32 %v13456_v48, %v15872_v41  ;;  %v11566_v11 = vld [vmem:[%s12127_s7 + $0x27c] ss:$28 sps:$4 sm:$0xff]  }
 0x348   : > { %8823 = vst [vmem:[%s12616_s20 + $0x26c] sm:$0xff] %v9883_v52  ;;  %v5587_v13 = vadd.f32 %v5586_v58, %v5394_v56  ;;  %v13611_v28 = vpop.f32.mrf.mxu0  ;;  %v11205_v56 = vld [vmem:[#allocation5 + $0x4e4] ss:$36 sps:$4 sm:$0xff]  }
 0x349   : > { %v5588_v45 = vpop.f32.mrf.mxu1 }
 0x34a   : > { %v9888_v17 = vpack.c.bf16 %v5587_v13, %v5585_v33  ;;  %v13615_v5 = vpop.f32.mrf.mxu0  ;;  %6625 = vmatpush1.bf16.msra.mxu1 %v11185_v27  ;;  %v5589_v34 = vadd.f32 %v5588_v45, %v13441_v4  ;;  %v11203_v13 = vld [vmem:[#allocation5 + $0x4e0] ss:$36 sps:$4 sm:$0xff]  }
 0x34b   : > { %v5590_v42 = vpop.f32.mrf.mxu1  ;;  %6626 = vmatprep.subr.bf16.mxu1 %v11193_v24  ;;  %v11211_v45 = vld [vmem:[#allocation5 + $0x49c] ss:$36 sps:$4 sm:$0xff]  }
 0x34c   : > { %8828 = vst [vmem:[%s12616_s20 + $0x290] sm:$0xff] %v9888_v17  ;;  %v5591_v60 = vadd.f32 %v5590_v42, %v5398_v18  ;;  %v13619_v14 = vpop.f32.mrf.mxu0  ;;  %6172 = vmatmul.mubr.bf16.gmra.mxu0 %v11564_v36  ;;  %v11567_v17 = vld [vmem:[%s12127_s7 + $0x278] ss:$28 sps:$4 sm:$0xff]   ;;  %v5414_v42 = vadd.f32 %v13478_v59, %v15873_v7  ;;  %v11229_v7 = vld [vmem:[#allocation5 + $0x844] ss:$36 sps:$4 sm:$0xff]  }
 0x34d   : > { %v5594_v62 = vpop.f32.mrf.mxu1  ;;  %6285 = vmatmul.mubr.bf16.gmra.mxu1 %v11565_v46  ;;  %6181 = vmatprep.mubr.bf16.mxu0 %v11566_v11  ;;  %v11217_v46 = vld [vmem:[#allocation5 + $0x8d4] ss:$36 sps:$4 sm:$0xff]  }
 0x34e   : > { %v9893_v25 = vpack.c.bf16 %v5591_v60, %v5589_v34  ;;  %6294 = vmatprep.mubr.bf16.mxu1 %v15866_v29  ;;  %v13627_v22 = vpop.f32.mrf.mxu0  ;;  %6627 = vmatpush1.bf16.msra.mxu1 %v11191_v38  ;;  %v5595_v49 = vadd.f32 %v5594_v62, %v13452_v40  ;;  %v11569_v34 = vld [vmem:[%s12127_s7 + $0x2b4] ss:$28 sps:$4 sm:$0xff]  }
 0x34f   : > { %v5596_v4 = vpop.f32.mrf.mxu1  ;;  %6628 = vmatprep.subr.bf16.mxu1 %v11199_v54  ;;  %v11209_v54 = vld [vmem:[#allocation5 + $0x498] ss:$36 sps:$4 sm:$0xff]  }
 0x350   : > { %8833 = vst [vmem:[%s12616_s20 + $0x2b4] sm:$0xff] %v9893_v25  ;;  %v5597_v47 = vadd.f32 %v5596_v4, %v5404_v19  ;;  %v13631_v48 = vpop.f32.mrf.mxu0  ;;  %v15874_v19 = vld [vmem:[#allocation36_spill] sm:$0xff] }
 0x351   : > { %v5598_v52 = vpop.f32.mrf.mxu1  ;;  %v5418_v25 = vadd.f32 %v13487_v1, %v15874_v19  ;;  %v11571_v1 = vld [vmem:[%s12127_s7 + $0xf8] ss:$28 sps:$4 sm:$0xff]  }
 0x352   : > { %v9898_v58 = vpack.c.bf16 %v5597_v47, %v5595_v49  ;;  %v13635_v33 = vpop.f32.mrf.mxu0  ;;  %6629 = vmatpush1.bf16.msra.mxu1 %v11197_v43  ;;  %v5599_v40 = vadd.f32 %v5598_v52, %v13463_v31  ;;  %v11215_v49 = vld [vmem:[#allocation5 + $0x8d0] ss:$36 sps:$4 sm:$0xff]  }
 0x353   : > { %v5600_v27 = vpop.f32.mrf.mxu1  ;;  %6630 = vmatprep.subr.bf16.mxu1 %v11205_v56  ;;  %v11223_v56 = vld [vmem:[#allocation5 + $0x88c] ss:$36 sps:$4 sm:$0xff]  }
 0x354   : > { %8838 = vst [vmem:[%s12616_s20 + $0x2d8] sm:$0xff] %v9898_v58  ;;  %v5601_v24 = vadd.f32 %v5600_v27, %v5408_v30  ;;  %v13639_v18 = vpop.f32.mrf.mxu0  ;;  %6182 = vmatmul.mubr.bf16.gmra.mxu0 %v11567_v17  ;;  %v11570_v58 = vld [vmem:[%s12127_s7 + $0x2b0] ss:$28 sps:$4 sm:$0xff]  }
 0x355   : > { %v5604_v57 = vpop.f32.mrf.mxu1  ;;  %6295 = vmatmul.mubr.bf16.gmra.mxu1 %v11568_v44  ;;  %6191 = vmatprep.mubr.bf16.mxu0 %v11569_v34  ;;  %v15875_v27 = vld [vmem:[#allocation37_spill] sm:$0xff] }
 0x356   : > { %v9903_v38 = vpack.c.bf16 %v5601_v24, %v5599_v40  ;;  %6304 = vmatprep.mubr.bf16.mxu1 %v15866_v29  ;;  %v13647_v60 = vpop.f32.mrf.mxu0  ;;  %6631 = vmatpush1.bf16.msra.mxu1 %v11203_v13  ;;  %v5605_v62 = vadd.f32 %v5604_v57, %v13474_v15  ;;  %v5424_v13 = vadd.f32 %v13500_v10, %v15875_v27  ;;  %v11572_v24 = vld [vmem:[%s12127_s7 + $0x2ec] ss:$28 sps:$4 sm:$0xff]   ;;  %v11241_v27 = vld [vmem:[#allocation5 + $0x7b4] ss:$36 sps:$4 sm:$0xff]  }
 0x357   : > { %v5606_v31 = vpop.f32.mrf.mxu1  ;;  %6632 = vmatprep.subr.bf16.mxu1 %v11211_v45  ;;  %v11221_v57 = vld [vmem:[#allocation5 + $0x888] ss:$36 sps:$4 sm:$0xff]  }
 0x358   : > { %8843 = vst [vmem:[%s12616_s20 + $0x2fc] sm:$0xff] %v9903_v38  ;;  %v5607_v36 = vadd.f32 %v5606_v31, %v5414_v42  ;;  %v13651_v59 = vpop.f32.mrf.mxu0  ;;  %v15876_v38 = vld [vmem:[#allocation38_spill] sm:$0xff] }
 0x359   : > { %v5608_v41 = vpop.f32.mrf.mxu1  ;;  %v5428_v34 = vadd.f32 %v13509_v39, %v15876_v38  ;;  %v11574_v39 = vld [vmem:[%s12127_s7 + $0x130] ss:$28 sps:$4 sm:$0xff]  }
 0x35a   : > { %v9908_v11 = vpack.c.bf16 %v5607_v36, %v5605_v62  ;;  %v13655_v43 = vpop.f32.mrf.mxu0  ;;  %6633 = vmatpush1.bf16.msra.mxu1 %v11209_v54  ;;  %v5609_v15 = vadd.f32 %v5608_v41, %v13485_v55  ;;  %v11227_v36 = vld [vmem:[#allocation5 + $0x840] ss:$36 sps:$4 sm:$0xff]  }
 0x35b   : > { %v5610_v4 = vpop.f32.mrf.mxu1  ;;  %6634 = vmatprep.subr.bf16.mxu1 %v11217_v46  ;;  %v11235_v41 = vld [vmem:[#allocation5 + $0x7fc] ss:$36 sps:$4 sm:$0xff]  }
 0x35c   : > { %8848 = vst [vmem:[%s12616_s20 + $0x320] sm:$0xff] %v9908_v11  ;;  %v5611_v47 = vadd.f32 %v5610_v4, %v5418_v25  ;;  %v13659_v30 = vpop.f32.mrf.mxu0  ;;  %6192 = vmatmul.mubr.bf16.gmra.mxu0 %v11570_v58  ;;  %v11573_v11 = vld [vmem:[%s12127_s7 + $0x2e8] ss:$28 sps:$4 sm:$0xff]  }
 0x35d   : > { %v5614_v52 = vpop.f32.mrf.mxu1  ;;  %6305 = vmatmul.mubr.bf16.gmra.mxu1 %v11571_v1  ;;  %6201 = vmatprep.mubr.bf16.mxu0 %v11572_v24  ;;  %v15877_v4 = vld [vmem:[#allocation39_spill] sm:$0xff] }
 0x35e   : > { %v9913_v40 = vpack.c.bf16 %v5611_v47, %v5609_v15  ;;  %6314 = vmatprep.mubr.bf16.mxu1 %v15866_v29  ;;  %v13667_v45 = vpop.f32.mrf.mxu0  ;;  %6635 = vmatpush2.bf16.msra.mxu1 %v11215_v49  ;;  %v5615_v17 = vadd.f32 %v5614_v52, %v13496_v37  ;;  %v5434_v49 = vadd.f32 %v13522_v23, %v15877_v4  ;;  %v11575_v47 = vld [vmem:[%s12127_s7 + $0x324] ss:$28 sps:$4 sm:$0xff]   ;;  %v11233_v52 = vld [vmem:[#allocation5 + $0x7f8] ss:$36 sps:$4 sm:$0xff]  }
 0x35f   : > { %v5616_v55 = vpop.f32.mrf.mxu1  ;;  %6636 = vmatprep.subr.bf16.mxu1 %v11223_v56  ;;  %v11253_v4 = vld [vmem:[#allocation5 + $0x724] ss:$36 sps:$4 sm:$0xff]  }
 0x360   : > { %8853 = vst [vmem:[%s12616_s20 + $0x344] sm:$0xff] %v9913_v40  ;;  %v5617_v44 = vadd.f32 %v5616_v55, %v5424_v13  ;;  %v13671_v10 = vpop.f32.mrf.mxu0  ;;  %v15878_v40 = vld [vmem:[#allocation40_spill] sm:$0xff] }
 0x361   : > { %v5618_v42 = vpop.f32.mrf.mxu1  ;;  %v5438_v24 = vadd.f32 %v13531_v21, %v15878_v40  ;;  %v11577_v21 = vld [vmem:[%s12127_s7 + $0x168] ss:$28 sps:$4 sm:$0xff]  }
 0x362   : > { %v9918_v31 = vpack.c.bf16 %v5617_v44, %v5615_v17  ;;  %v13675_v62 = vpop.f32.mrf.mxu0  ;;  %6637 = vmatpush2.bf16.msra.mxu1 %v11221_v57  ;;  %v5619_v37 = vadd.f32 %v5618_v42, %v13507_v2  ;;  %v11239_v44 = vld [vmem:[#allocation5 + $0x7b0] ss:$36 sps:$4 sm:$0xff]  }
 0x363   : > { %v5620_v54 = vpop.f32.mrf.mxu1  ;;  %6638 = vmatprep.subr.bf16.mxu1 %v11229_v7  ;;  %v11247_v42 = vld [vmem:[#allocation5 + $0x76c] ss:$36 sps:$4 sm:$0xff]  }
 0x364   : > { %8858 = vst [vmem:[%s12616_s20 + $0x368] sm:$0xff] %v9918_v31  ;;  %v5621_v46 = vadd.f32 %v5620_v54, %v5428_v34  ;;  %v13679_v25 = vpop.f32.mrf.mxu0  ;;  %6202 = vmatmul.mubr.bf16.gmra.mxu0 %v11573_v11  ;;  %v11576_v31 = vld [vmem:[%s12127_s7 + $0x320] ss:$28 sps:$4 sm:$0xff]   ;;  %v15879_v54 = vld [vmem:[#allocation41_spill] sm:$0xff] }
 0x365   : > { %v5624_v19 = vpop.f32.mrf.mxu1  ;;  %6315 = vmatmul.mubr.bf16.gmra.mxu1 %v11574_v39  ;;  %6211 = vmatprep.mubr.bf16.mxu0 %v11575_v47 }
 0x366   : > { %v9923_v15 = vpack.c.bf16 %v5621_v46, %v5619_v37  ;;  %6324 = vmatprep.mubr.bf16.mxu1 %v15866_v29  ;;  %v13687_v56 = vpop.f32.mrf.mxu0  ;;  %6639 = vmatpush2.bf16.msra.mxu1 %v11227_v36  ;;  %v5625_v58 = vadd.f32 %v5624_v19, %v13518_v12  ;;  %v5444_v36 = vadd.f32 %v13544_v32, %v15879_v54  ;;  %v11578_v46 = vld [vmem:[%s12127_s7 + $0x35c] ss:$28 sps:$4 sm:$0xff]   ;;  %v11245_v19 = vld [vmem:[#allocation5 + $0x768] ss:$36 sps:$4 sm:$0xff]  }
 0x367   : > { %v5626_v2 = vpop.f32.mrf.mxu1  ;;  %6640 = vmatprep.subr.bf16.mxu1 %v11235_v41  ;;  %v11257_v54 = vld [vmem:[#allocation5 + $0x6d8] ss:$36 sps:$4 sm:$0xff]  }
 0x368   : > { %8863 = vst [vmem:[%s12616_s20 + $0x38c] sm:$0xff] %v9923_v15  ;;  %v5627_v1 = vadd.f32 %v5626_v2, %v5434_v49  ;;  %v13691_v23 = vpop.f32.mrf.mxu0  ;;  %v15880_v15 = vld [vmem:[#allocation42_spill] sm:$0xff] }
 0x369   : > { %v5628_v13 = vpop.f32.mrf.mxu1  ;;  %v5448_v47 = vadd.f32 %v13553_v35, %v15880_v15  ;;  %v11579_v35 = vld [vmem:[%s12127_s7 + $0x358] ss:$28 sps:$4 sm:$0xff]  }
 0x36a   : > { %v9928_v55 = vpack.c.bf16 %v5627_v1, %v5625_v58  ;;  %v13695_v17 = vpop.f32.mrf.mxu0  ;;  %6641 = vmatpush2.bf16.msra.mxu1 %v11233_v52  ;;  %v5629_v12 = vadd.f32 %v5628_v13, %v13529_v20  ;;  %v11251_v1 = vld [vmem:[#allocation5 + $0x720] ss:$36 sps:$4 sm:$0xff]  }
 0x36b   : > { %v5630_v57 = vpop.f32.mrf.mxu1  ;;  %6642 = vmatprep.subr.bf16.mxu1 %v11241_v27  ;;  %v15881_v27 = vld [vmem:[#allocation12_spill] sm:$0xff] }
 0x36c   : > { %8868 = vst [vmem:[%s12616_s20 + $0x3b0] sm:$0xff] %v9928_v55  ;;  %v5631_v7 = vadd.f32 %v5630_v57, %v5438_v24  ;;  %v13699_v34 = vpop.f32.mrf.mxu0  ;;  %6212 = vmatmul.mubr.bf16.gmra.mxu0 %v11576_v31  ;;  %v930_v13 = vsub.s32 4, %v15881_v27  ;;  %v11259_v24 = vld [vmem:[#allocation5 + $0x6dc] ss:$36 sps:$4 sm:$0xff]  }
 0x36d   : > { %v5634_v38 = vpop.f32.mrf.mxu1  ;;  %6325 = vmatmul.mubr.bf16.gmra.mxu1 %v11577_v21  ;;  %6221 = vmatprep.mubr.bf16.mxu0 %v11578_v46 }
 0x36e   : > { %v9933_v37 = vpack.c.bf16 %v5631_v7, %v5629_v12  ;;  %6334 = vmatprep.mubr.bf16.mxu1 %v15866_v29  ;;  %v13707_v41 = vpop.f32.mrf.mxu0  ;;  %6643 = vmatpush2.bf16.msra.mxu1 %v11239_v44  ;;  %v5635_v11 = vadd.f32 %v5634_v38, %v13540_v53  ;;  %v11580_v44 = vld [vmem:[%s12127_s7 + $0x1a0] ss:$28 sps:$4 sm:$0xff]  }
 0x36f   : > { %v5636_v20 = vpop.f32.mrf.mxu1  ;;  %6644 = vmatprep.subr.bf16.mxu1 %v11247_v42  ;;  %v15882_v12 = vld [vmem:[#allocation43_spill] sm:$0xff]  ;;  %v934_v42 = vsub.s32 5, %v15881_v27  ;;  %v11595_v27 = vld [vmem:[%s12127_s7 + $0x2b8] ss:$28 sps:$4 sm:$0xff]  }
 0x370   : > { %8873 = vst [vmem:[%s12616_s20 + $0x3d4] sm:$0xff] %v9933_v37  ;;  %v5637_v39 = vadd.f32 %v5636_v20, %v5444_v36  ;;  %v13711_v32 = vpop.f32.mrf.mxu0  ;;  %v5454_v7 = vadd.f32 %v13566_v26, %v15882_v12  ;;  %v11582_v36 = vld [vmem:[#allocation7] sm:$0xff]  ;;  %v11265_v20 = vld [vmem:[#allocation5 + $0xf94] ss:$36 sps:$4 sm:$0xff]  }
 0x371   : > { %v5638_v49 = vpop.f32.mrf.mxu1  ;;  %v13731_v37 = vrot.slane %v11582_v36, %v930_v13 }
 0x372   : > { %v9938_v2 = vpack.c.bf16 %v5637_v39, %v5635_v11  ;;  %v13715_v58 = vpop.f32.mrf.mxu0  ;;  %6645 = vmatpush2.bf16.msra.mxu1 %v11245_v19  ;;  %v5639_v53 = vadd.f32 %v5638_v49, %v13551_v63  ;;  %v11581_v63 = vld [vmem:[%s12127_s7 + $0x4] ss:$28 sps:$4 sm:$0xff]   ;;  %v15883_v39 = vld [vmem:[#allocation44_spill] sm:$0xff]  ;;  %v13739_v49 = vrot.slane %v11582_v36, %v934_v42  ;;  %v11585_v42 = vld [vmem:[%s12127_s7 + $0x3c] ss:$28 sps:$4 sm:$0xff]  }
 0x373   : > { %v5640_v52 = vpop.f32.mrf.mxu1  ;;  %6646 = vmatprep.subr.bf16.mxu1 %v11253_v4  ;;  %v5458_v4 = vadd.f32 %v13575_v50, %v15883_v39 }
 0x374   : > { %8878 = vst [vmem:[%s12616_s20 + $0x3f8] sm:$0xff] %v9938_v2  ;;  %v5641_v40 = vadd.f32 %v5640_v52, %v5448_v47  ;;  %v13720_v57 = vpop.f32.mrf.mxu0  ;;  %6222 = vmatmul.mubr.bf16.gmra.mxu0 %v11579_v35  ;;  %v11212_v47 = vld [vmem:[#allocation5 + $0xb10] ss:$36 sps:$4 sm:$0xff]   ;;  %v5690_v35 = vadd.f32 %v13586_v51, %v13739_v49  ;;  %v5694_v36 = vadd.f32 %v13595_v6, %v13739_v49 }
 0x375   : > { %v5644_v55 = vpop.f32.mrf.mxu1  ;;  %6335 = vmatmul.mubr.bf16.gmra.mxu1 %v11580_v44  ;;  %6457 = vmatprep.mubr.bf16.mxu0 %v11581_v63  ;;  %v5692_v63 = vadd.f32 %v13591_v3, %v13731_v37  ;;  %v5698_v3 = vadd.f32 %v13599_v61, %v13731_v37  ;;  %v11587_v6 = vld [vmem:[%s12127_s7 + $0x38] ss:$28 sps:$4 sm:$0xff]  }
 0x376   : > { %v9943_v38 = vpack.c.bf16 %v5641_v40, %v5639_v53  ;;  %6344 = vmatprep.mubr.bf16.mxu1 %v15866_v29  ;;  %v13729_v21 = vpop.f32.mrf.mxu0  ;;  %6647 = vmatpush2.bf16.msra.mxu1 %v11251_v1  ;;  %v5645_v46 = vadd.f32 %v5644_v55, %v13562_v9  ;;  %v11220_v1 = vld [vmem:[#allocation5 + $0xacc] ss:$36 sps:$4 sm:$0xff]   ;;  %v5688_v9 = vadd.f32 %v13579_v0, %v13731_v37  ;;  %v11584_v55 = vld [vmem:[%s12127_s7] ss:$28 sps:$4 sm:$0xff]  }
 0x377   : > { %v5646_v31 = vpop.f32.mrf.mxu1  ;;  %6648 = vmatprep.subr.bf16.mxu1 %v11259_v24  ;;  %v11583_v24 = vld [vmem:[%s12127_s7 + $0x1d8] ss:$28 sps:$4 sm:$0xff]  }
 0x378   : > { %8883 = vst [vmem:[%s12616_s20 + $0x41c] sm:$0xff] %v9943_v38  ;;  %v5647_v26 = vadd.f32 %v5646_v31, %v5454_v7  ;;  %v13735_v11 = vpop.f32.mrf.mxu0  ;;  %v11226_v38 = vld [vmem:[#allocation5 + $0xa84] ss:$36 sps:$4 sm:$0xff]  }
 0x379   : > { %v5648_v19 = vpop.f32.mrf.mxu1 }
 0x37a   : > { %v9948_v15 = vpack.c.bf16 %v5647_v26, %v5645_v46  ;;  %v13741_v52 = vpop.f32.mrf.mxu0  ;;  %6649 = vmatpush2.bf16.msra.mxu1 %v11257_v54  ;;  %v5649_v13 = vadd.f32 %v5648_v19, %v13573_v16  ;;  %v11218_v16 = vld [vmem:[#allocation5 + $0xac8] ss:$36 sps:$4 sm:$0xff]   ;;  %v11224_v19 = vld [vmem:[#allocation5 + $0xa80] ss:$36 sps:$4 sm:$0xff]  }
 0x37b   : > { %v5650_v2 = vpop.f32.mrf.mxu1  ;;  %7004 = vmatprep.subr.bf16.mxu1 %v11265_v20 }
 0x37c   : > { %8888 = vst [vmem:[%s12616_s20 + $0x440] sm:$0xff] %v9948_v15  ;;  %v5651_v53 = vadd.f32 %v5650_v2, %v5458_v4  ;;  %v13747_v50 = vpop.f32.mrf.mxu0  ;;  %6458 = vmatmul.mubr.bf16.vlgmr.msra.gmra.mxu0 %v11584_v55  ;;  %v11232_v4 = vld [vmem:[#allocation5 + $0xa3c] ss:$36 sps:$4 sm:$0xff]   ;;  %v11586_v2 = vld [vmem:[%s12127_s7 + $0x210] ss:$28 sps:$4 sm:$0xff]  }
 0x37d   : > { %v5880_v40 = vpop.f32.mrf.mxu1  ;;  %6345 = vmatmul.mubr.bf16.gmra.mxu1 %v11583_v24  ;;  %6812 = vmatpush1.bf16.msra.mxu0 %v11212_v47  ;;  %v5702_v24 = vadd.f32 %v13611_v28, %v13731_v37  ;;  %v11236_v28 = vld [vmem:[#allocation5 + $0x9f0] ss:$36 sps:$4 sm:$0xff]  }
 0x37e   : > { %v9953_v44 = vpack.c.bf16 %v5651_v53, %v5649_v13  ;;  %v13753_v12 = vadd.f32 %v5880_v40, %v5688_v9  ;;  %6354 = vmatprep.mubr.bf16.mxu1 %v15866_v29  ;;  %v13756_v0 = vpop.f32.mrf.mxu0  ;;  %6467 = vmatprep.mubr.bf16.mxu0 %v11585_v42  ;;  %v11588_v13 = vld [vmem:[%s12127_s7 + $0x74] ss:$28 sps:$4 sm:$0xff]   ;;  %v11230_v40 = vld [vmem:[#allocation5 + $0xa38] ss:$36 sps:$4 sm:$0xff]  }
 0x37f   : > { %v5882_v7 = vpop.f32.mrf.mxu1  ;;  %6813 = vmatprep.subr.bf16.mxu0 %v11220_v1  ;;  %v5700_v1 = vadd.f32 %v13607_v8, %v13739_v49 }
 0x380   : > { %8893 = vst [vmem:[%s12616_s20 + $0x464] sm:$0xff] %v9953_v44  ;;  %v13762_v51 = vadd.f32 %v5882_v7, %v5690_v35  ;;  %v13764_v31 = vpop.f32.mrf.mxu0  ;;  %v11238_v35 = vld [vmem:[#allocation5 + $0x9f4] ss:$36 sps:$4 sm:$0xff]  }
 0x381   : > { %v5884_v54 = vpop.f32.mrf.mxu1  ;;  %6814 = vmatpush1.bf16.msra.mxu0 %v11218_v16  ;;  %v5704_v16 = vadd.f32 %v13615_v5, %v13739_v49  ;;  %v11590_v5 = vld [vmem:[%s12127_s7 + $0x70] ss:$28 sps:$4 sm:$0xff]  }
 0x382   : > { %15884 = vst [vmem:[#allocation13_spill] sm:$0xff] %v13762_v51  ;;  %v13768_v46 = vadd.f32 %v5884_v54, %v5692_v63  ;;  %v13770_v26 = vpop.f32.mrf.mxu0  ;;  %6815 = vmatprep.subr.bf16.mxu0 %v11226_v38  ;;  %v5708_v63 = vadd.f32 %v13619_v14, %v13731_v37  ;;  %v11608_v51 = vld [vmem:[%s12127_s7 + $0x1c0] ss:$28 sps:$4 sm:$0xff]  }
 0x383   : > { %v5886_v20 = vpop.f32.mrf.mxu1 }
 0x384   : > { %v13774_v39 = vadd.f32 %v5886_v20, %v5694_v36  ;;  %v13776_v15 = vpop.f32.mrf.mxu0  ;;  %6468 = vmatmul.mubr.bf16.gmra.mxu0 %v11587_v6  ;;  %v11244_v36 = vld [vmem:[#allocation5 + $0x9ac] ss:$36 sps:$4 sm:$0xff]  }
 0x385   : > { %v5890_v47 = vpop.f32.mrf.mxu1  ;;  %6355 = vmatmul.mubr.bf16.gmra.mxu1 %v11586_v2  ;;  %6477 = vmatprep.mubr.bf16.mxu0 %v11588_v13  ;;  %v11591_v2 = vld [vmem:[%s12127_s7 + $0xac] ss:$28 sps:$4 sm:$0xff]   ;;  %v5712_v13 = vadd.f32 %v13631_v48, %v13731_v37  ;;  %v11248_v48 = vld [vmem:[#allocation5 + $0x960] ss:$36 sps:$4 sm:$0xff]  }
 0x386   : > { %15885 = vst [vmem:[#allocation14_spill] sm:$0xff] %v13774_v39  ;;  %v13782_v9 = vadd.f32 %v5890_v47, %v5698_v3  ;;  %6364 = vmatprep.mubr.bf16.mxu1 %v15866_v29  ;;  %v13786_v61 = vpop.f32.mrf.mxu0  ;;  %6816 = vmatpush1.bf16.msra.mxu0 %v11224_v19  ;;  %v11589_v3 = vld [vmem:[%s12127_s7 + $0x248] ss:$28 sps:$4 sm:$0xff]  }
 0x387   : > { %v5892_v53 = vpop.f32.mrf.mxu1  ;;  %6817 = vmatprep.subr.bf16.mxu0 %v11232_v4  ;;  %v5710_v4 = vadd.f32 %v13627_v22, %v13739_v49  ;;  %v11607_v39 = vld [vmem:[%s12127_s7 + $0xc] ss:$28 sps:$4 sm:$0xff]  }
 0x388   : > { %v13790_v55 = vadd.f32 %v5892_v53, %v5700_v1  ;;  %v13792_v8 = vpop.f32.mrf.mxu0  ;;  %v11242_v1 = vld [vmem:[#allocation5 + $0x9a8] ss:$36 sps:$4 sm:$0xff]  }
 0x389   : > { %v5894_v44 = vpop.f32.mrf.mxu1 }
 0x38a   : > { %15886 = vst [vmem:[#allocation15_spill] sm:$0xff] %v13790_v55  ;;  %v13796_v7 = vadd.f32 %v5894_v44, %v5702_v24  ;;  %v13798_v42 = vpop.f32.mrf.mxu0  ;;  %6818 = vmatpush1.bf16.msra.mxu0 %v11230_v40  ;;  %v11250_v40 = vld [vmem:[#allocation5 + $0x964] ss:$36 sps:$4 sm:$0xff]  }
 0x38b   : > { %v5896_v38 = vpop.f32.mrf.mxu1  ;;  %6819 = vmatprep.subr.bf16.mxu0 %v11238_v35  ;;  %v5714_v35 = vadd.f32 %v13635_v33, %v13739_v49  ;;  %v11593_v33 = vld [vmem:[%s12127_s7 + $0xa8] ss:$28 sps:$4 sm:$0xff]  }
 0x38c   : > { %v13802_v54 = vadd.f32 %v5896_v38, %v5704_v16  ;;  %v13804_v20 = vpop.f32.mrf.mxu0  ;;  %6478 = vmatmul.mubr.bf16.gmra.mxu0 %v11590_v5  ;;  %v11592_v5 = vld [vmem:[%s12127_s7 + $0x280] ss:$28 sps:$4 sm:$0xff]  }
 0x38d   : > { %v5900_v19 = vpop.f32.mrf.mxu1  ;;  %6365 = vmatmul.mubr.bf16.gmra.mxu1 %v11589_v3  ;;  %6487 = vmatprep.mubr.bf16.mxu0 %v11591_v2  ;;  %v11606_v55 = vld [vmem:[%s12127_s7 + $0x1c4] ss:$28 sps:$4 sm:$0xff]  }
 0x38e   : > { %15887 = vst [vmem:[#allocation16_spill] sm:$0xff] %v13802_v54  ;;  %v13810_v47 = vadd.f32 %v5900_v19, %v5708_v63  ;;  %6374 = vmatprep.mubr.bf16.mxu1 %v15866_v29  ;;  %v13814_v14 = vpop.f32.mrf.mxu0  ;;  %6820 = vmatpush1.bf16.msra.mxu0 %v11236_v28  ;;  %v5718_v28 = vadd.f32 %v13639_v18, %v13731_v37  ;;  %v11601_v54 = vld [vmem:[%s12127_s7 + $0x328] ss:$28 sps:$4 sm:$0xff]  }
 0x38f   : > { %v5902_v6 = vpop.f32.mrf.mxu1  ;;  %6821 = vmatprep.subr.bf16.mxu0 %v11244_v36  ;;  %v11256_v36 = vld [vmem:[#allocation5 + $0x91c] ss:$36 sps:$4 sm:$0xff]  }
 0x390   : > { %v13818_v53 = vadd.f32 %v5902_v6, %v5710_v4  ;;  %v13820_v22 = vpop.f32.mrf.mxu0  ;;  %v5720_v4 = vadd.f32 %v13647_v60, %v13739_v49  ;;  %v11594_v6 = vld [vmem:[%s12127_s7 + $0xe4] ss:$28 sps:$4 sm:$0xff]  }
 0x391   : > { %v5904_v24 = vpop.f32.mrf.mxu1 }
 0x392   : > { %15888 = vst [vmem:[#allocation32_spill] sm:$0xff] %v13818_v53  ;;  %v13824_v44 = vadd.f32 %v5904_v24, %v5712_v13  ;;  %v13826_v16 = vpop.f32.mrf.mxu0  ;;  %6822 = vmatpush1.bf16.msra.mxu0 %v11242_v1  ;;  %v11254_v13 = vld [vmem:[#allocation5 + $0x918] ss:$36 sps:$4 sm:$0xff]  }
 0x393   : > { %v5906_v38 = vpop.f32.mrf.mxu1  ;;  %6823 = vmatprep.subr.bf16.mxu0 %v11250_v40  ;;  %v5722_v40 = vadd.f32 %v13651_v59, %v13731_v37  ;;  %v11260_v59 = vld [vmem:[#allocation5 + $0xd50] ss:$36 sps:$4 sm:$0xff]  }
 0x394   : > { %v13830_v63 = vadd.f32 %v5906_v38, %v5714_v35  ;;  %v13832_v19 = vpop.f32.mrf.mxu0  ;;  %6488 = vmatmul.mubr.bf16.gmra.mxu0 %v11593_v33  ;;  %v11262_v35 = vld [vmem:[#allocation5 + $0xd54] ss:$36 sps:$4 sm:$0xff]  }
 0x395   : > { %v5910_v3 = vpop.f32.mrf.mxu1  ;;  %6375 = vmatmul.mubr.bf16.gmra.mxu1 %v11592_v5  ;;  %6497 = vmatprep.mubr.bf16.mxu0 %v11594_v6 }
 0x396   : > { %15889 = vst [vmem:[#allocation17_spill] sm:$0xff] %v13830_v63  ;;  %v13838_v2 = vadd.f32 %v5910_v3, %v5718_v28  ;;  %6384 = vmatprep.mubr.bf16.mxu1 %v15866_v29  ;;  %v13842_v18 = vpop.f32.mrf.mxu0  ;;  %6824 = vmatpush1.bf16.msra.mxu0 %v11248_v48  ;;  %v5724_v28 = vadd.f32 %v13655_v43, %v13739_v49  ;;  %v11596_v43 = vld [vmem:[%s12127_s7 + $0xe0] ss:$28 sps:$4 sm:$0xff]   ;;  %v11598_v63 = vld [vmem:[%s12127_s7 + $0x2f0] ss:$28 sps:$4 sm:$0xff]  }
 0x397   : > { %v5912_v1 = vpop.f32.mrf.mxu1  ;;  %6825 = vmatprep.subr.bf16.mxu0 %v11256_v36  ;;  %v5728_v36 = vadd.f32 %v13659_v30, %v13731_v37 }
 0x398   : > { %v13846_v24 = vadd.f32 %v5912_v1, %v5720_v4  ;;  %v13848_v60 = vpop.f32.mrf.mxu0  ;;  %v11268_v4 = vld [vmem:[#allocation5 + $0xd0c] ss:$36 sps:$4 sm:$0xff]  }
 0x399   : > { %v5914_v38 = vpop.f32.mrf.mxu1 }
 0x39a   : > { %15890 = vst [vmem:[#allocation18_spill] sm:$0xff] %v13846_v24  ;;  %v13852_v3 = vadd.f32 %v5914_v38, %v5722_v40  ;;  %v13854_v5 = vpop.f32.mrf.mxu0  ;;  %6826 = vmatpush1.bf16.msra.mxu0 %v11254_v13  ;;  %v5730_v40 = vadd.f32 %v13667_v45, %v13739_v49  ;;  %v11597_v13 = vld [vmem:[%s12127_s7 + $0x11c] ss:$28 sps:$4 sm:$0xff]  }
 0x39b   : > { %v5916_v48 = vpop.f32.mrf.mxu1  ;;  %6827 = vmatprep.subr.bf16.mxu0 %v11262_v35 }
 0x39c   : > { %v13858_v33 = vadd.f32 %v5916_v48, %v5724_v28  ;;  %v13860_v6 = vpop.f32.mrf.mxu0  ;;  %6498 = vmatmul.mubr.bf16.gmra.mxu0 %v11596_v43  ;;  %v11266_v28 = vld [vmem:[#allocation5 + $0xd08] ss:$36 sps:$4 sm:$0xff]   ;;  %v5732_v48 = vadd.f32 %v13671_v10, %v13731_v37  ;;  %v11269_v10 = vld [vmem:[#allocation5 + $0xcc0] ss:$36 sps:$4 sm:$0xff]  }
 0x39d   : > { %v5920_v1 = vpop.f32.mrf.mxu1  ;;  %6385 = vmatmul.mubr.bf16.gmra.mxu1 %v11595_v27  ;;  %6507 = vmatprep.mubr.bf16.mxu0 %v11597_v13  ;;  %v11271_v43 = vld [vmem:[#allocation5 + $0xcc4] ss:$36 sps:$4 sm:$0xff]  }
 0x39e   : > { %15891 = vst [vmem:[#allocation19_spill] sm:$0xff] %v13858_v33  ;;  %v13866_v38 = vadd.f32 %v5920_v1, %v5728_v36  ;;  %6394 = vmatprep.mubr.bf16.mxu1 %v15866_v29  ;;  %v13870_v30 = vpop.f32.mrf.mxu0  ;;  %6828 = vmatpush2.bf16.msra.mxu0 %v11260_v59  ;;  %v5734_v1 = vadd.f32 %v13675_v62, %v13739_v49  ;;  %v11599_v62 = vld [vmem:[%s12127_s7 + $0x118] ss:$28 sps:$4 sm:$0xff]  }
 0x39f   : > { %v5922_v35 = vpop.f32.mrf.mxu1  ;;  %6829 = vmatprep.subr.bf16.mxu0 %v11268_v4  ;;  %v5738_v4 = vadd.f32 %v13679_v25, %v13731_v37 }
 0x3a0   : > { %v13874_v27 = vadd.f32 %v5922_v35, %v5730_v40  ;;  %v13876_v45 = vpop.f32.mrf.mxu0  ;;  %v11277_v35 = vld [vmem:[#allocation5 + $0xc7c] ss:$36 sps:$4 sm:$0xff]  }
 0x3a1   : > { %v5924_v36 = vpop.f32.mrf.mxu1 }
 0x3a2   : > { %15892 = vst [vmem:[#allocation20_spill] sm:$0xff] %v13874_v27  ;;  %v13880_v13 = vadd.f32 %v5924_v36, %v5732_v48  ;;  %v13882_v33 = vpop.f32.mrf.mxu0  ;;  %6830 = vmatpush2.bf16.msra.mxu0 %v11266_v28  ;;  %v5740_v48 = vadd.f32 %v13687_v56, %v13739_v49  ;;  %v11600_v28 = vld [vmem:[%s12127_s7 + $0x154] ss:$28 sps:$4 sm:$0xff]  }
 0x3a3   : > { %v5926_v59 = vpop.f32.mrf.mxu1  ;;  %6831 = vmatprep.subr.bf16.mxu0 %v11271_v43 }
 0x3a4   : > { %v13886_v40 = vadd.f32 %v5926_v59, %v5734_v1  ;;  %v13888_v27 = vpop.f32.mrf.mxu0  ;;  %6508 = vmatmul.mubr.bf16.gmra.mxu0 %v11599_v62  ;;  %v11275_v1 = vld [vmem:[#allocation5 + $0xc78] ss:$36 sps:$4 sm:$0xff]   ;;  %v5742_v59 = vadd.f32 %v13691_v23, %v13731_v37  ;;  %v11278_v23 = vld [vmem:[#allocation5 + $0xc30] ss:$36 sps:$4 sm:$0xff]  }
 0x3a5   : > { %v5930_v24 = vpop.f32.mrf.mxu1  ;;  %6395 = vmatmul.mubr.bf16.gmra.mxu1 %v11598_v63  ;;  %6517 = vmatprep.mubr.bf16.mxu0 %v11600_v28  ;;  %v11280_v62 = vld [vmem:[#allocation5 + $0xc34] ss:$36 sps:$4 sm:$0xff]  }
 0x3a6   : > { %15893 = vst [vmem:[#allocation21_spill] sm:$0xff] %v13886_v40  ;;  %v13894_v36 = vadd.f32 %v5930_v24, %v5738_v4  ;;  %6404 = vmatprep.mubr.bf16.mxu1 %v15866_v29  ;;  %v13898_v25 = vpop.f32.mrf.mxu0  ;;  %6832 = vmatpush2.bf16.msra.mxu0 %v11269_v10  ;;  %v5744_v4 = vadd.f32 %v13695_v17, %v13739_v49  ;;  %v11602_v17 = vld [vmem:[%s12127_s7 + $0x150] ss:$28 sps:$4 sm:$0xff]  }
 0x3a7   : > { %v5932_v43 = vpop.f32.mrf.mxu1  ;;  %6833 = vmatprep.subr.bf16.mxu0 %v11277_v35  ;;  %v5748_v35 = vadd.f32 %v13699_v34, %v13731_v37 }
 0x3a8   : > { %v13902_v63 = vadd.f32 %v5932_v43, %v5740_v48  ;;  %v13904_v56 = vpop.f32.mrf.mxu0  ;;  %v11286_v43 = vld [vmem:[#allocation5 + $0xbec] ss:$36 sps:$4 sm:$0xff]  }
 0x3a9   : > { %v5934_v24 = vpop.f32.mrf.mxu1 }
 0x3aa   : > { %15894 = vst [vmem:[#allocation22_spill] sm:$0xff] %v13902_v63  ;;  %v13908_v28 = vadd.f32 %v5934_v24, %v5742_v59  ;;  %v13910_v40 = vpop.f32.mrf.mxu0  ;;  %6834 = vmatpush2.bf16.msra.mxu0 %v11275_v1  ;;  %v5750_v59 = vadd.f32 %v13707_v41, %v13739_v49  ;;  %v11603_v1 = vld [vmem:[%s12127_s7 + $0x18c] ss:$28 sps:$4 sm:$0xff]  }
 0x3ab   : > { %v5936_v10 = vpop.f32.mrf.mxu1  ;;  %6835 = vmatprep.subr.bf16.mxu0 %v11280_v62 }
 0x3ac   : > { %v13914_v48 = vadd.f32 %v5936_v10, %v5744_v4  ;;  %v13916_v63 = vpop.f32.mrf.mxu0  ;;  %6518 = vmatmul.mubr.bf16.gmra.mxu0 %v11602_v17  ;;  %v11284_v4 = vld [vmem:[#allocation5 + $0xbe8] ss:$36 sps:$4 sm:$0xff]   ;;  %v5752_v10 = vadd.f32 %v13711_v32, %v13731_v37  ;;  %v11287_v32 = vld [vmem:[#allocation5 + $0xba0] ss:$36 sps:$4 sm:$0xff]  }
 0x3ad   : > { %v5940_v53 = vpop.f32.mrf.mxu1  ;;  %6405 = vmatmul.mubr.bf16.gmra.mxu1 %v11601_v54  ;;  %6527 = vmatprep.mubr.bf16.mxu0 %v11603_v1  ;;  %v11289_v17 = vld [vmem:[#allocation5 + $0xba4] ss:$36 sps:$4 sm:$0xff]  }
 0x3ae   : > { %15895 = vst [vmem:[#allocation23_spill] sm:$0xff] %v13914_v48  ;;  %v13922_v24 = vadd.f32 %v5940_v53, %v5748_v35  ;;  %6414 = vmatprep.mubr.bf16.mxu1 %v15866_v29  ;;  %v13926_v34 = vpop.f32.mrf.mxu0  ;;  %6836 = vmatpush2.bf16.msra.mxu0 %v11278_v23  ;;  %v5754_v35 = vadd.f32 %v13715_v58, %v13739_v49  ;;  %v11604_v58 = vld [vmem:[%s12127_s7 + $0x360] ss:$28 sps:$4 sm:$0xff]  }
 0x3af   : > { %v5942_v62 = vpop.f32.mrf.mxu1  ;;  %6837 = vmatprep.subr.bf16.mxu0 %v11286_v43  ;;  %v5758_v43 = vadd.f32 %v13720_v57, %v13731_v37 }
 0x3b0   : > { %v13930_v54 = vadd.f32 %v5942_v62, %v5750_v59  ;;  %v13932_v41 = vpop.f32.mrf.mxu0  ;;  %v11295_v62 = vld [vmem:[#allocation5 + $0xb5c] ss:$36 sps:$4 sm:$0xff]  }
 0x3b1   : > { %v5944_v53 = vpop.f32.mrf.mxu1 }
 0x3b2   : > { %15896 = vst [vmem:[#allocation24_spill] sm:$0xff] %v13930_v54  ;;  %v13936_v1 = vadd.f32 %v5944_v53, %v5752_v10  ;;  %v13938_v29 = vpop.f32.mrf.mxu0  ;;  %6838 = vmatpush2.bf16.msra.mxu0 %v11284_v4  ;;  %v11605_v10 = vld [vmem:[%s12127_s7 + $0x188] ss:$28 sps:$4 sm:$0xff]   ;;  %v5760_v53 = vadd.f32 %v13729_v21, %v13739_v49 }
 0x3b3   : > { %v5946_v23 = vpop.f32.mrf.mxu1  ;;  %6839 = vmatprep.subr.bf16.mxu0 %v11289_v17 }
 0x3b4   : > { %v13942_v59 = vadd.f32 %v5946_v23, %v5754_v35  ;;  %v13944_v54 = vpop.f32.mrf.mxu0  ;;  %6528 = vmatmul.mubr.bf16.gmra.mxu0 %v11605_v10  ;;  %v11293_v35 = vld [vmem:[#allocation5 + $0xb58] ss:$36 sps:$4 sm:$0xff]   ;;  %v5762_v23 = vadd.f32 %v13735_v11, %v13731_v37  ;;  %v11274_v11 = vld [vmem:[#allocation5 + $0xf4c] ss:$36 sps:$4 sm:$0xff]  }
 0x3b5   : > { %v5950_v48 = vpop.f32.mrf.mxu1  ;;  %6415 = vmatmul.mubr.bf16.gmra.mxu1 %v11604_v58  ;;  %6537 = vmatprep.mubr.bf16.mxu0 %v11606_v55  ;;  %v11296_v10 = vld [vmem:[#allocation5 + $0x458] ss:$36 sps:$4 sm:$0xff]  }
 0x3b6   : > { %15897 = vst [vmem:[#allocation25_spill] sm:$0xff] %v13942_v59  ;;  %v13950_v4 = vadd.f32 %v5950_v48, %v5758_v43  ;;  %6650 = vmatprep.mubr.bf16.mxu1 %v11607_v39  ;;  %v13954_v57 = vpop.f32.mrf.mxu0  ;;  %6840 = vmatpush2.bf16.msra.mxu0 %v11287_v32  ;;  %v5764_v39 = vadd.f32 %v13741_v52, %v13739_v49  ;;  %v11263_v43 = vld [vmem:[#allocation5 + $0xf90] ss:$36 sps:$4 sm:$0xff]   ;;  %v11609_v52 = vld [vmem:[%s12127_s7 + $0x8] ss:$28 sps:$4 sm:$0xff]  }
 0x3b7   : > { %v5952_v17 = vpop.f32.mrf.mxu1  ;;  %6841 = vmatprep.subr.bf16.mxu0 %v11295_v62  ;;  %v5768_v62 = vadd.f32 %v13747_v50, %v13731_v37  ;;  %v11610_v50 = vld [vmem:[%s12127_s7 + $0x1fc] ss:$28 sps:$4 sm:$0xff]  }
 0x3b8   : > { %v13958_v58 = vadd.f32 %v5952_v17, %v5760_v53  ;;  %v13960_v21 = vpop.f32.mrf.mxu0 }
 0x3b9   : > { %v5954_v48 = vpop.f32.mrf.mxu1 }
 0x3ba   : > { %15898 = vst [vmem:[#allocation26_spill] sm:$0xff] %v13958_v58  ;;  %v13964_v55 = vadd.f32 %v5954_v48, %v5762_v23  ;;  %v13966_v32 = vpop.f32.mrf.mxu0  ;;  %6842 = vmatpush2.bf16.msra.mxu0 %v11293_v35  ;;  %v5770_v23 = vadd.f32 %v13756_v0, %v13739_v49 }
 0x3bb   : > { %v5956_v59 = vpop.f32.mrf.mxu1  ;;  %9957 = vmatprep.subr.bf16.mxu0 %v11296_v10 }
 0x3bc   : > { %v13970_v53 = vadd.f32 %v5956_v59, %v5764_v39  ;;  %v6073_v58 = vpop.f32.mrf.mxu0  ;;  %6538 = vmatmul.mubr.bf16.gmra.mxu0 %v11608_v51  ;;  %v11272_v59 = vld [vmem:[#allocation5 + $0xf48] ss:$36 sps:$4 sm:$0xff]  }
 0x3bd   : > { %v5960_v17 = vpop.f32.mrf.mxu1  ;;  %6651 = vmatmul.mubr.bf16.vlgmr.msra.gmra.mxu1 %v11609_v52  ;;  %v13979_v35 = vadd.f32 %v6073_v58, %v13753_v12  ;;  %6547 = vmatprep.mubr.bf16.mxu0 %v11610_v50  ;;  %v11283_v51 = vld [vmem:[#allocation5 + $0xf04] ss:$36 sps:$4 sm:$0xff]   ;;  %v5772_v52 = vadd.f32 %v13764_v31, %v13731_v37  ;;  %v5774_v58 = vadd.f32 %v13770_v26, %v13739_v49 }
 0x3be   : > { %15899 = vst [vmem:[#allocation27_spill] sm:$0xff] %v13970_v53  ;;  %v13976_v48 = vadd.f32 %v5960_v17, %v5768_v62  ;;  %7005 = vmatpush1.bf16.msra.mxu1 %v11263_v43  ;;  %v13982_v39 = vpop.f32.mrf.mxu0  ;;  %v11611_v53 = vld [vmem:[%s12127_s7 + $0x44] ss:$28 sps:$4 sm:$0xff]  }
 0x3bf   : > { %v5962_v10 = vpop.f32.mrf.mxu1  ;;  %6660 = vmatprep.mubr.bf16.mxu1 %v11611_v53  ;;  %7006 = vmatprep.subr.bf16.mxu1 %v11274_v11  ;;  %v11281_v31 = vld [vmem:[#allocation5 + $0xf00] ss:$36 sps:$4 sm:$0xff]  }
 0x3c0   : > { %v13987_v0 = vadd.f32 %v5962_v10, %v5770_v23  ;;  %v6077_v12 = vpop.f32.mrf.mxu0  ;;  %v5778_v23 = vadd.f32 %v13776_v15, %v13731_v37  ;;  %v11292_v10 = vld [vmem:[#allocation5 + $0xebc] ss:$36 sps:$4 sm:$0xff]  }
 0x3c1   : > { %v5964_v62 = vpop.f32.mrf.mxu1  ;;  %v13994_v17 = vadd.f32 %v6077_v12, %v13768_v46  ;;  %v11613_v46 = vld [vmem:[%s12127_s7 + $0x40] ss:$28 sps:$4 sm:$0xff]  }
 0x3c2   : > { %15900 = vst [vmem:[#allocation28_spill] sm:$0xff] %v13987_v0  ;;  %v13991_v43 = vadd.f32 %v5964_v62, %v5772_v52  ;;  %7007 = vmatpush1.bf16.msra.mxu1 %v11272_v59  ;;  %v13996_v53 = vpop.f32.mrf.mxu0  ;;  %v11612_v62 = vld [vmem:[%s12127_s7 + $0x1f8] ss:$28 sps:$4 sm:$0xff]   ;;  %v5780_v59 = vadd.f32 %v13786_v61, %v13739_v49 }
 0x3c3   : > { %v5966_v11 = vpop.f32.mrf.mxu1  ;;  %7008 = vmatprep.subr.bf16.mxu1 %v11283_v51  ;;  %v11614_v51 = vld [vmem:[%s12127_s7 + $0x234] ss:$28 sps:$4 sm:$0xff]   ;;  %v11615_v15 = vld [vmem:[%s12127_s7 + $0x7c] ss:$28 sps:$4 sm:$0xff]  }
 0x3c4   : > { %v14000_v50 = vadd.f32 %v5966_v11, %v5774_v58  ;;  %v6083_v52 = vpop.f32.mrf.mxu0  ;;  %6548 = vmatmul.mubr.bf16.gmra.mxu0 %v11612_v62  ;;  %v5782_v62 = vadd.f32 %v13792_v8, %v13731_v37  ;;  %v11300_v61 = vld [vmem:[#allocation5 + $0xe74] ss:$36 sps:$4 sm:$0xff]  }
 0x3c5   : > { %v5970_v26 = vpop.f32.mrf.mxu1  ;;  %6661 = vmatmul.mubr.bf16.gmra.mxu1 %v11613_v46  ;;  %v14009_v0 = vadd.f32 %v6083_v52, %v13782_v9  ;;  %6557 = vmatprep.mubr.bf16.mxu0 %v11614_v51  ;;  %v11298_v8 = vld [vmem:[#allocation5 + $0xe70] ss:$36 sps:$4 sm:$0xff]  }
 0x3c6   : > { %15901 = vst [vmem:[#allocation29_spill] sm:$0xff] %v14000_v50  ;;  %v14006_v12 = vadd.f32 %v5970_v26, %v5778_v23  ;;  %6670 = vmatprep.mubr.bf16.mxu1 %v11615_v15  ;;  %v14013_v11 = vpop.f32.mrf.mxu0  ;;  %7009 = vmatpush1.bf16.msra.mxu1 %v11281_v31  ;;  %v11290_v50 = vld [vmem:[#allocation5 + $0xeb8] ss:$36 sps:$4 sm:$0xff]   ;;  %v5784_v26 = vadd.f32 %v13798_v42, %v13739_v49 }
 0x3c7   : > { %v5972_v58 = vpop.f32.mrf.mxu1  ;;  %7010 = vmatprep.subr.bf16.mxu1 %v11292_v10  ;;  %v5788_v10 = vadd.f32 %v13804_v20, %v13731_v37  ;;  %v11619_v20 = vld [vmem:[%s12127_s7 + $0xb4] ss:$28 sps:$4 sm:$0xff]  }
 0x3c8   : > { %v14017_v46 = vadd.f32 %v5972_v58, %v5780_v59  ;;  %v6087_v9 = vpop.f32.mrf.mxu0  ;;  %v11305_v58 = vld [vmem:[#allocation5 + $0xe2c] ss:$36 sps:$4 sm:$0xff]  }
 0x3c9   : > { %v5974_v23 = vpop.f32.mrf.mxu1  ;;  %v14024_v51 = vadd.f32 %v6087_v9, %v13796_v7  ;;  %v11617_v7 = vld [vmem:[%s12127_s7 + $0x78] ss:$28 sps:$4 sm:$0xff]   ;;  %v5790_v9 = vadd.f32 %v13814_v14, %v13739_v49  ;;  %v11310_v14 = vld [vmem:[#allocation5 + $0xde4] ss:$36 sps:$4 sm:$0xff]  }
 0x3ca   : > { %15902 = vst [vmem:[#allocation30_spill] sm:$0xff] %v14017_v46  ;;  %v14021_v52 = vadd.f32 %v5974_v23, %v5782_v62  ;;  %v14026_v15 = vpop.f32.mrf.mxu0  ;;  %7011 = vmatpush1.bf16.msra.mxu1 %v11290_v50  ;;  %v11616_v23 = vld [vmem:[%s12127_s7 + $0x230] ss:$28 sps:$4 sm:$0xff]  }
 0x3cb   : > { %15903 = vst [vmem:[#allocation31_spill] sm:$0xff] %v14024_v51  ;;  %v5976_v31 = vpop.f32.mrf.mxu1  ;;  %7012 = vmatprep.subr.bf16.mxu1 %v11300_v61  ;;  %v11618_v51 = vld [vmem:[%s12127_s7 + $0x26c] ss:$28 sps:$4 sm:$0xff]  }
 0x3cc   : > { %v14030_v59 = vadd.f32 %v5976_v31, %v5784_v26  ;;  %v6093_v62 = vpop.f32.mrf.mxu0  ;;  %6558 = vmatmul.mubr.bf16.gmra.mxu0 %v11616_v23  ;;  %v11303_v31 = vld [vmem:[#allocation5 + $0xe28] ss:$36 sps:$4 sm:$0xff]   ;;  %v5792_v23 = vadd.f32 %v13820_v22, %v13731_v37  ;;  %v11308_v22 = vld [vmem:[#allocation5 + $0xde0] ss:$36 sps:$4 sm:$0xff]  }
 0x3cd   : > { %v5980_v42 = vpop.f32.mrf.mxu1  ;;  %6671 = vmatmul.mubr.bf16.gmra.mxu1 %v11617_v7  ;;  %v14039_v50 = vadd.f32 %v6093_v62, %v13810_v47  ;;  %6567 = vmatprep.mubr.bf16.mxu0 %v11618_v51  ;;  %v5794_v51 = vadd.f32 %v13826_v16, %v13739_v49 }
 0x3ce   : > { %15904 = vst [vmem:[#allocation33_spill] sm:$0xff] %v14030_v59  ;;  %v14036_v46 = vadd.f32 %v5980_v42, %v5788_v10  ;;  %6680 = vmatprep.mubr.bf16.mxu1 %v11619_v20  ;;  %v14043_v26 = vpop.f32.mrf.mxu0  ;;  %7013 = vmatpush1.bf16.msra.mxu1 %v11298_v8  ;;  %v11622_v59 = vld [vmem:[%s12127_s7 + $0x2a4] ss:$28 sps:$4 sm:$0xff]  }
 0x3cf   : > { %v5982_v61 = vpop.f32.mrf.mxu1  ;;  %7014 = vmatprep.subr.bf16.mxu1 %v11305_v58  ;;  %v5798_v58 = vadd.f32 %v13832_v19, %v13731_v37  ;;  %v11623_v19 = vld [vmem:[%s12127_s7 + $0xec] ss:$28 sps:$4 sm:$0xff]  }
 0x3d0   : > { %v14047_v7 = vadd.f32 %v5982_v61, %v5790_v9  ;;  %v6097_v47 = vpop.f32.mrf.mxu0  ;;  %v11315_v61 = vld [vmem:[#allocation5 + $0xd9c] ss:$36 sps:$4 sm:$0xff]  }
 0x3d1   : > { %v5984_v10 = vpop.f32.mrf.mxu1  ;;  %v14054_v62 = vadd.f32 %v6097_v47, %v13824_v44  ;;  %v11621_v44 = vld [vmem:[%s12127_s7 + $0xb0] ss:$28 sps:$4 sm:$0xff]   ;;  %v5800_v47 = vadd.f32 %v13842_v18, %v13739_v49  ;;  %v11318_v18 = vld [vmem:[#allocation5 + $0x8d8] ss:$36 sps:$4 sm:$0xff]  }
 0x3d2   : > { %15905 = vst [vmem:[#allocation34_spill] sm:$0xff] %v14047_v7  ;;  %v14051_v42 = vadd.f32 %v5984_v10, %v5792_v23  ;;  %v14056_v20 = vpop.f32.mrf.mxu0  ;;  %7015 = vmatpush1.bf16.msra.mxu1 %v11303_v31  ;;  %v11620_v10 = vld [vmem:[%s12127_s7 + $0x268] ss:$28 sps:$4 sm:$0xff]  }
 0x3d3   : > { %v5986_v8 = vpop.f32.mrf.mxu1  ;;  %7016 = vmatprep.subr.bf16.mxu1 %v11310_v14 }
 0x3d4   : > { %v14060_v9 = vadd.f32 %v5986_v8, %v5794_v51  ;;  %v6103_v23 = vpop.f32.mrf.mxu0  ;;  %6568 = vmatmul.mubr.bf16.gmra.mxu0 %v11620_v10  ;;  %v11313_v8 = vld [vmem:[#allocation5 + $0xd98] ss:$36 sps:$4 sm:$0xff]   ;;  %v5802_v10 = vadd.f32 %v13848_v60, %v13731_v37  ;;  %v5808_v60 = vadd.f32 %v13860_v6, %v13731_v37  ;;  %v11627_v6 = vld [vmem:[%s12127_s7 + $0x124] ss:$28 sps:$4 sm:$0xff]  }
 0x3d5   : > { %v5990_v16 = vpop.f32.mrf.mxu1  ;;  %6681 = vmatmul.mubr.bf16.gmra.mxu1 %v11621_v44  ;;  %v14069_v31 = vadd.f32 %v6103_v23, %v13838_v2  ;;  %6577 = vmatprep.mubr.bf16.mxu0 %v11622_v59  ;;  %v5804_v59 = vadd.f32 %v13854_v5, %v13739_v49  ;;  %v11624_v5 = vld [vmem:[%s12127_s7 + $0x2a0] ss:$28 sps:$4 sm:$0xff]  }
 0x3d6   : > { %v14066_v7 = vadd.f32 %v5990_v16, %v5798_v58  ;;  %6690 = vmatprep.mubr.bf16.mxu1 %v11623_v19  ;;  %v14073_v51 = vpop.f32.mrf.mxu0  ;;  %7017 = vmatpush1.bf16.msra.mxu1 %v11308_v22 }
 0x3d7   : > { %v5992_v14 = vpop.f32.mrf.mxu1  ;;  %7018 = vmatprep.subr.bf16.mxu1 %v11315_v61 }
 0x3d8   : > { %v14077_v44 = vadd.f32 %v5992_v14, %v5800_v47  ;;  %v6107_v58 = vpop.f32.mrf.mxu0 }
 0x3d9   : > { %v5994_v2 = vpop.f32.mrf.mxu1  ;;  %v14084_v23 = vadd.f32 %v6107_v58, %v13852_v3  ;;  %v5810_v3 = vadd.f32 %v13870_v30, %v13739_v49 }
 0x3da   : > { %15906 = vst [vmem:[#allocation35_spill] sm:$0xff] %v14077_v44  ;;  %v14081_v16 = vadd.f32 %v5994_v2, %v5802_v10  ;;  %v14086_v19 = vpop.f32.mrf.mxu0  ;;  %7019 = vmatpush1.bf16.msra.mxu1 %v11313_v8  ;;  %v11625_v10 = vld [vmem:[%s12127_s7 + $0xe8] ss:$28 sps:$4 sm:$0xff]   ;;  %v11626_v8 = vld [vmem:[%s12127_s7 + $0x2dc] ss:$28 sps:$4 sm:$0xff]  }
 0x3db   : > { %v5996_v22 = vpop.f32.mrf.mxu1  ;;  %10069 = vmatprep.subr.bf16.mxu1 %v11318_v18 }
 0x3dc   : > { %v14090_v61 = vadd.f32 %v5996_v22, %v5804_v59  ;;  %v6113_v14 = vpop.f32.mrf.mxu0  ;;  %6578 = vmatmul.mubr.bf16.gmra.mxu0 %v11624_v5  ;;  %v5812_v22 = vadd.f32 %v13876_v45, %v13731_v37  ;;  %v5818_v45 = vadd.f32 %v13888_v27, %v13731_v37 }
 0x3dd   : > { %v6000_v47 = vpop.f32.mrf.mxu1  ;;  %6691 = vmatmul.mubr.bf16.gmra.mxu1 %v11625_v10  ;;  %v14099_v58 = vadd.f32 %v6113_v14, %v13866_v38  ;;  %6587 = vmatprep.mubr.bf16.mxu0 %v11626_v8  ;;  %v5814_v38 = vadd.f32 %v13882_v33, %v13739_v49  ;;  %v11629_v33 = vld [vmem:[%s12127_s7 + $0x120] ss:$28 sps:$4 sm:$0xff]  }
 0x3de   : > { %15907 = vst [vmem:[#allocation36_spill] sm:$0xff] %v14090_v61  ;;  %v14096_v2 = vadd.f32 %v6000_v47, %v5808_v60  ;;  %6700 = vmatprep.mubr.bf16.mxu1 %v11627_v6  ;;  %v14103_v59 = vpop.f32.mrf.mxu0  ;;  %v11631_v61 = vld [vmem:[%s12127_s7 + $0x15c] ss:$28 sps:$4 sm:$0xff]  }
 0x3df   : > { %v6002_v18 = vpop.f32.mrf.mxu1 }
 0x3e0   : > { %v14107_v5 = vadd.f32 %v6002_v18, %v5810_v3  ;;  %v6117_v60 = vpop.f32.mrf.mxu0 }
 0x3e1   : > { %v6004_v30 = vpop.f32.mrf.mxu1  ;;  %v14114_v14 = vadd.f32 %v6117_v60, %v13880_v13  ;;  %v11630_v60 = vld [vmem:[%s12127_s7 + $0x314] ss:$28 sps:$4 sm:$0xff]  }
 0x3e2   : > { %15908 = vst [vmem:[#allocation37_spill] sm:$0xff] %v14107_v5  ;;  %v14111_v47 = vadd.f32 %v6004_v30, %v5812_v22  ;;  %v14116_v8 = vpop.f32.mrf.mxu0  ;;  %v11628_v5 = vld [vmem:[%s12127_s7 + $0x2d8] ss:$28 sps:$4 sm:$0xff]   ;;  %v5820_v22 = vadd.f32 %v13898_v25, %v13739_v49 }
 0x3e3   : > { %v6006_v10 = vpop.f32.mrf.mxu1 }
 0x3e4   : > { %v14120_v3 = vadd.f32 %v6006_v10, %v5814_v38  ;;  %v6123_v18 = vpop.f32.mrf.mxu0  ;;  %6588 = vmatmul.mubr.bf16.gmra.mxu0 %v11628_v5  ;;  %v5822_v5 = vadd.f32 %v13904_v56, %v13731_v37  ;;  %v5828_v56 = vadd.f32 %v13916_v63, %v13731_v37 }
 0x3e5   : > { %v6010_v6 = vpop.f32.mrf.mxu1  ;;  %6701 = vmatmul.mubr.bf16.gmra.mxu1 %v11629_v33  ;;  %v14129_v30 = vadd.f32 %v6123_v18, %v13894_v36  ;;  %6597 = vmatprep.mubr.bf16.mxu0 %v11630_v60  ;;  %v5824_v36 = vadd.f32 %v13910_v40, %v13739_v49  ;;  %v11633_v40 = vld [vmem:[%s12127_s7 + $0x158] ss:$28 sps:$4 sm:$0xff]  }
 0x3e6   : > { %15909 = vst [vmem:[#allocation38_spill] sm:$0xff] %v14120_v3  ;;  %v14126_v13 = vadd.f32 %v6010_v6, %v5818_v45  ;;  %6710 = vmatprep.mubr.bf16.mxu1 %v11631_v61  ;;  %v14133_v38 = vpop.f32.mrf.mxu0  ;;  %v11635_v3 = vld [vmem:[%s12127_s7 + $0x194] ss:$28 sps:$4 sm:$0xff]  }
 0x3e7   : > { %v6012_v27 = vpop.f32.mrf.mxu1 }
 0x3e8   : > { %v14137_v10 = vadd.f32 %v6012_v27, %v5820_v22  ;;  %v6127_v45 = vpop.f32.mrf.mxu0 }
 0x3e9   : > { %v6014_v25 = vpop.f32.mrf.mxu1  ;;  %v14144_v61 = vadd.f32 %v6127_v45, %v13908_v28  ;;  %v11634_v45 = vld [vmem:[%s12127_s7 + $0x34c] ss:$28 sps:$4 sm:$0xff]  }
 0x3ea   : > { %15910 = vst [vmem:[#allocation39_spill] sm:$0xff] %v14137_v10  ;;  %v14141_v6 = vadd.f32 %v6014_v25, %v5822_v5  ;;  %v14146_v33 = vpop.f32.mrf.mxu0  ;;  %v11632_v10 = vld [vmem:[%s12127_s7 + $0x310] ss:$28 sps:$4 sm:$0xff]   ;;  %v5830_v5 = vadd.f32 %v13926_v34, %v13739_v49 }
 0x3eb   : > { %v6016_v18 = vpop.f32.mrf.mxu1 }
 0x3ec   : > { %v14150_v22 = vadd.f32 %v6016_v18, %v5824_v36  ;;  %v6133_v27 = vpop.f32.mrf.mxu0  ;;  %6598 = vmatmul.mubr.bf16.gmra.mxu0 %v11632_v10  ;;  %v5832_v10 = vadd.f32 %v13932_v41, %v13731_v37  ;;  %v5838_v41 = vadd.f32 %v13944_v54, %v13731_v37 }
 0x3ed   : > { %v6020_v60 = vpop.f32.mrf.mxu1  ;;  %6711 = vmatmul.mubr.bf16.gmra.mxu1 %v11633_v40  ;;  %v14159_v25 = vadd.f32 %v6133_v27, %v13922_v24  ;;  %6607 = vmatprep.mubr.bf16.mxu0 %v11634_v45  ;;  %v5834_v24 = vadd.f32 %v13938_v29, %v13739_v49  ;;  %v11637_v29 = vld [vmem:[%s12127_s7 + $0x190] ss:$28 sps:$4 sm:$0xff]  }
 0x3ee   : > { %15911 = vst [vmem:[#allocation40_spill] sm:$0xff] %v14150_v22  ;;  %v14156_v28 = vadd.f32 %v6020_v60, %v5828_v56  ;;  %6720 = vmatprep.mubr.bf16.mxu1 %v11635_v3  ;;  %v14163_v36 = vpop.f32.mrf.mxu0  ;;  %v11639_v22 = vld [vmem:[%s12127_s7 + $0x14] ss:$28 sps:$4 sm:$0xff]  }
 0x3ef   : > { %v6022_v63 = vpop.f32.mrf.mxu1 }
 0x3f0   : > { %v14167_v18 = vadd.f32 %v6022_v63, %v5830_v5  ;;  %v6137_v56 = vpop.f32.mrf.mxu0 }
 0x3f1   : > { %v6024_v34 = vpop.f32.mrf.mxu1  ;;  %v14174_v3 = vadd.f32 %v6137_v56, %v13936_v1  ;;  %v11638_v56 = vld [vmem:[%s12127_s7 + $0x1cc] ss:$28 sps:$4 sm:$0xff]  }
 0x3f2   : > { %15912 = vst [vmem:[#allocation41_spill] sm:$0xff] %v14167_v18  ;;  %v14171_v60 = vadd.f32 %v6024_v34, %v5832_v10  ;;  %v14176_v40 = vpop.f32.mrf.mxu0  ;;  %v11636_v18 = vld [vmem:[%s12127_s7 + $0x348] ss:$28 sps:$4 sm:$0xff]   ;;  %v5840_v10 = vadd.f32 %v13954_v57, %v13739_v49 }
 0x3f3   : > { %v6026_v27 = vpop.f32.mrf.mxu1 }
 0x3f4   : > { %v14180_v5 = vadd.f32 %v6026_v27, %v5834_v24  ;;  %v6143_v63 = vpop.f32.mrf.mxu0  ;;  %6608 = vmatmul.mubr.bf16.gmra.mxu0 %v11636_v18  ;;  %v5842_v18 = vadd.f32 %v13960_v21, %v13731_v37 }
 0x3f5   : > { %v6030_v45 = vpop.f32.mrf.mxu1  ;;  %6721 = vmatmul.mubr.bf16.gmra.mxu1 %v11637_v29  ;;  %v14189_v34 = vadd.f32 %v6143_v63, %v13950_v4  ;;  %6843 = vmatprep.mubr.bf16.mxu0 %v11639_v22  ;;  %v5844_v4 = vadd.f32 %v13966_v32, %v13739_v49  ;;  %v11297_v63 = vld [vmem:[#allocation5 + $0x218] ss:$36 sps:$4 sm:$0xff]  }
 0x3f6   : > { %15913 = vst [vmem:[#allocation42_spill] sm:$0xff] %v14180_v5  ;;  %v14186_v1 = vadd.f32 %v6030_v45, %v5838_v41  ;;  %6730 = vmatprep.mubr.bf16.mxu1 %v11638_v56  ;;  %v14193_v24 = vpop.f32.mrf.mxu0  ;;  %v11301_v5 = vld [vmem:[#allocation5 + $0x410] ss:$36 sps:$4 sm:$0xff]  }
 0x3f7   : > { %v6032_v54 = vpop.f32.mrf.mxu1  ;;  %v15916_v49 = vld [vmem:[#allocation13_spill] sm:$0xff] }
 0x3f8   : > { %v14197_v27 = vadd.f32 %v6032_v54, %v5840_v10  ;;  %v6147_v41 = vpop.f32.mrf.mxu0  ;;  %v11640_v54 = vld [vmem:[%s12127_s7 + $0x1c8] ss:$28 sps:$4 sm:$0xff]   ;;  %v6076_v32 = vadd.f32 %v13982_v39, %v15916_v49 }
 0x3f9   : > { %v6034_v57 = vpop.f32.mrf.mxu1  ;;  %v14204_v22 = vadd.f32 %v6147_v41, %v13964_v55 }
 0x3fa   : > { %15914 = vst [vmem:[#allocation43_spill] sm:$0xff] %v14197_v27  ;;  %v14201_v45 = vadd.f32 %v6034_v57, %v5842_v18  ;;  %v14206_v56 = vpop.f32.mrf.mxu0  ;;  %v11641_v27 = vld [vmem:[%s12127_s7 + $0x10] ss:$28 sps:$4 sm:$0xff]   ;;  %v11642_v18 = vld [vmem:[%s12127_s7 + $0x204] ss:$28 sps:$4 sm:$0xff]  }
 0x3fb   : > { %v6036_v29 = vpop.f32.mrf.mxu1  ;;  %v11302_v57 = vld [vmem:[#allocation5 + $0x1d0] ss:$36 sps:$4 sm:$0xff]  }
 0x3fc   : > { %v14208_v37 = vadd.f32 %v6036_v29, %v5844_v4  ;;  %v6153_v21 = vpop.f32.mrf.mxu0  ;;  %6844 = vmatmul.mubr.bf16.vlgmr.msra.gmra.mxu0 %v11641_v27  ;;  %v11643_v29 = vld [vmem:[%s12127_s7 + $0x4c] ss:$28 sps:$4 sm:$0xff]  }
 0x3fd   : > { %v6266_v10 = vpop.f32.mrf.mxu1  ;;  %6731 = vmatmul.mubr.bf16.gmra.mxu1 %v11640_v54  ;;  %v14215_v55 = vadd.f32 %v6153_v21, %v13976_v48  ;;  %9958 = vmatpush3.bf16.msra.mxu0 %v11297_v63  ;;  %v11306_v54 = vld [vmem:[#allocation5 + $0x3c8] ss:$36 sps:$4 sm:$0xff]   ;;  %v15917_v48 = vld [vmem:[#allocation14_spill] sm:$0xff] }
 0x3fe   : > { %15915 = vst [vmem:[#allocation44_spill] sm:$0xff] %v14208_v37  ;;  %6740 = vmatprep.mubr.bf16.mxu1 %v11642_v18  ;;  %v14218_v41 = vpop.f32.mrf.mxu0  ;;  %6853 = vmatprep.mubr.bf16.mxu0 %v11643_v29  ;;  %v6267_v27 = vadd.f32 %v6266_v10, %v13979_v35  ;;  %v6080_v63 = vadd.f32 %v13996_v53, %v15917_v48  ;;  %v11646_v48 = vld [vmem:[%s12127_s7 + $0x23c] ss:$28 sps:$4 sm:$0xff]  }
 0x3ff   : > { %v6268_v4 = vpop.f32.mrf.mxu1  ;;  %9959 = vmatprep.subr.bf16.mxu0 %v11301_v5  ;;  %v11307_v5 = vld [vmem:[#allocation5 + $0x188] ss:$36 sps:$4 sm:$0xff]  }
 0x400   : > { %v6269_v37 = vadd.f32 %v6268_v4, %v6076_v32  ;;  %v6157_v44 = vpop.f32.mrf.mxu0  ;;  %v11311_v32 = vld [vmem:[#allocation5 + $0x380] ss:$36 sps:$4 sm:$0xff]  }
 0x401   : > { %v6270_v39 = vpop.f32.mrf.mxu1  ;;  %v14225_v49 = vadd.f32 %v6157_v44, %v13991_v43  ;;  %9960 = vmatpush3.bf16.msra.mxu0 %v11302_v57  ;;  %v11645_v43 = vld [vmem:[%s12127_s7 + $0x48] ss:$28 sps:$4 sm:$0xff]  }
 0x402   : > { %v9799_v21 = vpack.c.bf16 %v6269_v37, %v6267_v27  ;;  %v14227_v18 = vpop.f32.mrf.mxu0  ;;  %9961 = vmatprep.subr.bf16.mxu0 %v11306_v54  ;;  %v6271_v35 = vadd.f32 %v6270_v39, %v13994_v17  ;;  %v11644_v37 = vld [vmem:[%s12127_s7 + $0x200] ss:$28 sps:$4 sm:$0xff]  }
 0x403   : > { %v6272_v29 = vpop.f32.mrf.mxu1  ;;  %v15918_v44 = vld [vmem:[#allocation15_spill] sm:$0xff] }
 0x404   : > { %8739 = vst [vmem:[%s12616_s20 + $0x10] sm:$0xff] %v9799_v21  ;;  %v6273_v10 = vadd.f32 %v6272_v29, %v6080_v63  ;;  %v6163_v4 = vpop.f32.mrf.mxu0  ;;  %6854 = vmatmul.mubr.bf16.gmra.mxu0 %v11645_v43  ;;  %v6086_v57 = vadd.f32 %v14013_v11, %v15918_v44  ;;  %v11647_v21 = vld [vmem:[%s12127_s7 + $0x84] ss:$28 sps:$4 sm:$0xff]   ;;  %v11316_v11 = vld [vmem:[#allocation5 + $0x338] ss:$36 sps:$4 sm:$0xff]  }
 0x405   : > { %v6276_v53 = vpop.f32.mrf.mxu1  ;;  %6741 = vmatmul.mubr.bf16.gmra.mxu1 %v11644_v37  ;;  %v14236_v54 = vadd.f32 %v6163_v4, %v14006_v12  ;;  %6863 = vmatprep.mubr.bf16.mxu0 %v11647_v21  ;;  %v11312_v63 = vld [vmem:[#allocation5 + $0x140] ss:$36 sps:$4 sm:$0xff]  }
 0x406   : > { %v9804_v27 = vpack.c.bf16 %v6273_v10, %v6271_v35  ;;  %6750 = vmatprep.mubr.bf16.mxu1 %v11646_v48  ;;  %v14240_v17 = vpop.f32.mrf.mxu0  ;;  %9962 = vmatpush3.bf16.msra.mxu0 %v11307_v5  ;;  %v6277_v29 = vadd.f32 %v6276_v53, %v14009_v0  ;;  %v15919_v10 = vld [vmem:[#allocation16_spill] sm:$0xff]  ;;  %v11317_v0 = vld [vmem:[#allocation5 + $0xf8] ss:$36 sps:$4 sm:$0xff]  }
 0x407   : > { %v6278_v39 = vpop.f32.mrf.mxu1  ;;  %9963 = vmatprep.subr.bf16.mxu0 %v11311_v32  ;;  %v6090_v4 = vadd.f32 %v14026_v15, %v15919_v10  ;;  %v15920_v32 = vld [vmem:[#allocation31_spill] sm:$0xff]  ;;  %v11650_v10 = vld [vmem:[%s12127_s7 + $0x274] ss:$28 sps:$4 sm:$0xff]  }
 0x408   : > { %8744 = vst [vmem:[%s12616_s20 + $0x34] sm:$0xff] %v9804_v27  ;;  %v6279_v37 = vadd.f32 %v6278_v39, %v6086_v57  ;;  %v6167_v35 = vpop.f32.mrf.mxu0  ;;  %v11320_v27 = vld [vmem:[#allocation5 + $0x2f0] ss:$36 sps:$4 sm:$0xff]  }
 0x409   : > { %v6280_v12 = vpop.f32.mrf.mxu1  ;;  %v14247_v44 = vadd.f32 %v6167_v35, %v14021_v52  ;;  %v11648_v39 = vld [vmem:[%s12127_s7 + $0x238] ss:$28 sps:$4 sm:$0xff]   ;;  %v11649_v52 = vld [vmem:[%s12127_s7 + $0x80] ss:$28 sps:$4 sm:$0xff]  }
 0x40a   : > { %v9809_v43 = vpack.c.bf16 %v6279_v37, %v6277_v29  ;;  %v14249_v5 = vpop.f32.mrf.mxu0  ;;  %9964 = vmatpush3.bf16.msra.mxu0 %v11312_v63  ;;  %v6281_v53 = vadd.f32 %v6280_v12, %v15920_v32  ;;  %v15921_v29 = vld [vmem:[#allocation32_spill] sm:$0xff]  ;;  %v11651_v12 = vld [vmem:[%s12127_s7 + $0xbc] ss:$28 sps:$4 sm:$0xff]  }
 0x40b   : > { %v6282_v48 = vpop.f32.mrf.mxu1  ;;  %9965 = vmatprep.subr.bf16.mxu0 %v11316_v11  ;;  %v6096_v37 = vadd.f32 %v14043_v26, %v15921_v29  ;;  %v11324_v26 = vld [vmem:[#allocation5 + $0x2a8] ss:$36 sps:$4 sm:$0xff]  }
 0x40c   : > { %8749 = vst [vmem:[%s12616_s20 + $0x58] sm:$0xff] %v9809_v43  ;;  %v6283_v57 = vadd.f32 %v6282_v48, %v6090_v4  ;;  %v6173_v21 = vpop.f32.mrf.mxu0  ;;  %6864 = vmatmul.mubr.bf16.gmra.mxu0 %v11649_v52  ;;  %v11321_v43 = vld [vmem:[#allocation5 + $0xb0] ss:$36 sps:$4 sm:$0xff]  }
 0x40d   : > { %v6286_v15 = vpop.f32.mrf.mxu1  ;;  %6751 = vmatmul.mubr.bf16.gmra.mxu1 %v11648_v39  ;;  %v14258_v35 = vadd.f32 %v6173_v21, %v14036_v46  ;;  %6873 = vmatprep.mubr.bf16.mxu0 %v11651_v12  ;;  %v15923_v12 = vld [vmem:[#allocation18_spill] sm:$0xff] }
 0x40e   : > { %v9814_v63 = vpack.c.bf16 %v6283_v57, %v6281_v53  ;;  %6760 = vmatprep.mubr.bf16.mxu1 %v11650_v10  ;;  %v14262_v11 = vpop.f32.mrf.mxu0  ;;  %9966 = vmatpush3.bf16.msra.mxu0 %v11317_v0  ;;  %v6287_v48 = vadd.f32 %v6286_v15, %v14039_v50  ;;  %v15922_v57 = vld [vmem:[#allocation17_spill] sm:$0xff]  ;;  %v11325_v50 = vld [vmem:[#allocation5 + $0x68] ss:$36 sps:$4 sm:$0xff]  }
 0x40f   : > { %v6288_v4 = vpop.f32.mrf.mxu1  ;;  %9967 = vmatprep.subr.bf16.mxu0 %v11320_v27  ;;  %v6100_v21 = vadd.f32 %v14056_v20, %v15922_v57  ;;  %v11652_v10 = vld [vmem:[%s12127_s7 + $0x270] ss:$28 sps:$4 sm:$0xff]  }
 0x410   : > { %8754 = vst [vmem:[%s12616_s20 + $0x7c] sm:$0xff] %v9814_v63  ;;  %v6289_v32 = vadd.f32 %v6288_v4, %v6096_v37  ;;  %v6177_v53 = vpop.f32.mrf.mxu0  ;;  %v11328_v37 = vld [vmem:[#allocation5 + $0x260] ss:$36 sps:$4 sm:$0xff]   ;;  %v6106_v4 = vadd.f32 %v14073_v51, %v15923_v12  ;;  %v11332_v51 = vld [vmem:[#allocation5 + $0xd58] ss:$36 sps:$4 sm:$0xff]  }
 0x411   : > { %v6290_v46 = vpop.f32.mrf.mxu1  ;;  %v14269_v52 = vadd.f32 %v6177_v53, %v14051_v42  ;;  %v11653_v42 = vld [vmem:[%s12127_s7 + $0xb8] ss:$28 sps:$4 sm:$0xff]   ;;  %v11656_v12 = vld [vmem:[%s12127_s7 + $0x2a8] ss:$28 sps:$4 sm:$0xff]  }
 0x412   : > { %v9819_v39 = vpack.c.bf16 %v6289_v32, %v6287_v48  ;;  %v14271_v0 = vpop.f32.mrf.mxu0  ;;  %9968 = vmatpush3.bf16.msra.mxu0 %v11321_v43  ;;  %v6291_v27 = vadd.f32 %v6290_v46, %v14054_v62  ;;  %v11654_v32 = vld [vmem:[%s12127_s7 + $0x2ac] ss:$28 sps:$4 sm:$0xff]   ;;  %v11655_v62 = vld [vmem:[%s12127_s7 + $0xf4] ss:$28 sps:$4 sm:$0xff]   ;;  %v11329_v46 = vld [vmem:[#allocation5 + $0x20] ss:$36 sps:$4 sm:$0xff]  }
 0x413   : > { %v6292_v29 = vpop.f32.mrf.mxu1  ;;  %9969 = vmatprep.subr.bf16.mxu0 %v11324_v26 }
 0x414   : > { %8759 = vst [vmem:[%s12616_s20 + $0xa0] sm:$0xff] %v9819_v39  ;;  %v6293_v15 = vadd.f32 %v6292_v29, %v6100_v21  ;;  %v6183_v63 = vpop.f32.mrf.mxu0  ;;  %6874 = vmatmul.mubr.bf16.gmra.mxu0 %v11653_v42  ;;  %v15924_v29 = vld [vmem:[#allocation19_spill] sm:$0xff] }
 0x415   : > { %v6296_v20 = vpop.f32.mrf.mxu1  ;;  %6761 = vmatmul.mubr.bf16.gmra.mxu1 %v11652_v10  ;;  %v14280_v48 = vadd.f32 %v6183_v63, %v14066_v7  ;;  %6883 = vmatprep.mubr.bf16.mxu0 %v11655_v62  ;;  %v11658_v62 = vld [vmem:[%s12127_s7 + $0x2e4] ss:$28 sps:$4 sm:$0xff]  }
 0x416   : > { %v9824_v43 = vpack.c.bf16 %v6293_v15, %v6291_v27  ;;  %6770 = vmatprep.mubr.bf16.mxu1 %v11654_v32  ;;  %v14284_v26 = vpop.f32.mrf.mxu0  ;;  %9970 = vmatpush3.bf16.msra.mxu0 %v11325_v50  ;;  %v6297_v57 = vadd.f32 %v6296_v20, %v14069_v31  ;;  %v6110_v27 = vadd.f32 %v14086_v19, %v15924_v29  ;;  %v11657_v19 = vld [vmem:[%s12127_s7 + $0xf0] ss:$28 sps:$4 sm:$0xff]  }
 0x417   : > { %v6298_v53 = vpop.f32.mrf.mxu1  ;;  %9971 = vmatprep.subr.bf16.mxu0 %v11328_v37 }
 0x418   : > { %8764 = vst [vmem:[%s12616_s20 + $0xc4] sm:$0xff] %v9824_v43  ;;  %v6299_v21 = vadd.f32 %v6298_v53, %v6106_v4  ;;  %v6187_v39 = vpop.f32.mrf.mxu0 }
 0x419   : > { %v6300_v7 = vpop.f32.mrf.mxu1  ;;  %v14291_v63 = vadd.f32 %v6187_v39, %v14081_v16  ;;  %v15925_v16 = vld [vmem:[#allocation20_spill] sm:$0xff]  ;;  %v15926_v39 = vld [vmem:[#allocation21_spill] sm:$0xff] }
 0x41a   : > { %v9829_v15 = vpack.c.bf16 %v6299_v21, %v6297_v57  ;;  %v14293_v10 = vpop.f32.mrf.mxu0  ;;  %9972 = vmatpush3.bf16.msra.mxu0 %v11329_v46  ;;  %v6301_v31 = vadd.f32 %v6300_v7, %v14084_v23  ;;  %v6116_v4 = vadd.f32 %v14103_v59, %v15925_v16  ;;  %v11659_v23 = vld [vmem:[%s12127_s7 + $0x12c] ss:$28 sps:$4 sm:$0xff]   ;;  %v11662_v16 = vld [vmem:[%s12127_s7 + $0x31c] ss:$28 sps:$4 sm:$0xff]  }
 0x41b   : > { %v6302_v50 = vpop.f32.mrf.mxu1  ;;  %10181 = vmatprep.subr.bf16.mxu0 %v11332_v51 }
 0x41c   : > { %8769 = vst [vmem:[%s12616_s20 + $0xe8] sm:$0xff] %v9829_v15  ;;  %v6303_v37 = vadd.f32 %v6302_v50, %v6110_v27  ;;  %v6193_v20 = vpop.f32.mrf.mxu0  ;;  %6884 = vmatmul.mubr.bf16.gmra.mxu0 %v11657_v19 }
 0x41d   : > { %v6306_v42 = vpop.f32.mrf.mxu1  ;;  %6771 = vmatmul.mubr.bf16.gmra.mxu1 %v11656_v12  ;;  %v14302_v32 = vadd.f32 %v6193_v20, %v14096_v2  ;;  %6893 = vmatprep.mubr.bf16.mxu0 %v11659_v23  ;;  %v6120_v2 = vadd.f32 %v14116_v8, %v15926_v39  ;;  %v11660_v20 = vld [vmem:[%s12127_s7 + $0x2e0] ss:$28 sps:$4 sm:$0xff]  }
 0x41e   : > { %v9834_v43 = vpack.c.bf16 %v6303_v37, %v6301_v31  ;;  %6780 = vmatprep.mubr.bf16.mxu1 %v11658_v62  ;;  %v14306_v53 = vpop.f32.mrf.mxu0  ;;  %v6307_v57 = vadd.f32 %v6306_v42, %v14099_v58  ;;  %v11661_v42 = vld [vmem:[%s12127_s7 + $0x128] ss:$28 sps:$4 sm:$0xff]   ;;  %v15927_v8 = vld [vmem:[#allocation22_spill] sm:$0xff] }
 0x41f   : > { %v6308_v46 = vpop.f32.mrf.mxu1  ;;  %v6126_v12 = vadd.f32 %v14133_v38, %v15927_v8 }
 0x420   : > { %8774 = vst [vmem:[%s12616_s20 + $0x10c] sm:$0xff] %v9834_v43  ;;  %v6309_v21 = vadd.f32 %v6308_v46, %v6116_v4  ;;  %v6197_v51 = vpop.f32.mrf.mxu0  ;;  %v11663_v4 = vld [vmem:[%s12127_s7 + $0x164] ss:$28 sps:$4 sm:$0xff]  }
 0x421   : > { %v6310_v59 = vpop.f32.mrf.mxu1  ;;  %v14313_v29 = vadd.f32 %v6197_v51, %v14111_v47 }
 0x422   : > { %v9839_v7 = vpack.c.bf16 %v6309_v21, %v6307_v57  ;;  %v14315_v27 = vpop.f32.mrf.mxu0  ;;  %v6311_v50 = vadd.f32 %v6310_v59, %v14114_v14  ;;  %v15928_v57 = vld [vmem:[#allocation23_spill] sm:$0xff] }
 0x423   : > { %v6312_v15 = vpop.f32.mrf.mxu1 }
 0x424   : > { %8779 = vst [vmem:[%s12616_s20 + $0x130] sm:$0xff] %v9839_v7  ;;  %v6313_v58 = vadd.f32 %v6312_v15, %v6120_v2  ;;  %v6203_v31 = vpop.f32.mrf.mxu0  ;;  %6894 = vmatmul.mubr.bf16.gmra.mxu0 %v11661_v42  ;;  %v11667_v42 = vld [vmem:[%s12127_s7 + $0x19c] ss:$28 sps:$4 sm:$0xff]  }
 0x425   : > { %v6316_v37 = vpop.f32.mrf.mxu1  ;;  %6781 = vmatmul.mubr.bf16.gmra.mxu1 %v11660_v20  ;;  %v14324_v19 = vadd.f32 %v6203_v31, %v14126_v13  ;;  %6903 = vmatprep.mubr.bf16.mxu0 %v11663_v4  ;;  %v6130_v13 = vadd.f32 %v14146_v33, %v15928_v57  ;;  %v15929_v33 = vld [vmem:[#allocation24_spill] sm:$0xff]  ;;  %v15930_v4 = vld [vmem:[#allocation25_spill] sm:$0xff] }
 0x426   : > { %v9844_v47 = vpack.c.bf16 %v6313_v58, %v6311_v50  ;;  %6790 = vmatprep.mubr.bf16.mxu1 %v11662_v16  ;;  %v14328_v14 = vpop.f32.mrf.mxu0  ;;  %v6317_v62 = vadd.f32 %v6316_v37, %v14129_v30  ;;  %v11664_v50 = vld [vmem:[%s12127_s7 + $0x318] ss:$28 sps:$4 sm:$0xff]   ;;  %v11665_v58 = vld [vmem:[%s12127_s7 + $0x160] ss:$28 sps:$4 sm:$0xff]   ;;  %v6136_v31 = vadd.f32 %v14163_v36, %v15929_v33 }
 0x427   : > { %v6318_v43 = vpop.f32.mrf.mxu1  ;;  %v11666_v20 = vld [vmem:[%s12127_s7 + $0x354] ss:$28 sps:$4 sm:$0xff]  }
 0x428   : > { %8784 = vst [vmem:[%s12616_s20 + $0x154] sm:$0xff] %v9844_v47  ;;  %v6319_v23 = vadd.f32 %v6318_v43, %v6126_v12  ;;  %v6207_v46 = vpop.f32.mrf.mxu0 }
 0x429   : > { %v6320_v38 = vpop.f32.mrf.mxu1  ;;  %v14335_v51 = vadd.f32 %v6207_v46, %v14141_v6 }
 0x42a   : > { %v9849_v21 = vpack.c.bf16 %v6319_v23, %v6317_v62  ;;  %v14337_v59 = vpop.f32.mrf.mxu0  ;;  %v6321_v2 = vadd.f32 %v6320_v38, %v14144_v61 }
 0x42b   : > { %v6322_v39 = vpop.f32.mrf.mxu1 }
 0x42c   : > { %8789 = vst [vmem:[%s12616_s20 + $0x178] sm:$0xff] %v9849_v21  ;;  %v6323_v30 = vadd.f32 %v6322_v39, %v6130_v13  ;;  %v6213_v7 = vpop.f32.mrf.mxu0  ;;  %6904 = vmatmul.mubr.bf16.gmra.mxu0 %v11665_v58  ;;  %v11668_v21 = vld [vmem:[%s12127_s7 + $0x350] ss:$28 sps:$4 sm:$0xff]   ;;  %v11669_v39 = vld [vmem:[%s12127_s7 + $0x198] ss:$28 sps:$4 sm:$0xff]  }
 0x42d   : > { %v6326_v15 = vpop.f32.mrf.mxu1  ;;  %6791 = vmatmul.mubr.bf16.gmra.mxu1 %v11664_v50  ;;  %v14346_v37 = vadd.f32 %v6213_v7, %v14156_v28  ;;  %6913 = vmatprep.mubr.bf16.mxu0 %v11667_v42  ;;  %v6140_v28 = vadd.f32 %v14176_v40, %v15930_v4  ;;  %v15931_v40 = vld [vmem:[#allocation26_spill] sm:$0xff]  ;;  %v11670_v7 = vld [vmem:[%s12127_s7 + $0x1d4] ss:$28 sps:$4 sm:$0xff]  }
 0x42e   : > { %v9854_v6 = vpack.c.bf16 %v6323_v30, %v6321_v2  ;;  %6800 = vmatprep.mubr.bf16.mxu1 %v11666_v20  ;;  %v14350_v61 = vpop.f32.mrf.mxu0  ;;  %v6327_v12 = vadd.f32 %v6326_v15, %v14159_v25  ;;  %v6146_v2 = vadd.f32 %v14193_v24, %v15931_v40  ;;  %v15932_v15 = vmov 0  }
 0x42f   : > { %v6328_v8 = vpop.f32.mrf.mxu1 }
 0x430   : > { %8794 = vst [vmem:[%s12616_s20 + $0x19c] sm:$0xff] %v9854_v6  ;;  %v6329_v47 = vadd.f32 %v6328_v8, %v6136_v31  ;;  %v6217_v16 = vpop.f32.mrf.mxu0  ;;  %v15933_v6 = vld [vmem:[#allocation27_spill] sm:$0xff]  ;;  %v11319_v8 = vld [vmem:[#allocation5 + $0x698] ss:$36 sps:$4 sm:$0xff]  }
 0x431   : > { %v6330_v36 = vpop.f32.mrf.mxu1  ;;  %v14357_v62 = vadd.f32 %v6217_v16, %v14171_v60  ;;  %v11322_v16 = vld [vmem:[#allocation5 + $0x890] ss:$36 sps:$4 sm:$0xff]  }
 0x432   : > { %v9859_v43 = vpack.c.bf16 %v6329_v47, %v6327_v12  ;;  %v14359_v23 = vpop.f32.mrf.mxu0  ;;  %v6331_v38 = vadd.f32 %v6330_v36, %v14174_v3 }
 0x433   : > { %v6332_v46 = vpop.f32.mrf.mxu1 }
 0x434   : > { %8799 = vst [vmem:[%s12616_s20 + $0x1c0] sm:$0xff] %v9859_v43  ;;  %v6333_v25 = vadd.f32 %v6332_v46, %v6140_v28  ;;  %v6223_v57 = vpop.f32.mrf.mxu0  ;;  %6914 = vmatmul.mubr.bf16.gmra.mxu0 %v11669_v39  ;;  %v11671_v43 = vld [vmem:[%s12127_s7 + $0x1d0] ss:$28 sps:$4 sm:$0xff]  }
 0x435   : > { %v6336_v13 = vpop.f32.mrf.mxu1  ;;  %6801 = vmatmul.mubr.bf16.gmra.mxu1 %v11668_v21  ;;  %v14368_v60 = vadd.f32 %v6223_v57, %v14186_v1  ;;  %6923 = vmatprep.mubr.bf16.mxu0 %v11670_v7  ;;  %v6150_v1 = vadd.f32 %v14206_v56, %v15933_v6  ;;  %v11672_v56 = vld [vmem:[%s12127_s7 + $0x18] ss:$28 sps:$4 sm:$0xff]   ;;  %v11330_v6 = vld [vmem:[#allocation5 + $0x800] ss:$36 sps:$4 sm:$0xff]  }
 0x436   : > { %v9864_v30 = vpack.c.bf16 %v6333_v25, %v6331_v38  ;;  %7036 = vmatprep.mubr.bf16.mxu1 %v15932_v15  ;;  %v14372_v3 = vpop.f32.mrf.mxu0  ;;  %v6337_v58 = vadd.f32 %v6336_v13, %v14189_v34  ;;  %v11673_v25 = vld [vmem:[%s12127_s7 + $0x20c] ss:$28 sps:$4 sm:$0xff]   ;;  %v11323_v57 = vld [vmem:[#allocation5 + $0x650] ss:$36 sps:$4 sm:$0xff]  }
 0x437   : > { %v6338_v50 = vpop.f32.mrf.mxu1 }
 0x438   : > { %8804 = vst [vmem:[%s12616_s20 + $0x1e4] sm:$0xff] %v9864_v30  ;;  %v6339_v33 = vadd.f32 %v6338_v50, %v6146_v2  ;;  %v6227_v31 = vpop.f32.mrf.mxu0  ;;  %v15935_v30 = vld [vmem:[#allocation29_spill] sm:$0xff] }
 0x439   : > { %v6340_v24 = vpop.f32.mrf.mxu1  ;;  %v14379_v42 = vadd.f32 %v6227_v31, %v14201_v45  ;;  %v15934_v45 = vld [vmem:[#allocation28_spill] sm:$0xff]  ;;  %v6160_v7 = vadd.f32 %v14227_v18, %v15935_v30 }
 0x43a   : > { %v9869_v20 = vpack.c.bf16 %v6339_v33, %v6337_v58  ;;  %v14381_v12 = vpop.f32.mrf.mxu0  ;;  %v6341_v34 = vadd.f32 %v6340_v24, %v14204_v22  ;;  %v6156_v46 = vadd.f32 %v14218_v41, %v15934_v45  ;;  %v11326_v22 = vld [vmem:[#allocation5 + $0x848] ss:$36 sps:$4 sm:$0xff]   ;;  %v11338_v30 = vld [vmem:[#allocation5 + $0x770] ss:$36 sps:$4 sm:$0xff]  }
 0x43b   : > { %v6342_v47 = vpop.f32.mrf.mxu1  ;;  %v11327_v31 = vld [vmem:[#allocation5 + $0x608] ss:$36 sps:$4 sm:$0xff]  }
 0x43c   : > { %8809 = vst [vmem:[%s12616_s20 + $0x208] sm:$0xff] %v9869_v20  ;;  %v6343_v36 = vadd.f32 %v6342_v47, %v6150_v1  ;;  %v14385_v28 = vpop.f32.mrf.mxu0  ;;  %6924 = vmatmul.mubr.bf16.gmra.mxu0 %v11671_v43  ;;  %v11675_v18 = vld [vmem:[%s12127_s7 + $0x50] ss:$28 sps:$4 sm:$0xff]   ;;  %v15936_v47 = vld [vmem:[#allocation30_spill] sm:$0xff] }
 0x43d   : > { %v6346_v4 = vpop.f32.mrf.mxu1  ;;  %7037 = vmatmul.mubr.bf16.vlgmr.msra.gmra.mxu1 %v11672_v56  ;;  %6933 = vmatprep.mubr.bf16.mxu0 %v11673_v25  ;;  %v11331_v43 = vld [vmem:[#allocation5 + $0x5c0] ss:$36 sps:$4 sm:$0xff]   ;;  %v15937_v25 = vld [vmem:[#allocation33_spill] sm:$0xff] }
 0x43e   : > { %v9874_v38 = vpack.c.bf16 %v6343_v36, %v6341_v34  ;;  %10070 = vmatpush3.bf16.msra.mxu1 %v11319_v8  ;;  %v14392_v21 = vpop.f32.mrf.mxu0  ;;  %7046 = vmatprep.mubr.bf16.mxu1 %v15932_v15  ;;  %v6347_v39 = vadd.f32 %v6346_v4, %v14215_v55  ;;  %v11674_v8 = vld [vmem:[%s12127_s7 + $0x208] ss:$28 sps:$4 sm:$0xff]  }
 0x43f   : > { %v6348_v13 = vpop.f32.mrf.mxu1  ;;  %10071 = vmatprep.subr.bf16.mxu1 %v11322_v16  ;;  %v6166_v16 = vadd.f32 %v14240_v17, %v15936_v47  ;;  %v11676_v36 = vld [vmem:[%s12127_s7 + $0x244] ss:$28 sps:$4 sm:$0xff]  }
 0x440   : > { %8814 = vst [vmem:[%s12616_s20 + $0x22c] sm:$0xff] %v9874_v38  ;;  %v6349_v40 = vadd.f32 %v6348_v13, %v6156_v46  ;;  %v14397_v41 = vpop.f32.mrf.mxu0  ;;  %v11334_v46 = vld [vmem:[#allocation5 + $0x7b8] ss:$36 sps:$4 sm:$0xff]  }
 0x441   : > { %v6350_v2 = vpop.f32.mrf.mxu1 }
 0x442   : > { %v9879_v50 = vpack.c.bf16 %v6349_v40, %v6347_v39  ;;  %10072 = vmatpush3.bf16.msra.mxu1 %v11323_v57  ;;  %v14401_v33 = vpop.f32.mrf.mxu0  ;;  %v6351_v55 = vadd.f32 %v6350_v2, %v14225_v49  ;;  %v6170_v57 = vadd.f32 %v14249_v5, %v15937_v25  ;;  %v11335_v40 = vld [vmem:[#allocation5 + $0x578] ss:$36 sps:$4 sm:$0xff]   ;;  %v11678_v5 = vld [vmem:[%s12127_s7 + $0x88] ss:$28 sps:$4 sm:$0xff]  }
 0x443   : > { %v6352_v58 = vpop.f32.mrf.mxu1  ;;  %10073 = vmatprep.subr.bf16.mxu1 %v11326_v22 }
 0x444   : > { %8819 = vst [vmem:[%s12616_s20 + $0x250] sm:$0xff] %v9879_v50  ;;  %v6353_v24 = vadd.f32 %v6352_v58, %v6160_v7  ;;  %v14405_v20 = vpop.f32.mrf.mxu0  ;;  %6934 = vmatmul.mubr.bf16.gmra.mxu0 %v11674_v8  ;;  %v11677_v58 = vld [vmem:[%s12127_s7 + $0x240] ss:$28 sps:$4 sm:$0xff]   ;;  %v11339_v8 = vld [vmem:[#allocation5 + $0x530] ss:$36 sps:$4 sm:$0xff]  }
 0x445   : > { %v6356_v1 = vpop.f32.mrf.mxu1  ;;  %7047 = vmatmul.mubr.bf16.gmra.mxu1 %v11675_v18  ;;  %6943 = vmatprep.mubr.bf16.mxu0 %v11676_v36  ;;  %v6180_v36 = vadd.f32 %v14271_v0, %v14060_v9  ;;  %v11681_v9 = vld [vmem:[%s12127_s7 + $0xc0] ss:$28 sps:$4 sm:$0xff]  }
 0x446   : > { %v9884_v34 = vpack.c.bf16 %v6353_v24, %v6351_v55  ;;  %7056 = vmatprep.mubr.bf16.mxu1 %v15932_v15  ;;  %v14413_v49 = vpop.f32.mrf.mxu0  ;;  %10074 = vmatpush3.bf16.msra.mxu1 %v11327_v31  ;;  %v6357_v56 = vadd.f32 %v6356_v1, %v14236_v54  ;;  %v15938_v31 = vld [vmem:[#allocation34_spill] sm:$0xff]  ;;  %v15939_v0 = vld [vmem:[#allocation35_spill] sm:$0xff] }
 0x447   : > { %v6358_v4 = vpop.f32.mrf.mxu1  ;;  %10075 = vmatprep.subr.bf16.mxu1 %v11330_v6  ;;  %v6176_v55 = vadd.f32 %v14262_v11, %v15938_v31  ;;  %v11679_v6 = vld [vmem:[%s12127_s7 + $0x27c] ss:$28 sps:$4 sm:$0xff]  }
 0x448   : > { %8824 = vst [vmem:[%s12616_s20 + $0x274] sm:$0xff] %v9884_v34  ;;  %v6359_v45 = vadd.f32 %v6358_v4, %v6166_v16  ;;  %v14417_v17 = vpop.f32.mrf.mxu0  ;;  %v11342_v16 = vld [vmem:[#allocation5 + $0x728] ss:$36 sps:$4 sm:$0xff]  }
 0x449   : > { %v6360_v38 = vpop.f32.mrf.mxu1 }
 0x44a   : > { %v9889_v13 = vpack.c.bf16 %v6359_v45, %v6357_v56  ;;  %v14421_v39 = vpop.f32.mrf.mxu0  ;;  %10076 = vmatpush3.bf16.msra.mxu1 %v11331_v43  ;;  %v6361_v54 = vadd.f32 %v6360_v38, %v14247_v44  ;;  %v11343_v45 = vld [vmem:[#allocation5 + $0x4e8] ss:$36 sps:$4 sm:$0xff]   ;;  %v11346_v38 = vld [vmem:[#allocation5 + $0x6e0] ss:$36 sps:$4 sm:$0xff]  }
 0x44b   : > { %v6362_v22 = vpop.f32.mrf.mxu1  ;;  %10077 = vmatprep.subr.bf16.mxu1 %v11334_v46 }
 0x44c   : > { %8829 = vst [vmem:[%s12616_s20 + $0x298] sm:$0xff] %v9889_v13  ;;  %v6363_v2 = vadd.f32 %v6362_v22, %v6170_v57  ;;  %v14425_v50 = vpop.f32.mrf.mxu0  ;;  %6944 = vmatmul.mubr.bf16.gmra.mxu0 %v11677_v58  ;;  %v11680_v13 = vld [vmem:[%s12127_s7 + $0x278] ss:$28 sps:$4 sm:$0xff]   ;;  %v6186_v22 = vadd.f32 %v14284_v26, %v15939_v0 }
 0x44d   : > { %v6366_v7 = vpop.f32.mrf.mxu1  ;;  %7057 = vmatmul.mubr.bf16.gmra.mxu1 %v11678_v5  ;;  %6953 = vmatprep.mubr.bf16.mxu0 %v11679_v6  ;;  %v14457_v5 = vld [vmem:[#allocation5 + $0xf98] ss:$36 sps:$4 sm:$0xff]  }
 0x44e   : > { %v9894_v24 = vpack.c.bf16 %v6363_v2, %v6361_v54  ;;  %7066 = vmatprep.mubr.bf16.mxu1 %v15932_v15  ;;  %v14433_v1 = vpop.f32.mrf.mxu0  ;;  %10078 = vmatpush3.bf16.msra.mxu1 %v11335_v40  ;;  %v6367_v18 = vadd.f32 %v6366_v7, %v14258_v35  ;;  %v11682_v54 = vld [vmem:[%s12127_s7 + $0x2b4] ss:$28 sps:$4 sm:$0xff]  }
 0x44f   : > { %v6368_v44 = vpop.f32.mrf.mxu1  ;;  %10079 = vmatprep.subr.bf16.mxu1 %v11338_v30  ;;  %v11347_v30 = vld [vmem:[#allocation5 + $0x4a0] ss:$36 sps:$4 sm:$0xff]  }
 0x450   : > { %8834 = vst [vmem:[%s12616_s20 + $0x2bc] sm:$0xff] %v9894_v24  ;;  %v6369_v47 = vadd.f32 %v6368_v44, %v6176_v55  ;;  %v14437_v11 = vpop.f32.mrf.mxu0  ;;  %v15940_v55 = vld [vmem:[#allocation36_spill] sm:$0xff] }
 0x451   : > { %v6370_v34 = vpop.f32.mrf.mxu1  ;;  %v6190_v24 = vadd.f32 %v14293_v10, %v15940_v55  ;;  %v15941_v10 = vld [vmem:[#allocation37_spill] sm:$0xff] }
 0x452   : > { %v9899_v4 = vpack.c.bf16 %v6369_v47, %v6367_v18  ;;  %v14441_v56 = vpop.f32.mrf.mxu0  ;;  %10080 = vmatpush3.bf16.msra.mxu1 %v11339_v8  ;;  %v6371_v35 = vadd.f32 %v6370_v34, %v14269_v52  ;;  %v11683_v34 = vld [vmem:[%s12127_s7 + $0x2b0] ss:$28 sps:$4 sm:$0xff]  }
 0x453   : > { %v6372_v43 = vpop.f32.mrf.mxu1  ;;  %10081 = vmatprep.subr.bf16.mxu1 %v11342_v16 }
 0x454   : > { %8839 = vst [vmem:[%s12616_s20 + $0x2e0] sm:$0xff] %v9899_v4  ;;  %v6373_v46 = vadd.f32 %v6372_v43, %v6180_v36  ;;  %v14445_v57 = vpop.f32.mrf.mxu0  ;;  %6954 = vmatmul.mubr.bf16.gmra.mxu0 %v11680_v13  ;;  %v11684_v36 = vld [vmem:[%s12127_s7 + $0xf8] ss:$28 sps:$4 sm:$0xff]   ;;  %v6196_v4 = vadd.f32 %v14306_v53, %v15941_v10 }
 0x455   : > { %v6376_v25 = vpop.f32.mrf.mxu1  ;;  %7067 = vmatmul.mubr.bf16.gmra.mxu1 %v11681_v9  ;;  %6963 = vmatprep.mubr.bf16.mxu0 %v11682_v54  ;;  %v15942_v9 = vld [vmem:[#allocation38_spill] sm:$0xff] }
 0x456   : > { %v9904_v40 = vpack.c.bf16 %v6373_v46, %v6371_v35  ;;  %7076 = vmatprep.mubr.bf16.mxu1 %v15932_v15  ;;  %v14453_v2 = vpop.f32.mrf.mxu0  ;;  %10082 = vmatpush3.bf16.msra.mxu1 %v11343_v45  ;;  %v6377_v7 = vadd.f32 %v6376_v25, %v14280_v48  ;;  %v11685_v45 = vld [vmem:[%s12127_s7 + $0x2ec] ss:$28 sps:$4 sm:$0xff]   ;;  %v6200_v53 = vadd.f32 %v14315_v27, %v15942_v9 }
 0x457   : > { %v6378_v52 = vpop.f32.mrf.mxu1  ;;  %10083 = vmatprep.subr.bf16.mxu1 %v11346_v38 }
 0x458   : > { %8844 = vst [vmem:[%s12616_s20 + $0x304] sm:$0xff] %v9904_v40  ;;  %v6379_v58 = vadd.f32 %v6378_v52, %v6186_v22  ;;  %v14459_v31 = vpop.f32.mrf.mxu0 }
 0x459   : > { %v6380_v26 = vpop.f32.mrf.mxu1 }
 0x45a   : > { %v9909_v6 = vpack.c.bf16 %v6379_v58, %v6377_v7  ;;  %v14463_v8 = vpop.f32.mrf.mxu0  ;;  %10084 = vmatpush3.bf16.msra.mxu1 %v11347_v30  ;;  %v6381_v48 = vadd.f32 %v6380_v26, %v14291_v63  ;;  %v11687_v58 = vld [vmem:[%s12127_s7 + $0x130] ss:$28 sps:$4 sm:$0xff]   ;;  %v15943_v26 = vld [vmem:[#allocation39_spill] sm:$0xff] }
 0x45b   : > { %v6382_v44 = vpop.f32.mrf.mxu1  ;;  %10317 = vmatprep.subr.bf16.mxu1 %v14457_v5  ;;  %v6206_v55 = vadd.f32 %v14328_v14, %v15943_v26 }
 0x45c   : > { %8849 = vst [vmem:[%s12616_s20 + $0x328] sm:$0xff] %v9909_v6  ;;  %v6383_v18 = vadd.f32 %v6382_v44, %v6190_v24  ;;  %v14468_v16 = vpop.f32.mrf.mxu0  ;;  %6964 = vmatmul.mubr.bf16.gmra.mxu0 %v11683_v34  ;;  %v11688_v24 = vld [vmem:[%s12127_s7 + $0x324] ss:$28 sps:$4 sm:$0xff]   ;;  %v15944_v34 = vld [vmem:[#allocation40_spill] sm:$0xff] }
 0x45d   : > { %v6386_v47 = vpop.f32.mrf.mxu1  ;;  %7077 = vmatmul.mubr.bf16.gmra.mxu1 %v11684_v36  ;;  %6973 = vmatprep.mubr.bf16.mxu0 %v11685_v45  ;;  %v6210_v14 = vadd.f32 %v14337_v59, %v15944_v34  ;;  %v11693_v34 = vld [vmem:[%s12127_s7 + $0x1a0] ss:$28 sps:$4 sm:$0xff]  }
 0x45e   : > { %v9914_v43 = vpack.c.bf16 %v6383_v18, %v6381_v48  ;;  %7086 = vmatprep.mubr.bf16.mxu1 %v15932_v15  ;;  %v14476_v35 = vpop.f32.mrf.mxu0  ;;  %v6387_v46 = vadd.f32 %v6386_v47, %v14302_v32  ;;  %v11686_v32 = vld [vmem:[%s12127_s7 + $0x2e8] ss:$28 sps:$4 sm:$0xff]  }
 0x45f   : > { %v6388_v63 = vpop.f32.mrf.mxu1 }
 0x460   : > { %8854 = vst [vmem:[%s12616_s20 + $0x34c] sm:$0xff] %v9914_v43  ;;  %v6389_v38 = vadd.f32 %v6388_v63, %v6196_v4  ;;  %v14480_v13 = vpop.f32.mrf.mxu0 }
 0x461   : > { %v6390_v25 = vpop.f32.mrf.mxu1 }
 0x462   : > { %v9919_v0 = vpack.c.bf16 %v6389_v38, %v6387_v46  ;;  %v14484_v40 = vpop.f32.mrf.mxu0  ;;  %v6391_v54 = vadd.f32 %v6390_v25, %v14313_v29  ;;  %v11690_v38 = vld [vmem:[%s12127_s7 + $0x168] ss:$28 sps:$4 sm:$0xff]   ;;  %v15945_v25 = vld [vmem:[#allocation41_spill] sm:$0xff] }
 0x463   : > { %v6392_v22 = vpop.f32.mrf.mxu1  ;;  %v6216_v9 = vadd.f32 %v14350_v61, %v15945_v25 }
 0x464   : > { %8859 = vst [vmem:[%s12616_s20 + $0x370] sm:$0xff] %v9919_v0  ;;  %v6393_v52 = vadd.f32 %v6392_v22, %v6200_v53  ;;  %v14488_v7 = vpop.f32.mrf.mxu0  ;;  %6974 = vmatmul.mubr.bf16.gmra.mxu0 %v11686_v32  ;;  %v11691_v53 = vld [vmem:[%s12127_s7 + $0x35c] ss:$28 sps:$4 sm:$0xff]  }
 0x465   : > { %v6396_v30 = vpop.f32.mrf.mxu1  ;;  %7087 = vmatmul.mubr.bf16.gmra.mxu1 %v11687_v58  ;;  %6983 = vmatprep.mubr.bf16.mxu0 %v11688_v24  ;;  %v15946_v32 = vld [vmem:[#allocation42_spill] sm:$0xff] }
 0x466   : > { %v9924_v27 = vpack.c.bf16 %v6393_v52, %v6391_v54  ;;  %7096 = vmatprep.mubr.bf16.mxu1 %v15932_v15  ;;  %v14496_v29 = vpop.f32.mrf.mxu0  ;;  %v6397_v44 = vadd.f32 %v6396_v30, %v14324_v19  ;;  %v11689_v19 = vld [vmem:[%s12127_s7 + $0x320] ss:$28 sps:$4 sm:$0xff]   ;;  %v6220_v61 = vadd.f32 %v14359_v23, %v15946_v32 }
 0x467   : > { %v6398_v6 = vpop.f32.mrf.mxu1  ;;  %v15948_v23 = vld [vmem:[#allocation43_spill] sm:$0xff] }
 0x468   : > { %8864 = vst [vmem:[%s12616_s20 + $0x394] sm:$0xff] %v9924_v27  ;;  %v6399_v48 = vadd.f32 %v6398_v6, %v6206_v55  ;;  %v14500_v47 = vpop.f32.mrf.mxu0  ;;  %v15947_v27 = vld [vmem:[#allocation12_spill] sm:$0xff] }
 0x469   : > { %v6400_v18 = vpop.f32.mrf.mxu1  ;;  %v938_v24 = vsub.s32 6, %v15947_v27 }
 0x46a   : > { %v9929_v36 = vpack.c.bf16 %v6399_v48, %v6397_v44  ;;  %v14504_v4 = vpop.f32.mrf.mxu0  ;;  %v6401_v43 = vadd.f32 %v6400_v18, %v14335_v51  ;;  %v11692_v18 = vld [vmem:[%s12127_s7 + $0x358] ss:$28 sps:$4 sm:$0xff]  }
 0x46b   : > { %v6402_v10 = vpop.f32.mrf.mxu1 }
 0x46c   : > { %8869 = vst [vmem:[%s12616_s20 + $0x3b8] sm:$0xff] %v9929_v36  ;;  %v6403_v45 = vadd.f32 %v6402_v10, %v6210_v14  ;;  %v14508_v46 = vpop.f32.mrf.mxu0  ;;  %6984 = vmatmul.mubr.bf16.gmra.mxu0 %v11689_v19  ;;  %v6226_v14 = vadd.f32 %v14372_v3, %v15948_v23  ;;  %v942_v36 = vsub.s32 7, %v15947_v27  ;;  %v11698_v23 = vld [vmem:[%s12127_s7 + $0x3c] ss:$28 sps:$4 sm:$0xff]  }
 0x46d   : > { %v6406_v63 = vpop.f32.mrf.mxu1  ;;  %7097 = vmatmul.mubr.bf16.gmra.mxu1 %v11690_v38  ;;  %6993 = vmatprep.mubr.bf16.mxu0 %v11691_v53 }
 0x46e   : > { %v9934_v59 = vpack.c.bf16 %v6403_v45, %v6401_v43  ;;  %7106 = vmatprep.mubr.bf16.mxu1 %v15932_v15  ;;  %v14516_v22 = vpop.f32.mrf.mxu0  ;;  %v6407_v51 = vadd.f32 %v6406_v63, %v14346_v37  ;;  %v11694_v43 = vld [vmem:[%s12127_s7 + $0x4] ss:$28 sps:$4 sm:$0xff]  }
 0x46f   : > { %v6408_v0 = vpop.f32.mrf.mxu1  ;;  %v11695_v63 = vld [vmem:[#allocation7] sm:$0xff] }
 0x470   : > { %8874 = vst [vmem:[%s12616_s20 + $0x3dc] sm:$0xff] %v9934_v59  ;;  %v6409_v54 = vadd.f32 %v6408_v0, %v6216_v9  ;;  %v14520_v30 = vpop.f32.mrf.mxu0  ;;  %v14540_v19 = vrot.slane %v11695_v63, %v938_v24  ;;  %v15949_v59 = vld [vmem:[#allocation44_spill] sm:$0xff]  ;;  %v14548_v0 = vrot.slane %v11695_v63, %v942_v36 }
 0x471   : > { %v6410_v52 = vpop.f32.mrf.mxu1  ;;  %v6230_v53 = vadd.f32 %v14381_v12, %v15949_v59  ;;  %v11696_v12 = vld [vmem:[%s12127_s7 + $0x1d8] ss:$28 sps:$4 sm:$0xff]  }
 0x472   : > { %v9939_v58 = vpack.c.bf16 %v6409_v54, %v6407_v51  ;;  %v14524_v55 = vpop.f32.mrf.mxu0  ;;  %v6411_v6 = vadd.f32 %v6410_v52, %v14357_v62  ;;  %v11333_v54 = vld [vmem:[#allocation5 + $0xb18] ss:$36 sps:$4 sm:$0xff]   ;;  %v6464_v36 = vadd.f32 %v14397_v41, %v14540_v19  ;;  %v11341_v41 = vld [vmem:[#allocation5 + $0xa88] ss:$36 sps:$4 sm:$0xff]  }
 0x473   : > { %v6412_v26 = vpop.f32.mrf.mxu1 }
 0x474   : > { %8879 = vst [vmem:[%s12616_s20 + $0x400] sm:$0xff] %v9939_v58  ;;  %v6413_v44 = vadd.f32 %v6412_v26, %v6220_v61  ;;  %v14529_v48 = vpop.f32.mrf.mxu0  ;;  %6994 = vmatmul.mubr.bf16.gmra.mxu0 %v11692_v18  ;;  %v11336_v61 = vld [vmem:[#allocation5 + $0xd10] ss:$36 sps:$4 sm:$0xff]  }
 0x475   : > { %v6416_v37 = vpop.f32.mrf.mxu1  ;;  %7107 = vmatmul.mubr.bf16.gmra.mxu1 %v11693_v34  ;;  %7229 = vmatprep.mubr.bf16.mxu0 %v11694_v43 }
 0x476   : > { %v9944_v10 = vpack.c.bf16 %v6413_v44, %v6411_v6  ;;  %7116 = vmatprep.mubr.bf16.mxu1 %v15932_v15  ;;  %v14538_v45 = vpop.f32.mrf.mxu0  ;;  %v6417_v38 = vadd.f32 %v6416_v37, %v14368_v60  ;;  %v6460_v60 = vadd.f32 %v14385_v28, %v14540_v19  ;;  %v11697_v6 = vld [vmem:[%s12127_s7] ss:$28 sps:$4 sm:$0xff]   ;;  %v6462_v44 = vadd.f32 %v14392_v21, %v14548_v0 }
 0x477   : > { %v6418_v62 = vpop.f32.mrf.mxu1 }
 0x478   : > { %8884 = vst [vmem:[%s12616_s20 + $0x424] sm:$0xff] %v9944_v10  ;;  %v6419_v25 = vadd.f32 %v6418_v62, %v6226_v14  ;;  %v14544_v9 = vpop.f32.mrf.mxu0  ;;  %v11340_v14 = vld [vmem:[#allocation5 + $0xcc8] ss:$36 sps:$4 sm:$0xff]   ;;  %v6466_v62 = vadd.f32 %v14401_v33, %v14548_v0  ;;  %v11700_v33 = vld [vmem:[%s12127_s7 + $0x38] ss:$28 sps:$4 sm:$0xff]  }
 0x479   : > { %v6420_v3 = vpop.f32.mrf.mxu1 }
 0x47a   : > { %v9949_v51 = vpack.c.bf16 %v6419_v25, %v6417_v38  ;;  %v14550_v32 = vpop.f32.mrf.mxu0  ;;  %v6421_v58 = vadd.f32 %v6420_v3, %v14379_v42  ;;  %v11337_v42 = vld [vmem:[#allocation5 + $0xad0] ss:$36 sps:$4 sm:$0xff]   ;;  %v6470_v3 = vadd.f32 %v14405_v20, %v14540_v19 }
 0x47b   : > { %v6422_v52 = vpop.f32.mrf.mxu1 }
 0x47c   : > { %8889 = vst [vmem:[%s12616_s20 + $0x448] sm:$0xff] %v9949_v51  ;;  %v6423_v26 = vadd.f32 %v6422_v52, %v6230_v53  ;;  %v14556_v27 = vpop.f32.mrf.mxu0  ;;  %7230 = vmatmul.mubr.bf16.vlgmr.msra.gmra.mxu0 %v11697_v6  ;;  %v11344_v53 = vld [vmem:[#allocation5 + $0xc80] ss:$36 sps:$4 sm:$0xff]   ;;  %v11699_v52 = vld [vmem:[%s12127_s7 + $0x210] ss:$28 sps:$4 sm:$0xff]  }
 0x47d   : > { %v6652_v24 = vpop.f32.mrf.mxu1  ;;  %7117 = vmatmul.mubr.bf16.gmra.mxu1 %v11696_v12  ;;  %10182 = vmatpush3.bf16.msra.mxu0 %v11333_v54  ;;  %v6474_v12 = vadd.f32 %v14417_v17, %v14540_v19  ;;  %v11349_v17 = vld [vmem:[#allocation5 + $0x9f8] ss:$36 sps:$4 sm:$0xff]  }
 0x47e   : > { %v9954_v37 = vpack.c.bf16 %v6423_v26, %v6421_v58  ;;  %v14562_v18 = vadd.f32 %v6652_v24, %v6460_v60  ;;  %7126 = vmatprep.mubr.bf16.mxu1 %v15932_v15  ;;  %v14565_v28 = vpop.f32.mrf.mxu0  ;;  %7237 = vmatprep.mubr.bf16.mxu0 %v11698_v23  ;;  %v11701_v58 = vld [vmem:[%s12127_s7 + $0x74] ss:$28 sps:$4 sm:$0xff]   ;;  %v11345_v24 = vld [vmem:[#allocation5 + $0xa40] ss:$36 sps:$4 sm:$0xff]  }
 0x47f   : > { %v6654_v34 = vpop.f32.mrf.mxu1  ;;  %10183 = vmatprep.subr.bf16.mxu0 %v11336_v61  ;;  %v6472_v61 = vadd.f32 %v14413_v49, %v14548_v0 }
 0x480   : > { %8894 = vst [vmem:[%s12616_s20 + $0x46c] sm:$0xff] %v9954_v37  ;;  %v14571_v21 = vadd.f32 %v6654_v34, %v6462_v44  ;;  %v14573_v10 = vpop.f32.mrf.mxu0  ;;  %v11348_v44 = vld [vmem:[#allocation5 + $0xc38] ss:$36 sps:$4 sm:$0xff]  }
 0x481   : > { %v6656_v43 = vpop.f32.mrf.mxu1  ;;  %10184 = vmatpush3.bf16.msra.mxu0 %v11337_v42  ;;  %v6476_v42 = vadd.f32 %v14421_v39, %v14548_v0  ;;  %v11703_v39 = vld [vmem:[%s12127_s7 + $0x70] ss:$28 sps:$4 sm:$0xff]  }
 0x482   : > { %v14577_v63 = vadd.f32 %v6656_v43, %v6464_v36  ;;  %v14579_v38 = vpop.f32.mrf.mxu0  ;;  %10185 = vmatprep.subr.bf16.mxu0 %v11340_v14  ;;  %v6480_v36 = vadd.f32 %v14425_v50, %v14540_v19 }
 0x483   : > { %v6658_v25 = vpop.f32.mrf.mxu1 }
 0x484   : > { %v14583_v59 = vadd.f32 %v6658_v25, %v6466_v62  ;;  %v14585_v51 = vpop.f32.mrf.mxu0  ;;  %7238 = vmatmul.mubr.bf16.gmra.mxu0 %v11700_v33  ;;  %v11351_v62 = vld [vmem:[#allocation5 + $0xbf0] ss:$36 sps:$4 sm:$0xff]  }
 0x485   : > { %v6662_v54 = vpop.f32.mrf.mxu1  ;;  %7127 = vmatmul.mubr.bf16.gmra.mxu1 %v11699_v52  ;;  %7245 = vmatprep.mubr.bf16.mxu0 %v11701_v58  ;;  %v11704_v52 = vld [vmem:[%s12127_s7 + $0xac] ss:$28 sps:$4 sm:$0xff]   ;;  %v6484_v58 = vadd.f32 %v14437_v11, %v14540_v19 }
 0x486   : > { %15950 = vst [vmem:[#allocation13_spill] sm:$0xff] %v14583_v59  ;;  %v14591_v60 = vadd.f32 %v6662_v54, %v6470_v3  ;;  %7136 = vmatprep.mubr.bf16.mxu1 %v15932_v15  ;;  %v14595_v20 = vpop.f32.mrf.mxu0  ;;  %10186 = vmatpush3.bf16.msra.mxu0 %v11341_v41  ;;  %v11702_v3 = vld [vmem:[%s12127_s7 + $0x248] ss:$28 sps:$4 sm:$0xff]  }
 0x487   : > { %v6664_v26 = vpop.f32.mrf.mxu1  ;;  %10187 = vmatprep.subr.bf16.mxu0 %v11344_v53  ;;  %v6482_v53 = vadd.f32 %v14433_v1, %v14548_v0  ;;  %v11355_v11 = vld [vmem:[#allocation5 + $0x968] ss:$36 sps:$4 sm:$0xff]  }
 0x488   : > { %v14599_v6 = vadd.f32 %v6664_v26, %v6472_v61  ;;  %v14601_v49 = vpop.f32.mrf.mxu0  ;;  %v11352_v61 = vld [vmem:[#allocation5 + $0x9b0] ss:$36 sps:$4 sm:$0xff]   ;;  %v11722_v59 = vld [vmem:[%s12127_s7 + $0x8] ss:$28 sps:$4 sm:$0xff]  }
 0x489   : > { %v6666_v37 = vpop.f32.mrf.mxu1 }
 0x48a   : > { %15951 = vst [vmem:[#allocation14_spill] sm:$0xff] %v14599_v6  ;;  %v14605_v34 = vadd.f32 %v6666_v37, %v6474_v12  ;;  %v14607_v23 = vpop.f32.mrf.mxu0  ;;  %10188 = vmatpush3.bf16.msra.mxu0 %v11345_v24  ;;  %v11354_v24 = vld [vmem:[#allocation5 + $0xba8] ss:$36 sps:$4 sm:$0xff]   ;;  %v6540_v6 = vadd.f32 %v14556_v27, %v14540_v19  ;;  %v11723_v27 = vld [vmem:[%s12127_s7 + $0x1fc] ss:$28 sps:$4 sm:$0xff]  }
 0x48b   : > { %v6668_v14 = vpop.f32.mrf.mxu1  ;;  %10189 = vmatprep.subr.bf16.mxu0 %v11348_v44  ;;  %v6486_v44 = vadd.f32 %v14441_v56, %v14548_v0  ;;  %v11706_v56 = vld [vmem:[%s12127_s7 + $0xa8] ss:$28 sps:$4 sm:$0xff]  }
 0x48c   : > { %v14611_v43 = vadd.f32 %v6668_v14, %v6476_v42  ;;  %v14613_v25 = vpop.f32.mrf.mxu0  ;;  %7246 = vmatmul.mubr.bf16.gmra.mxu0 %v11703_v39  ;;  %v11705_v39 = vld [vmem:[%s12127_s7 + $0x280] ss:$28 sps:$4 sm:$0xff]  }
 0x48d   : > { %v6672_v41 = vpop.f32.mrf.mxu1  ;;  %7137 = vmatmul.mubr.bf16.gmra.mxu1 %v11702_v3  ;;  %7253 = vmatprep.mubr.bf16.mxu0 %v11704_v52 }
 0x48e   : > { %15952 = vst [vmem:[#allocation15_spill] sm:$0xff] %v14611_v43  ;;  %v14619_v54 = vadd.f32 %v6672_v41, %v6480_v36  ;;  %7146 = vmatprep.mubr.bf16.mxu1 %v15932_v15  ;;  %v14623_v50 = vpop.f32.mrf.mxu0  ;;  %10190 = vmatpush3.bf16.msra.mxu0 %v11349_v17  ;;  %v6490_v17 = vadd.f32 %v14445_v57, %v14540_v19  ;;  %v11720_v43 = vld [vmem:[%s12127_s7 + $0xc] ss:$28 sps:$4 sm:$0xff]  }
 0x48f   : > { %v6674_v33 = vpop.f32.mrf.mxu1  ;;  %10191 = vmatprep.subr.bf16.mxu0 %v11351_v62  ;;  %v11357_v62 = vld [vmem:[#allocation5 + $0xb60] ss:$36 sps:$4 sm:$0xff]  }
 0x490   : > { %v14627_v26 = vadd.f32 %v6674_v33, %v6482_v53  ;;  %v14629_v1 = vpop.f32.mrf.mxu0  ;;  %v6492_v53 = vadd.f32 %v14453_v2, %v14548_v0  ;;  %v11707_v33 = vld [vmem:[%s12127_s7 + $0xe4] ss:$28 sps:$4 sm:$0xff]  }
 0x491   : > { %v6676_v12 = vpop.f32.mrf.mxu1 }
 0x492   : > { %15953 = vst [vmem:[#allocation16_spill] sm:$0xff] %v14627_v26  ;;  %v14633_v37 = vadd.f32 %v6676_v12, %v6484_v58  ;;  %v14635_v42 = vpop.f32.mrf.mxu0  ;;  %10192 = vmatpush3.bf16.msra.mxu0 %v11352_v61  ;;  %v11358_v58 = vld [vmem:[#allocation5 + $0x920] ss:$36 sps:$4 sm:$0xff]  }
 0x493   : > { %v6678_v14 = vpop.f32.mrf.mxu1  ;;  %10193 = vmatprep.subr.bf16.mxu0 %v11354_v24  ;;  %v6494_v24 = vadd.f32 %v14459_v31, %v14540_v19  ;;  %v6500_v31 = vadd.f32 %v14468_v16, %v14540_v19 }
 0x494   : > { %v14639_v36 = vadd.f32 %v6678_v14, %v6486_v44  ;;  %v14641_v41 = vpop.f32.mrf.mxu0  ;;  %7254 = vmatmul.mubr.bf16.gmra.mxu0 %v11706_v56  ;;  %v6496_v14 = vadd.f32 %v14463_v8, %v14548_v0  ;;  %v6502_v8 = vadd.f32 %v14476_v35, %v14548_v0  ;;  %v6506_v35 = vadd.f32 %v14484_v40, %v14548_v0 }
 0x495   : > { %v6682_v3 = vpop.f32.mrf.mxu1  ;;  %7147 = vmatmul.mubr.bf16.gmra.mxu1 %v11705_v39  ;;  %7261 = vmatprep.mubr.bf16.mxu0 %v11707_v33  ;;  %v11709_v33 = vld [vmem:[%s12127_s7 + $0xe0] ss:$28 sps:$4 sm:$0xff]   ;;  %v6512_v40 = vadd.f32 %v14496_v29, %v14548_v0  ;;  %v6516_v29 = vadd.f32 %v14504_v4, %v14548_v0  ;;  %v6522_v4 = vadd.f32 %v14516_v22, %v14548_v0 }
 0x496   : > { %15954 = vst [vmem:[#allocation31_spill] sm:$0xff] %v14639_v36  ;;  %v14647_v52 = vadd.f32 %v6682_v3, %v6490_v17  ;;  %7156 = vmatprep.mubr.bf16.mxu1 %v15932_v15  ;;  %v14651_v57 = vpop.f32.mrf.mxu0  ;;  %10194 = vmatpush3.bf16.msra.mxu0 %v11355_v11 }
 0x497   : > { %v6684_v61 = vpop.f32.mrf.mxu1  ;;  %10195 = vmatprep.subr.bf16.mxu0 %v11357_v62 }
 0x498   : > { %v14655_v12 = vadd.f32 %v6684_v61, %v6492_v53  ;;  %v14657_v2 = vpop.f32.mrf.mxu0  ;;  %v11708_v53 = vld [vmem:[%s12127_s7 + $0x2b8] ss:$28 sps:$4 sm:$0xff]  }
 0x499   : > { %v6686_v44 = vpop.f32.mrf.mxu1 }
 0x49a   : > { %15955 = vst [vmem:[#allocation32_spill] sm:$0xff] %v14655_v12  ;;  %v14661_v17 = vadd.f32 %v6686_v44, %v6494_v24  ;;  %v14663_v3 = vpop.f32.mrf.mxu0  ;;  %10196 = vmatpush3.bf16.msra.mxu0 %v11358_v58  ;;  %v11710_v58 = vld [vmem:[%s12127_s7 + $0x11c] ss:$28 sps:$4 sm:$0xff]   ;;  %v6504_v44 = vadd.f32 %v14480_v13, %v14540_v19  ;;  %v6520_v12 = vadd.f32 %v14508_v46, %v14540_v19 }
 0x49b   : > { %v6688_v11 = vpop.f32.mrf.mxu1 }
 0x49c   : > { %v14667_v39 = vadd.f32 %v6688_v11, %v6496_v14  ;;  %v14669_v56 = vpop.f32.mrf.mxu0  ;;  %7262 = vmatmul.mubr.bf16.gmra.mxu0 %v11709_v33 }
 0x49d   : > { %v6692_v62 = vpop.f32.mrf.mxu1  ;;  %7157 = vmatmul.mubr.bf16.gmra.mxu1 %v11708_v53  ;;  %7269 = vmatprep.mubr.bf16.mxu0 %v11710_v58  ;;  %v6510_v58 = vadd.f32 %v14488_v7, %v14540_v19 }
 0x49e   : > { %15956 = vst [vmem:[#allocation17_spill] sm:$0xff] %v14667_v39  ;;  %v14675_v61 = vadd.f32 %v6692_v62, %v6500_v31  ;;  %7166 = vmatprep.mubr.bf16.mxu1 %v15932_v15  ;;  %v14679_v16 = vpop.f32.mrf.mxu0 }
 0x49f   : > { %v6694_v24 = vpop.f32.mrf.mxu1 }
 0x4a0   : > { %v14683_v14 = vadd.f32 %v6694_v24, %v6502_v8  ;;  %v14685_v11 = vpop.f32.mrf.mxu0  ;;  %v11711_v24 = vld [vmem:[%s12127_s7 + $0x2f0] ss:$28 sps:$4 sm:$0xff]  }
 0x4a1   : > { %v6696_v53 = vpop.f32.mrf.mxu1 }
 0x4a2   : > { %15957 = vst [vmem:[#allocation18_spill] sm:$0xff] %v14683_v14  ;;  %v14689_v31 = vadd.f32 %v6696_v53, %v6504_v44  ;;  %v14691_v62 = vpop.f32.mrf.mxu0  ;;  %v11712_v14 = vld [vmem:[%s12127_s7 + $0x118] ss:$28 sps:$4 sm:$0xff]  }
 0x4a3   : > { %v6698_v33 = vpop.f32.mrf.mxu1  ;;  %v11713_v53 = vld [vmem:[%s12127_s7 + $0x154] ss:$28 sps:$4 sm:$0xff]  }
 0x4a4   : > { %v14695_v39 = vadd.f32 %v6698_v33, %v6506_v35  ;;  %v14697_v13 = vpop.f32.mrf.mxu0  ;;  %7270 = vmatmul.mubr.bf16.gmra.mxu0 %v11712_v14  ;;  %v6514_v33 = vadd.f32 %v14500_v47, %v14540_v19 }
 0x4a5   : > { %v6702_v8 = vpop.f32.mrf.mxu1  ;;  %7167 = vmatmul.mubr.bf16.gmra.mxu1 %v11711_v24  ;;  %7277 = vmatprep.mubr.bf16.mxu0 %v11713_v53 }
 0x4a6   : > { %15958 = vst [vmem:[#allocation19_spill] sm:$0xff] %v14695_v39  ;;  %v14703_v44 = vadd.f32 %v6702_v8, %v6510_v58  ;;  %7176 = vmatprep.mubr.bf16.mxu1 %v15932_v15  ;;  %v14707_v7 = vpop.f32.mrf.mxu0 }
 0x4a7   : > { %v6704_v35 = vpop.f32.mrf.mxu1 }
 0x4a8   : > { %v14711_v24 = vadd.f32 %v6704_v35, %v6512_v40  ;;  %v14713_v14 = vpop.f32.mrf.mxu0  ;;  %v11714_v35 = vld [vmem:[%s12127_s7 + $0x328] ss:$28 sps:$4 sm:$0xff]  }
 0x4a9   : > { %v6706_v39 = vpop.f32.mrf.mxu1 }
 0x4aa   : > { %15959 = vst [vmem:[#allocation20_spill] sm:$0xff] %v14711_v24  ;;  %v14717_v58 = vadd.f32 %v6706_v39, %v6514_v33  ;;  %v14719_v8 = vpop.f32.mrf.mxu0  ;;  %v11715_v24 = vld [vmem:[%s12127_s7 + $0x150] ss:$28 sps:$4 sm:$0xff]  }
 0x4ab   : > { %v6708_v53 = vpop.f32.mrf.mxu1  ;;  %v11716_v33 = vld [vmem:[%s12127_s7 + $0x18c] ss:$28 sps:$4 sm:$0xff]  }
 0x4ac   : > { %v14723_v36 = vadd.f32 %v6708_v53, %v6516_v29  ;;  %v14725_v47 = vpop.f32.mrf.mxu0  ;;  %7278 = vmatmul.mubr.bf16.gmra.mxu0 %v11715_v24  ;;  %v6524_v53 = vadd.f32 %v14520_v30, %v14540_v19 }
 0x4ad   : > { %v6712_v40 = vpop.f32.mrf.mxu1  ;;  %7177 = vmatmul.mubr.bf16.gmra.mxu1 %v11714_v35  ;;  %7285 = vmatprep.mubr.bf16.mxu0 %v11716_v33 }
 0x4ae   : > { %15960 = vst [vmem:[#allocation21_spill] sm:$0xff] %v14723_v36  ;;  %v14731_v39 = vadd.f32 %v6712_v40, %v6520_v12  ;;  %7186 = vmatprep.mubr.bf16.mxu1 %v15932_v15  ;;  %v14735_v46 = vpop.f32.mrf.mxu0  ;;  %v6526_v12 = vadd.f32 %v14524_v55, %v14548_v0  ;;  %v6530_v36 = vadd.f32 %v14529_v48, %v14540_v19 }
 0x4af   : > { %v6714_v29 = vpop.f32.mrf.mxu1  ;;  %v6532_v55 = vadd.f32 %v14538_v45, %v14548_v0  ;;  %v6536_v45 = vadd.f32 %v14550_v32, %v14548_v0  ;;  %v6542_v32 = vadd.f32 %v14565_v28, %v14548_v0 }
 0x4b0   : > { %v14739_v35 = vadd.f32 %v6714_v29, %v6522_v4  ;;  %v14741_v24 = vpop.f32.mrf.mxu0  ;;  %v11717_v29 = vld [vmem:[%s12127_s7 + $0x360] ss:$28 sps:$4 sm:$0xff]  }
 0x4b1   : > { %v6716_v22 = vpop.f32.mrf.mxu1 }
 0x4b2   : > { %15961 = vst [vmem:[#allocation22_spill] sm:$0xff] %v14739_v35  ;;  %v14745_v15 = vadd.f32 %v6716_v22, %v6524_v53  ;;  %v14747_v40 = vpop.f32.mrf.mxu0  ;;  %v11718_v35 = vld [vmem:[%s12127_s7 + $0x188] ss:$28 sps:$4 sm:$0xff]  }
 0x4b3   : > { %v6718_v33 = vpop.f32.mrf.mxu1  ;;  %v11719_v22 = vld [vmem:[%s12127_s7 + $0x1c4] ss:$28 sps:$4 sm:$0xff]  }
 0x4b4   : > { %v14751_v26 = vadd.f32 %v6718_v33, %v6526_v12  ;;  %v14753_v30 = vpop.f32.mrf.mxu0  ;;  %7286 = vmatmul.mubr.bf16.gmra.mxu0 %v11718_v35  ;;  %v6534_v33 = vadd.f32 %v14544_v9, %v14540_v19 }
 0x4b5   : > { %v6722_v4 = vpop.f32.mrf.mxu1  ;;  %7187 = vmatmul.mubr.bf16.gmra.mxu1 %v11717_v29  ;;  %7293 = vmatprep.mubr.bf16.mxu0 %v11719_v22  ;;  %v11353_v22 = vld [vmem:[#allocation5 + $0xf50] ss:$36 sps:$4 sm:$0xff]  }
 0x4b6   : > { %15962 = vst [vmem:[#allocation23_spill] sm:$0xff] %v14751_v26  ;;  %v14759_v53 = vadd.f32 %v6722_v4, %v6530_v36  ;;  %7390 = vmatprep.mubr.bf16.mxu1 %v11720_v43  ;;  %v14763_v48 = vpop.f32.mrf.mxu0 }
 0x4b7   : > { %v6724_v12 = vpop.f32.mrf.mxu1 }
 0x4b8   : > { %v14767_v29 = vadd.f32 %v6724_v12, %v6532_v55  ;;  %v14769_v35 = vpop.f32.mrf.mxu0 }
 0x4b9   : > { %v6726_v26 = vpop.f32.mrf.mxu1 }
 0x4ba   : > { %15963 = vst [vmem:[#allocation24_spill] sm:$0xff] %v14767_v29  ;;  %v14773_v36 = vadd.f32 %v6726_v26, %v6534_v33  ;;  %v14775_v43 = vpop.f32.mrf.mxu0  ;;  %v11721_v29 = vld [vmem:[%s12127_s7 + $0x1c0] ss:$28 sps:$4 sm:$0xff]  }
 0x4bb   : > { %v6728_v4 = vpop.f32.mrf.mxu1 }
 0x4bc   : > { %v14779_v9 = vadd.f32 %v6728_v4, %v6536_v45  ;;  %v6845_v12 = vpop.f32.mrf.mxu0  ;;  %7294 = vmatmul.mubr.bf16.gmra.mxu0 %v11721_v29  ;;  %v11356_v29 = vld [vmem:[#allocation5 + $0xf08] ss:$36 sps:$4 sm:$0xff]  }
 0x4bd   : > { %v6732_v55 = vpop.f32.mrf.mxu1  ;;  %7391 = vmatmul.mubr.bf16.vlgmr.msra.gmra.mxu1 %v11722_v59  ;;  %v14788_v33 = vadd.f32 %v6845_v12, %v14562_v18  ;;  %7301 = vmatprep.mubr.bf16.mxu0 %v11723_v27  ;;  %v6544_v59 = vadd.f32 %v14573_v10, %v14540_v19  ;;  %v6550_v10 = vadd.f32 %v14585_v51, %v14540_v19  ;;  %v11728_v51 = vld [vmem:[%s12127_s7 + $0x7c] ss:$28 sps:$4 sm:$0xff]  }
 0x4be   : > { %15964 = vst [vmem:[#allocation25_spill] sm:$0xff] %v14779_v9  ;;  %v14785_v26 = vadd.f32 %v6732_v55, %v6540_v6  ;;  %10318 = vmatpush3.bf16.msra.mxu1 %v14457_v5  ;;  %v14792_v4 = vpop.f32.mrf.mxu0  ;;  %v11724_v9 = vld [vmem:[%s12127_s7 + $0x44] ss:$28 sps:$4 sm:$0xff]   ;;  %v6546_v5 = vadd.f32 %v14579_v38, %v14548_v0 }
 0x4bf   : > { %v6734_v45 = vpop.f32.mrf.mxu1  ;;  %7398 = vmatprep.mubr.bf16.mxu1 %v11724_v9  ;;  %10319 = vmatprep.subr.bf16.mxu1 %v11353_v22 }
 0x4c0   : > { %v14797_v28 = vadd.f32 %v6734_v45, %v6542_v32  ;;  %v6849_v18 = vpop.f32.mrf.mxu0  ;;  %v11359_v45 = vld [vmem:[#allocation5 + $0xec0] ss:$36 sps:$4 sm:$0xff]  }
 0x4c1   : > { %v6736_v6 = vpop.f32.mrf.mxu1  ;;  %v14804_v12 = vadd.f32 %v6849_v18, %v14577_v63  ;;  %v6552_v63 = vadd.f32 %v14595_v20, %v14548_v0  ;;  %v11360_v20 = vld [vmem:[#allocation5 + $0xe78] ss:$36 sps:$4 sm:$0xff]  }
 0x4c2   : > { %15965 = vst [vmem:[#allocation26_spill] sm:$0xff] %v14797_v28  ;;  %v14801_v55 = vadd.f32 %v6736_v6, %v6544_v59  ;;  %10320 = vmatpush3.bf16.msra.mxu1 %v11353_v22  ;;  %v14806_v27 = vpop.f32.mrf.mxu0  ;;  %v11725_v59 = vld [vmem:[%s12127_s7 + $0x1f8] ss:$28 sps:$4 sm:$0xff]   ;;  %v11726_v6 = vld [vmem:[%s12127_s7 + $0x40] ss:$28 sps:$4 sm:$0xff]  }
 0x4c3   : > { %15966 = vst [vmem:[#allocation27_spill] sm:$0xff] %v14804_v12  ;;  %v6738_v9 = vpop.f32.mrf.mxu1  ;;  %10321 = vmatprep.subr.bf16.mxu1 %v11356_v29  ;;  %v11727_v12 = vld [vmem:[%s12127_s7 + $0x234] ss:$28 sps:$4 sm:$0xff]  }
 0x4c4   : > { %v14810_v32 = vadd.f32 %v6738_v9, %v6546_v5  ;;  %v6855_v38 = vpop.f32.mrf.mxu0  ;;  %7302 = vmatmul.mubr.bf16.gmra.mxu0 %v11725_v59  ;;  %v6554_v59 = vadd.f32 %v14601_v49, %v14540_v19  ;;  %v6560_v49 = vadd.f32 %v14613_v25, %v14540_v19  ;;  %v11732_v25 = vld [vmem:[%s12127_s7 + $0xb4] ss:$28 sps:$4 sm:$0xff]  }
 0x4c5   : > { %v6742_v28 = vpop.f32.mrf.mxu1  ;;  %7399 = vmatmul.mubr.bf16.gmra.mxu1 %v11726_v6  ;;  %v14819_v18 = vadd.f32 %v6855_v38, %v14591_v60  ;;  %7309 = vmatprep.mubr.bf16.mxu0 %v11727_v12  ;;  %v6556_v12 = vadd.f32 %v14607_v23, %v14548_v0 }
 0x4c6   : > { %15967 = vst [vmem:[#allocation28_spill] sm:$0xff] %v14810_v32  ;;  %v14816_v22 = vadd.f32 %v6742_v28, %v6550_v10  ;;  %7406 = vmatprep.mubr.bf16.mxu1 %v11728_v51  ;;  %v14823_v9 = vpop.f32.mrf.mxu0  ;;  %10322 = vmatpush3.bf16.msra.mxu1 %v11356_v29  ;;  %v11731_v32 = vld [vmem:[%s12127_s7 + $0x26c] ss:$28 sps:$4 sm:$0xff]  }
 0x4c7   : > { %v6744_v5 = vpop.f32.mrf.mxu1  ;;  %10323 = vmatprep.subr.bf16.mxu1 %v11359_v45 }
 0x4c8   : > { %v14827_v6 = vadd.f32 %v6744_v5, %v6552_v63  ;;  %v6859_v60 = vpop.f32.mrf.mxu0  ;;  %v11361_v5 = vld [vmem:[#allocation5 + $0xe30] ss:$36 sps:$4 sm:$0xff]  }
 0x4c9   : > { %v6746_v28 = vpop.f32.mrf.mxu1  ;;  %v14834_v38 = vadd.f32 %v6859_v60, %v14605_v34  ;;  %v6562_v34 = vadd.f32 %v14623_v50, %v14548_v0  ;;  %v11362_v50 = vld [vmem:[#allocation5 + $0xde8] ss:$36 sps:$4 sm:$0xff]  }
 0x4ca   : > { %15968 = vst [vmem:[#allocation29_spill] sm:$0xff] %v14827_v6  ;;  %v14831_v10 = vadd.f32 %v6746_v28, %v6554_v59  ;;  %v14836_v51 = vpop.f32.mrf.mxu0  ;;  %10324 = vmatpush3.bf16.msra.mxu1 %v11359_v45  ;;  %v11729_v59 = vld [vmem:[%s12127_s7 + $0x230] ss:$28 sps:$4 sm:$0xff]   ;;  %v11730_v28 = vld [vmem:[%s12127_s7 + $0x78] ss:$28 sps:$4 sm:$0xff]  }
 0x4cb   : > { %v6748_v29 = vpop.f32.mrf.mxu1  ;;  %10325 = vmatprep.subr.bf16.mxu1 %v11360_v20 }
 0x4cc   : > { %v14840_v63 = vadd.f32 %v6748_v29, %v6556_v12  ;;  %v6865_v23 = vpop.f32.mrf.mxu0  ;;  %7310 = vmatmul.mubr.bf16.gmra.mxu0 %v11729_v59  ;;  %v6564_v59 = vadd.f32 %v14629_v1, %v14540_v19  ;;  %v6570_v1 = vadd.f32 %v14641_v41, %v14540_v19  ;;  %v11736_v41 = vld [vmem:[%s12127_s7 + $0xec] ss:$28 sps:$4 sm:$0xff]  }
 0x4cd   : > { %v6752_v6 = vpop.f32.mrf.mxu1  ;;  %7407 = vmatmul.mubr.bf16.gmra.mxu1 %v11730_v28  ;;  %v14849_v45 = vadd.f32 %v6865_v23, %v14619_v54  ;;  %7317 = vmatprep.mubr.bf16.mxu0 %v11731_v32  ;;  %v6566_v32 = vadd.f32 %v14635_v42, %v14548_v0 }
 0x4ce   : > { %15969 = vst [vmem:[#allocation30_spill] sm:$0xff] %v14840_v63  ;;  %v14846_v60 = vadd.f32 %v6752_v6, %v6560_v49  ;;  %7414 = vmatprep.mubr.bf16.mxu1 %v11732_v25  ;;  %v14853_v29 = vpop.f32.mrf.mxu0  ;;  %10326 = vmatpush3.bf16.msra.mxu1 %v11360_v20  ;;  %v11735_v63 = vld [vmem:[%s12127_s7 + $0x2a4] ss:$28 sps:$4 sm:$0xff]  }
 0x4cf   : > { %v6754_v12 = vpop.f32.mrf.mxu1  ;;  %10327 = vmatprep.subr.bf16.mxu1 %v11361_v5 }
 0x4d0   : > { %v14857_v28 = vadd.f32 %v6754_v12, %v6562_v34  ;;  %v6869_v54 = vpop.f32.mrf.mxu0  ;;  %v11363_v12 = vld [vmem:[#allocation5 + $0xda0] ss:$36 sps:$4 sm:$0xff]  }
 0x4d1   : > { %v6756_v6 = vpop.f32.mrf.mxu1  ;;  %v14864_v23 = vadd.f32 %v6869_v54, %v14633_v37  ;;  %v6572_v37 = vadd.f32 %v14651_v57, %v14548_v0 }
 0x4d2   : > { %15970 = vst [vmem:[#allocation33_spill] sm:$0xff] %v14857_v28  ;;  %v14861_v49 = vadd.f32 %v6756_v6, %v6564_v59  ;;  %v14866_v25 = vpop.f32.mrf.mxu0  ;;  %10328 = vmatpush3.bf16.msra.mxu1 %v11361_v5  ;;  %v11733_v59 = vld [vmem:[%s12127_s7 + $0x268] ss:$28 sps:$4 sm:$0xff]   ;;  %v11734_v6 = vld [vmem:[%s12127_s7 + $0xb0] ss:$28 sps:$4 sm:$0xff]  }
 0x4d3   : > { %v6758_v20 = vpop.f32.mrf.mxu1  ;;  %10329 = vmatprep.subr.bf16.mxu1 %v11362_v50 }
 0x4d4   : > { %v14870_v34 = vadd.f32 %v6758_v20, %v6566_v32  ;;  %v6875_v42 = vpop.f32.mrf.mxu0  ;;  %7318 = vmatmul.mubr.bf16.gmra.mxu0 %v11733_v59  ;;  %v6574_v59 = vadd.f32 %v14657_v2, %v14540_v19  ;;  %v6580_v2 = vadd.f32 %v14669_v56, %v14540_v19 }
 0x4d5   : > { %v6762_v28 = vpop.f32.mrf.mxu1  ;;  %7415 = vmatmul.mubr.bf16.gmra.mxu1 %v11734_v6  ;;  %v14879_v5 = vadd.f32 %v6875_v42, %v14647_v52  ;;  %7325 = vmatprep.mubr.bf16.mxu0 %v11735_v63  ;;  %v6576_v52 = vadd.f32 %v14663_v3, %v14548_v0  ;;  %v11738_v3 = vld [vmem:[%s12127_s7 + $0xe8] ss:$28 sps:$4 sm:$0xff]  }
 0x4d6   : > { %v14876_v54 = vadd.f32 %v6762_v28, %v6570_v1  ;;  %7422 = vmatprep.mubr.bf16.mxu1 %v11736_v41  ;;  %v14883_v20 = vpop.f32.mrf.mxu0  ;;  %10330 = vmatpush3.bf16.msra.mxu1 %v11362_v50 }
 0x4d7   : > { %v6764_v32 = vpop.f32.mrf.mxu1  ;;  %10331 = vmatprep.subr.bf16.mxu1 %v11363_v12 }
 0x4d8   : > { %v14887_v6 = vadd.f32 %v6764_v32, %v6572_v37  ;;  %v6879_v28 = vpop.f32.mrf.mxu0 }
 0x4d9   : > { %v6766_v57 = vpop.f32.mrf.mxu1  ;;  %v14894_v1 = vadd.f32 %v6879_v28, %v14661_v17  ;;  %v6582_v17 = vadd.f32 %v14679_v16, %v14548_v0  ;;  %v11740_v28 = vld [vmem:[%s12127_s7 + $0x124] ss:$28 sps:$4 sm:$0xff]  }
 0x4da   : > { %15971 = vst [vmem:[#allocation34_spill] sm:$0xff] %v14887_v6  ;;  %v14891_v63 = vadd.f32 %v6766_v57, %v6574_v59  ;;  %v14896_v42 = vpop.f32.mrf.mxu0  ;;  %10332 = vmatpush3.bf16.msra.mxu1 %v11363_v12  ;;  %v11737_v6 = vld [vmem:[%s12127_s7 + $0x2a0] ss:$28 sps:$4 sm:$0xff]  }
 0x4db   : > { %v6768_v50 = vpop.f32.mrf.mxu1  ;;  %v11739_v12 = vld [vmem:[%s12127_s7 + $0x2dc] ss:$28 sps:$4 sm:$0xff]  }
 0x4dc   : > { %v14900_v37 = vadd.f32 %v6768_v50, %v6576_v52  ;;  %v6885_v32 = vpop.f32.mrf.mxu0  ;;  %7326 = vmatmul.mubr.bf16.gmra.mxu0 %v11737_v6  ;;  %v6584_v6 = vadd.f32 %v14685_v11, %v14540_v19  ;;  %v6590_v11 = vadd.f32 %v14697_v13, %v14540_v19 }
 0x4dd   : > { %v6772_v41 = vpop.f32.mrf.mxu1  ;;  %7423 = vmatmul.mubr.bf16.gmra.mxu1 %v11738_v3  ;;  %v14909_v57 = vadd.f32 %v6885_v32, %v14675_v61  ;;  %7333 = vmatprep.mubr.bf16.mxu0 %v11739_v12  ;;  %v6586_v61 = vadd.f32 %v14691_v62, %v14548_v0  ;;  %v11742_v62 = vld [vmem:[%s12127_s7 + $0x120] ss:$28 sps:$4 sm:$0xff]  }
 0x4de   : > { %15972 = vst [vmem:[#allocation35_spill] sm:$0xff] %v14900_v37  ;;  %v14906_v59 = vadd.f32 %v6772_v41, %v6580_v2  ;;  %7430 = vmatprep.mubr.bf16.mxu1 %v11740_v28  ;;  %v14913_v52 = vpop.f32.mrf.mxu0  ;;  %v11744_v37 = vld [vmem:[%s12127_s7 + $0x15c] ss:$28 sps:$4 sm:$0xff]  }
 0x4df   : > { %v6774_v56 = vpop.f32.mrf.mxu1 }
 0x4e0   : > { %v14917_v50 = vadd.f32 %v6774_v56, %v6582_v17  ;;  %v6889_v2 = vpop.f32.mrf.mxu0 }
 0x4e1   : > { %v6776_v16 = vpop.f32.mrf.mxu1  ;;  %v14924_v32 = vadd.f32 %v6889_v2, %v14689_v31  ;;  %v11743_v2 = vld [vmem:[%s12127_s7 + $0x314] ss:$28 sps:$4 sm:$0xff]  }
 0x4e2   : > { %15973 = vst [vmem:[#allocation36_spill] sm:$0xff] %v14917_v50  ;;  %v14921_v41 = vadd.f32 %v6776_v16, %v6584_v6  ;;  %v14926_v12 = vpop.f32.mrf.mxu0  ;;  %v11741_v50 = vld [vmem:[%s12127_s7 + $0x2d8] ss:$28 sps:$4 sm:$0xff]   ;;  %v6592_v6 = vadd.f32 %v14707_v7, %v14548_v0 }
 0x4e3   : > { %v6778_v3 = vpop.f32.mrf.mxu1 }
 0x4e4   : > { %v14930_v17 = vadd.f32 %v6778_v3, %v6586_v61  ;;  %v6895_v56 = vpop.f32.mrf.mxu0  ;;  %7334 = vmatmul.mubr.bf16.gmra.mxu0 %v11741_v50  ;;  %v6594_v50 = vadd.f32 %v14713_v14, %v14540_v19  ;;  %v6600_v14 = vadd.f32 %v14725_v47, %v14540_v19 }
 0x4e5   : > { %v6782_v28 = vpop.f32.mrf.mxu1  ;;  %7431 = vmatmul.mubr.bf16.gmra.mxu1 %v11742_v62  ;;  %v14939_v16 = vadd.f32 %v6895_v56, %v14703_v44  ;;  %7341 = vmatprep.mubr.bf16.mxu0 %v11743_v2  ;;  %v6596_v44 = vadd.f32 %v14719_v8, %v14548_v0  ;;  %v11746_v8 = vld [vmem:[%s12127_s7 + $0x158] ss:$28 sps:$4 sm:$0xff]  }
 0x4e6   : > { %15974 = vst [vmem:[#allocation37_spill] sm:$0xff] %v14930_v17  ;;  %v14936_v31 = vadd.f32 %v6782_v28, %v6590_v11  ;;  %7438 = vmatprep.mubr.bf16.mxu1 %v11744_v37  ;;  %v14943_v61 = vpop.f32.mrf.mxu0  ;;  %v11748_v17 = vld [vmem:[%s12127_s7 + $0x194] ss:$28 sps:$4 sm:$0xff]  }
 0x4e7   : > { %v6784_v13 = vpop.f32.mrf.mxu1 }
 0x4e8   : > { %v14947_v3 = vadd.f32 %v6784_v13, %v6592_v6  ;;  %v6899_v11 = vpop.f32.mrf.mxu0 }
 0x4e9   : > { %v6786_v7 = vpop.f32.mrf.mxu1  ;;  %v14954_v37 = vadd.f32 %v6899_v11, %v14717_v58  ;;  %v11747_v11 = vld [vmem:[%s12127_s7 + $0x34c] ss:$28 sps:$4 sm:$0xff]  }
 0x4ea   : > { %15975 = vst [vmem:[#allocation38_spill] sm:$0xff] %v14947_v3  ;;  %v14951_v28 = vadd.f32 %v6786_v7, %v6594_v50  ;;  %v14956_v62 = vpop.f32.mrf.mxu0  ;;  %v11745_v3 = vld [vmem:[%s12127_s7 + $0x310] ss:$28 sps:$4 sm:$0xff]   ;;  %v6602_v50 = vadd.f32 %v14735_v46, %v14548_v0 }
 0x4eb   : > { %v6788_v56 = vpop.f32.mrf.mxu1 }
 0x4ec   : > { %v14960_v6 = vadd.f32 %v6788_v56, %v6596_v44  ;;  %v6905_v13 = vpop.f32.mrf.mxu0  ;;  %7342 = vmatmul.mubr.bf16.gmra.mxu0 %v11745_v3  ;;  %v6604_v3 = vadd.f32 %v14741_v24, %v14540_v19  ;;  %v6610_v24 = vadd.f32 %v14753_v30, %v14540_v19 }
 0x4ed   : > { %v6792_v2 = vpop.f32.mrf.mxu1  ;;  %7439 = vmatmul.mubr.bf16.gmra.mxu1 %v11746_v8  ;;  %v14969_v7 = vadd.f32 %v6905_v13, %v14731_v39  ;;  %7349 = vmatprep.mubr.bf16.mxu0 %v11747_v11  ;;  %v6606_v39 = vadd.f32 %v14747_v40, %v14548_v0  ;;  %v11750_v40 = vld [vmem:[%s12127_s7 + $0x190] ss:$28 sps:$4 sm:$0xff]  }
 0x4ee   : > { %15976 = vst [vmem:[#allocation39_spill] sm:$0xff] %v14960_v6  ;;  %v14966_v58 = vadd.f32 %v6792_v2, %v6600_v14  ;;  %7446 = vmatprep.mubr.bf16.mxu1 %v11748_v17  ;;  %v14973_v44 = vpop.f32.mrf.mxu0  ;;  %v11752_v6 = vld [vmem:[%s12127_s7 + $0x14] ss:$28 sps:$4 sm:$0xff]  }
 0x4ef   : > { %v6794_v47 = vpop.f32.mrf.mxu1 }
 0x4f0   : > { %v14977_v56 = vadd.f32 %v6794_v47, %v6602_v50  ;;  %v6909_v14 = vpop.f32.mrf.mxu0 }
 0x4f1   : > { %v6796_v46 = vpop.f32.mrf.mxu1  ;;  %v14984_v17 = vadd.f32 %v6909_v14, %v14745_v15  ;;  %v11751_v14 = vld [vmem:[%s12127_s7 + $0x1cc] ss:$28 sps:$4 sm:$0xff]  }
 0x4f2   : > { %15977 = vst [vmem:[#allocation40_spill] sm:$0xff] %v14977_v56  ;;  %v14981_v2 = vadd.f32 %v6796_v46, %v6604_v3  ;;  %v14986_v8 = vpop.f32.mrf.mxu0  ;;  %v11749_v56 = vld [vmem:[%s12127_s7 + $0x348] ss:$28 sps:$4 sm:$0xff]   ;;  %v6612_v3 = vadd.f32 %v14763_v48, %v14548_v0 }
 0x4f3   : > { %v6798_v13 = vpop.f32.mrf.mxu1 }
 0x4f4   : > { %v14990_v50 = vadd.f32 %v6798_v13, %v6606_v39  ;;  %v6915_v47 = vpop.f32.mrf.mxu0  ;;  %7350 = vmatmul.mubr.bf16.gmra.mxu0 %v11749_v56  ;;  %v6614_v56 = vadd.f32 %v14769_v35, %v14540_v19 }
 0x4f5   : > { %v6802_v11 = vpop.f32.mrf.mxu1  ;;  %7447 = vmatmul.mubr.bf16.gmra.mxu1 %v11750_v40  ;;  %v14999_v46 = vadd.f32 %v6915_v47, %v14759_v53  ;;  %7551 = vmatprep.mubr.bf16.mxu0 %v11752_v6  ;;  %v6616_v53 = vadd.f32 %v14775_v43, %v14548_v0  ;;  %v6848_v0 = vadd.f32 %v14792_v4, %v14571_v21 }
 0x4f6   : > { %15978 = vst [vmem:[#allocation41_spill] sm:$0xff] %v14990_v50  ;;  %v14996_v15 = vadd.f32 %v6802_v11, %v6610_v24  ;;  %7454 = vmatprep.mubr.bf16.mxu1 %v11751_v14  ;;  %v15003_v39 = vpop.f32.mrf.mxu0  ;;  %v11758_v50 = vld [vmem:[%s12127_s7 + $0x48] ss:$28 sps:$4 sm:$0xff]  }
 0x4f7   : > { %v6804_v30 = vpop.f32.mrf.mxu1 }
 0x4f8   : > { %v15007_v13 = vadd.f32 %v6804_v30, %v6612_v3  ;;  %v6919_v24 = vpop.f32.mrf.mxu0  ;;  %v11753_v3 = vld [vmem:[%s12127_s7 + $0x1c8] ss:$28 sps:$4 sm:$0xff]   ;;  %v11754_v30 = vld [vmem:[%s12127_s7 + $0x10] ss:$28 sps:$4 sm:$0xff]  }
 0x4f9   : > { %v6806_v48 = vpop.f32.mrf.mxu1  ;;  %v15014_v6 = vadd.f32 %v6919_v24, %v14773_v36  ;;  %v11755_v36 = vld [vmem:[%s12127_s7 + $0x204] ss:$28 sps:$4 sm:$0xff]  }
 0x4fa   : > { %15979 = vst [vmem:[#allocation42_spill] sm:$0xff] %v15007_v13  ;;  %v15011_v11 = vadd.f32 %v6806_v48, %v6614_v56  ;;  %v15016_v40 = vpop.f32.mrf.mxu0  ;;  %v11756_v56 = vld [vmem:[%s12127_s7 + $0x4c] ss:$28 sps:$4 sm:$0xff]  }
 0x4fb   : > { %v6808_v47 = vpop.f32.mrf.mxu1 }
 0x4fc   : > { %v15018_v14 = vadd.f32 %v6808_v47, %v6616_v53  ;;  %v6925_v19 = vpop.f32.mrf.mxu0  ;;  %7552 = vmatmul.mubr.bf16.vlgmr.msra.gmra.mxu0 %v11754_v30 }
 0x4fd   : > { %v7038_v35 = vpop.f32.mrf.mxu1  ;;  %7455 = vmatmul.mubr.bf16.gmra.mxu1 %v11753_v3  ;;  %v15025_v43 = vadd.f32 %v6925_v19, %v14785_v26  ;;  %7559 = vmatprep.mubr.bf16.mxu0 %v11756_v56  ;;  %v15982_v56 = vld [vmem:[#allocation27_spill] sm:$0xff] }
 0x4fe   : > { %15980 = vst [vmem:[#allocation12_spill] sm:$0xff] %v15018_v14  ;;  %7462 = vmatprep.mubr.bf16.mxu1 %v11755_v36  ;;  %v15029_v48 = vpop.f32.mrf.mxu0  ;;  %v7039_v53 = vadd.f32 %v7038_v35, %v14788_v33  ;;  %v15981_v14 = vld [vmem:[#allocation13_spill] sm:$0xff] }
 0x4ff   : > { %v7040_v24 = vpop.f32.mrf.mxu1  ;;  %v6852_v21 = vadd.f32 %v14806_v27, %v15981_v14  ;;  %v15983_v27 = vld [vmem:[#allocation14_spill] sm:$0xff] }
 0x500   : > { %v7041_v47 = vadd.f32 %v7040_v24, %v6848_v0  ;;  %v6929_v3 = vpop.f32.mrf.mxu0  ;;  %v11757_v24 = vld [vmem:[%s12127_s7 + $0x200] ss:$28 sps:$4 sm:$0xff]   ;;  %v6858_v14 = vadd.f32 %v14823_v9, %v15983_v27 }
 0x501   : > { %v7042_v30 = vpop.f32.mrf.mxu1  ;;  %v15035_v4 = vadd.f32 %v6929_v3, %v14801_v55  ;;  %v11760_v3 = vld [vmem:[%s12127_s7 + $0x84] ss:$28 sps:$4 sm:$0xff]  }
 0x502   : > { %v9800_v26 = vpack.c.bf16 %v7041_v47, %v7039_v53  ;;  %v15037_v19 = vpop.f32.mrf.mxu0  ;;  %v7043_v13 = vadd.f32 %v7042_v30, %v15982_v56  ;;  %v11759_v47 = vld [vmem:[%s12127_s7 + $0x23c] ss:$28 sps:$4 sm:$0xff]  }
 0x503   : > { %v7044_v36 = vpop.f32.mrf.mxu1 }
 0x504   : > { %8740 = vst [vmem:[%s12616_s20 + $0x18] sm:$0xff] %v9800_v26  ;;  %v7045_v33 = vadd.f32 %v7044_v36, %v6852_v21  ;;  %v6935_v35 = vpop.f32.mrf.mxu0  ;;  %7560 = vmatmul.mubr.bf16.gmra.mxu0 %v11758_v50 }
 0x505   : > { %v7048_v0 = vpop.f32.mrf.mxu1  ;;  %7463 = vmatmul.mubr.bf16.gmra.mxu1 %v11757_v24  ;;  %v15046_v53 = vadd.f32 %v6935_v35, %v14816_v22  ;;  %7567 = vmatprep.mubr.bf16.mxu0 %v11760_v3 }
 0x506   : > { %v9805_v55 = vpack.c.bf16 %v7045_v33, %v7043_v13  ;;  %7470 = vmatprep.mubr.bf16.mxu1 %v11759_v47  ;;  %v15050_v30 = vpop.f32.mrf.mxu0  ;;  %v7049_v26 = vadd.f32 %v7048_v0, %v14819_v18  ;;  %v15984_v13 = vld [vmem:[#allocation15_spill] sm:$0xff] }
 0x507   : > { %v7050_v21 = vpop.f32.mrf.mxu1  ;;  %v6862_v22 = vadd.f32 %v14836_v51, %v15984_v13  ;;  %v11762_v47 = vld [vmem:[%s12127_s7 + $0x80] ss:$28 sps:$4 sm:$0xff]   ;;  %v15985_v51 = vld [vmem:[#allocation16_spill] sm:$0xff] }
 0x508   : > { %8745 = vst [vmem:[%s12616_s20 + $0x3c] sm:$0xff] %v9805_v55  ;;  %v7051_v50 = vadd.f32 %v7050_v21, %v6858_v14  ;;  %v6939_v36 = vpop.f32.mrf.mxu0  ;;  %v11761_v55 = vld [vmem:[%s12127_s7 + $0x238] ss:$28 sps:$4 sm:$0xff]   ;;  %v6868_v3 = vadd.f32 %v14853_v29, %v15985_v51  ;;  %v11765_v51 = vld [vmem:[%s12127_s7 + $0x270] ss:$28 sps:$4 sm:$0xff]  }
 0x509   : > { %v7052_v9 = vpop.f32.mrf.mxu1  ;;  %v15057_v33 = vadd.f32 %v6939_v36, %v14831_v10 }
 0x50a   : > { %v9810_v56 = vpack.c.bf16 %v7051_v50, %v7049_v26  ;;  %v15059_v35 = vpop.f32.mrf.mxu0  ;;  %v7053_v27 = vadd.f32 %v7052_v9, %v14834_v38  ;;  %v11763_v26 = vld [vmem:[%s12127_s7 + $0x274] ss:$28 sps:$4 sm:$0xff]   ;;  %v11764_v50 = vld [vmem:[%s12127_s7 + $0xbc] ss:$28 sps:$4 sm:$0xff]  }
 0x50b   : > { %v7054_v24 = vpop.f32.mrf.mxu1 }
 0x50c   : > { %8750 = vst [vmem:[%s12616_s20 + $0x60] sm:$0xff] %v9810_v56  ;;  %v7055_v18 = vadd.f32 %v7054_v24, %v6862_v22  ;;  %v6945_v0 = vpop.f32.mrf.mxu0  ;;  %7568 = vmatmul.mubr.bf16.gmra.mxu0 %v11762_v47  ;;  %v15986_v56 = vld [vmem:[#allocation31_spill] sm:$0xff] }
 0x50d   : > { %v7058_v14 = vpop.f32.mrf.mxu1  ;;  %7471 = vmatmul.mubr.bf16.gmra.mxu1 %v11761_v55  ;;  %v15068_v21 = vadd.f32 %v6945_v0, %v14846_v60  ;;  %7575 = vmatprep.mubr.bf16.mxu0 %v11764_v50  ;;  %v6872_v60 = vadd.f32 %v14866_v25, %v15986_v56  ;;  %v15987_v25 = vld [vmem:[#allocation32_spill] sm:$0xff]  ;;  %v15988_v56 = vld [vmem:[#allocation17_spill] sm:$0xff] }
 0x50e   : > { %v9815_v10 = vpack.c.bf16 %v7055_v18, %v7053_v27  ;;  %7478 = vmatprep.mubr.bf16.mxu1 %v11763_v26  ;;  %v15072_v38 = vpop.f32.mrf.mxu0  ;;  %v7059_v9 = vadd.f32 %v7058_v14, %v14849_v45  ;;  %v11767_v50 = vld [vmem:[%s12127_s7 + $0x2ac] ss:$28 sps:$4 sm:$0xff]  }
 0x50f   : > { %v7060_v36 = vpop.f32.mrf.mxu1 }
 0x510   : > { %8755 = vst [vmem:[%s12616_s20 + $0x84] sm:$0xff] %v9815_v10  ;;  %v7061_v13 = vadd.f32 %v7060_v36, %v6868_v3  ;;  %v6949_v22 = vpop.f32.mrf.mxu0  ;;  %v11766_v3 = vld [vmem:[%s12127_s7 + $0xb8] ss:$28 sps:$4 sm:$0xff]   ;;  %v6878_v10 = vadd.f32 %v14883_v20, %v15987_v25 }
 0x511   : > { %v7062_v29 = vpop.f32.mrf.mxu1  ;;  %v15079_v27 = vadd.f32 %v6949_v22, %v14861_v49  ;;  %v11768_v36 = vld [vmem:[%s12127_s7 + $0xf4] ss:$28 sps:$4 sm:$0xff]  }
 0x512   : > { %v9820_v24 = vpack.c.bf16 %v7061_v13, %v7059_v9  ;;  %v15081_v18 = vpop.f32.mrf.mxu0  ;;  %v7063_v55 = vadd.f32 %v7062_v29, %v14864_v23 }
 0x513   : > { %v7064_v0 = vpop.f32.mrf.mxu1 }
 0x514   : > { %8760 = vst [vmem:[%s12616_s20 + $0xa8] sm:$0xff] %v9820_v24  ;;  %v7065_v45 = vadd.f32 %v7064_v0, %v6872_v60  ;;  %v6955_v14 = vpop.f32.mrf.mxu0  ;;  %7576 = vmatmul.mubr.bf16.gmra.mxu0 %v11766_v3  ;;  %v11770_v3 = vld [vmem:[%s12127_s7 + $0xf0] ss:$28 sps:$4 sm:$0xff]  }
 0x515   : > { %v7068_v47 = vpop.f32.mrf.mxu1  ;;  %7479 = vmatmul.mubr.bf16.gmra.mxu1 %v11765_v51  ;;  %v15090_v26 = vadd.f32 %v6955_v14, %v14876_v54  ;;  %7583 = vmatprep.mubr.bf16.mxu0 %v11768_v36  ;;  %v6882_v54 = vadd.f32 %v14896_v42, %v15988_v56  ;;  %v11769_v51 = vld [vmem:[%s12127_s7 + $0x2a8] ss:$28 sps:$4 sm:$0xff]   ;;  %v15989_v42 = vld [vmem:[#allocation18_spill] sm:$0xff] }
 0x516   : > { %v9825_v49 = vpack.c.bf16 %v7065_v45, %v7063_v55  ;;  %7486 = vmatprep.mubr.bf16.mxu1 %v11767_v50  ;;  %v15094_v23 = vpop.f32.mrf.mxu0  ;;  %v7069_v13 = vadd.f32 %v7068_v47, %v14879_v5  ;;  %v6888_v25 = vadd.f32 %v14913_v52, %v15989_v42  ;;  %v11772_v50 = vld [vmem:[%s12127_s7 + $0x12c] ss:$28 sps:$4 sm:$0xff]   ;;  %v11775_v42 = vld [vmem:[%s12127_s7 + $0x31c] ss:$28 sps:$4 sm:$0xff]  }
 0x517   : > { %v7070_v9 = vpop.f32.mrf.mxu1 }
 0x518   : > { %8765 = vst [vmem:[%s12616_s20 + $0xcc] sm:$0xff] %v9825_v49  ;;  %v7071_v22 = vadd.f32 %v7070_v9, %v6878_v10  ;;  %v6959_v29 = vpop.f32.mrf.mxu0  ;;  %v11771_v49 = vld [vmem:[%s12127_s7 + $0x2e4] ss:$28 sps:$4 sm:$0xff]  }
 0x519   : > { %v7072_v20 = vpop.f32.mrf.mxu1  ;;  %v15101_v24 = vadd.f32 %v6959_v29, %v14891_v63  ;;  %v15990_v29 = vld [vmem:[#allocation19_spill] sm:$0xff] }
 0x51a   : > { %v9830_v60 = vpack.c.bf16 %v7071_v22, %v7069_v13  ;;  %v15103_v0 = vpop.f32.mrf.mxu0  ;;  %v7073_v45 = vadd.f32 %v7072_v20, %v14894_v1 }
 0x51b   : > { %v7074_v55 = vpop.f32.mrf.mxu1 }
 0x51c   : > { %8770 = vst [vmem:[%s12616_s20 + $0xf0] sm:$0xff] %v9830_v60  ;;  %v7075_v5 = vadd.f32 %v7074_v55, %v6882_v54  ;;  %v6965_v14 = vpop.f32.mrf.mxu0  ;;  %7584 = vmatmul.mubr.bf16.gmra.mxu0 %v11770_v3 }
 0x51d   : > { %v7078_v47 = vpop.f32.mrf.mxu1  ;;  %7487 = vmatmul.mubr.bf16.gmra.mxu1 %v11769_v51  ;;  %v15112_v10 = vadd.f32 %v6965_v14, %v14906_v59  ;;  %7591 = vmatprep.mubr.bf16.mxu0 %v11772_v50  ;;  %v6892_v59 = vadd.f32 %v14926_v12, %v15990_v29  ;;  %v11773_v14 = vld [vmem:[%s12127_s7 + $0x2e0] ss:$28 sps:$4 sm:$0xff]   ;;  %v15991_v12 = vld [vmem:[#allocation20_spill] sm:$0xff] }
 0x51e   : > { %v9835_v63 = vpack.c.bf16 %v7075_v5, %v7073_v45  ;;  %7494 = vmatprep.mubr.bf16.mxu1 %v11771_v49  ;;  %v15116_v1 = vpop.f32.mrf.mxu0  ;;  %v7079_v9 = vadd.f32 %v7078_v47, %v14909_v57  ;;  %v11774_v47 = vld [vmem:[%s12127_s7 + $0x128] ss:$28 sps:$4 sm:$0xff]   ;;  %v6898_v51 = vadd.f32 %v14943_v61, %v15991_v12 }
 0x51f   : > { %v7080_v36 = vpop.f32.mrf.mxu1 }
 0x520   : > { %8775 = vst [vmem:[%s12616_s20 + $0x114] sm:$0xff] %v9835_v63  ;;  %v7081_v13 = vadd.f32 %v7080_v36, %v6888_v25  ;;  %v6969_v22 = vpop.f32.mrf.mxu0  ;;  %v11776_v25 = vld [vmem:[%s12127_s7 + $0x164] ss:$28 sps:$4 sm:$0xff]  }
 0x521   : > { %v7082_v52 = vpop.f32.mrf.mxu1  ;;  %v15123_v56 = vadd.f32 %v6969_v22, %v14921_v41 }
 0x522   : > { %v9840_v20 = vpack.c.bf16 %v7081_v13, %v7079_v9  ;;  %v15125_v54 = vpop.f32.mrf.mxu0  ;;  %v7083_v55 = vadd.f32 %v7082_v52, %v14924_v32  ;;  %v15992_v9 = vld [vmem:[#allocation21_spill] sm:$0xff] }
 0x523   : > { %v7084_v60 = vpop.f32.mrf.mxu1 }
 0x524   : > { %8780 = vst [vmem:[%s12616_s20 + $0x138] sm:$0xff] %v9840_v20  ;;  %v7085_v57 = vadd.f32 %v7084_v60, %v6892_v59  ;;  %v6975_v45 = vpop.f32.mrf.mxu0  ;;  %7592 = vmatmul.mubr.bf16.gmra.mxu0 %v11774_v47  ;;  %v11780_v47 = vld [vmem:[%s12127_s7 + $0x19c] ss:$28 sps:$4 sm:$0xff]  }
 0x525   : > { %v7088_v5 = vpop.f32.mrf.mxu1  ;;  %7495 = vmatmul.mubr.bf16.gmra.mxu1 %v11773_v14  ;;  %v15134_v3 = vadd.f32 %v6975_v45, %v14936_v31  ;;  %7599 = vmatprep.mubr.bf16.mxu0 %v11776_v25  ;;  %v6902_v31 = vadd.f32 %v14956_v62, %v15992_v9  ;;  %v15993_v62 = vld [vmem:[#allocation22_spill] sm:$0xff]  ;;  %v11779_v14 = vld [vmem:[%s12127_s7 + $0x354] ss:$28 sps:$4 sm:$0xff]   ;;  %v15994_v25 = vld [vmem:[#allocation23_spill] sm:$0xff] }
 0x526   : > { %v9845_v41 = vpack.c.bf16 %v7085_v57, %v7083_v55  ;;  %7502 = vmatprep.mubr.bf16.mxu1 %v11775_v42  ;;  %v15138_v32 = vpop.f32.mrf.mxu0  ;;  %v7089_v49 = vadd.f32 %v7088_v5, %v14939_v16  ;;  %v11777_v55 = vld [vmem:[%s12127_s7 + $0x318] ss:$28 sps:$4 sm:$0xff]   ;;  %v11778_v57 = vld [vmem:[%s12127_s7 + $0x160] ss:$28 sps:$4 sm:$0xff]   ;;  %v6908_v45 = vadd.f32 %v14973_v44, %v15993_v62 }
 0x527   : > { %v7090_v63 = vpop.f32.mrf.mxu1 }
 0x528   : > { %8785 = vst [vmem:[%s12616_s20 + $0x15c] sm:$0xff] %v9845_v41  ;;  %v7091_v50 = vadd.f32 %v7090_v63, %v6898_v51  ;;  %v6979_v36 = vpop.f32.mrf.mxu0 }
 0x529   : > { %v7092_v61 = vpop.f32.mrf.mxu1  ;;  %v15145_v22 = vadd.f32 %v6979_v36, %v14951_v28 }
 0x52a   : > { %v9850_v13 = vpack.c.bf16 %v7091_v50, %v7089_v49  ;;  %v15147_v52 = vpop.f32.mrf.mxu0  ;;  %v7093_v59 = vadd.f32 %v7092_v61, %v14954_v37 }
 0x52b   : > { %v7094_v29 = vpop.f32.mrf.mxu1 }
 0x52c   : > { %8790 = vst [vmem:[%s12616_s20 + $0x180] sm:$0xff] %v9850_v13  ;;  %v7095_v16 = vadd.f32 %v7094_v29, %v6902_v31  ;;  %v6985_v20 = vpop.f32.mrf.mxu0  ;;  %7600 = vmatmul.mubr.bf16.gmra.mxu0 %v11778_v57  ;;  %v11781_v13 = vld [vmem:[%s12127_s7 + $0x350] ss:$28 sps:$4 sm:$0xff]   ;;  %v11782_v29 = vld [vmem:[%s12127_s7 + $0x198] ss:$28 sps:$4 sm:$0xff]  }
 0x52d   : > { %v7098_v60 = vpop.f32.mrf.mxu1  ;;  %7503 = vmatmul.mubr.bf16.gmra.mxu1 %v11777_v55  ;;  %v15156_v5 = vadd.f32 %v6985_v20, %v14966_v58  ;;  %7607 = vmatprep.mubr.bf16.mxu0 %v11780_v47  ;;  %v6912_v58 = vadd.f32 %v14986_v8, %v15994_v25  ;;  %v15995_v8 = vld [vmem:[#allocation24_spill] sm:$0xff] }
 0x52e   : > { %v9855_v28 = vpack.c.bf16 %v7095_v16, %v7093_v59  ;;  %7510 = vmatprep.mubr.bf16.mxu1 %v11779_v14  ;;  %v15160_v37 = vpop.f32.mrf.mxu0  ;;  %v7099_v51 = vadd.f32 %v7098_v60, %v14969_v7  ;;  %v6918_v59 = vadd.f32 %v15003_v39, %v15995_v8  ;;  %v11783_v20 = vld [vmem:[%s12127_s7 + $0x1d4] ss:$28 sps:$4 sm:$0xff]  }
 0x52f   : > { %v7100_v12 = vpop.f32.mrf.mxu1  ;;  %v11784_v60 = vld [vmem:[%s12127_s7 + $0x18] ss:$28 sps:$4 sm:$0xff]   ;;  %v11785_v25 = vld [vmem:[%s12127_s7 + $0x1d0] ss:$28 sps:$4 sm:$0xff]  }
 0x530   : > { %8795 = vst [vmem:[%s12616_s20 + $0x1a4] sm:$0xff] %v9855_v28  ;;  %v7101_v41 = vadd.f32 %v7100_v12, %v6908_v45  ;;  %v6989_v42 = vpop.f32.mrf.mxu0  ;;  %v15996_v28 = vld [vmem:[#allocation25_spill] sm:$0xff] }
 0x531   : > { %v7102_v44 = vpop.f32.mrf.mxu1  ;;  %v15167_v49 = vadd.f32 %v6989_v42, %v14981_v2 }
 0x532   : > { %v9860_v63 = vpack.c.bf16 %v7101_v41, %v7099_v51  ;;  %v15169_v50 = vpop.f32.mrf.mxu0  ;;  %v7103_v61 = vadd.f32 %v7102_v44, %v14984_v17 }
 0x533   : > { %v7104_v36 = vpop.f32.mrf.mxu1 }
 0x534   : > { %8800 = vst [vmem:[%s12616_s20 + $0x1c8] sm:$0xff] %v9860_v63  ;;  %v7105_v7 = vadd.f32 %v7104_v36, %v6912_v58  ;;  %v6995_v9 = vpop.f32.mrf.mxu0  ;;  %7608 = vmatmul.mubr.bf16.gmra.mxu0 %v11782_v29  ;;  %v11786_v58 = vld [vmem:[%s12127_s7 + $0x50] ss:$28 sps:$4 sm:$0xff]  }
 0x535   : > { %v7108_v31 = vpop.f32.mrf.mxu1  ;;  %7511 = vmatmul.mubr.bf16.gmra.mxu1 %v11781_v13  ;;  %v15178_v16 = vadd.f32 %v6995_v9, %v14996_v15  ;;  %7615 = vmatprep.mubr.bf16.mxu0 %v11783_v20  ;;  %v6922_v15 = vadd.f32 %v15016_v40, %v15996_v28  ;;  %v15997_v40 = vld [vmem:[#allocation26_spill] sm:$0xff]  ;;  %v11787_v36 = vld [vmem:[%s12127_s7 + $0x20c] ss:$28 sps:$4 sm:$0xff]  }
 0x536   : > { %v9865_v2 = vpack.c.bf16 %v7105_v7, %v7103_v61  ;;  %10333 = vmatprep.mubr.bf16.mxu1 %v11784_v60  ;;  %v15182_v17 = vpop.f32.mrf.mxu0  ;;  %v7109_v57 = vadd.f32 %v7108_v31, %v14999_v46  ;;  %v6928_v63 = vadd.f32 %v15029_v48, %v15997_v40  ;;  %v11788_v61 = vld [vmem:[%s12127_s7 + $0x88] ss:$28 sps:$4 sm:$0xff]   ;;  %v11790_v28 = vld [vmem:[%s12127_s7 + $0xc0] ss:$28 sps:$4 sm:$0xff]  }
 0x537   : > { %v7110_v55 = vpop.f32.mrf.mxu1 }
 0x538   : > { %8805 = vst [vmem:[%s12616_s20 + $0x1ec] sm:$0xff] %v9865_v2  ;;  %v7111_v62 = vadd.f32 %v7110_v55, %v6918_v59  ;;  %v6999_v45 = vpop.f32.mrf.mxu0  ;;  %v15998_v59 = vld [vmem:[#allocation28_spill] sm:$0xff] }
 0x539   : > { %v7112_v39 = vpop.f32.mrf.mxu1  ;;  %v15189_v47 = vadd.f32 %v6999_v45, %v15011_v11  ;;  %v6932_v48 = vadd.f32 %v15037_v19, %v15998_v59  ;;  %v16001_v59 = vld [vmem:[#allocation33_spill] sm:$0xff] }
 0x53a   : > { %v9870_v14 = vpack.c.bf16 %v7111_v62, %v7109_v57  ;;  %v15191_v12 = vpop.f32.mrf.mxu0  ;;  %v7113_v41 = vadd.f32 %v7112_v39, %v15014_v6  ;;  %v11789_v39 = vld [vmem:[%s12127_s7 + $0x208] ss:$28 sps:$4 sm:$0xff]  }
 0x53b   : > { %v7114_v51 = vpop.f32.mrf.mxu1 }
 0x53c   : > { %8810 = vst [vmem:[%s12616_s20 + $0x210] sm:$0xff] %v9870_v14  ;;  %v7115_v46 = vadd.f32 %v7114_v51, %v6922_v15  ;;  %v9973_v44 = vpop.f32.mrf.mxu0  ;;  %7616 = vmatmul.mubr.bf16.gmra.mxu0 %v11785_v25  ;;  %v15999_v15 = vld [vmem:[#allocation29_spill] sm:$0xff]  ;;  %v11791_v51 = vld [vmem:[%s12127_s7 + $0x244] ss:$28 sps:$4 sm:$0xff]  }
 0x53d   : > { %v7118_v42 = vpop.f32.mrf.mxu1  ;;  %10334 = vmatmul.mubr.bf16.vlgmr.msra.gmra.mxu1 %v11786_v58  ;;  %7623 = vmatprep.mubr.bf16.mxu0 %v11787_v36  ;;  %v6938_v19 = vadd.f32 %v15050_v30, %v15999_v15 }
 0x53e   : > { %v9875_v11 = vpack.c.bf16 %v7115_v46, %v7113_v41  ;;  %10337 = vmatprep.mubr.bf16.mxu1 %v11788_v61  ;;  %v9974_v9 = vpop.f32.mrf.mxu0  ;;  %v7119_v6 = vadd.f32 %v7118_v42, %v15025_v43  ;;  %v11792_v41 = vld [vmem:[%s12127_s7 + $0xf8] ss:$28 sps:$4 sm:$0xff]  }
 0x53f   : > { %v7120_v7 = vpop.f32.mrf.mxu1  ;;  %v15203_v13 = vadd.f32 %v9974_v9, %v9973_v44 }
 0x540   : > { %8815 = vst [vmem:[%s12616_s20 + $0x234] sm:$0xff] %v9875_v11  ;;  %v7121_v31 = vadd.f32 %v7120_v7, %v6928_v63  ;;  %v9976_v8 = vpop.f32.mrf.mxu0  ;;  %v16000_v63 = vld [vmem:[#allocation30_spill] sm:$0xff] }
 0x541   : > { %v7122_v29 = vpop.f32.mrf.mxu1  ;;  %v6942_v30 = vadd.f32 %v15059_v35, %v16000_v63  ;;  %v6948_v35 = vadd.f32 %v15072_v38, %v16001_v59  ;;  %v6952_v38 = vadd.f32 %v15081_v18, %v14870_v34 }
 0x542   : > { %v9880_v2 = vpack.c.bf16 %v7121_v31, %v7119_v6  ;;  %v9977_v60 = vpop.f32.mrf.mxu0  ;;  %v7123_v55 = vadd.f32 %v7122_v29, %v15035_v4  ;;  %v11793_v29 = vld [vmem:[%s12127_s7 + $0x240] ss:$28 sps:$4 sm:$0xff]  }
 0x543   : > { %v7124_v20 = vpop.f32.mrf.mxu1  ;;  %v15209_v43 = vadd.f32 %v9977_v60, %v9976_v8  ;;  %v11794_v8 = vld [vmem:[%s12127_s7 + $0x130] ss:$28 sps:$4 sm:$0xff]  }
 0x544   : > { %8820 = vst [vmem:[%s12616_s20 + $0x258] sm:$0xff] %v9880_v2  ;;  %v7125_v57 = vadd.f32 %v7124_v20, %v6932_v48  ;;  %v9979_v45 = vpop.f32.mrf.mxu0  ;;  %7624 = vmatmul.mubr.bf16.gmra.mxu0 %v11789_v39  ;;  %v11795_v2 = vld [vmem:[%s12127_s7 + $0x27c] ss:$28 sps:$4 sm:$0xff]   ;;  %v11796_v20 = vld [vmem:[%s12127_s7 + $0x168] ss:$28 sps:$4 sm:$0xff]  }
 0x545   : > { %v7128_v62 = vpop.f32.mrf.mxu1  ;;  %10338 = vmatmul.mubr.bf16.gmra.mxu1 %v11790_v28  ;;  %7631 = vmatprep.mubr.bf16.mxu0 %v11791_v51 }
 0x546   : > { %v9885_v14 = vpack.c.bf16 %v7125_v57, %v7123_v55  ;;  %10341 = vmatprep.mubr.bf16.mxu1 %v11792_v41  ;;  %v9980_v46 = vpop.f32.mrf.mxu0  ;;  %v7129_v42 = vadd.f32 %v7128_v62, %v15046_v53 }
 0x547   : > { %v7130_v4 = vpop.f32.mrf.mxu1  ;;  %v15219_v25 = vadd.f32 %v9980_v46, %v9979_v45  ;;  %v11797_v46 = vld [vmem:[%s12127_s7 + $0x278] ss:$28 sps:$4 sm:$0xff]  }
 0x548   : > { %8825 = vst [vmem:[%s12616_s20 + $0x27c] sm:$0xff] %v9885_v14  ;;  %v7131_v44 = vadd.f32 %v7130_v4, %v6938_v19  ;;  %v9982_v40 = vpop.f32.mrf.mxu0 }
 0x549   : > { %v7132_v58 = vpop.f32.mrf.mxu1 }
 0x54a   : > { %v9890_v11 = vpack.c.bf16 %v7131_v44, %v7129_v42  ;;  %v9983_v61 = vpop.f32.mrf.mxu0  ;;  %v7133_v7 = vadd.f32 %v7132_v58, %v15057_v33  ;;  %v11798_v42 = vld [vmem:[%s12127_s7 + $0x1a0] ss:$28 sps:$4 sm:$0xff]   ;;  %v11799_v58 = vld [vmem:[%s12127_s7 + $0x2b4] ss:$28 sps:$4 sm:$0xff]  }
 0x54b   : > { %v7134_v36 = vpop.f32.mrf.mxu1  ;;  %v15225_v53 = vadd.f32 %v9983_v61, %v9982_v40  ;;  %v16002_v44 = vld [vmem:[#allocation34_spill] sm:$0xff] }
 0x54c   : > { %8830 = vst [vmem:[%s12616_s20 + $0x2a0] sm:$0xff] %v9890_v11  ;;  %v7135_v9 = vadd.f32 %v7134_v36, %v6942_v30  ;;  %v9985_v31 = vpop.f32.mrf.mxu0  ;;  %7632 = vmatmul.mubr.bf16.gmra.mxu0 %v11793_v29  ;;  %v6958_v34 = vadd.f32 %v15094_v23, %v16002_v44  ;;  %v11800_v40 = vld [vmem:[%s12127_s7 + $0x1d8] ss:$28 sps:$4 sm:$0xff]  }
 0x54d   : > { %v7138_v6 = vpop.f32.mrf.mxu1  ;;  %10342 = vmatmul.mubr.bf16.gmra.mxu1 %v11794_v8  ;;  %7639 = vmatprep.mubr.bf16.mxu0 %v11795_v2  ;;  %v11801_v2 = vld [vmem:[%s12127_s7 + $0x2b0] ss:$28 sps:$4 sm:$0xff]  }
 0x54e   : > { %v9895_v48 = vpack.c.bf16 %v7135_v9, %v7133_v7  ;;  %10345 = vmatprep.mubr.bf16.mxu1 %v11796_v20  ;;  %v9986_v60 = vpop.f32.mrf.mxu0  ;;  %v7139_v55 = vadd.f32 %v7138_v6, %v15068_v21  ;;  %v16003_v9 = vld [vmem:[#allocation35_spill] sm:$0xff]  ;;  %v11802_v20 = vld [vmem:[%s12127_s7 + $0x210] ss:$28 sps:$4 sm:$0xff]  }
 0x54f   : > { %v7140_v33 = vpop.f32.mrf.mxu1  ;;  %v15235_v62 = vadd.f32 %v9986_v60, %v9985_v31  ;;  %v6962_v23 = vadd.f32 %v15103_v0, %v16003_v9 }
 0x550   : > { %8835 = vst [vmem:[%s12616_s20 + $0x2c4] sm:$0xff] %v9895_v48  ;;  %v7141_v57 = vadd.f32 %v7140_v33, %v6948_v35  ;;  %v9988_v39 = vpop.f32.mrf.mxu0  ;;  %v16004_v33 = vld [vmem:[#allocation36_spill] sm:$0xff] }
 0x551   : > { %v7142_v45 = vpop.f32.mrf.mxu1  ;;  %v6968_v0 = vadd.f32 %v15116_v1, %v16004_v33  ;;  %v11809_v33 = vld [vmem:[%s12127_s7 + $0x320] ss:$28 sps:$4 sm:$0xff]  }
 0x552   : > { %v9900_v28 = vpack.c.bf16 %v7141_v57, %v7139_v55  ;;  %v9989_v19 = vpop.f32.mrf.mxu0  ;;  %v7143_v14 = vadd.f32 %v7142_v45, %v15079_v27  ;;  %v11803_v55 = vld [vmem:[%s12127_s7 + $0x2ec] ss:$28 sps:$4 sm:$0xff]  }
 0x553   : > { %v7144_v15 = vpop.f32.mrf.mxu1  ;;  %v15241_v21 = vadd.f32 %v9989_v19, %v9988_v39  ;;  %v11804_v57 = vld [vmem:[%s12127_s7 + $0x248] ss:$28 sps:$4 sm:$0xff]  }
 0x554   : > { %8840 = vst [vmem:[%s12616_s20 + $0x2e8] sm:$0xff] %v9900_v28  ;;  %v7145_v51 = vadd.f32 %v7144_v15, %v6952_v38  ;;  %v9991_v4 = vpop.f32.mrf.mxu0  ;;  %7640 = vmatmul.mubr.bf16.gmra.mxu0 %v11797_v46 }
 0x555   : > { %v7148_v41 = vpop.f32.mrf.mxu1  ;;  %10346 = vmatmul.mubr.bf16.gmra.mxu1 %v11798_v42  ;;  %7647 = vmatprep.mubr.bf16.mxu0 %v11799_v58  ;;  %v11806_v58 = vld [vmem:[%s12127_s7 + $0x280] ss:$28 sps:$4 sm:$0xff]  }
 0x556   : > { %v9905_v18 = vpack.c.bf16 %v7145_v51, %v7143_v14  ;;  %10349 = vmatprep.mubr.bf16.mxu1 %v11800_v40  ;;  %v9992_v63 = vpop.f32.mrf.mxu0  ;;  %v7149_v30 = vadd.f32 %v7148_v41, %v15090_v26  ;;  %v16005_v14 = vld [vmem:[#allocation37_spill] sm:$0xff]  ;;  %v16006_v40 = vld [vmem:[#allocation38_spill] sm:$0xff] }
 0x557   : > { %v7150_v27 = vpop.f32.mrf.mxu1  ;;  %v15251_v36 = vadd.f32 %v9992_v63, %v9991_v4  ;;  %v6972_v1 = vadd.f32 %v15125_v54, %v16005_v14  ;;  %v6978_v54 = vadd.f32 %v15138_v32, %v16006_v40  ;;  %v11807_v63 = vld [vmem:[%s12127_s7 + $0x324] ss:$28 sps:$4 sm:$0xff]  }
 0x558   : > { %8845 = vst [vmem:[%s12616_s20 + $0x30c] sm:$0xff] %v9905_v18  ;;  %v7151_v11 = vadd.f32 %v7150_v27, %v6958_v34  ;;  %v9994_v7 = vpop.f32.mrf.mxu0  ;;  %v11805_v18 = vld [vmem:[%s12127_s7 + $0x2e8] ss:$28 sps:$4 sm:$0xff]   ;;  %v16010_v40 = vld [vmem:[#allocation42_spill] sm:$0xff] }
 0x559   : > { %v7152_v61 = vpop.f32.mrf.mxu1 }
 0x55a   : > { %v9910_v6 = vpack.c.bf16 %v7151_v11, %v7149_v30  ;;  %v9995_v29 = vpop.f32.mrf.mxu0  ;;  %v7153_v8 = vadd.f32 %v7152_v61, %v15101_v24  ;;  %v11808_v30 = vld [vmem:[%s12127_s7 + $0x2b8] ss:$28 sps:$4 sm:$0xff]  }
 0x55b   : > { %v7154_v31 = vpop.f32.mrf.mxu1  ;;  %v15257_v26 = vadd.f32 %v9995_v29, %v9994_v7 }
 0x55c   : > { %8850 = vst [vmem:[%s12616_s20 + $0x330] sm:$0xff] %v9910_v6  ;;  %v7155_v59 = vadd.f32 %v7154_v31, %v6962_v23  ;;  %v9997_v48 = vpop.f32.mrf.mxu0  ;;  %7648 = vmatmul.mubr.bf16.gmra.mxu0 %v11801_v2  ;;  %v16007_v31 = vld [vmem:[#allocation39_spill] sm:$0xff] }
 0x55d   : > { %v7158_v35 = vpop.f32.mrf.mxu1  ;;  %10350 = vmatmul.mubr.bf16.gmra.mxu1 %v11802_v20  ;;  %7655 = vmatprep.mubr.bf16.mxu0 %v11803_v55  ;;  %v6982_v32 = vadd.f32 %v15147_v52, %v16007_v31 }
 0x55e   : > { %v9915_v60 = vpack.c.bf16 %v7155_v59, %v7153_v8  ;;  %10353 = vmatprep.mubr.bf16.mxu1 %v11804_v57  ;;  %v9998_v45 = vpop.f32.mrf.mxu0  ;;  %v7159_v39 = vadd.f32 %v7158_v35, %v15112_v10  ;;  %v11811_v57 = vld [vmem:[%s12127_s7 + $0x35c] ss:$28 sps:$4 sm:$0xff]  }
 0x55f   : > { %v7160_v24 = vpop.f32.mrf.mxu1  ;;  %v15267_v28 = vadd.f32 %v9998_v45, %v9997_v48 }
 0x560   : > { %8855 = vst [vmem:[%s12616_s20 + $0x354] sm:$0xff] %v9915_v60  ;;  %v7161_v38 = vadd.f32 %v7160_v24, %v6968_v0  ;;  %v10000_v19 = vpop.f32.mrf.mxu0  ;;  %v11810_v0 = vld [vmem:[%s12127_s7 + $0x2f0] ss:$28 sps:$4 sm:$0xff]   ;;  %v11812_v24 = vld [vmem:[%s12127_s7 + $0x328] ss:$28 sps:$4 sm:$0xff]  }
 0x561   : > { %v7162_v15 = vpop.f32.mrf.mxu1  ;;  %v16008_v60 = vld [vmem:[#allocation40_spill] sm:$0xff] }
 0x562   : > { %v9920_v51 = vpack.c.bf16 %v7161_v38, %v7159_v39  ;;  %v10001_v4 = vpop.f32.mrf.mxu0  ;;  %v7163_v46 = vadd.f32 %v7162_v15, %v15123_v56  ;;  %v6988_v52 = vadd.f32 %v15160_v37, %v16008_v60 }
 0x563   : > { %v7164_v41 = vpop.f32.mrf.mxu1  ;;  %v15273_v10 = vadd.f32 %v10001_v4, %v10000_v19 }
 0x564   : > { %8860 = vst [vmem:[%s12616_s20 + $0x378] sm:$0xff] %v9920_v51  ;;  %v7165_v42 = vadd.f32 %v7164_v41, %v6972_v1  ;;  %v10003_v34 = vpop.f32.mrf.mxu0  ;;  %7656 = vmatmul.mubr.bf16.gmra.mxu0 %v11805_v18  ;;  %v16009_v1 = vld [vmem:[#allocation41_spill] sm:$0xff] }
 0x565   : > { %v7168_v44 = vpop.f32.mrf.mxu1  ;;  %10354 = vmatmul.mubr.bf16.gmra.mxu1 %v11806_v58  ;;  %7663 = vmatprep.mubr.bf16.mxu0 %v11807_v63  ;;  %v6992_v37 = vadd.f32 %v15169_v50, %v16009_v1  ;;  %v11813_v18 = vld [vmem:[%s12127_s7 + $0x358] ss:$28 sps:$4 sm:$0xff]   ;;  %v11814_v58 = vld [vmem:[%s12127_s7 + $0x360] ss:$28 sps:$4 sm:$0xff]   ;;  %v6998_v50 = vadd.f32 %v15182_v17, %v16010_v40 }
 0x566   : > { %v9925_v27 = vpack.c.bf16 %v7165_v42, %v7163_v46  ;;  %10357 = vmatprep.mubr.bf16.mxu1 %v11808_v30  ;;  %v10004_v11 = vpop.f32.mrf.mxu0  ;;  %v7169_v61 = vadd.f32 %v7168_v44, %v15134_v3 }
 0x567   : > { %v7170_v56 = vpop.f32.mrf.mxu1  ;;  %v15283_v9 = vadd.f32 %v10004_v11, %v10003_v34 }
 0x568   : > { %8865 = vst [vmem:[%s12616_s20 + $0x39c] sm:$0xff] %v9925_v27  ;;  %v7171_v7 = vadd.f32 %v7170_v56, %v6978_v54  ;;  %v10006_v6 = vpop.f32.mrf.mxu0 }
 0x569   : > { %v7172_v23 = vpop.f32.mrf.mxu1 }
 0x56a   : > { %v9930_v29 = vpack.c.bf16 %v7171_v7, %v7169_v61  ;;  %v10007_v59 = vpop.f32.mrf.mxu0  ;;  %v7173_v35 = vadd.f32 %v7172_v23, %v15145_v22  ;;  %v16011_v7 = vld [vmem:[#allocation12_spill] sm:$0xff] }
 0x56b   : > { %v7174_v8 = vpop.f32.mrf.mxu1  ;;  %v15289_v3 = vadd.f32 %v10007_v59, %v10006_v6  ;;  %v7002_v23 = vadd.f32 %v15191_v12, %v16011_v7  ;;  %v15321_v59 = vld [vmem:[#allocation7 + $0x8] ss:$0 sm:$0xff] }
 0x56c   : > { %8870 = vst [vmem:[%s12616_s20 + $0x3c0] sm:$0xff] %v9930_v29  ;;  %v7175_v48 = vadd.f32 %v7174_v8, %v6982_v32  ;;  %v10009_v20 = vpop.f32.mrf.mxu0  ;;  %7664 = vmatmul.mubr.bf16.gmra.mxu0 %v11809_v33  ;;  %v7232_v33 = vadd.f32 %v15203_v13, %v15321_v59  ;;  %v7240_v1 = vadd.f32 %v15219_v25, %v15321_v59 }
 0x56d   : > { %v7178_v2 = vpop.f32.mrf.mxu1  ;;  %10358 = vmatmul.mubr.bf16.gmra.mxu1 %v11810_v0  ;;  %7671 = vmatprep.mubr.bf16.mxu0 %v11811_v57 }
 0x56e   : > { %v9935_v55 = vpack.c.bf16 %v7175_v48, %v7173_v35  ;;  %10361 = vmatprep.mubr.bf16.mxu1 %v11812_v24  ;;  %v10010_v45 = vpop.f32.mrf.mxu0  ;;  %v7179_v39 = vadd.f32 %v7178_v2, %v15156_v5  ;;  %v7235_v24 = vadd.f32 %v15209_v43, %v15321_v59 }
 0x56f   : > { %v7180_v22 = vpop.f32.mrf.mxu1  ;;  %v15299_v15 = vadd.f32 %v10010_v45, %v10009_v20 }
 0x570   : > { %8875 = vst [vmem:[%s12616_s20 + $0x3e4] sm:$0xff] %v9935_v55  ;;  %v7181_v38 = vadd.f32 %v7180_v22, %v6988_v52  ;;  %v10012_v14 = vpop.f32.mrf.mxu0 }
 0x571   : > { %v7182_v19 = vpop.f32.mrf.mxu1 }
 0x572   : > { %v9940_v51 = vpack.c.bf16 %v7181_v38, %v7179_v39  ;;  %v10013_v4 = vpop.f32.mrf.mxu0  ;;  %v7183_v46 = vadd.f32 %v7182_v19, %v15167_v49 }
 0x573   : > { %v7184_v41 = vpop.f32.mrf.mxu1  ;;  %v15305_v44 = vadd.f32 %v10013_v4, %v10012_v14 }
 0x574   : > { %8880 = vst [vmem:[%s12616_s20 + $0x408] sm:$0xff] %v9940_v51  ;;  %v7185_v42 = vadd.f32 %v7184_v41, %v6992_v37  ;;  %v10015_v34 = vpop.f32.mrf.mxu0  ;;  %7672 = vmatmul.mubr.bf16.gmra.mxu0 %v11813_v18 }
 0x575   : > { %v7188_v5 = vpop.f32.mrf.mxu1  ;;  %10362 = vmatmul.mubr.bf16.gmra.mxu1 %v11814_v58 }
 0x576   : > { %v9945_v54 = vpack.c.bf16 %v7185_v42, %v7183_v46  ;;  %v10016_v63 = vpop.f32.mrf.mxu0  ;;  %v7189_v30 = vadd.f32 %v7188_v5, %v15178_v16  ;;  %v7243_v5 = vadd.f32 %v15225_v53, %v15321_v59 }
 0x577   : > { %v7190_v27 = vpop.f32.mrf.mxu1  ;;  %v15313_v56 = vadd.f32 %v10016_v63, %v10015_v34 }
 0x578   : > { %8885 = vst [vmem:[%s12616_s20 + $0x42c] sm:$0xff] %v9945_v54  ;;  %v7191_v49 = vadd.f32 %v7190_v27, %v6998_v50  ;;  %v10018_v61 = vpop.f32.mrf.mxu0  ;;  %v7248_v27 = vadd.f32 %v15235_v62, %v15321_v59 }
 0x579   : > { %v7192_v11 = vpop.f32.mrf.mxu1 }
 0x57a   : > { %v9950_v6 = vpack.c.bf16 %v7191_v49, %v7189_v30  ;;  %v10019_v32 = vpop.f32.mrf.mxu0  ;;  %v7193_v17 = vadd.f32 %v7192_v11, %v15189_v47 }
 0x57b   : > { %v7194_v31 = vpop.f32.mrf.mxu1  ;;  %v15319_v8 = vadd.f32 %v10019_v32, %v10018_v61 }
 0x57c   : > { %8890 = vst [vmem:[%s12616_s20 + $0x450] sm:$0xff] %v9950_v6  ;;  %v7195_v29 = vadd.f32 %v7194_v31, %v7002_v23  ;;  %v10021_v16 = vpop.f32.mrf.mxu0  ;;  %v7251_v23 = vadd.f32 %v15241_v21, %v15321_v59 }
 0x57d   : > { %v10085_v35 = vpop.f32.mrf.mxu1 }
 0x57e   : > { %v9955_v48 = vpack.c.bf16 %v7195_v29, %v7193_v17  ;;  %v10022_v2 = vpop.f32.mrf.mxu0 }
 0x57f   : > { %v10086_v20 = vpop.f32.mrf.mxu1  ;;  %v15326_v12 = vadd.f32 %v10022_v2, %v10021_v16 }
 0x580   : > { %8895 = vst [vmem:[%s12616_s20 + $0x474] sm:$0xff] %v9955_v48  ;;  %v10087_v0 = vadd.f32 %v10086_v20, %v10085_v35  ;;  %v10024_v60 = vpop.f32.mrf.mxu0  ;;  %v7256_v35 = vadd.f32 %v15251_v36, %v15321_v59 }
 0x581   : > { %v10088_v52 = vpop.f32.mrf.mxu1 }
 0x582   : > { %v15328_v47 = vadd.f32 %v10087_v0, %v7232_v33  ;;  %v10025_v55 = vpop.f32.mrf.mxu0 }
 0x583   : > { %v10089_v57 = vpop.f32.mrf.mxu1  ;;  %v15332_v22 = vadd.f32 %v10025_v55, %v10024_v60 }
 0x584   : > { %v10090_v45 = vadd.f32 %v10089_v57, %v10088_v52  ;;  %v10027_v39 = vpop.f32.mrf.mxu0  ;;  %v7259_v52 = vadd.f32 %v15257_v26, %v15321_v59 }
 0x585   : > { %v10091_v38 = vpop.f32.mrf.mxu1 }
 0x586   : > { %v15334_v19 = vadd.f32 %v10090_v45, %v7235_v24  ;;  %v10028_v13 = vpop.f32.mrf.mxu0 }
 0x587   : > { %v10092_v14 = vpop.f32.mrf.mxu1  ;;  %v15338_v37 = vadd.f32 %v10028_v13, %v10027_v39  ;;  %v7264_v13 = vadd.f32 %v15267_v28, %v15321_v59 }
 0x588   : > { %v10093_v51 = vadd.f32 %v10092_v14, %v10091_v38  ;;  %v10030_v41 = vpop.f32.mrf.mxu0 }
 0x589   : > { %v10094_v4 = vpop.f32.mrf.mxu1 }
 0x58a   : > { %v15340_v46 = vadd.f32 %v10093_v51, %v7240_v1  ;;  %v10031_v43 = vpop.f32.mrf.mxu0 }
 0x58b   : > { %v10095_v42 = vpop.f32.mrf.mxu1  ;;  %v15344_v34 = vadd.f32 %v10031_v43, %v10030_v41 }
 0x58c   : > { %v10096_v18 = vadd.f32 %v10095_v42, %v10094_v4  ;;  %v10033_v58 = vpop.f32.mrf.mxu0  ;;  %v7267_v42 = vadd.f32 %v15273_v10, %v15321_v59 }
 0x58d   : > { %v10097_v40 = vpop.f32.mrf.mxu1 }
 0x58e   : > { %v15346_v50 = vadd.f32 %v10096_v18, %v7243_v5  ;;  %v10034_v25 = vpop.f32.mrf.mxu0 }
 0x58f   : > { %v10098_v54 = vpop.f32.mrf.mxu1  ;;  %v15350_v63 = vadd.f32 %v10034_v25, %v10033_v58 }
 0x590   : > { %v10099_v30 = vadd.f32 %v10098_v54, %v10097_v40  ;;  %v10036_v49 = vpop.f32.mrf.mxu0 }
 0x591   : > { %v10100_v11 = vpop.f32.mrf.mxu1 }
 0x592   : > { %v15352_v61 = vadd.f32 %v10099_v30, %v7248_v27  ;;  %v10037_v53 = vpop.f32.mrf.mxu0  ;;  %v7272_v27 = vadd.f32 %v15283_v9, %v15321_v59 }
 0x593   : > { %v10101_v7 = vpop.f32.mrf.mxu1  ;;  %v15356_v6 = vadd.f32 %v10037_v53, %v10036_v49 }
 0x594   : > { %v10102_v31 = vadd.f32 %v10101_v7, %v10100_v11  ;;  %v10039_v32 = vpop.f32.mrf.mxu0 }
 0x595   : > { %v10103_v17 = vpop.f32.mrf.mxu1 }
 0x596   : > { %v15358_v29 = vadd.f32 %v10102_v31, %v7251_v23  ;;  %v10040_v62 = vpop.f32.mrf.mxu0  ;;  %v7275_v31 = vadd.f32 %v15289_v3, %v15321_v59 }
 0x597   : > { %v10104_v16 = vpop.f32.mrf.mxu1  ;;  %v15362_v48 = vadd.f32 %v10040_v62, %v10039_v32 }
 0x598   : > { %v10105_v2 = vadd.f32 %v10104_v16, %v10103_v17  ;;  %v10042_v20 = vpop.f32.mrf.mxu0 }
 0x599   : > { %v10106_v33 = vpop.f32.mrf.mxu1 }
 0x59a   : > { %v15364_v0 = vadd.f32 %v10105_v2, %v7256_v35  ;;  %v10043_v21 = vpop.f32.mrf.mxu0 }
 0x59b   : > { %v10107_v60 = vpop.f32.mrf.mxu1  ;;  %v15368_v55 = vadd.f32 %v10043_v21, %v10042_v20  ;;  %v7280_v20 = vadd.f32 %v15299_v15, %v15321_v59 }
 0x59c   : > { %v10108_v57 = vadd.f32 %v10107_v60, %v10106_v33  ;;  %v10045_v24 = vpop.f32.mrf.mxu0 }
 0x59d   : > { %v10109_v45 = vpop.f32.mrf.mxu1 }
 0x59e   : > { %v15370_v39 = vadd.f32 %v10108_v57, %v7259_v52  ;;  %v10046_v36 = vpop.f32.mrf.mxu0 }
 0x59f   : > { %v10110_v38 = vpop.f32.mrf.mxu1  ;;  %v15374_v14 = vadd.f32 %v10046_v36, %v10045_v24 }
 0x5a0   : > { %v10111_v1 = vadd.f32 %v10110_v38, %v10109_v45  ;;  %v10048_v51 = vpop.f32.mrf.mxu0  ;;  %v7283_v45 = vadd.f32 %v15305_v44, %v15321_v59 }
 0x5a1   : > { %v10112_v41 = vpop.f32.mrf.mxu1 }
 0x5a2   : > { %v15376_v4 = vadd.f32 %v10111_v1, %v7264_v13  ;;  %v10049_v26 = vpop.f32.mrf.mxu0 }
 0x5a3   : > { %v10113_v43 = vpop.f32.mrf.mxu1  ;;  %v15380_v5 = vadd.f32 %v10049_v26, %v10048_v51  ;;  %v7288_v26 = vadd.f32 %v15313_v56, %v15321_v59 }
 0x5a4   : > { %v10114_v18 = vadd.f32 %v10113_v43, %v10112_v41  ;;  %v10051_v58 = vpop.f32.mrf.mxu0 }
 0x5a5   : > { %v10115_v40 = vpop.f32.mrf.mxu1 }
 0x5a6   : > { %v15382_v25 = vadd.f32 %v10114_v18, %v7267_v42  ;;  %v10052_v28 = vpop.f32.mrf.mxu0 }
 0x5a7   : > { %v10116_v54 = vpop.f32.mrf.mxu1  ;;  %v15386_v30 = vadd.f32 %v10052_v28, %v10051_v58 }
 0x5a8   : > { %v10117_v49 = vadd.f32 %v10116_v54, %v10115_v40  ;;  %v10054_v11 = vpop.f32.mrf.mxu0  ;;  %v7291_v54 = vadd.f32 %v15319_v8, %v15321_v59 }
 0x5a9   : > { %v10118_v53 = vpop.f32.mrf.mxu1 }
 0x5aa   : > { %v15388_v7 = vadd.f32 %v10117_v49, %v7272_v27  ;;  %v10055_v10 = vpop.f32.mrf.mxu0 }
 0x5ab   : > { %v10119_v23 = vpop.f32.mrf.mxu1  ;;  %v15392_v32 = vadd.f32 %v10055_v10, %v10054_v11 }
 0x5ac   : > { %v10120_v17 = vadd.f32 %v10119_v23, %v10118_v53  ;;  %v10057_v62 = vpop.f32.mrf.mxu0 }
 0x5ad   : > { %v10121_v16 = vpop.f32.mrf.mxu1 }
 0x5ae   : > { %v15394_v35 = vadd.f32 %v10120_v17, %v7275_v31  ;;  %v10058_v9 = vpop.f32.mrf.mxu0  ;;  %v7296_v31 = vadd.f32 %v15326_v12, %v15321_v59 }
 0x5af   : > { %v10122_v2 = vpop.f32.mrf.mxu1  ;;  %v15398_v33 = vadd.f32 %v10058_v9, %v10057_v62 }
 0x5b0   : > { %v10123_v21 = vadd.f32 %v10122_v2, %v10121_v16  ;;  %v10060_v60 = vpop.f32.mrf.mxu0 }
 0x5b1   : > { %v10124_v52 = vpop.f32.mrf.mxu1 }
 0x5b2   : > { %v15400_v57 = vadd.f32 %v10123_v21, %v7280_v20  ;;  %v10061_v3 = vpop.f32.mrf.mxu0  ;;  %v7299_v20 = vadd.f32 %v15332_v22, %v15321_v59 }
 0x5b3   : > { %v10125_v24 = vpop.f32.mrf.mxu1  ;;  %v15404_v36 = vadd.f32 %v10061_v3, %v10060_v60 }
 0x5b4   : > { %v10126_v38 = vadd.f32 %v10125_v24, %v10124_v52  ;;  %v10063_v13 = vpop.f32.mrf.mxu0 }
 0x5b5   : > { %v10127_v1 = vpop.f32.mrf.mxu1 }
 0x5b6   : > { %v15406_v51 = vadd.f32 %v10126_v38, %v7283_v45  ;;  %v10064_v15 = vpop.f32.mrf.mxu0  ;;  %v7304_v45 = vadd.f32 %v15338_v37, %v15321_v59 }
 0x5b7   : > { %v10128_v41 = vpop.f32.mrf.mxu1  ;;  %v15410_v43 = vadd.f32 %v10064_v15, %v10063_v13 }
 0x5b8   : > { %v10129_v42 = vadd.f32 %v10128_v41, %v10127_v1  ;;  %v10066_v18 = vpop.f32.mrf.mxu0 }
 0x5b9   : > { %v10130_v58 = vpop.f32.mrf.mxu1 }
 0x5ba   : > { %v15412_v40 = vadd.f32 %v10129_v42, %v7288_v26  ;;  %v10067_v44 = vpop.f32.mrf.mxu0  ;;  %v7307_v26 = vadd.f32 %v15344_v34, %v15321_v59 }
 0x5bb   : > { %v10131_v28 = vpop.f32.mrf.mxu1  ;;  %v15416_v27 = vadd.f32 %v10067_v44, %v10066_v18 }
 0x5bc   : > { %v10132_v49 = vadd.f32 %v10131_v28, %v10130_v58  ;;  %v15418_v53 = vpop.f32.mrf.mxu0 }
 0x5bd   : > { %v10133_v11 = vpop.f32.mrf.mxu1 }
 0x5be   : > { %v15420_v10 = vadd.f32 %v10132_v49, %v7291_v54  ;;  %v15422_v23 = vpop.f32.mrf.mxu0  ;;  %v7312_v54 = vadd.f32 %v15350_v63, %v15321_v59 }
 0x5bf   : > { %v10134_v56 = vpop.f32.mrf.mxu1 }
 0x5c0   : > { %v10135_v17 = vadd.f32 %v10134_v56, %v10133_v11  ;;  %v15426_v16 = vpop.f32.mrf.mxu0 }
 0x5c1   : > { %v10136_v62 = vpop.f32.mrf.mxu1 }
 0x5c2   : > { %v15428_v9 = vadd.f32 %v10135_v17, %v7296_v31  ;;  %v15430_v2 = vpop.f32.mrf.mxu0 }
 0x5c3   : > { %v10137_v8 = vpop.f32.mrf.mxu1 }
 0x5c4   : > { %v10138_v21 = vadd.f32 %v10137_v8, %v10136_v62  ;;  %v15434_v52 = vpop.f32.mrf.mxu0  ;;  %v7315_v62 = vadd.f32 %v15356_v6, %v15321_v59 }
 0x5c5   : > { %v10139_v60 = vpop.f32.mrf.mxu1 }
 0x5c6   : > { %v15436_v3 = vadd.f32 %v10138_v21, %v7299_v20  ;;  %v15438_v12 = vpop.f32.mrf.mxu0 }
 0x5c7   : > { %v10140_v24 = vpop.f32.mrf.mxu1 }
 0x5c8   : > { %16012 = vst [vmem:[#allocation43_spill] sm:$0xff] %v15436_v3  ;;  %v10141_v38 = vadd.f32 %v10140_v24, %v10139_v60  ;;  %v15442_v1 = vpop.f32.mrf.mxu0 }
 0x5c9   : > { %v10142_v13 = vpop.f32.mrf.mxu1 }
 0x5ca   : > { %v15444_v15 = vadd.f32 %v10141_v38, %v7304_v45  ;;  %v15446_v22 = vpop.f32.mrf.mxu0  ;;  %v7320_v45 = vadd.f32 %v15362_v48, %v15321_v59 }
 0x5cb   : > { %v10143_v41 = vpop.f32.mrf.mxu1 }
 0x5cc   : > { %v10144_v42 = vadd.f32 %v10143_v41, %v10142_v13  ;;  %v15450_v58 = vpop.f32.mrf.mxu0 }
 0x5cd   : > { %v10145_v18 = vpop.f32.mrf.mxu1 }
 0x5ce   : > { %v15452_v44 = vadd.f32 %v10144_v42, %v7307_v26  ;;  %v15454_v37 = vpop.f32.mrf.mxu0 }
 0x5cf   : > { %v10146_v28 = vpop.f32.mrf.mxu1 }
 0x5d0   : > { %16013 = vst [vmem:[#allocation44_spill] sm:$0xff] %v15452_v44  ;;  %v10147_v49 = vadd.f32 %v10146_v28, %v10145_v18  ;;  %v15458_v56 = vpop.f32.mrf.mxu0  ;;  %v7323_v18 = vadd.f32 %v15368_v55, %v15321_v59 }
 0x5d1   : > { %v10148_v11 = vpop.f32.mrf.mxu1 }
 0x5d2   : > { %v15460_v31 = vadd.f32 %v10147_v49, %v7312_v54  ;;  %v15462_v34 = vpop.f32.mrf.mxu0 }
 0x5d3   : > { %v10149_v17 = vpop.f32.mrf.mxu1 }
 0x5d4   : > { %16014 = vst [vmem:[#allocation13_spill] sm:$0xff] %v15460_v31  ;;  %v10150_v8 = vadd.f32 %v10149_v17, %v10148_v11  ;;  %v15466_v21 = vpop.f32.mrf.mxu0 }
 0x5d5   : > { %v10151_v20 = vpop.f32.mrf.mxu1 }
 0x5d6   : > { %v15468_v60 = vadd.f32 %v10150_v8, %v7315_v62  ;;  %v15470_v63 = vpop.f32.mrf.mxu0  ;;  %v7328_v62 = vadd.f32 %v15374_v14, %v15321_v59 }
 0x5d7   : > { %v10152_v24 = vpop.f32.mrf.mxu1 }
 0x5d8   : > { %16015 = vst [vmem:[#allocation27_spill] sm:$0xff] %v15468_v60  ;;  %v10153_v38 = vadd.f32 %v10152_v24, %v10151_v20  ;;  %v15474_v41 = vpop.f32.mrf.mxu0 }
 0x5d9   : > { %v10154_v13 = vpop.f32.mrf.mxu1 }
 0x5da   : > { %v15476_v26 = vadd.f32 %v10153_v38, %v7320_v45  ;;  %v15478_v6 = vpop.f32.mrf.mxu0 }
 0x5db   : > { %v10155_v42 = vpop.f32.mrf.mxu1 }
 0x5dc   : > { %16016 = vst [vmem:[#allocation14_spill] sm:$0xff] %v15476_v26  ;;  %v10156_v28 = vadd.f32 %v10155_v42, %v10154_v13  ;;  %v15482_v49 = vpop.f32.mrf.mxu0  ;;  %v7331_v13 = vadd.f32 %v15380_v5, %v15321_v59 }
 0x5dd   : > { %v10157_v54 = vpop.f32.mrf.mxu1 }
 0x5de   : > { %v15484_v11 = vadd.f32 %v10156_v28, %v7323_v18  ;;  %v15486_v48 = vpop.f32.mrf.mxu0 }
 0x5df   : > { %v10158_v17 = vpop.f32.mrf.mxu1 }
 0x5e0   : > { %16017 = vst [vmem:[#allocation15_spill] sm:$0xff] %v15484_v11  ;;  %v10159_v8 = vadd.f32 %v10158_v17, %v10157_v54  ;;  %v15490_v24 = vpop.f32.mrf.mxu0  ;;  %v7336_v54 = vadd.f32 %v15386_v30, %v15321_v59 }
 0x5e1   : > { %v10160_v20 = vpop.f32.mrf.mxu1 }
 0x5e2   : > { %v15492_v45 = vadd.f32 %v10159_v8, %v7328_v62  ;;  %v15494_v55 = vpop.f32.mrf.mxu0 }
 0x5e3   : > { %v10161_v38 = vpop.f32.mrf.mxu1 }
 0x5e4   : > { %16018 = vst [vmem:[#allocation16_spill] sm:$0xff] %v15492_v45  ;;  %v10162_v42 = vadd.f32 %v10161_v38, %v10160_v20  ;;  %v15498_v28 = vpop.f32.mrf.mxu0  ;;  %v7339_v20 = vadd.f32 %v15392_v32, %v15321_v59 }
 0x5e5   : > { %v10163_v18 = vpop.f32.mrf.mxu1 }
 0x5e6   : > { %v15500_v60 = vadd.f32 %v10162_v42, %v7331_v13  ;;  %v15502_v14 = vpop.f32.mrf.mxu0 }
 0x5e7   : > { %v10164_v11 = vpop.f32.mrf.mxu1 }
 0x5e8   : > { %16019 = vst [vmem:[#allocation31_spill] sm:$0xff] %v15500_v60  ;;  %v10165_v17 = vadd.f32 %v10164_v11, %v10163_v18  ;;  %v15506_v8 = vpop.f32.mrf.mxu0  ;;  %v7344_v11 = vadd.f32 %v15398_v33, %v15321_v59 }
 0x5e9   : > { %v10166_v62 = vpop.f32.mrf.mxu1 }
 0x5ea   : > { %v15508_v45 = vadd.f32 %v10165_v17, %v7336_v54  ;;  %v15510_v5 = vpop.f32.mrf.mxu0 }
 0x5eb   : > { %v10167_v31 = vpop.f32.mrf.mxu1 }
 0x5ec   : > { %16020 = vst [vmem:[#allocation32_spill] sm:$0xff] %v15508_v45  ;;  %v10168_v38 = vadd.f32 %v10167_v31, %v10166_v62  ;;  %v15514_v42 = vpop.f32.mrf.mxu0  ;;  %v7347_v31 = vadd.f32 %v15404_v36, %v15321_v59  ;;  %v10199_v36 = vadd.f32 %v15422_v23, %v15418_v53  ;;  %v10202_v53 = vadd.f32 %v15430_v2, %v15426_v16 }
 0x5ed   : > { %v10169_v13 = vpop.f32.mrf.mxu1  ;;  %v10211_v16 = vadd.f32 %v15454_v37, %v15450_v58  ;;  %v10214_v37 = vadd.f32 %v15462_v34, %v15458_v56  ;;  %v10223_v56 = vadd.f32 %v15486_v48, %v15482_v49  ;;  %v10226_v49 = vadd.f32 %v15494_v55, %v15490_v24 }
 0x5ee   : > { %v15516_v60 = vadd.f32 %v10168_v38, %v7339_v20  ;;  %v15518_v30 = vpop.f32.mrf.mxu0 }
 0x5ef   : > { %v10170_v26 = vpop.f32.mrf.mxu1  ;;  %v10235_v55 = vadd.f32 %v15518_v30, %v15514_v42 }
 0x5f0   : > { %16021 = vst [vmem:[#allocation17_spill] sm:$0xff] %v15516_v60  ;;  %v10171_v18 = vadd.f32 %v10170_v26, %v10169_v13  ;;  %v15522_v17 = vpop.f32.mrf.mxu0  ;;  %v7352_v26 = vadd.f32 %v15410_v43, %v15321_v59  ;;  %v10205_v13 = vadd.f32 %v15438_v12, %v15434_v52  ;;  %v10208_v43 = vadd.f32 %v15446_v22, %v15442_v1 }
 0x5f1   : > { %v10172_v54 = vpop.f32.mrf.mxu1 }
 0x5f2   : > { %v15524_v45 = vadd.f32 %v10171_v18, %v7344_v11  ;;  %v15526_v32 = vpop.f32.mrf.mxu0  ;;  %v7562_v52 = vadd.f32 %v10205_v13, %v15340_v46  ;;  %v7565_v22 = vadd.f32 %v10208_v43, %v15346_v50 }
 0x5f3   : > { %v10173_v3 = vpop.f32.mrf.mxu1  ;;  %v10238_v42 = vadd.f32 %v15526_v32, %v15522_v17 }
 0x5f4   : > { %16022 = vst [vmem:[#allocation18_spill] sm:$0xff] %v15524_v45  ;;  %v10174_v62 = vadd.f32 %v10173_v3, %v10172_v54  ;;  %v15530_v38 = vpop.f32.mrf.mxu0 }
 0x5f5   : > { %v10175_v20 = vpop.f32.mrf.mxu1 }
 0x5f6   : > { %v15532_v60 = vadd.f32 %v10174_v62, %v7347_v31  ;;  %v15534_v33 = vpop.f32.mrf.mxu0  ;;  %v7355_v62 = vadd.f32 %v15416_v27, %v15321_v59  ;;  %v10217_v27 = vadd.f32 %v15470_v63, %v15466_v21  ;;  %v10220_v21 = vadd.f32 %v15478_v6, %v15474_v41 }
 0x5f7   : > { %v10176_v44 = vpop.f32.mrf.mxu1  ;;  %v10229_v41 = vadd.f32 %v15502_v14, %v15498_v28  ;;  %v10232_v28 = vadd.f32 %v15510_v5, %v15506_v8  ;;  %v10241_v5 = vadd.f32 %v15534_v33, %v15530_v38 }
 0x5f8   : > { %16023 = vst [vmem:[#allocation19_spill] sm:$0xff] %v15532_v60  ;;  %v10177_v11 = vadd.f32 %v10176_v44, %v10175_v20  ;;  %v15540_v45 = vpop.f32.mrf.mxu0 }
 0x5f9   : > { %v10178_v18 = vpop.f32.mrf.mxu1 }
 0x5fa   : > { %v15544_v3 = vadd.f32 %v10177_v11, %v7352_v26  ;;  %v15546_v31 = vpop.f32.mrf.mxu0  ;;  %v7554_v26 = vadd.f32 %v10199_v36, %v15328_v47 }
 0x5fb   : > { %v10179_v54 = vpop.f32.mrf.mxu1  ;;  %v10244_v33 = vadd.f32 %v15546_v31, %v15540_v45 }
 0x5fc   : > { %v10180_v60 = vadd.f32 %v10179_v54, %v10178_v18  ;;  %v15553_v12 = vpop.f32.mrf.mxu0 }
 0x5fd   : > { %v10335_v44 = vpop.f32.mrf.mxu1 }
 0x5fe   : > { %v15557_v23 = vadd.f32 %v10180_v60, %v7355_v62  ;;  %v7723_v20 = vadd.f32 %v10335_v44, %v7562_v52  ;;  %v15560_v11 = vpop.f32.mrf.mxu0  ;;  %v7557_v60 = vadd.f32 %v10202_v53, %v15334_v19  ;;  %v7578_v62 = vadd.f32 %v10217_v27, %v15364_v0 }
 0x5ff   : > { %v7714_v59 = vpop.f32.mrf.mxu1  ;;  %v7570_v44 = vadd.f32 %v10211_v16, %v15352_v61  ;;  %v10247_v17 = vadd.f32 %v15560_v11, %v15553_v12 }
 0x600   : > { %v9811_v46 = vpack.c.bf16 %v7723_v20, %v7723_v20  ;;  %v7715_v1 = vadd.f32 %v7714_v59, %v7554_v26  ;;  %v15565_v13 = vpop.f32.mrf.mxu0  ;;  %v7581_v26 = vadd.f32 %v10220_v21, %v15370_v39  ;;  %v7597_v21 = vadd.f32 %v10232_v28, %v15394_v35 }
 0x601   : > { %v10336_v18 = vpop.f32.mrf.mxu1 }
 0x602   : > { %8751 = vst [vmem:[%s12616_s20 + $0x68] sm:$0xf] %v9811_v46  ;;  %v9801_v47 = vpack.c.bf16 %v7715_v1, %v7715_v1  ;;  %v7726_v2 = vadd.f32 %v10336_v18, %v7565_v22  ;;  %v15571_v36 = vpop.f32.mrf.mxu0  ;;  %v7573_v46 = vadd.f32 %v10214_v37, %v15358_v29  ;;  %v7594_v18 = vadd.f32 %v10229_v41, %v15388_v7 }
 0x603   : > { %v7717_v54 = vpop.f32.mrf.mxu1  ;;  %v10250_v12 = vadd.f32 %v15571_v36, %v15565_v13 }
 0x604   : > { %8741 = vst [vmem:[%s12616_s20 + $0x20] sm:$0xf] %v9801_v47  ;;  %v9816_v50 = vpack.c.bf16 %v7726_v2, %v7726_v2  ;;  %v7718_v63 = vadd.f32 %v7717_v54, %v7557_v60  ;;  %v15577_v43 = vpop.f32.mrf.mxu0  ;;  %v7586_v2 = vadd.f32 %v10223_v56, %v15376_v4 }
 0x605   : > { %v10339_v58 = vpop.f32.mrf.mxu1 }
 0x606   : > { %8756 = vst [vmem:[%s12616_s20 + $0x8c] sm:$0xf] %v9816_v50  ;;  %v9806_v19 = vpack.c.bf16 %v7718_v63, %v7718_v63  ;;  %v7739_v52 = vadd.f32 %v10339_v58, %v7578_v62  ;;  %v10252_v53 = vpop.f32.mrf.mxu0  ;;  %v7589_v62 = vadd.f32 %v10226_v49, %v15382_v25  ;;  %v16024_v49 = vld [vmem:[#allocation44_spill] sm:$0xff] }
 0x607   : > { %v7730_v20 = vpop.f32.mrf.mxu1  ;;  %v10253_v45 = vadd.f32 %v10252_v53, %v15577_v43 }
 0x608   : > { %8746 = vst [vmem:[%s12616_s20 + $0x44] sm:$0xf] %v9806_v19  ;;  %v9831_v0 = vpack.c.bf16 %v7739_v52, %v7739_v52  ;;  %v7731_v6 = vadd.f32 %v7730_v20, %v7570_v44  ;;  %v15587_v59 = vpop.f32.mrf.mxu0  ;;  %v7610_v19 = vadd.f32 %v10241_v5, %v15412_v40  ;;  %v7602_v20 = vadd.f32 %v10235_v55, %v15400_v57  ;;  %v16026_v55 = vld [vmem:[#allocation14_spill] sm:$0xff] }
 0x609   : > { %v10340_v27 = vpop.f32.mrf.mxu1  ;;  %v7613_v40 = vadd.f32 %v10244_v33, %v15420_v10  ;;  %v7605_v57 = vadd.f32 %v10238_v42, %v15406_v51  ;;  %v7626_v10 = vadd.f32 %v10253_v45, %v15444_v15  ;;  %v7618_v51 = vadd.f32 %v10247_v17, %v15428_v9  ;;  %v16027_v33 = vld [vmem:[#allocation13_spill] sm:$0xff]  ;;  %v16029_v45 = vld [vmem:[#allocation27_spill] sm:$0xff] }
 0x60a   : > { %8771 = vst [vmem:[%s12616_s20 + $0xf8] sm:$0xf] %v9831_v0  ;;  %v9821_v61 = vpack.c.bf16 %v7731_v6, %v7731_v6  ;;  %v7742_v34 = vadd.f32 %v10340_v27, %v7581_v26  ;;  %v10255_v1 = vpop.f32.mrf.mxu0 }
 0x60b   : > { %v7733_v22 = vpop.f32.mrf.mxu1  ;;  %v10256_v43 = vadd.f32 %v10255_v1, %v15587_v59 }
 0x60c   : > { %8761 = vst [vmem:[%s12616_s20 + $0xb0] sm:$0xf] %v9821_v61  ;;  %v9836_v39 = vpack.c.bf16 %v7742_v34, %v7742_v34  ;;  %v7734_v14 = vadd.f32 %v7733_v22, %v7573_v46  ;;  %v15597_v16 = vpop.f32.mrf.mxu0 }
 0x60d   : > { %v10343_v47 = vpop.f32.mrf.mxu1  ;;  %v7629_v15 = vadd.f32 %v10256_v43, %v16024_v49  ;;  %v16033_v49 = vld [vmem:[#allocation31_spill] sm:$0xff] }
 0x60e   : > { %8776 = vst [vmem:[%s12616_s20 + $0x11c] sm:$0xf] %v9836_v39  ;;  %v9826_v29 = vpack.c.bf16 %v7734_v14, %v7734_v14  ;;  %v7755_v48 = vadd.f32 %v10343_v47, %v7594_v18  ;;  %v15603_v60 = vpop.f32.mrf.mxu0 }
 0x60f   : > { %v7746_v8 = vpop.f32.mrf.mxu1  ;;  %v10259_v13 = vadd.f32 %v15603_v60, %v15597_v16 }
 0x610   : > { %8766 = vst [vmem:[%s12616_s20 + $0xd4] sm:$0xf] %v9826_v29  ;;  %v9851_v7 = vpack.c.bf16 %v7755_v48, %v7755_v48  ;;  %v7747_v54 = vadd.f32 %v7746_v8, %v7586_v2  ;;  %v15609_v50 = vpop.f32.mrf.mxu0  ;;  %v16025_v8 = vld [vmem:[#allocation43_spill] sm:$0xff] }
 0x611   : > { %v10344_v24 = vpop.f32.mrf.mxu1  ;;  %v7621_v9 = vadd.f32 %v10250_v12, %v16025_v8 }
 0x612   : > { %8791 = vst [vmem:[%s12616_s20 + $0x188] sm:$0xf] %v9851_v7  ;;  %v9841_v4 = vpack.c.bf16 %v7747_v54, %v7747_v54  ;;  %v7758_v63 = vadd.f32 %v10344_v24, %v7597_v21  ;;  %v15615_v58 = vpop.f32.mrf.mxu0 }
 0x613   : > { %v7749_v38 = vpop.f32.mrf.mxu1  ;;  %v10262_v16 = vadd.f32 %v15615_v58, %v15609_v50 }
 0x614   : > { %8781 = vst [vmem:[%s12616_s20 + $0x140] sm:$0xf] %v9841_v4  ;;  %v9856_v35 = vpack.c.bf16 %v7758_v63, %v7758_v63  ;;  %v7750_v37 = vadd.f32 %v7749_v38, %v7589_v62  ;;  %v10263_v52 = vpop.f32.mrf.mxu0 }
 0x615   : > { %v10347_v44 = vpop.f32.mrf.mxu1 }
 0x616   : > { %8796 = vst [vmem:[%s12616_s20 + $0x1ac] sm:$0xf] %v9856_v35  ;;  %v9846_v25 = vpack.c.bf16 %v7750_v37, %v7750_v37  ;;  %v7771_v30 = vadd.f32 %v10347_v44, %v7610_v19  ;;  %v10264_v41 = vpop.f32.mrf.mxu0  ;;  %v7634_v35 = vadd.f32 %v10259_v13, %v16027_v33 }
 0x617   : > { %v7762_v0 = vpop.f32.mrf.mxu1  ;;  %v10265_v59 = vadd.f32 %v10264_v41, %v10263_v52 }
 0x618   : > { %8786 = vst [vmem:[%s12616_s20 + $0x164] sm:$0xf] %v9846_v25  ;;  %v9871_v31 = vpack.c.bf16 %v7771_v30, %v7771_v30  ;;  %v7763_v6 = vadd.f32 %v7762_v0, %v7602_v20  ;;  %v10266_v26 = vpop.f32.mrf.mxu0  ;;  %v16028_v25 = vld [vmem:[#allocation15_spill] sm:$0xff] }
 0x619   : > { %v10348_v27 = vpop.f32.mrf.mxu1  ;;  %v7642_v4 = vadd.f32 %v10265_v59, %v16026_v55 }
 0x61a   : > { %8811 = vst [vmem:[%s12616_s20 + $0x218] sm:$0xf] %v9871_v31  ;;  %v9861_v32 = vpack.c.bf16 %v7763_v6, %v7763_v6  ;;  %v7774_v56 = vadd.f32 %v10348_v27, %v7613_v40  ;;  %v10267_v61 = vpop.f32.mrf.mxu0  ;;  %v7637_v31 = vadd.f32 %v10262_v16, %v16029_v45 }
 0x61b   : > { %v7765_v34 = vpop.f32.mrf.mxu1  ;;  %v10268_v54 = vadd.f32 %v10267_v61, %v10266_v26 }
 0x61c   : > { %8801 = vst [vmem:[%s12616_s20 + $0x1d0] sm:$0xf] %v9861_v32  ;;  %v9876_v53 = vpack.c.bf16 %v7774_v56, %v7774_v56  ;;  %v7766_v46 = vadd.f32 %v7765_v34, %v7605_v57  ;;  %v10269_v22 = vpop.f32.mrf.mxu0  ;;  %v16030_v32 = vld [vmem:[#allocation32_spill] sm:$0xff] }
 0x61d   : > { %v10351_v28 = vpop.f32.mrf.mxu1  ;;  %v7645_v30 = vadd.f32 %v10268_v54, %v16028_v25 }
 0x61e   : > { %8816 = vst [vmem:[%s12616_s20 + $0x23c] sm:$0xf] %v9876_v53  ;;  %v9866_v11 = vpack.c.bf16 %v7766_v46, %v7766_v46  ;;  %v7787_v39 = vadd.f32 %v10351_v28, %v7626_v10  ;;  %v10270_v14 = vpop.f32.mrf.mxu0  ;;  %v16031_v46 = vld [vmem:[#allocation16_spill] sm:$0xff] }
 0x61f   : > { %v7778_v18 = vpop.f32.mrf.mxu1  ;;  %v10271_v0 = vadd.f32 %v10270_v14, %v10269_v22 }
 0x620   : > { %8806 = vst [vmem:[%s12616_s20 + $0x1f4] sm:$0xf] %v9866_v11  ;;  %v9891_v1 = vpack.c.bf16 %v7787_v39, %v7787_v39  ;;  %v7779_v47 = vadd.f32 %v7778_v18, %v7618_v51  ;;  %v10272_v29 = vpop.f32.mrf.mxu0  ;;  %v16032_v39 = vld [vmem:[#allocation17_spill] sm:$0xff] }
 0x621   : > { %v10352_v48 = vpop.f32.mrf.mxu1  ;;  %v7650_v10 = vadd.f32 %v10271_v0, %v16031_v46 }
 0x622   : > { %8831 = vst [vmem:[%s12616_s20 + $0x2a8] sm:$0xf] %v9891_v1  ;;  %v9881_v36 = vpack.c.bf16 %v7779_v47, %v7779_v47  ;;  %v7790_v2 = vadd.f32 %v10352_v48, %v7629_v15  ;;  %v10273_v5 = vpop.f32.mrf.mxu0 }
 0x623   : > { %v7781_v7 = vpop.f32.mrf.mxu1  ;;  %v10274_v34 = vadd.f32 %v10273_v5, %v10272_v29 }
 0x624   : > { %8821 = vst [vmem:[%s12616_s20 + $0x260] sm:$0xf] %v9881_v36  ;;  %v9896_v21 = vpack.c.bf16 %v7790_v2, %v7790_v2  ;;  %v7782_v24 = vadd.f32 %v7781_v7, %v7621_v9  ;;  %v10275_v63 = vpop.f32.mrf.mxu0  ;;  %v16034_v7 = vld [vmem:[#allocation18_spill] sm:$0xff] }
 0x625   : > { %v10355_v62 = vpop.f32.mrf.mxu1  ;;  %v7653_v15 = vadd.f32 %v10274_v34, %v16033_v49 }
 0x626   : > { %8836 = vst [vmem:[%s12616_s20 + $0x2cc] sm:$0xf] %v9896_v21  ;;  %v9886_v60 = vpack.c.bf16 %v7782_v24, %v7782_v24  ;;  %v7803_v38 = vadd.f32 %v10355_v62, %v7642_v4  ;;  %v10276_v37 = vpop.f32.mrf.mxu0 }
 0x627   : > { %v7794_v19 = vpop.f32.mrf.mxu1  ;;  %v10277_v44 = vadd.f32 %v10276_v37, %v10275_v63 }
 0x628   : > { %8826 = vst [vmem:[%s12616_s20 + $0x284] sm:$0xf] %v9886_v60  ;;  %v9911_v52 = vpack.c.bf16 %v7803_v38, %v7803_v38  ;;  %v7795_v42 = vadd.f32 %v7794_v19, %v7634_v35  ;;  %v10278_v20 = vpop.f32.mrf.mxu0  ;;  %v16035_v38 = vld [vmem:[#allocation19_spill] sm:$0xff] }
 0x629   : > { %v10356_v41 = vpop.f32.mrf.mxu1  ;;  %v7658_v56 = vadd.f32 %v10277_v44, %v16030_v32 }
 0x62a   : > { %8851 = vst [vmem:[%s12616_s20 + $0x338] sm:$0xf] %v9911_v52  ;;  %v9901_v50 = vpack.c.bf16 %v7795_v42, %v7795_v42  ;;  %v7806_v58 = vadd.f32 %v10356_v41, %v7645_v30  ;;  %v10279_v6 = vpop.f32.mrf.mxu0 }
 0x62b   : > { %v7797_v40 = vpop.f32.mrf.mxu1  ;;  %v10280_v27 = vadd.f32 %v10279_v6, %v10278_v20 }
 0x62c   : > { %8841 = vst [vmem:[%s12616_s20 + $0x2f0] sm:$0xf] %v9901_v50  ;;  %v9916_v26 = vpack.c.bf16 %v7806_v58, %v7806_v58  ;;  %v7798_v17 = vadd.f32 %v7797_v40, %v7637_v31  ;;  %v10281_v57 = vpop.f32.mrf.mxu0 }
 0x62d   : > { %v10359_v61 = vpop.f32.mrf.mxu1  ;;  %v7661_v51 = vadd.f32 %v10280_v27, %v16032_v39 }
 0x62e   : > { %8856 = vst [vmem:[%s12616_s20 + $0x35c] sm:$0xf] %v9916_v26  ;;  %v9906_v43 = vpack.c.bf16 %v7798_v17, %v7798_v17  ;;  %v7819_v53 = vadd.f32 %v10359_v61, %v7658_v56  ;;  %v10282_v22 = vpop.f32.mrf.mxu0 }
 0x62f   : > { %v7810_v28 = vpop.f32.mrf.mxu1  ;;  %v10283_v59 = vadd.f32 %v10282_v22, %v10281_v57 }
 0x630   : > { %8846 = vst [vmem:[%s12616_s20 + $0x314] sm:$0xf] %v9906_v43  ;;  %v9931_v12 = vpack.c.bf16 %v7819_v53, %v7819_v53  ;;  %v7811_v11 = vadd.f32 %v7810_v28, %v7650_v10  ;;  %v10284_v14 = vpop.f32.mrf.mxu0 }
 0x631   : > { %v10360_v18 = vpop.f32.mrf.mxu1  ;;  %v7666_v54 = vadd.f32 %v10283_v59, %v16034_v7 }
 0x632   : > { %8871 = vst [vmem:[%s12616_s20 + $0x3c8] sm:$0xf] %v9931_v12  ;;  %v9921_v1 = vpack.c.bf16 %v7811_v11, %v7811_v11  ;;  %v7822_v47 = vadd.f32 %v10360_v18, %v7661_v51  ;;  %v10285_v29 = vpop.f32.mrf.mxu0 }
 0x633   : > { %v7813_v48 = vpop.f32.mrf.mxu1  ;;  %v10286_v9 = vadd.f32 %v10285_v29, %v10284_v14 }
 0x634   : > { %8861 = vst [vmem:[%s12616_s20 + $0x380] sm:$0xf] %v9921_v1  ;;  %v9936_v13 = vpack.c.bf16 %v7822_v47, %v7822_v47  ;;  %v7814_v36 = vadd.f32 %v7813_v48, %v7653_v15  ;;  %v10287_v2 = vpop.f32.mrf.mxu0 }
 0x635   : > { %v10363_v8 = vpop.f32.mrf.mxu1  ;;  %v7669_v33 = vadd.f32 %v10286_v9, %v16035_v38 }
 0x636   : > { %8876 = vst [vmem:[%s12616_s20 + $0x3ec] sm:$0xf] %v9936_v13  ;;  %v9926_v5 = vpack.c.bf16 %v7814_v36, %v7814_v36  ;;  %v10288_v21 = vpop.f32.mrf.mxu0 }
 0x637   : > { %v7826_v24 = vpop.f32.mrf.mxu1  ;;  %v10289_v55 = vadd.f32 %v10288_v21, %v10287_v2 }
 0x638   : > { %8866 = vst [vmem:[%s12616_s20 + $0x3a4] sm:$0xf] %v9926_v5  ;;  %v7827_v4 = vadd.f32 %v7826_v24, %v7666_v54  ;;  %v10290_v63 = vpop.f32.mrf.mxu0 }
 0x639   : > { %v10364_v62 = vpop.f32.mrf.mxu1  ;;  %v7674_v16 = vadd.f32 %v10289_v55, %v15544_v3 }
 0x63a   : > { %v9941_v60 = vpack.c.bf16 %v7827_v4, %v7827_v4  ;;  %v10291_v35 = vpop.f32.mrf.mxu0 }
 0x63b   : > { %v7829_v37 = vpop.f32.mrf.mxu1  ;;  %v7835_v19 = vadd.f32 %v10363_v8, %v7674_v16  ;;  %v10292_v52 = vadd.f32 %v10291_v35, %v10290_v63 }
 0x63c   : > { %8881 = vst [vmem:[%s12616_s20 + $0x410] sm:$0xf] %v9941_v60  ;;  %v7830_v44 = vadd.f32 %v7829_v37, %v7669_v33 }
 0x63d   : > { %v9951_v42 = vpack.c.bf16 %v7835_v19, %v7835_v19  ;;  %v7677_v25 = vadd.f32 %v10292_v52, %v15557_v23 }
 0x63e   : > { %v9946_v30 = vpack.c.bf16 %v7830_v44, %v7830_v44 }
 0x63f   : > { %8891 = vst [vmem:[%s12616_s20 + $0x458] sm:$0xf] %v9951_v42  ;;  %v7838_v3 = vadd.f32 %v10364_v62, %v7677_v25 }
 0x640   : > { %8886 = vst [vmem:[%s12616_s20 + $0x434] sm:$0xf] %v9946_v30 }
 0x641   : > { %v9956_v20 = vpack.c.bf16 %v7838_v3, %v7838_v3 }
 0x643   : > { %8896 = vst [vmem:[%s12616_s20 + $0x47c] sm:$0xf] %v9956_v20 }
 0x644   : > { %11908 = shalt.err (!%p11905_p0)
}
 0x645   : > { %s11909_s25 = scalar_lea.hbm %s15678_s9, 18432  ;;  %s11913_s5 = scalar_lea.hbm %s15727_s3, 36864 }
 0x646   : > { %p11910_p5 = scmp.ne.s32.totalorder %s15678_s9, %s11909_s25  ;;  %p11914_p4 = scmp.lt.s32.totalorder %s15678_s9, %s15727_s3 }
 0x647   : > { %p11915_p6 = scmp.lt.s32.totalorder %s11913_s5, %s11909_s25 }
 0x648   : > { %p11911_p3 = pnand %p11910_p5, %p16036_p11 }
 0x649   : > { %p11916_p8 = por %p11915_p6, %p11914_p4 }
 0x64a   : > { %p11912_p10 = pneg %p11911_p3 }
 0x64c   : > { %p11917_p9 = pnand %p11916_p8, %p11912_p10 }
 0x64e   : > { %11920 = shalt.err (!%p11917_p9)
}
 0x64f   : > { %s11974_s18 = smov 576   ;;  %s11975_s20 = smov 36  }
 0x650   : > { %10412 = dma.vmem_to_hbm [thread:$0]  (%p16036_p11), %s15680_s27, 18432, %s15678_s9, %s8898_s16, %s11974_s18, %s11974_s18, %s11975_s20  }
 0x651 PF: > { %s8927_s24 = sand.u32 1, %s11951_s12   ;;  %p16037_p1 = scmp.ne.s32.totalorder %s15741_s19, 0 }
 0x652   : > { %p16038_p2 = scmp.ge.s32.totalorder %s11963_s15, 2  ;;  %s8928_s29 = scalar_lea.sflag [#allocation4], %s8927_s24 }
 0x654   : > { %p10426_p12 = pnand %p16038_p2, %p16037_p1 }
 0x656   : > { %p10427_p7 = pneg %p10426_p12 }
 0x658   : > { %11946 = dma.done.wait (%p10427_p7), %s8928_s29, 18432  }
 0x659   : > { %11948 = vsyncadd (%p10427_p7), %s8928_s29, 4294948864  ;;  %p17_p13 = scmp.ge.s32.totalorder %s12068_s8, 4   ;;  %s16039_s12 = smov %s11955_s13 }
 0x65a   : > { %s16040_s13 = smov %s11959_s14  ;;  %s16041_s14 = smov %s12084_s17 }
 0x65b   : > { %s16042_s15 = smov %s12068_s8  ;;  %19 = sbr.rel (!%p17_p13) target bundleno = 6 (0x6), region = 85 }
 0x660   :  { %8933 = vsyncpa [#allocation3], 1 }
 0x661   :  { %8935 = vsyncpa [#allocation3 + $0x1], 1 }
 0x662   :  { %8936 = vsyncpa [#allocation6], 1 }
 0x663   :  { %8937 = vsyncpa [#allocation4], 1 }
 0x664   :  { %8939 = vsyncpa [#allocation4 + $0x1], 1 }

</bundles_post_ra>
